<compile_context>
chip_gen: v6e
topology: v6e:2x2x1
jax: 0.10.0
libtpu: 0.0.40
codegen_flags: <defaults>
</compile_context>

<pallas_src>
import numpy as np
import jax
import jax.numpy as jnp
from jax.experimental import pallas as pl
from jax.experimental.pallas import tpu as pltpu


def make_uv_aggregator_kernel(Bblk, H, S, Dw, D, Fp, filter_sizes, compute_dtype):
    Ls = [S - k + 1 for k in filter_sizes]
    M = Bblk * H
    cdt = compute_dtype

    def kernel(euvr_ref, uvrep_ref, wflat_ref,
               wconv_ref, bconv_ref, w1w_ref,
               w1uvr_ref, b1_ref, w2_ref, b2_ref,
               wa1o_ref, wa1rep_ref, ba1_ref, wa2_ref, ba2_ref,
               wa3_ref, out_ref):

        def mm(a, b):
            return jnp.dot(a.astype(cdt), b, preferred_element_type=jnp.float32)

        e_uvr = euvr_ref[...].reshape(M, 2 * D)        # (M, 2D)   cat(e_uv, e_r)
        uv_rep = uvrep_ref[...]                        # (Bblk, D)
        wflat = wflat_ref[...].reshape(M, S * Dw)      # (M, S*Dw) flattened word embeddings

        # ---- relu(w_r1 @ cat(e_uv, e_r, e_w)), split as the (e_uv|e_r) chunk + e_w chunk ----
        h1 = mm(e_uvr, w1uvr_ref[...]) + b1_ref[...]

        # ---- TextCNN: one fused matmul over all filter sizes (block-banded im2col weight);
        #      ReLU + max-over-time via a balanced pairwise-max tree on 128-aligned lane slices ----
        acc = mm(wflat, wconv_ref[...])                # (M, sum_k L_k*Fp), f32
        feats = []
        off = 0
        for L in Ls:
            cols = [acc[:, off + l * Fp: off + (l + 1) * Fp] for l in range(L)]
            while len(cols) > 1:                       # balanced max tree (log L depth)
                nxt = [jnp.maximum(a, b) for a, b in zip(cols[0::2], cols[1::2])]
                if len(cols) % 2:
                    nxt.append(cols[-1])
                cols = nxt
            feats.append(cols[0])
            off += L * Fp
        feat = jnp.concatenate(feats, axis=-1)                       # (M, nfs*Fp)
        feat = jnp.maximum(feat + bconv_ref[...], 0.0)               # relu(x+b) commutes with max
        h1 = jnp.maximum(h1 + mm(feat, w1w_ref[...]), 0.0)           # (M, D)

        o = jnp.maximum(mm(h1, w2_ref[...]) + b2_ref[...], 0.0)      # (M, D)

        # ---- Attention (dropout identity in eval mode); uv_rep term computed once per batch
        #      element and broadcast over the H history slots ----
        uvterm = mm(uv_rep, wa1rep_ref[...])                         # (Bblk, D)
        a1 = mm(o, wa1o_ref[...]).reshape(Bblk, H, D)
        a1 = jnp.maximum(a1 + uvterm[:, None, :] + ba1_ref[...][None], 0.0)
        a2 = jnp.maximum(mm(a1.reshape(M, D), wa2_ref[...]) + ba2_ref[...], 0.0)

        # width-1 logit matmul replaced by a VPU/XLU lane reduction; the att3 bias is dropped
        # (it is constant over the softmax axis, so the softmax output is unchanged).
        wa3 = wa3_ref[...]                                           # (1, D)
        logits = jnp.sum(a2.reshape(Bblk, H, D) * wa3[None], axis=-1, keepdims=True)

        # segmented softmax over the history axis (per batch element)
        m = jnp.max(logits, axis=1, keepdims=True)
        e = jnp.exp(logits - m)
        att = e / jnp.sum(e, axis=1, keepdims=True)                  # (Bblk, H, 1)

        o3 = o.reshape(Bblk, H, D)
        out_ref[...] = jnp.sum(o3 * att, axis=1).astype(out_ref.dtype)   # (Bblk, D)

    return kernel


def uv_aggregator_forward(nodes, history_uv, history_r, history_w, params,
                          filter_sizes=(3, 4, 5), uv=True,
                          compute_dtype=jnp.bfloat16, block_rows=512,
                          single_buffer_weights=True):
    B, H = history_uv.shape
    S = history_w.shape[-1]
    D = params["u2e"].shape[1]
    Dw = params["word_emb"].shape[1]
    F = params["conv_w"][0].shape[-1]
    nfs = len(filter_sizes)
    Fp = ((F + 127) // 128) * 128          # pad filters to a lane multiple (100 -> 128)
    Ls = [S - k + 1 for k in filter_sizes]
    total_conv = sum(L * Fp for L in Ls)
    cdt = compute_dtype

    # ---- batch blocking: M = Bblk*H rows per grid step; ensure >= 2 blocks so the
    #      "parallel" batch axis can be split across v7x's two TensorCores ----
    Bblk = max(8, (max(1, block_rows // H) // 8) * 8)     # keep second-to-last out dim 8-aligned
    while Bblk > 8 and (B + Bblk - 1) // Bblk < 2:
        Bblk = max(8, ((Bblk // 2) // 8) * 8)
    n_blocks = max(2, (B + Bblk - 1) // Bblk)
    B_pad = n_blocks * Bblk

    # ---- embedding lookups stay in plain JAX (gather glue) ----
    if uv:
        e_uv = params["v2e"][history_uv]              # (B, H, D)
        uv_rep = params["u2e"][nodes]                 # (B, D)
    else:
        e_uv = params["u2e"][history_uv]
        uv_rep = params["v2e"][nodes]
    e_r = params["r2e"][history_r]                    # (B, H, D)
    e_uvr = jnp.concatenate([e_uv, e_r], axis=-1)     # (B, H, 2D) — single DMA stream / matmul
    wemb = params["word_emb"][history_w].reshape(B, H, S * Dw)   # (B, H, S*Dw)

    if B_pad != B:
        e_uvr = jnp.pad(e_uvr, ((0, B_pad - B), (0, 0), (0, 0)))
        uv_rep = jnp.pad(uv_rep, ((0, B_pad - B), (0, 0)))
        wemb = jnp.pad(wemb, ((0, B_pad - B), (0, 0), (0, 0)))

    e_uvr = e_uvr.astype(cdt)
    uv_rep = uv_rep.astype(cdt)
    wemb = wemb.astype(cdt)

    # ---- host-side weight prep: fused/padded conv weights, split linears ----
    w_r1 = np.asarray(params["w_r1"], np.float32)     # (2D + F*nfs, D)
    wconv = np.zeros((S * Dw, total_conv), np.float32)   # fused block-banded im2col weight
    bconv = np.zeros((1, nfs * Fp), np.float32)
    w1w = np.zeros((nfs * Fp, D), np.float32)             # zero-padded w_r1 rows for e_w
    off = 0
    for fi, (k, L) in enumerate(zip(filter_sizes, Ls)):
        wc = np.zeros((k, Dw, Fp), np.float32)
        wc[:, :, :F] = np.asarray(params["conv_w"][fi], np.float32)
        wc2 = wc.reshape(k * Dw, Fp)
        for l in range(L):
            wconv[l * Dw:(l + k) * Dw, off + l * Fp: off + (l + 1) * Fp] = wc2
        bconv[:, fi * Fp:fi * Fp + F] = np.asarray(params["conv_b"][fi], np.float32).reshape(1, F)
        w1w[fi * Fp:fi * Fp + F] = w_r1[2 * D + fi * F: 2 * D + (fi + 1) * F]
        off += L * Fp

    att1 = np.asarray(params["att1_w"], np.float32)
    wconv_j = jnp.asarray(wconv, cdt)
    bconv_j = jnp.asarray(bconv, cdt)
    w1w_j = jnp.asarray(w1w, cdt)
    w1_uvr = jnp.asarray(w_r1[:2 * D], cdt)           # (2D, D)
    b1 = params["b_r1"].astype(cdt)
    w2 = params["w_r2"].astype(cdt)
    b2 = params["b_r2"].astype(cdt)
    wa1_o = jnp.asarray(att1[:D], cdt)
    wa1_rep = jnp.asarray(att1[D:2 * D], cdt)
    ba1 = params["att1_b"].astype(cdt)
    wa2 = params["att2_w"].astype(cdt)
    ba2 = params["att2_b"].astype(cdt)
    wa3_row = params["att3_w"].reshape(1, D).astype(cdt)
    # att3_b is intentionally not passed: softmax over H is invariant to a constant bias.

    args = [e_uvr, uv_rep, wemb,
            wconv_j, bconv_j, w1w_j,
            w1_uvr, b1, w2, b2,
            wa1_o, wa1_rep, ba1, wa2, ba2,
            wa3_row]

    def build_specs(single_buffer):
        def full(shape):
            if single_buffer:
                # grid-invariant weights: single VMEM buffer (halves weight VMEM on v7x)
                return pl.BlockSpec(shape, lambda i: (0,) * len(shape),
                                    pipeline_mode=pl.Buffered(1))
            return pl.BlockSpec(shape, lambda i: (0,) * len(shape))
        return [
            pl.BlockSpec((Bblk, H, 2 * D), lambda i: (i, 0, 0)),
            pl.BlockSpec((Bblk, D), lambda i: (i, 0)),
            pl.BlockSpec((Bblk, H, S * Dw), lambda i: (i, 0, 0)),
            full((S * Dw, total_conv)), full((1, nfs * Fp)), full((nfs * Fp, D)),
            full((2 * D, D)), full((1, D)),                 # w1_uvr, b1
            full((D, D)), full((1, D)),                     # w2, b2
            full((D, D)), full((D, D)), full((1, D)),       # wa1_o, wa1_rep, ba1
            full((D, D)), full((1, D)),                     # wa2, ba2
            full((1, D)),                                   # wa3_row
        ]

    # vmem budget from the actual block footprint (+ the fused-conv f32 accumulator), <= 32 MiB
    weight_bytes = sum(int(np.prod(a.shape)) * a.dtype.itemsize for a in args[3:])
    item = jnp.dtype(cdt).itemsize

    def vmem_limit(single_buffer):
        act = 2 * (Bblk * H * 2 * D + Bblk * D + Bblk * H * S * Dw) * item  # double-buffered blocks
        outb = 2 * Bblk * D * 4
        wts = weight_bytes * (1 if single_buffer else 2)
        accb = Bblk * H * total_conv * 4          # fused conv matmul accumulator + temporaries
        est = int(1.25 * (act + outb + wts + 3 * accb)) + (4 << 20)
        return max(8 << 20, min(est, 32 << 20))

    kernel = make_uv_aggregator_kernel(Bblk, H, S, Dw, D, Fp, filter_sizes, cdt)

    def run(single_buffer):
        return pl.pallas_call(
            kernel,
            grid=(n_blocks,),
            in_specs=build_specs(single_buffer),
            out_specs=pl.BlockSpec((Bblk, D), lambda i: (i, 0)),
            out_shape=jax.ShapeDtypeStruct((B_pad, D), jnp.float32),
            compiler_params=pltpu.CompilerParams(
                dimension_semantics=("parallel",),          # batch blocks are independent
                vmem_limit_bytes=vmem_limit(single_buffer)),
        )(*args)

    try:
        out = jax.block_until_ready(run(single_buffer_weights))
    except Exception:
        # Fallback if pl.Buffered(1) is not supported by this jax/Mosaic build:
        # retry with default double-buffering (numerics identical).
        if not single_buffer_weights:
            raise
        out = jax.block_until_ready(run(False))
    return out[:B]


def reference_forward(nodes, history_uv, history_r, history_w, params,
                      filter_sizes=(3, 4, 5), uv=True):
    B, H = history_uv.shape
    S = history_w.shape[-1]
    D = params["u2e"].shape[1]
    Dw = params["word_emb"].shape[1]
    F = params["conv_w"][0].shape[-1]
    if uv:
        e_uv_all = params["v2e"][history_uv]
        rep_all = params["u2e"][nodes]
    else:
        e_uv_all = params["u2e"][history_uv]
        rep_all = params["v2e"][nodes]
    e_r_all = params["r2e"][history_r]
    wemb_all = params["word_emb"][history_w]
    outs = []
    for i in range(B):
        wemb = wemb_all[i]
        feats = []
        for fi, k in enumerate(filter_sizes):
            L = S - k + 1
            acc = jnp.zeros((H * L, F), jnp.float32)
            for j in range(k):
                win = wemb[:, j:j + L, :].reshape(H * L, Dw)
                acc = acc + win @ params["conv_w"][fi][j]
            acc = jnp.maximum(acc + params["conv_b"][fi], 0.0)
            feats.append(jnp.max(acc.reshape(H, L, F), axis=1))
        e_w = jnp.concatenate(feats, axis=1)
        x = jnp.concatenate([e_uv_all[i], e_r_all[i], e_w], axis=1)
        h1 = jnp.maximum(x @ params["w_r1"] + params["b_r1"], 0.0)
        o = jnp.maximum(h1 @ params["w_r2"] + params["b_r2"], 0.0)
        a_in = jnp.concatenate([o, jnp.broadcast_to(rep_all[i][None], (H, D))], axis=1)
        a1 = jnp.maximum(a_in @ params["att1_w"] + params["att1_b"], 0.0)
        a2 = jnp.maximum(a1 @ params["att2_w"] + params["att2_b"], 0.0)
        logits = a2 @ params["att3_w"] + params["att3_b"]
        att = jax.nn.softmax(logits, axis=0)
        outs.append(jnp.sum(o * att, axis=0))
    return jnp.stack(outs)


if __name__ == "__main__":
    key = jax.random.PRNGKey(0)
    B, H, D = 2, 8, 32            # batch, history length, embed_dim
    Dw, V, S = 16, 50, 12         # word_dim, vocab_size, seq_len
    F = 100                       # filters_num
    filter_sizes = (3, 4, 5)      # 3 * 100 = 300 (matches the hard-coded +300 in w_r1)
    n_users, n_items, n_ratings = 20, 30, 5

    ks = iter(jax.random.split(key, 64))

    def nrm(shape, scale=0.1):
        return (scale * jax.random.normal(next(ks), shape)).astype(jnp.float32)

    params = {
        "u2e": nrm((n_users, D), 1.0),
        "v2e": nrm((n_items, D), 1.0),
        "r2e": nrm((n_ratings, D), 1.0),
        "word_emb": nrm((V, Dw), 1.0),   # initW
        "conv_w": [nrm((k, Dw, F)) for k in filter_sizes],
        "conv_b": [nrm((1, F)) for _ in filter_sizes],
        "w_r1": nrm((2 * D + F * len(filter_sizes), D)),
        "b_r1": nrm((1, D)),
        "w_r2": nrm((D, D)),
        "b_r2": nrm((1, D)),
        "att1_w": nrm((2 * D, D)),
        "att1_b": nrm((1, D)),
        "att2_w": nrm((D, D)),
        "att2_b": nrm((1, D)),
        "att3_w": nrm((D, 1)),
        "att3_b": nrm((1, 1)),
    }

    nodes = jax.random.randint(next(ks), (B,), 0, n_users)
    history_uv = jax.random.randint(next(ks), (B, H), 0, n_items)
    history_r = jax.random.randint(next(ks), (B, H), 0, n_ratings)
    history_w = jax.random.randint(next(ks), (B, H, S), 0, V)

    ref = jax.block_until_ready(reference_forward(
        nodes, history_uv, history_r, history_w, params,
        filter_sizes=filter_sizes, uv=True))

    # Check 1: f32 compute path (tight-ish tolerance; matches the reference math exactly
    # up to f32 matmul reassociation).
    out_f32 = uv_aggregator_forward(nodes, history_uv, history_r, history_w, params,
                                    filter_sizes=filter_sizes, uv=True,
                                    compute_dtype=jnp.float32)
    out_f32 = jax.block_until_ready(out_f32)
    assert out_f32.shape == (B, D)
    np.testing.assert_allclose(np.asarray(out_f32), np.asarray(ref), rtol=2e-2, atol=2e-2)

    # Check 2: default bf16 compute (MXU-native, f32 accumulation) — looser tolerance.
    out_bf16 = uv_aggregator_forward(nodes, history_uv, history_r, history_w, params,
                                     filter_sizes=filter_sizes, uv=True)
    out_bf16 = jax.block_until_ready(out_bf16)
    assert out_bf16.shape == (B, D)
    np.testing.assert_allclose(np.asarray(out_bf16), np.asarray(ref), rtol=5e-2, atol=5e-2)

    # Check 3: multi-block batch path with padding (B=12, Bblk=8 -> 2 blocks, B_pad=16).
    B2 = 12
    nodes2 = jax.random.randint(next(ks), (B2,), 0, n_users)
    history_uv2 = jax.random.randint(next(ks), (B2, H), 0, n_items)
    history_r2 = jax.random.randint(next(ks), (B2, H), 0, n_ratings)
    history_w2 = jax.random.randint(next(ks), (B2, H, S), 0, V)
    out2 = uv_aggregator_forward(nodes2, history_uv2, history_r2, history_w2, params,
                                 filter_sizes=filter_sizes, uv=True,
                                 compute_dtype=jnp.float32, block_rows=64)
    out2 = jax.block_until_ready(out2)
    ref2 = jax.block_until_ready(reference_forward(
        nodes2, history_uv2, history_r2, history_w2, params,
        filter_sizes=filter_sizes, uv=True))
    assert out2.shape == (B2, D)
    np.testing.assert_allclose(np.asarray(out2), np.asarray(ref2), rtol=2e-2, atol=2e-2)

    print("KERNEL_OK")
</pallas_src>

<mosaic_0001>
module attributes {stable_mosaic.version = 11 : i64} {
  func.func @kernel(%arg0: i32, %arg1: memref<8x8x64xf32, #tpu.memory_space<vmem>>, %arg2: memref<8x32xf32, #tpu.memory_space<vmem>>, %arg3: memref<8x8x192xf32, #tpu.memory_space<vmem>>, %arg4: memref<192x3456xf32, #tpu.memory_space<vmem>>, %arg5: memref<1x384xf32, #tpu.memory_space<vmem>>, %arg6: memref<384x32xf32, #tpu.memory_space<vmem>>, %arg7: memref<64x32xf32, #tpu.memory_space<vmem>>, %arg8: memref<1x32xf32, #tpu.memory_space<vmem>>, %arg9: memref<32x32xf32, #tpu.memory_space<vmem>>, %arg10: memref<1x32xf32, #tpu.memory_space<vmem>>, %arg11: memref<32x32xf32, #tpu.memory_space<vmem>>, %arg12: memref<32x32xf32, #tpu.memory_space<vmem>>, %arg13: memref<1x32xf32, #tpu.memory_space<vmem>>, %arg14: memref<32x32xf32, #tpu.memory_space<vmem>>, %arg15: memref<1x32xf32, #tpu.memory_space<vmem>>, %arg16: memref<1x32xf32, #tpu.memory_space<vmem>>, %arg17: memref<8x32xf32, #tpu.memory_space<vmem>>) attributes {dimension_semantics = [#tpu.dimension_semantics<parallel>], iteration_bounds = array<i64: 2>, scalar_prefetch = 0 : i64, scratch_operands = 0 : i64, tpu.core_type = #tpu.core_type<tc>, window_params = [{transform_indices = @transform_0, window_bounds = array<i64: 8, 8, 64>}, {transform_indices = @transform_1, window_bounds = array<i64: 8, 32>}, {transform_indices = @transform_2, window_bounds = array<i64: 8, 8, 192>}, {pipeline_mode = #tpu.pipeline_mode<synchronous>, transform_indices = @transform_3, window_bounds = array<i64: 192, 3456>}, {pipeline_mode = #tpu.pipeline_mode<synchronous>, transform_indices = @transform_4, window_bounds = array<i64: 1, 384>}, {pipeline_mode = #tpu.pipeline_mode<synchronous>, transform_indices = @transform_5, window_bounds = array<i64: 384, 32>}, {pipeline_mode = #tpu.pipeline_mode<synchronous>, transform_indices = @transform_6, window_bounds = array<i64: 64, 32>}, {pipeline_mode = #tpu.pipeline_mode<synchronous>, transform_indices = @transform_7, window_bounds = array<i64: 1, 32>}, {pipeline_mode = #tpu.pipeline_mode<synchronous>, transform_indices = @transform_8, window_bounds = array<i64: 32, 32>}, {pipeline_mode = #tpu.pipeline_mode<synchronous>, transform_indices = @transform_9, window_bounds = array<i64: 1, 32>}, {pipeline_mode = #tpu.pipeline_mode<synchronous>, transform_indices = @transform_10, window_bounds = array<i64: 32, 32>}, {pipeline_mode = #tpu.pipeline_mode<synchronous>, transform_indices = @transform_11, window_bounds = array<i64: 32, 32>}, {pipeline_mode = #tpu.pipeline_mode<synchronous>, transform_indices = @transform_12, window_bounds = array<i64: 1, 32>}, {pipeline_mode = #tpu.pipeline_mode<synchronous>, transform_indices = @transform_13, window_bounds = array<i64: 32, 32>}, {pipeline_mode = #tpu.pipeline_mode<synchronous>, transform_indices = @transform_14, window_bounds = array<i64: 1, 32>}, {pipeline_mode = #tpu.pipeline_mode<synchronous>, transform_indices = @transform_15, window_bounds = array<i64: 1, 32>}, {transform_indices = @transform_16, window_bounds = array<i64: 8, 32>}]} {
    %c0 = arith.constant 0 : index
    %c0_0 = arith.constant 0 : index
    %c0_1 = arith.constant 0 : index
    %0 = vector.load %arg1[%c0, %c0_0, %c0_1] : memref<8x8x64xf32, #tpu.memory_space<vmem>>, vector<8x8x64xf32>
    %1 = vector.shape_cast %0 : vector<8x8x64xf32> to vector<64x64xf32>
    %c0_2 = arith.constant 0 : index
    %c0_3 = arith.constant 0 : index
    %2 = vector.load %arg2[%c0_2, %c0_3] : memref<8x32xf32, #tpu.memory_space<vmem>>, vector<8x32xf32>
    %c0_4 = arith.constant 0 : index
    %c0_5 = arith.constant 0 : index
    %c0_6 = arith.constant 0 : index
    %3 = vector.load %arg3[%c0_4, %c0_5, %c0_6] : memref<8x8x192xf32, #tpu.memory_space<vmem>>, vector<8x8x192xf32>
    %4 = vector.shape_cast %3 : vector<8x8x192xf32> to vector<64x192xf32>
    %c0_7 = arith.constant 0 : index
    %c0_8 = arith.constant 0 : index
    %5 = vector.load %arg7[%c0_7, %c0_8] : memref<64x32xf32, #tpu.memory_space<vmem>>, vector<64x32xf32>
    %cst = arith.constant dense<0.000000e+00> : vector<64x32xf32>
    %6 = tpu.matmul %1, %5, %cst {dimension_numbers = #tpu.dot_dimension_numbers<[1], [0], [0], [1], [0, 0, 1, 1], [], []>} : vector<64x64xf32>, vector<64x32xf32>, vector<64x32xf32> -> vector<64x32xf32>
    %c0_9 = arith.constant 0 : index
    %c0_10 = arith.constant 0 : index
    %7 = vector.load %arg8[%c0_9, %c0_10] : memref<1x32xf32, #tpu.memory_space<vmem>>, vector<1x32xf32>
    %8 = vector.broadcast %7 : vector<1x32xf32> to vector<64x32xf32>
    %9 = arith.addf %6, %8 : vector<64x32xf32>
    %c0_11 = arith.constant 0 : index
    %c0_12 = arith.constant 0 : index
    %10 = vector.load %arg4[%c0_11, %c0_12] : memref<192x3456xf32, #tpu.memory_space<vmem>>, vector<192x3456xf32>
    %cst_13 = arith.constant dense<0.000000e+00> : vector<64x3456xf32>
    %11 = tpu.matmul %4, %10, %cst_13 {dimension_numbers = #tpu.dot_dimension_numbers<[1], [0], [0], [1], [0, 0, 1, 1], [], []>} : vector<64x192xf32>, vector<192x3456xf32>, vector<64x3456xf32> -> vector<64x3456xf32>
    %12 = vector.extract_strided_slice %11 {offsets = [0, 0], sizes = [64, 128], strides = [1, 1]} : vector<64x3456xf32> to vector<64x128xf32>
    %13 = vector.extract_strided_slice %11 {offsets = [0, 128], sizes = [64, 128], strides = [1, 1]} : vector<64x3456xf32> to vector<64x128xf32>
    %14 = vector.extract_strided_slice %11 {offsets = [0, 256], sizes = [64, 128], strides = [1, 1]} : vector<64x3456xf32> to vector<64x128xf32>
    %15 = vector.extract_strided_slice %11 {offsets = [0, 384], sizes = [64, 128], strides = [1, 1]} : vector<64x3456xf32> to vector<64x128xf32>
    %16 = vector.extract_strided_slice %11 {offsets = [0, 512], sizes = [64, 128], strides = [1, 1]} : vector<64x3456xf32> to vector<64x128xf32>
    %17 = vector.extract_strided_slice %11 {offsets = [0, 640], sizes = [64, 128], strides = [1, 1]} : vector<64x3456xf32> to vector<64x128xf32>
    %18 = vector.extract_strided_slice %11 {offsets = [0, 768], sizes = [64, 128], strides = [1, 1]} : vector<64x3456xf32> to vector<64x128xf32>
    %19 = vector.extract_strided_slice %11 {offsets = [0, 896], sizes = [64, 128], strides = [1, 1]} : vector<64x3456xf32> to vector<64x128xf32>
    %20 = vector.extract_strided_slice %11 {offsets = [0, 1024], sizes = [64, 128], strides = [1, 1]} : vector<64x3456xf32> to vector<64x128xf32>
    %21 = vector.extract_strided_slice %11 {offsets = [0, 1152], sizes = [64, 128], strides = [1, 1]} : vector<64x3456xf32> to vector<64x128xf32>
    %22 = arith.maximumf %12, %13 : vector<64x128xf32>
    %23 = arith.maximumf %14, %15 : vector<64x128xf32>
    %24 = arith.maximumf %16, %17 : vector<64x128xf32>
    %25 = arith.maximumf %18, %19 : vector<64x128xf32>
    %26 = arith.maximumf %20, %21 : vector<64x128xf32>
    %27 = arith.maximumf %22, %23 : vector<64x128xf32>
    %28 = arith.maximumf %24, %25 : vector<64x128xf32>
    %29 = arith.maximumf %27, %28 : vector<64x128xf32>
    %30 = arith.maximumf %29, %26 : vector<64x128xf32>
    %31 = vector.extract_strided_slice %11 {offsets = [0, 1280], sizes = [64, 128], strides = [1, 1]} : vector<64x3456xf32> to vector<64x128xf32>
    %32 = vector.extract_strided_slice %11 {offsets = [0, 1408], sizes = [64, 128], strides = [1, 1]} : vector<64x3456xf32> to vector<64x128xf32>
    %33 = vector.extract_strided_slice %11 {offsets = [0, 1536], sizes = [64, 128], strides = [1, 1]} : vector<64x3456xf32> to vector<64x128xf32>
    %34 = vector.extract_strided_slice %11 {offsets = [0, 1664], sizes = [64, 128], strides = [1, 1]} : vector<64x3456xf32> to vector<64x128xf32>
    %35 = vector.extract_strided_slice %11 {offsets = [0, 1792], sizes = [64, 128], strides = [1, 1]} : vector<64x3456xf32> to vector<64x128xf32>
    %36 = vector.extract_strided_slice %11 {offsets = [0, 1920], sizes = [64, 128], strides = [1, 1]} : vector<64x3456xf32> to vector<64x128xf32>
    %37 = vector.extract_strided_slice %11 {offsets = [0, 2048], sizes = [64, 128], strides = [1, 1]} : vector<64x3456xf32> to vector<64x128xf32>
    %38 = vector.extract_strided_slice %11 {offsets = [0, 2176], sizes = [64, 128], strides = [1, 1]} : vector<64x3456xf32> to vector<64x128xf32>
    %39 = vector.extract_strided_slice %11 {offsets = [0, 2304], sizes = [64, 128], strides = [1, 1]} : vector<64x3456xf32> to vector<64x128xf32>
    %40 = arith.maximumf %31, %32 : vector<64x128xf32>
    %41 = arith.maximumf %33, %34 : vector<64x128xf32>
    %42 = arith.maximumf %35, %36 : vector<64x128xf32>
    %43 = arith.maximumf %37, %38 : vector<64x128xf32>
    %44 = arith.maximumf %40, %41 : vector<64x128xf32>
    %45 = arith.maximumf %42, %43 : vector<64x128xf32>
    %46 = arith.maximumf %44, %45 : vector<64x128xf32>
    %47 = arith.maximumf %46, %39 : vector<64x128xf32>
    %48 = vector.extract_strided_slice %11 {offsets = [0, 2432], sizes = [64, 128], strides = [1, 1]} : vector<64x3456xf32> to vector<64x128xf32>
    %49 = vector.extract_strided_slice %11 {offsets = [0, 2560], sizes = [64, 128], strides = [1, 1]} : vector<64x3456xf32> to vector<64x128xf32>
    %50 = vector.extract_strided_slice %11 {offsets = [0, 2688], sizes = [64, 128], strides = [1, 1]} : vector<64x3456xf32> to vector<64x128xf32>
    %51 = vector.extract_strided_slice %11 {offsets = [0, 2816], sizes = [64, 128], strides = [1, 1]} : vector<64x3456xf32> to vector<64x128xf32>
    %52 = vector.extract_strided_slice %11 {offsets = [0, 2944], sizes = [64, 128], strides = [1, 1]} : vector<64x3456xf32> to vector<64x128xf32>
    %53 = vector.extract_strided_slice %11 {offsets = [0, 3072], sizes = [64, 128], strides = [1, 1]} : vector<64x3456xf32> to vector<64x128xf32>
    %54 = vector.extract_strided_slice %11 {offsets = [0, 3200], sizes = [64, 128], strides = [1, 1]} : vector<64x3456xf32> to vector<64x128xf32>
    %55 = vector.extract_strided_slice %11 {offsets = [0, 3328], sizes = [64, 128], strides = [1, 1]} : vector<64x3456xf32> to vector<64x128xf32>
    %56 = arith.maximumf %48, %49 : vector<64x128xf32>
    %57 = arith.maximumf %50, %51 : vector<64x128xf32>
    %58 = arith.maximumf %52, %53 : vector<64x128xf32>
    %59 = arith.maximumf %54, %55 : vector<64x128xf32>
    %60 = arith.maximumf %56, %57 : vector<64x128xf32>
    %61 = arith.maximumf %58, %59 : vector<64x128xf32>
    %62 = arith.maximumf %60, %61 : vector<64x128xf32>
    %63 = tpu.concatenate %30, %47, %62 in 1 : vector<64x128xf32>, vector<64x128xf32>, vector<64x128xf32> -> vector<64x384xf32>
    %c0_14 = arith.constant 0 : index
    %c0_15 = arith.constant 0 : index
    %64 = vector.load %arg5[%c0_14, %c0_15] : memref<1x384xf32, #tpu.memory_space<vmem>>, vector<1x384xf32>
    %65 = vector.broadcast %64 : vector<1x384xf32> to vector<64x384xf32>
    %66 = arith.addf %63, %65 : vector<64x384xf32>
    %cst_16 = arith.constant 0.000000e+00 : f32
    %67 = vector.broadcast %cst_16 : f32 to vector<64x384xf32>
    %68 = arith.maximumf %66, %67 : vector<64x384xf32>
    %c0_17 = arith.constant 0 : index
    %c0_18 = arith.constant 0 : index
    %69 = vector.load %arg6[%c0_17, %c0_18] : memref<384x32xf32, #tpu.memory_space<vmem>>, vector<384x32xf32>
    %cst_19 = arith.constant dense<0.000000e+00> : vector<64x32xf32>
    %70 = tpu.matmul %68, %69, %cst_19 {dimension_numbers = #tpu.dot_dimension_numbers<[1], [0], [0], [1], [0, 0, 1, 1], [], []>} : vector<64x384xf32>, vector<384x32xf32>, vector<64x32xf32> -> vector<64x32xf32>
    %71 = arith.addf %9, %70 : vector<64x32xf32>
    %cst_20 = arith.constant 0.000000e+00 : f32
    %72 = vector.broadcast %cst_20 : f32 to vector<64x32xf32>
    %73 = arith.maximumf %71, %72 : vector<64x32xf32>
    %c0_21 = arith.constant 0 : index
    %c0_22 = arith.constant 0 : index
    %74 = vector.load %arg9[%c0_21, %c0_22] : memref<32x32xf32, #tpu.memory_space<vmem>>, vector<32x32xf32>
    %cst_23 = arith.constant dense<0.000000e+00> : vector<64x32xf32>
    %75 = tpu.matmul %73, %74, %cst_23 {dimension_numbers = #tpu.dot_dimension_numbers<[1], [0], [0], [1], [0, 0, 1, 1], [], []>} : vector<64x32xf32>, vector<32x32xf32>, vector<64x32xf32> -> vector<64x32xf32>
    %c0_24 = arith.constant 0 : index
    %c0_25 = arith.constant 0 : index
    %76 = vector.load %arg10[%c0_24, %c0_25] : memref<1x32xf32, #tpu.memory_space<vmem>>, vector<1x32xf32>
    %77 = vector.broadcast %76 : vector<1x32xf32> to vector<64x32xf32>
    %78 = arith.addf %75, %77 : vector<64x32xf32>
    %cst_26 = arith.constant 0.000000e+00 : f32
    %79 = vector.broadcast %cst_26 : f32 to vector<64x32xf32>
    %80 = arith.maximumf %78, %79 : vector<64x32xf32>
    %c0_27 = arith.constant 0 : index
    %c0_28 = arith.constant 0 : index
    %81 = vector.load %arg12[%c0_27, %c0_28] : memref<32x32xf32, #tpu.memory_space<vmem>>, vector<32x32xf32>
    %cst_29 = arith.constant dense<0.000000e+00> : vector<8x32xf32>
    %82 = tpu.matmul %2, %81, %cst_29 {dimension_numbers = #tpu.dot_dimension_numbers<[1], [0], [0], [1], [0, 0, 1, 1], [], []>} : vector<8x32xf32>, vector<32x32xf32>, vector<8x32xf32> -> vector<8x32xf32>
    %c0_30 = arith.constant 0 : index
    %c0_31 = arith.constant 0 : index
    %83 = vector.load %arg11[%c0_30, %c0_31] : memref<32x32xf32, #tpu.memory_space<vmem>>, vector<32x32xf32>
    %cst_32 = arith.constant dense<0.000000e+00> : vector<64x32xf32>
    %84 = tpu.matmul %80, %83, %cst_32 {dimension_numbers = #tpu.dot_dimension_numbers<[1], [0], [0], [1], [0, 0, 1, 1], [], []>} : vector<64x32xf32>, vector<32x32xf32>, vector<64x32xf32> -> vector<64x32xf32>
    %85 = vector.shape_cast %84 : vector<64x32xf32> to vector<8x8x32xf32>
    %86 = vector.shape_cast %82 : vector<8x32xf32> to vector<8x1x32xf32>
    %87 = vector.broadcast %86 : vector<8x1x32xf32> to vector<8x8x32xf32>
    %88 = arith.addf %85, %87 : vector<8x8x32xf32>
    %c0_33 = arith.constant 0 : index
    %c0_34 = arith.constant 0 : index
    %89 = vector.load %arg13[%c0_33, %c0_34] : memref<1x32xf32, #tpu.memory_space<vmem>>, vector<1x32xf32>
    %90 = vector.shape_cast %89 : vector<1x32xf32> to vector<1x1x32xf32>
    %91 = vector.broadcast %90 : vector<1x1x32xf32> to vector<8x8x32xf32>
    %92 = arith.addf %88, %91 : vector<8x8x32xf32>
    %cst_35 = arith.constant 0.000000e+00 : f32
    %93 = vector.broadcast %cst_35 : f32 to vector<8x8x32xf32>
    %94 = arith.maximumf %92, %93 : vector<8x8x32xf32>
    %95 = vector.shape_cast %94 : vector<8x8x32xf32> to vector<64x32xf32>
    %c0_36 = arith.constant 0 : index
    %c0_37 = arith.constant 0 : index
    %96 = vector.load %arg14[%c0_36, %c0_37] : memref<32x32xf32, #tpu.memory_space<vmem>>, vector<32x32xf32>
    %cst_38 = arith.constant dense<0.000000e+00> : vector<64x32xf32>
    %97 = tpu.matmul %95, %96, %cst_38 {dimension_numbers = #tpu.dot_dimension_numbers<[1], [0], [0], [1], [0, 0, 1, 1], [], []>} : vector<64x32xf32>, vector<32x32xf32>, vector<64x32xf32> -> vector<64x32xf32>
    %c0_39 = arith.constant 0 : index
    %c0_40 = arith.constant 0 : index
    %98 = vector.load %arg15[%c0_39, %c0_40] : memref<1x32xf32, #tpu.memory_space<vmem>>, vector<1x32xf32>
    %99 = vector.broadcast %98 : vector<1x32xf32> to vector<64x32xf32>
    %100 = arith.addf %97, %99 : vector<64x32xf32>
    %cst_41 = arith.constant 0.000000e+00 : f32
    %101 = vector.broadcast %cst_41 : f32 to vector<64x32xf32>
    %102 = arith.maximumf %100, %101 : vector<64x32xf32>
    %c0_42 = arith.constant 0 : index
    %c0_43 = arith.constant 0 : index
    %103 = vector.load %arg16[%c0_42, %c0_43] : memref<1x32xf32, #tpu.memory_space<vmem>>, vector<1x32xf32>
    %104 = vector.shape_cast %102 : vector<64x32xf32> to vector<8x8x32xf32>
    %105 = vector.shape_cast %103 : vector<1x32xf32> to vector<1x1x32xf32>
    %106 = vector.broadcast %105 : vector<1x1x32xf32> to vector<8x8x32xf32>
    %107 = arith.mulf %104, %106 : vector<8x8x32xf32>
    %cst_44 = arith.constant dense<0.000000e+00> : vector<8x8xf32>
    %108 = vector.multi_reduction <add>, %107, %cst_44 [2] : vector<8x8x32xf32> to vector<8x8xf32>
    %109 = vector.shape_cast %108 : vector<8x8xf32> to vector<8x8x1xf32>
    %cst_45 = arith.constant dense<0xFF800000> : vector<8x1xf32>
    %110 = vector.multi_reduction <maximumf>, %109, %cst_45 [1] : vector<8x8x1xf32> to vector<8x1xf32>
    %111 = vector.shape_cast %110 : vector<8x1xf32> to vector<8x1x1xf32>
    %112 = vector.broadcast %111 : vector<8x1x1xf32> to vector<8x8x1xf32>
    %113 = arith.subf %109, %112 : vector<8x8x1xf32>
    %114 = math.exp %113 : vector<8x8x1xf32>
    %cst_46 = arith.constant dense<0.000000e+00> : vector<8x1xf32>
    %115 = vector.multi_reduction <add>, %114, %cst_46 [1] : vector<8x8x1xf32> to vector<8x1xf32>
    %116 = vector.shape_cast %115 : vector<8x1xf32> to vector<8x1x1xf32>
    %117 = vector.broadcast %116 : vector<8x1x1xf32> to vector<8x8x1xf32>
    %118 = arith.divf %114, %117 : vector<8x8x1xf32>
    %119 = vector.shape_cast %80 : vector<64x32xf32> to vector<8x8x32xf32>
    %120 = vector.broadcast %118 : vector<8x8x1xf32> to vector<8x8x32xf32>
    %121 = arith.mulf %119, %120 : vector<8x8x32xf32>
    %cst_47 = arith.constant dense<0.000000e+00> : vector<8x32xf32>
    %122 = vector.multi_reduction <add>, %121, %cst_47 [1] : vector<8x8x32xf32> to vector<8x32xf32>
    %c0_48 = arith.constant 0 : index
    %c0_49 = arith.constant 0 : index
    %123 = vector.load %arg17[%c0_48, %c0_49] : memref<8x32xf32, #tpu.memory_space<vmem>>, vector<8x32xf32>
    tpu.vector_store %arg17[%c0_48, %c0_49], %122 {strides = array<i32>} : memref<8x32xf32, #tpu.memory_space<vmem>>, vector<8x32xf32>,
    return
  }
  func.func @transform_0(%arg0: i32) -> (i32, i32, i32) {
    %c0_i32 = arith.constant 0 : i32
    %c0_i32_0 = arith.constant 0 : i32
    %c0_i32_1 = arith.constant 0 : i32
    return %arg0, %c0_i32, %c0_i32_0 : i32, i32, i32
  }
  func.func @transform_1(%arg0: i32) -> (i32, i32) {
    %c0_i32 = arith.constant 0 : i32
    %c0_i32_0 = arith.constant 0 : i32
    return %arg0, %c0_i32 : i32, i32
  }
  func.func @transform_2(%arg0: i32) -> (i32, i32, i32) {
    %c0_i32 = arith.constant 0 : i32
    %c0_i32_0 = arith.constant 0 : i32
    %c0_i32_1 = arith.constant 0 : i32
    return %arg0, %c0_i32, %c0_i32_0 : i32, i32, i32
  }
  func.func @transform_3(%arg0: i32) -> (i32, i32) {
    %c0_i32 = arith.constant 0 : i32
    %c0_i32_0 = arith.constant 0 : i32
    %c0_i32_1 = arith.constant 0 : i32
    return %c0_i32, %c0_i32_0 : i32, i32
  }
  func.func @transform_4(%arg0: i32) -> (i32, i32) {
    %c0_i32 = arith.constant 0 : i32
    %c0_i32_0 = arith.constant 0 : i32
    %c0_i32_1 = arith.constant 0 : i32
    return %c0_i32, %c0_i32_0 : i32, i32
  }
  func.func @transform_5(%arg0: i32) -> (i32, i32) {
    %c0_i32 = arith.constant 0 : i32
    %c0_i32_0 = arith.constant 0 : i32
    %c0_i32_1 = arith.constant 0 : i32
    return %c0_i32, %c0_i32_0 : i32, i32
  }
  func.func @transform_6(%arg0: i32) -> (i32, i32) {
    %c0_i32 = arith.constant 0 : i32
    %c0_i32_0 = arith.constant 0 : i32
    %c0_i32_1 = arith.constant 0 : i32
    return %c0_i32, %c0_i32_0 : i32, i32
  }
  func.func @transform_7(%arg0: i32) -> (i32, i32) {
    %c0_i32 = arith.constant 0 : i32
    %c0_i32_0 = arith.constant 0 : i32
    %c0_i32_1 = arith.constant 0 : i32
    return %c0_i32, %c0_i32_0 : i32, i32
  }
  func.func @transform_8(%arg0: i32) -> (i32, i32) {
    %c0_i32 = arith.constant 0 : i32
    %c0_i32_0 = arith.constant 0 : i32
    %c0_i32_1 = arith.constant 0 : i32
    return %c0_i32, %c0_i32_0 : i32, i32
  }
  func.func @transform_9(%arg0: i32) -> (i32, i32) {
    %c0_i32 = arith.constant 0 : i32
    %c0_i32_0 = arith.constant 0 : i32
    %c0_i32_1 = arith.constant 0 : i32
    return %c0_i32, %c0_i32_0 : i32, i32
  }
  func.func @transform_10(%arg0: i32) -> (i32, i32) {
    %c0_i32 = arith.constant 0 : i32
    %c0_i32_0 = arith.constant 0 : i32
    %c0_i32_1 = arith.constant 0 : i32
    return %c0_i32, %c0_i32_0 : i32, i32
  }
  func.func @transform_11(%arg0: i32) -> (i32, i32) {
    %c0_i32 = arith.constant 0 : i32
    %c0_i32_0 = arith.constant 0 : i32
    %c0_i32_1 = arith.constant 0 : i32
    return %c0_i32, %c0_i32_0 : i32, i32
  }
  func.func @transform_12(%arg0: i32) -> (i32, i32) {
    %c0_i32 = arith.constant 0 : i32
    %c0_i32_0 = arith.constant 0 : i32
    %c0_i32_1 = arith.constant 0 : i32
    return %c0_i32, %c0_i32_0 : i32, i32
  }
  func.func @transform_13(%arg0: i32) -> (i32, i32) {
    %c0_i32 = arith.constant 0 : i32
    %c0_i32_0 = arith.constant 0 : i32
    %c0_i32_1 = arith.constant 0 : i32
    return %c0_i32, %c0_i32_0 : i32, i32
  }
  func.func @transform_14(%arg0: i32) -> (i32, i32) {
    %c0_i32 = arith.constant 0 : i32
    %c0_i32_0 = arith.constant 0 : i32
    %c0_i32_1 = arith.constant 0 : i32
    return %c0_i32, %c0_i32_0 : i32, i32
  }
  func.func @transform_15(%arg0: i32) -> (i32, i32) {
    %c0_i32 = arith.constant 0 : i32
    %c0_i32_0 = arith.constant 0 : i32
    %c0_i32_1 = arith.constant 0 : i32
    return %c0_i32, %c0_i32_0 : i32, i32
  }
  func.func @transform_16(%arg0: i32) -> (i32, i32) {
    %c0_i32 = arith.constant 0 : i32
    %c0_i32_0 = arith.constant 0 : i32
    return %arg0, %c0_i32 : i32, i32
  }
}

module attributes {stable_mosaic.version = 11 : i64} {
  func.func @kernel(%arg0: i32, %arg1: memref<8x8x64xf32, #tpu.memory_space<vmem>>, %arg2: memref<8x32xf32, #tpu.memory_space<vmem>>, %arg3: memref<8x8x192xf32, #tpu.memory_space<vmem>>, %arg4: memref<192x3456xf32, #tpu.memory_space<vmem>>, %arg5: memref<1x384xf32, #tpu.memory_space<vmem>>, %arg6: memref<384x32xf32, #tpu.memory_space<vmem>>, %arg7: memref<64x32xf32, #tpu.memory_space<vmem>>, %arg8: memref<1x32xf32, #tpu.memory_space<vmem>>, %arg9: memref<32x32xf32, #tpu.memory_space<vmem>>, %arg10: memref<1x32xf32, #tpu.memory_space<vmem>>, %arg11: memref<32x32xf32, #tpu.memory_space<vmem>>, %arg12: memref<32x32xf32, #tpu.memory_space<vmem>>, %arg13: memref<1x32xf32, #tpu.memory_space<vmem>>, %arg14: memref<32x32xf32, #tpu.memory_space<vmem>>, %arg15: memref<1x32xf32, #tpu.memory_space<vmem>>, %arg16: memref<1x32xf32, #tpu.memory_space<vmem>>, %arg17: memref<8x32xf32, #tpu.memory_space<vmem>>) attributes {dimension_semantics = [#tpu.dimension_semantics<parallel>], iteration_bounds = array<i64: 2>, scalar_prefetch = 0 : i64, scratch_operands = 0 : i64, tpu.core_type = #tpu.core_type<tc>, window_params = [{transform_indices = @transform_0, window_bounds = array<i64: 8, 8, 64>}, {transform_indices = @transform_1, window_bounds = array<i64: 8, 32>}, {transform_indices = @transform_2, window_bounds = array<i64: 8, 8, 192>}, {pipeline_mode = #tpu.pipeline_mode<synchronous>, transform_indices = @transform_3, window_bounds = array<i64: 192, 3456>}, {pipeline_mode = #tpu.pipeline_mode<synchronous>, transform_indices = @transform_4, window_bounds = array<i64: 1, 384>}, {pipeline_mode = #tpu.pipeline_mode<synchronous>, transform_indices = @transform_5, window_bounds = array<i64: 384, 32>}, {pipeline_mode = #tpu.pipeline_mode<synchronous>, transform_indices = @transform_6, window_bounds = array<i64: 64, 32>}, {pipeline_mode = #tpu.pipeline_mode<synchronous>, transform_indices = @transform_7, window_bounds = array<i64: 1, 32>}, {pipeline_mode = #tpu.pipeline_mode<synchronous>, transform_indices = @transform_8, window_bounds = array<i64: 32, 32>}, {pipeline_mode = #tpu.pipeline_mode<synchronous>, transform_indices = @transform_9, window_bounds = array<i64: 1, 32>}, {pipeline_mode = #tpu.pipeline_mode<synchronous>, transform_indices = @transform_10, window_bounds = array<i64: 32, 32>}, {pipeline_mode = #tpu.pipeline_mode<synchronous>, transform_indices = @transform_11, window_bounds = array<i64: 32, 32>}, {pipeline_mode = #tpu.pipeline_mode<synchronous>, transform_indices = @transform_12, window_bounds = array<i64: 1, 32>}, {pipeline_mode = #tpu.pipeline_mode<synchronous>, transform_indices = @transform_13, window_bounds = array<i64: 32, 32>}, {pipeline_mode = #tpu.pipeline_mode<synchronous>, transform_indices = @transform_14, window_bounds = array<i64: 1, 32>}, {pipeline_mode = #tpu.pipeline_mode<synchronous>, transform_indices = @transform_15, window_bounds = array<i64: 1, 32>}, {transform_indices = @transform_16, window_bounds = array<i64: 8, 32>}]} {
    %c0 = arith.constant 0 : index
    %c0_0 = arith.constant 0 : index
    %c0_1 = arith.constant 0 : index
    %0 = vector.load %arg1[%c0, %c0_0, %c0_1] : memref<8x8x64xf32, #tpu.memory_space<vmem>>, vector<8x8x64xf32>
    %1 = vector.shape_cast %0 : vector<8x8x64xf32> to vector<64x64xf32>
    %c0_2 = arith.constant 0 : index
    %c0_3 = arith.constant 0 : index
    %2 = vector.load %arg2[%c0_2, %c0_3] : memref<8x32xf32, #tpu.memory_space<vmem>>, vector<8x32xf32>
    %c0_4 = arith.constant 0 : index
    %c0_5 = arith.constant 0 : index
    %c0_6 = arith.constant 0 : index
    %3 = vector.load %arg3[%c0_4, %c0_5, %c0_6] : memref<8x8x192xf32, #tpu.memory_space<vmem>>, vector<8x8x192xf32>
    %4 = vector.shape_cast %3 : vector<8x8x192xf32> to vector<64x192xf32>
    %c0_7 = arith.constant 0 : index
    %c0_8 = arith.constant 0 : index
    %5 = vector.load %arg7[%c0_7, %c0_8] : memref<64x32xf32, #tpu.memory_space<vmem>>, vector<64x32xf32>
    %cst = arith.constant dense<0.000000e+00> : vector<64x32xf32>
    %6 = tpu.matmul %1, %5, %cst {dimension_numbers = #tpu.dot_dimension_numbers<[1], [0], [0], [1], [0, 0, 1, 1], [], []>} : vector<64x64xf32>, vector<64x32xf32>, vector<64x32xf32> -> vector<64x32xf32>
    %c0_9 = arith.constant 0 : index
    %c0_10 = arith.constant 0 : index
    %7 = vector.load %arg8[%c0_9, %c0_10] : memref<1x32xf32, #tpu.memory_space<vmem>>, vector<1x32xf32>
    %8 = vector.broadcast %7 : vector<1x32xf32> to vector<64x32xf32>
    %9 = arith.addf %6, %8 : vector<64x32xf32>
    %c0_11 = arith.constant 0 : index
    %c0_12 = arith.constant 0 : index
    %10 = vector.load %arg4[%c0_11, %c0_12] : memref<192x3456xf32, #tpu.memory_space<vmem>>, vector<192x3456xf32>
    %cst_13 = arith.constant dense<0.000000e+00> : vector<64x3456xf32>
    %11 = tpu.matmul %4, %10, %cst_13 {dimension_numbers = #tpu.dot_dimension_numbers<[1], [0], [0], [1], [0, 0, 1, 1], [], []>} : vector<64x192xf32>, vector<192x3456xf32>, vector<64x3456xf32> -> vector<64x3456xf32>
    %12 = vector.extract_strided_slice %11 {offsets = [0, 0], sizes = [64, 128], strides = [1, 1]} : vector<64x3456xf32> to vector<64x128xf32>
    %13 = vector.extract_strided_slice %11 {offsets = [0, 128], sizes = [64, 128], strides = [1, 1]} : vector<64x3456xf32> to vector<64x128xf32>
    %14 = vector.extract_strided_slice %11 {offsets = [0, 256], sizes = [64, 128], strides = [1, 1]} : vector<64x3456xf32> to vector<64x128xf32>
    %15 = vector.extract_strided_slice %11 {offsets = [0, 384], sizes = [64, 128], strides = [1, 1]} : vector<64x3456xf32> to vector<64x128xf32>
    %16 = vector.extract_strided_slice %11 {offsets = [0, 512], sizes = [64, 128], strides = [1, 1]} : vector<64x3456xf32> to vector<64x128xf32>
    %17 = vector.extract_strided_slice %11 {offsets = [0, 640], sizes = [64, 128], strides = [1, 1]} : vector<64x3456xf32> to vector<64x128xf32>
    %18 = vector.extract_strided_slice %11 {offsets = [0, 768], sizes = [64, 128], strides = [1, 1]} : vector<64x3456xf32> to vector<64x128xf32>
    %19 = vector.extract_strided_slice %11 {offsets = [0, 896], sizes = [64, 128], strides = [1, 1]} : vector<64x3456xf32> to vector<64x128xf32>
    %20 = vector.extract_strided_slice %11 {offsets = [0, 1024], sizes = [64, 128], strides = [1, 1]} : vector<64x3456xf32> to vector<64x128xf32>
    %21 = vector.extract_strided_slice %11 {offsets = [0, 1152], sizes = [64, 128], strides = [1, 1]} : vector<64x3456xf32> to vector<64x128xf32>
    %22 = arith.maximumf %12, %13 : vector<64x128xf32>
    %23 = arith.maximumf %14, %15 : vector<64x128xf32>
    %24 = arith.maximumf %16, %17 : vector<64x128xf32>
    %25 = arith.maximumf %18, %19 : vector<64x128xf32>
    %26 = arith.maximumf %20, %21 : vector<64x128xf32>
    %27 = arith.maximumf %22, %23 : vector<64x128xf32>
    %28 = arith.maximumf %24, %25 : vector<64x128xf32>
    %29 = arith.maximumf %27, %28 : vector<64x128xf32>
    %30 = arith.maximumf %29, %26 : vector<64x128xf32>
    %31 = vector.extract_strided_slice %11 {offsets = [0, 1280], sizes = [64, 128], strides = [1, 1]} : vector<64x3456xf32> to vector<64x128xf32>
    %32 = vector.extract_strided_slice %11 {offsets = [0, 1408], sizes = [64, 128], strides = [1, 1]} : vector<64x3456xf32> to vector<64x128xf32>
    %33 = vector.extract_strided_slice %11 {offsets = [0, 1536], sizes = [64, 128], strides = [1, 1]} : vector<64x3456xf32> to vector<64x128xf32>
    %34 = vector.extract_strided_slice %11 {offsets = [0, 1664], sizes = [64, 128], strides = [1, 1]} : vector<64x3456xf32> to vector<64x128xf32>
    %35 = vector.extract_strided_slice %11 {offsets = [0, 1792], sizes = [64, 128], strides = [1, 1]} : vector<64x3456xf32> to vector<64x128xf32>
    %36 = vector.extract_strided_slice %11 {offsets = [0, 1920], sizes = [64, 128], strides = [1, 1]} : vector<64x3456xf32> to vector<64x128xf32>
    %37 = vector.extract_strided_slice %11 {offsets = [0, 2048], sizes = [64, 128], strides = [1, 1]} : vector<64x3456xf32> to vector<64x128xf32>
    %38 = vector.extract_strided_slice %11 {offsets = [0, 2176], sizes = [64, 128], strides = [1, 1]} : vector<64x3456xf32> to vector<64x128xf32>
    %39 = vector.extract_strided_slice %11 {offsets = [0, 2304], sizes = [64, 128], strides = [1, 1]} : vector<64x3456xf32> to vector<64x128xf32>
    %40 = arith.maximumf %31, %32 : vector<64x128xf32>
    %41 = arith.maximumf %33, %34 : vector<64x128xf32>
    %42 = arith.maximumf %35, %36 : vector<64x128xf32>
    %43 = arith.maximumf %37, %38 : vector<64x128xf32>
    %44 = arith.maximumf %40, %41 : vector<64x128xf32>
    %45 = arith.maximumf %42, %43 : vector<64x128xf32>
    %46 = arith.maximumf %44, %45 : vector<64x128xf32>
    %47 = arith.maximumf %46, %39 : vector<64x128xf32>
    %48 = vector.extract_strided_slice %11 {offsets = [0, 2432], sizes = [64, 128], strides = [1, 1]} : vector<64x3456xf32> to vector<64x128xf32>
    %49 = vector.extract_strided_slice %11 {offsets = [0, 2560], sizes = [64, 128], strides = [1, 1]} : vector<64x3456xf32> to vector<64x128xf32>
    %50 = vector.extract_strided_slice %11 {offsets = [0, 2688], sizes = [64, 128], strides = [1, 1]} : vector<64x3456xf32> to vector<64x128xf32>
    %51 = vector.extract_strided_slice %11 {offsets = [0, 2816], sizes = [64, 128], strides = [1, 1]} : vector<64x3456xf32> to vector<64x128xf32>
    %52 = vector.extract_strided_slice %11 {offsets = [0, 2944], sizes = [64, 128], strides = [1, 1]} : vector<64x3456xf32> to vector<64x128xf32>
    %53 = vector.extract_strided_slice %11 {offsets = [0, 3072], sizes = [64, 128], strides = [1, 1]} : vector<64x3456xf32> to vector<64x128xf32>
    %54 = vector.extract_strided_slice %11 {offsets = [0, 3200], sizes = [64, 128], strides = [1, 1]} : vector<64x3456xf32> to vector<64x128xf32>
    %55 = vector.extract_strided_slice %11 {offsets = [0, 3328], sizes = [64, 128], strides = [1, 1]} : vector<64x3456xf32> to vector<64x128xf32>
    %56 = arith.maximumf %48, %49 : vector<64x128xf32>
    %57 = arith.maximumf %50, %51 : vector<64x128xf32>
    %58 = arith.maximumf %52, %53 : vector<64x128xf32>
    %59 = arith.maximumf %54, %55 : vector<64x128xf32>
    %60 = arith.maximumf %56, %57 : vector<64x128xf32>
    %61 = arith.maximumf %58, %59 : vector<64x128xf32>
    %62 = arith.maximumf %60, %61 : vector<64x128xf32>
    %63 = tpu.concatenate %30, %47, %62 in 1 : vector<64x128xf32>, vector<64x128xf32>, vector<64x128xf32> -> vector<64x384xf32>
    %c0_14 = arith.constant 0 : index
    %c0_15 = arith.constant 0 : index
    %64 = vector.load %arg5[%c0_14, %c0_15] : memref<1x384xf32, #tpu.memory_space<vmem>>, vector<1x384xf32>
    %65 = vector.broadcast %64 : vector<1x384xf32> to vector<64x384xf32>
    %66 = arith.addf %63, %65 : vector<64x384xf32>
    %cst_16 = arith.constant 0.000000e+00 : f32
    %67 = vector.broadcast %cst_16 : f32 to vector<64x384xf32>
    %68 = arith.maximumf %66, %67 : vector<64x384xf32>
    %c0_17 = arith.constant 0 : index
    %c0_18 = arith.constant 0 : index
    %69 = vector.load %arg6[%c0_17, %c0_18] : memref<384x32xf32, #tpu.memory_space<vmem>>, vector<384x32xf32>
    %cst_19 = arith.constant dense<0.000000e+00> : vector<64x32xf32>
    %70 = tpu.matmul %68, %69, %cst_19 {dimension_numbers = #tpu.dot_dimension_numbers<[1], [0], [0], [1], [0, 0, 1, 1], [], []>} : vector<64x384xf32>, vector<384x32xf32>, vector<64x32xf32> -> vector<64x32xf32>
    %71 = arith.addf %9, %70 : vector<64x32xf32>
    %cst_20 = arith.constant 0.000000e+00 : f32
    %72 = vector.broadcast %cst_20 : f32 to vector<64x32xf32>
    %73 = arith.maximumf %71, %72 : vector<64x32xf32>
    %c0_21 = arith.constant 0 : index
    %c0_22 = arith.constant 0 : index
    %74 = vector.load %arg9[%c0_21, %c0_22] : memref<32x32xf32, #tpu.memory_space<vmem>>, vector<32x32xf32>
    %cst_23 = arith.constant dense<0.000000e+00> : vector<64x32xf32>
    %75 = tpu.matmul %73, %74, %cst_23 {dimension_numbers = #tpu.dot_dimension_numbers<[1], [0], [0], [1], [0, 0, 1, 1], [], []>} : vector<64x32xf32>, vector<32x32xf32>, vector<64x32xf32> -> vector<64x32xf32>
    %c0_24 = arith.constant 0 : index
    %c0_25 = arith.constant 0 : index
    %76 = vector.load %arg10[%c0_24, %c0_25] : memref<1x32xf32, #tpu.memory_space<vmem>>, vector<1x32xf32>
    %77 = vector.broadcast %76 : vector<1x32xf32> to vector<64x32xf32>
    %78 = arith.addf %75, %77 : vector<64x32xf32>
    %cst_26 = arith.constant 0.000000e+00 : f32
    %79 = vector.broadcast %cst_26 : f32 to vector<64x32xf32>
    %80 = arith.maximumf %78, %79 : vector<64x32xf32>
    %c0_27 = arith.constant 0 : index
    %c0_28 = arith.constant 0 : index
    %81 = vector.load %arg12[%c0_27, %c0_28] : memref<32x32xf32, #tpu.memory_space<vmem>>, vector<32x32xf32>
    %cst_29 = arith.constant dense<0.000000e+00> : vector<8x32xf32>
    %82 = tpu.matmul %2, %81, %cst_29 {dimension_numbers = #tpu.dot_dimension_numbers<[1], [0], [0], [1], [0, 0, 1, 1], [], []>} : vector<8x32xf32>, vector<32x32xf32>, vector<8x32xf32> -> vector<8x32xf32>
    %c0_30 = arith.constant 0 : index
    %c0_31 = arith.constant 0 : index
    %83 = vector.load %arg11[%c0_30, %c0_31] : memref<32x32xf32, #tpu.memory_space<vmem>>, vector<32x32xf32>
    %cst_32 = arith.constant dense<0.000000e+00> : vector<64x32xf32>
    %84 = tpu.matmul %80, %83, %cst_32 {dimension_numbers = #tpu.dot_dimension_numbers<[1], [0], [0], [1], [0, 0, 1, 1], [], []>} : vector<64x32xf32>, vector<32x32xf32>, vector<64x32xf32> -> vector<64x32xf32>
    %85 = vector.shape_cast %84 : vector<64x32xf32> to vector<8x8x32xf32>
    %86 = vector.shape_cast %82 : vector<8x32xf32> to vector<8x1x32xf32>
    %87 = vector.broadcast %86 : vector<8x1x32xf32> to vector<8x8x32xf32>
    %88 = arith.addf %85, %87 : vector<8x8x32xf32>
    %c0_33 = arith.constant 0 : index
    %c0_34 = arith.constant 0 : index
    %89 = vector.load %arg13[%c0_33, %c0_34] : memref<1x32xf32, #tpu.memory_space<vmem>>, vector<1x32xf32>
    %90 = vector.shape_cast %89 : vector<1x32xf32> to vector<1x1x32xf32>
    %91 = vector.broadcast %90 : vector<1x1x32xf32> to vector<8x8x32xf32>
    %92 = arith.addf %88, %91 : vector<8x8x32xf32>
    %cst_35 = arith.constant 0.000000e+00 : f32
    %93 = vector.broadcast %cst_35 : f32 to vector<8x8x32xf32>
    %94 = arith.maximumf %92, %93 : vector<8x8x32xf32>
    %95 = vector.shape_cast %94 : vector<8x8x32xf32> to vector<64x32xf32>
    %c0_36 = arith.constant 0 : index
    %c0_37 = arith.constant 0 : index
    %96 = vector.load %arg14[%c0_36, %c0_37] : memref<32x32xf32, #tpu.memory_space<vmem>>, vector<32x32xf32>
    %cst_38 = arith.constant dense<0.000000e+00> : vector<64x32xf32>
    %97 = tpu.matmul %95, %96, %cst_38 {dimension_numbers = #tpu.dot_dimension_numbers<[1], [0], [0], [1], [0, 0, 1, 1], [], []>} : vector<64x32xf32>, vector<32x32xf32>, vector<64x32xf32> -> vector<64x32xf32>
    %c0_39 = arith.constant 0 : index
    %c0_40 = arith.constant 0 : index
    %98 = vector.load %arg15[%c0_39, %c0_40] : memref<1x32xf32, #tpu.memory_space<vmem>>, vector<1x32xf32>
    %99 = vector.broadcast %98 : vector<1x32xf32> to vector<64x32xf32>
    %100 = arith.addf %97, %99 : vector<64x32xf32>
    %cst_41 = arith.constant 0.000000e+00 : f32
    %101 = vector.broadcast %cst_41 : f32 to vector<64x32xf32>
    %102 = arith.maximumf %100, %101 : vector<64x32xf32>
    %c0_42 = arith.constant 0 : index
    %c0_43 = arith.constant 0 : index
    %103 = vector.load %arg16[%c0_42, %c0_43] : memref<1x32xf32, #tpu.memory_space<vmem>>, vector<1x32xf32>
    %104 = vector.shape_cast %102 : vector<64x32xf32> to vector<8x8x32xf32>
    %105 = vector.shape_cast %103 : vector<1x32xf32> to vector<1x1x32xf32>
    %106 = vector.broadcast %105 : vector<1x1x32xf32> to vector<8x8x32xf32>
    %107 = arith.mulf %104, %106 : vector<8x8x32xf32>
    %cst_44 = arith.constant dense<0.000000e+00> : vector<8x8xf32>
    %108 = vector.multi_reduction <add>, %107, %cst_44 [2] : vector<8x8x32xf32> to vector<8x8xf32>
    %109 = vector.shape_cast %108 : vector<8x8xf32> to vector<8x8x1xf32>
    %cst_45 = arith.constant dense<0xFF800000> : vector<8x1xf32>
    %110 = vector.multi_reduction <maximumf>, %109, %cst_45 [1] : vector<8x8x1xf32> to vector<8x1xf32>
    %111 = vector.shape_cast %110 : vector<8x1xf32> to vector<8x1x1xf32>
    %112 = vector.broadcast %111 : vector<8x1x1xf32> to vector<8x8x1xf32>
    %113 = arith.subf %109, %112 : vector<8x8x1xf32>
    %114 = math.exp %113 : vector<8x8x1xf32>
    %cst_46 = arith.constant dense<0.000000e+00> : vector<8x1xf32>
    %115 = vector.multi_reduction <add>, %114, %cst_46 [1] : vector<8x8x1xf32> to vector<8x1xf32>
    %116 = vector.shape_cast %115 : vector<8x1xf32> to vector<8x1x1xf32>
    %117 = vector.broadcast %116 : vector<8x1x1xf32> to vector<8x8x1xf32>
    %118 = arith.divf %114, %117 : vector<8x8x1xf32>
    %119 = vector.shape_cast %80 : vector<64x32xf32> to vector<8x8x32xf32>
    %120 = vector.broadcast %118 : vector<8x8x1xf32> to vector<8x8x32xf32>
    %121 = arith.mulf %119, %120 : vector<8x8x32xf32>
    %cst_47 = arith.constant dense<0.000000e+00> : vector<8x32xf32>
    %122 = vector.multi_reduction <add>, %121, %cst_47 [1] : vector<8x8x32xf32> to vector<8x32xf32>
    %c0_48 = arith.constant 0 : index
    %c0_49 = arith.constant 0 : index
    %123 = vector.load %arg17[%c0_48, %c0_49] : memref<8x32xf32, #tpu.memory_space<vmem>>, vector<8x32xf32>
    tpu.vector_store %arg17[%c0_48, %c0_49], %122 {strides = array<i32>} : memref<8x32xf32, #tpu.memory_space<vmem>>, vector<8x32xf32>,
    return
  }
  func.func @transform_0(%arg0: i32) -> (i32, i32, i32) {
    %c0_i32 = arith.constant 0 : i32
    %c0_i32_0 = arith.constant 0 : i32
    %c0_i32_1 = arith.constant 0 : i32
    return %arg0, %c0_i32, %c0_i32_0 : i32, i32, i32
  }
  func.func @transform_1(%arg0: i32) -> (i32, i32) {
    %c0_i32 = arith.constant 0 : i32
    %c0_i32_0 = arith.constant 0 : i32
    return %arg0, %c0_i32 : i32, i32
  }
  func.func @transform_2(%arg0: i32) -> (i32, i32, i32) {
    %c0_i32 = arith.constant 0 : i32
    %c0_i32_0 = arith.constant 0 : i32
    %c0_i32_1 = arith.constant 0 : i32
    return %arg0, %c0_i32, %c0_i32_0 : i32, i32, i32
  }
  func.func @transform_3(%arg0: i32) -> (i32, i32) {
    %c0_i32 = arith.constant 0 : i32
    %c0_i32_0 = arith.constant 0 : i32
    %c0_i32_1 = arith.constant 0 : i32
    return %c0_i32, %c0_i32_0 : i32, i32
  }
  func.func @transform_4(%arg0: i32) -> (i32, i32) {
    %c0_i32 = arith.constant 0 : i32
    %c0_i32_0 = arith.constant 0 : i32
    %c0_i32_1 = arith.constant 0 : i32
    return %c0_i32, %c0_i32_0 : i32, i32
  }
  func.func @transform_5(%arg0: i32) -> (i32, i32) {
    %c0_i32 = arith.constant 0 : i32
    %c0_i32_0 = arith.constant 0 : i32
    %c0_i32_1 = arith.constant 0 : i32
    return %c0_i32, %c0_i32_0 : i32, i32
  }
  func.func @transform_6(%arg0: i32) -> (i32, i32) {
    %c0_i32 = arith.constant 0 : i32
    %c0_i32_0 = arith.constant 0 : i32
    %c0_i32_1 = arith.constant 0 : i32
    return %c0_i32, %c0_i32_0 : i32, i32
  }
  func.func @transform_7(%arg0: i32) -> (i32, i32) {
    %c0_i32 = arith.constant 0 : i32
    %c0_i32_0 = arith.constant 0 : i32
    %c0_i32_1 = arith.constant 0 : i32
    return %c0_i32, %c0_i32_0 : i32, i32
  }
  func.func @transform_8(%arg0: i32) -> (i32, i32) {
    %c0_i32 = arith.constant 0 : i32
    %c0_i32_0 = arith.constant 0 : i32
    %c0_i32_1 = arith.constant 0 : i32
    return %c0_i32, %c0_i32_0 : i32, i32
  }
  func.func @transform_9(%arg0: i32) -> (i32, i32) {
    %c0_i32 = arith.constant 0 : i32
    %c0_i32_0 = arith.constant 0 : i32
    %c0_i32_1 = arith.constant 0 : i32
    return %c0_i32, %c0_i32_0 : i32, i32
  }
  func.func @transform_10(%arg0: i32) -> (i32, i32) {
    %c0_i32 = arith.constant 0 : i32
    %c0_i32_0 = arith.constant 0 : i32
    %c0_i32_1 = arith.constant 0 : i32
    return %c0_i32, %c0_i32_0 : i32, i32
  }
  func.func @transform_11(%arg0: i32) -> (i32, i32) {
    %c0_i32 = arith.constant 0 : i32
    %c0_i32_0 = arith.constant 0 : i32
    %c0_i32_1 = arith.constant 0 : i32
    return %c0_i32, %c0_i32_0 : i32, i32
  }
  func.func @transform_12(%arg0: i32) -> (i32, i32) {
    %c0_i32 = arith.constant 0 : i32
    %c0_i32_0 = arith.constant 0 : i32
    %c0_i32_1 = arith.constant 0 : i32
    return %c0_i32, %c0_i32_0 : i32, i32
  }
  func.func @transform_13(%arg0: i32) -> (i32, i32) {
    %c0_i32 = arith.constant 0 : i32
    %c0_i32_0 = arith.constant 0 : i32
    %c0_i32_1 = arith.constant 0 : i32
    return %c0_i32, %c0_i32_0 : i32, i32
  }
  func.func @transform_14(%arg0: i32) -> (i32, i32) {
    %c0_i32 = arith.constant 0 : i32
    %c0_i32_0 = arith.constant 0 : i32
    %c0_i32_1 = arith.constant 0 : i32
    return %c0_i32, %c0_i32_0 : i32, i32
  }
  func.func @transform_15(%arg0: i32) -> (i32, i32) {
    %c0_i32 = arith.constant 0 : i32
    %c0_i32_0 = arith.constant 0 : i32
    %c0_i32_1 = arith.constant 0 : i32
    return %c0_i32, %c0_i32_0 : i32, i32
  }
  func.func @transform_16(%arg0: i32) -> (i32, i32) {
    %c0_i32 = arith.constant 0 : i32
    %c0_i32_0 = arith.constant 0 : i32
    return %arg0, %c0_i32 : i32, i32
  }
}

</mosaic_0001>

<bundles_post_ra>
// kernel: tpu_custom_call.1
= control target key start
LH: loop header
LB: loop body
LE: loop exit
PB: predicated region body
PF: predicated region fallthrough
CT: control target
= control target key end

     0   :  { %s7791_s0 = inlined_call_operand.hbm [shape: f32[16,8,64], index: 0, kind: input, shape index: {}]   ;;  %s7792_s1 = inlined_call_operand.hbm [shape: f32[16,32], index: 1, kind: input, shape index: {}]   ;;  %s7793_s2 = inlined_call_operand.hbm [shape: f32[16,8,192], index: 2, kind: input, shape index: {}]   ;;  %s7794_s3 = inlined_call_operand.hbm [shape: f32[192,3456], index: 3, kind: input, shape index: {}]   ;;  %s7795_s4 = inlined_call_operand.hbm [shape: f32[1,384], index: 4, kind: input, shape index: {}]   ;;  %s7796_s5 = inlined_call_operand.vmem [shape: f32[384,32], index: 5, kind: input, shape index: {}]   ;;  %s7797_s6 = inlined_call_operand.vmem [shape: f32[64,32], index: 6, kind: input, shape index: {}]   ;;  %s7798_s7 = inlined_call_operand.hbm [shape: f32[1,32], index: 7, kind: input, shape index: {}]   ;;  %s7799_s8 = inlined_call_operand.hbm [shape: f32[32,32], index: 8, kind: input, shape index: {}]   ;;  %s7800_s9 = inlined_call_operand.hbm [shape: f32[1,32], index: 9, kind: input, shape index: {}]   ;;  %s7801_s10 = inlined_call_operand.hbm [shape: f32[32,32], index: 10, kind: input, shape index: {}]   ;;  %s7802_s11 = inlined_call_operand.hbm [shape: f32[32,32], index: 11, kind: input, shape index: {}]   ;;  %s7803_s12 = inlined_call_operand.hbm [shape: f32[1,32], index: 12, kind: input, shape index: {}]   ;;  %s7804_s13 = inlined_call_operand.hbm [shape: f32[32,32], index: 13, kind: input, shape index: {}]   ;;  %s7805_s14 = inlined_call_operand.hbm [shape: f32[1,32], index: 14, kind: input, shape index: {}]   ;;  %s7806_s15 = inlined_call_operand.hbm [shape: f32[1,32], index: 15, kind: input, shape index: {}]   ;;  %s7807_s16 = inlined_call_operand.hbm [shape: f32[16,32], index: 16, kind: output, shape index: {}]  }
   0x1   :  { %7841 = sst [smem:[#allocation58_spill]] %s7791_s0 }
   0x2   :  { %7842 = sst [smem:[#allocation59_spill]] %s7792_s1 }
   0x3   :  { %7843 = sst [smem:[#allocation60_spill]] %s7794_s3 }
   0x4   :  { %7844 = sst [smem:[#allocation61_spill]] %s7795_s4 }
   0x5   :  { %7845 = sst [smem:[#allocation62_spill]] %s7796_s5 }
   0x6   :  { %7846 = sst [smem:[#allocation63_spill]] %s7797_s6 }
   0x7   :  { %7847 = sst [smem:[#allocation64_spill]] %s7798_s7 }
   0x8   :  { %7848 = sst [smem:[#allocation65_spill]] %s7800_s9 }
   0x9   :  { %7849 = sst [smem:[#allocation66_spill]] %s7802_s11 }
   0xa   :  { %7850 = sst [smem:[#allocation67_spill]] %s7804_s13 }
   0xb   :  { %7851 = sst [smem:[#allocation68_spill]] %s7807_s16 }
   0xc   :  { %21 = vsyncpa [#allocation3], 0 }
   0xd   :  { %23 = vsyncpa [#allocation3 + $0x1], 0 }
   0xe   :  { %24 = vsyncpa [#allocation6], 0 }
   0xf   :  { %26 = vsyncpa [#allocation6 + $0x1], 0 }
  0x10   :  { %27 = vsyncpa [#allocation9], 0 }
  0x11   :  { %28 = vsyncpa [#allocation12], 0 }
  0x12   :  { %29 = vsyncpa [#allocation15], 0 }
  0x13   :  { %30 = vsyncpa [#allocation18], 0 }
  0x14   :  { %31 = vsyncpa [#allocation21], 0 }
  0x15   :  { %32 = vsyncpa [#allocation24], 0 }
  0x16   :  { %33 = vsyncpa [#allocation4], 0 }
  0x17   :  { %35 = vsyncpa [#allocation4 + $0x1], 0  ;;  %s6133_s21 = smov 0   ;;  %s6135_s22 = smov 0  }
  0x18   :  { %s6137_s23 = smov 0   ;;  %s6139_s24 = smov 0  }
  0x19 LB: > { %7852 = sst [smem:[#allocation35_spill]] %s6010_s21  ;;  %s6024_s25 = smov [#allocation8]   ;;  %s6022_s24 = sphi %s6139_s24, %s7951_s24   ;;  %s6018_s23 = sphi %s6137_s23, %s7953_s23   ;;  %s6014_s22 = sphi %s6135_s22, %s7955_s22   ;;  %s6010_s21 = sphi %s6133_s21, %s7954_s21  }
  0x1a   : > { %7853 = sst [smem:[#allocation36_spill]] %s6018_s23  ;;  %s435_s26 = sshll.u32 %s6024_s25, 4  ;;  %s436_s26 = int_to_ptr.vmem [resolvable:$true] %s435_s26 }
  0x1b   : > { %s6154_s27 = sadd.s32 4294967295, %s6022_s24   ;;  %p4836_p0 = scmp.ge.s32.totalorder %s6022_s24, 1 }
  0x1c   : > { %p7821_p1 = scmp.eq.s32.totalorder %s6154_s27, 0  ;;  %p423_p2 = scmp.lt.s32.totalorder %s6022_s24, 3 }
  0x1d   : > { %s6025_s29 = smov [#allocation11]   ;;  %s6026_s17 = smov [#allocation14]  }
  0x1e   : > { %p6159_p3 = pnand %p4836_p0, %p423_p2  ;;  %s466_s30 = sshll.u32 %s6025_s29, 4  ;;  %s467_s30 = int_to_ptr.vmem [resolvable:$true] %s466_s30 }
  0x1f   : > { %s490_s18 = sshll.u32 %s6026_s17, 4  ;;  %s5571_s20 = scalar_lea.vmem %s436_s26, 82944  ;;  %s6172_s18 = int_to_ptr.vmem [resolvable:$true] %s490_s18 }
  0x20   : > { %s7854_s28 = scalar_select %p6159_p3, 1, 0 }
  0x21   : > { %p5371_p5 = pneg %p6159_p3  ;;  %p5572_p8 = scmp.ne.s32.totalorder %s436_s26, %s5571_s20 }
  0x22   : > { %7855 = sst [smem:[#allocation37_spill]] %s7854_s28  ;;  %p5579_p11 = scmp.lt.s32.totalorder %s436_s26, %s436_s26 }
  0x23   : > { %p6168_p6 = pnand %p5371_p5, %p7821_p1  ;;  %p5580_p12 = scmp.lt.s32.totalorder %s5571_s20, %s5571_s20 }
  0x25   : > { %s7856_s0 = scalar_select %p6168_p6, 1, 0 }
  0x26   : > { %p6176_p7 = pneg %p6168_p6  ;;  %p5581_p13 = por %p5580_p12, %p5579_p11 }
  0x28   : > { %s7857_s19 = scalar_select %p6176_p7, 1, 0 }
  0x29   : > { %p5574_p9 = pnand %p5572_p8, %p6176_p7 }
  0x2b   : > { %p5575_p10 = pneg %p5574_p9 }
  0x2d   : > { %p5582_p0 = pnand %p5581_p13, %p5575_p10 }
  0x2f   : > { %5585 = shalt.err (!%p5582_p0)
}
  0x30   : > { %s6027_s25 = smov 3456   ;;  %s6028_s29 = smov 216  }
  0x31   : > { %s7858_s3 = sld [smem:[#allocation60_spill]]  ;;  %s5597_s5 = scalar_lea.vmem %s467_s30, 16 }
  0x32   : > { %p5598_p2 = scmp.ne.s32.totalorder %s467_s30, %s5597_s5  ;;  %s5604_s6 = scalar_lea.vmem %s467_s30, 32 }
  0x33   : > { %p5605_p9 = scmp.lt.s32.totalorder %s467_s30, %s467_s30  ;;  %p5606_p4 = scmp.lt.s32.totalorder %s5604_s6, %s5597_s5 }
  0x34   : > { %p5600_p5 = pnand %p5598_p2, %p6176_p7 }
  0x35   : > { %p5607_p11 = por %p5606_p4, %p5605_p9 }
  0x36   : > { %p5601_p8 = pneg %p5600_p5 }
  0x37   : > { %5374 = dma.hbm_to_vmem [thread:$0]  (!%p6168_p6), %s7858_s3, 82944, %s436_s26, [#allocation9], %s6027_s25, %s6027_s25, %s6028_s29  }
  0x38   : > { %p5608_p10 = pnand %p5607_p11, %p5601_p8 }
  0x3a   : > { %5611 = shalt.err (!%p5608_p10)
}
  0x3b   : > { %s7859_s7 = sld [smem:[#allocation64_spill]]  ;;  %s5623_s16 = scalar_lea.vmem %s6172_s18, 16 }
  0x3c   : > { %p5624_p12 = scmp.ne.s32.totalorder %s6172_s18, %s5623_s16  ;;  %s5630_s5 = scalar_lea.vmem %s6172_s18, 32 }
  0x3d   : > { %p5631_p4 = scmp.lt.s32.totalorder %s6172_s18, %s6172_s18  ;;  %p5632_p2 = scmp.lt.s32.totalorder %s5630_s5, %s5623_s16 }
  0x3e   : > { %p5626_p13 = pnand %p5624_p12, %p6176_p7 }
  0x3f   : > { %p5633_p5 = por %p5632_p2, %p5631_p4 }
  0x40   : > { %p5627_p0 = pneg %p5626_p13 }
  0x41   : > { %5380 = dma.hbm_to_vmem [thread:$0]  (!%p6168_p6), %s7859_s7, 16, %s467_s30, [#allocation12]  }
  0x42   : > { %p5634_p8 = pnand %p5633_p5, %p5627_p0 }
  0x44   : > { %5637 = shalt.err (!%p5634_p8)
}
  0x45   : > { %s7860_s9 = sld [smem:[#allocation65_spill]]  ;;  %s6029_s28 = smov [#allocation17]  }
  0x46   : > { %s513_s30 = sshll.u32 %s6029_s28, 4  ;;  %s6030_s25 = smov [#allocation20]   ;;  %s514_s30 = int_to_ptr.vmem [resolvable:$true] %s513_s30 }
  0x47   : > { %s537_s29 = sshll.u32 %s6030_s25, 4  ;;  %s5649_s17 = scalar_lea.vmem %s514_s30, 512  ;;  %s538_s29 = int_to_ptr.vmem [resolvable:$true] %s537_s29 }
  0x48   : > { %p5650_p9 = scmp.ne.s32.totalorder %s514_s30, %s5649_s17  ;;  %p5657_p12 = scmp.lt.s32.totalorder %s514_s30, %s514_s30 }
  0x49   : > { %p5658_p13 = scmp.lt.s32.totalorder %s5649_s17, %s5649_s17 }
  0x4a   : > { %p5652_p11 = pnand %p5650_p9, %p6176_p7 }
  0x4b   : > { %5386 = dma.hbm_to_vmem [thread:$0]  (!%p6168_p6), %s7860_s9, 16, %s6172_s18, [#allocation15]  }
  0x4c   : > { %p5653_p10 = pneg %p5652_p11  ;;  %p5659_p0 = por %p5658_p13, %p5657_p12 }
  0x4e   : > { %p5660_p4 = pnand %p5659_p0, %p5653_p10 }
  0x50   : > { %5663 = shalt.err (!%p5660_p4)
}
  0x51   : > { %s7814_s20 = smov 128   ;;  %s7816_s16 = smov 8  }
  0x52   : > { %s7861_s11 = sld [smem:[#allocation66_spill]]  ;;  %s5675_s6 = scalar_lea.vmem %s538_s29, 512 }
  0x53   : > { %p5676_p2 = scmp.ne.s32.totalorder %s538_s29, %s5675_s6  ;;  %p5683_p9 = scmp.lt.s32.totalorder %s538_s29, %s538_s29 }
  0x54   : > { %p5684_p11 = scmp.lt.s32.totalorder %s5675_s6, %s5675_s6 }
  0x55   : > { %p5678_p5 = pnand %p5676_p2, %p6176_p7 }
  0x56   : > { %p5685_p10 = por %p5684_p11, %p5683_p9 }
  0x57   : > { %p5679_p8 = pneg %p5678_p5 }
  0x58   : > { %5392 = dma.hbm_to_vmem [thread:$0]  (!%p6168_p6), %s7861_s11, 512, %s514_s30, [#allocation18], %s7814_s20, %s7814_s20, %s7816_s16  }
  0x59   : > { %p5686_p12 = pnand %p5685_p10, %p5679_p8 }
  0x5b   : > { %5689 = shalt.err (!%p5686_p12)
}
  0x5c   : > { %s7862_s13 = sld [smem:[#allocation67_spill]]  ;;  %s4835_s30 = sadd.s32 4294967294, %s6022_s24  }
  0x5d   : > { %s6229_s25 = sadd.s32 1, %s6022_s24   ;;  %s48_s17 = sadd.s32 1, %s6018_s23 }
  0x5e   : > { %7863 = sst [smem:[#allocation38_spill]] %s6229_s25  ;;  %s45_s18 = ssub.s32 %s6022_s24, %s6229_s25 }
  0x5f   : > { %p55_p13 = scmp.ne.s32.totalorder %s6018_s23, %s6014_s22  ;;  %p46_p0 = scmp.eq.s32.totalorder %s45_s18, 0 }
  0x60   : > { %p56_p4 = scmp.eq.s32.totalorder %s6022_s24, 0  ;;  %p61_p2 = scmp.ne.s32.totalorder %s6014_s22, %s6010_s21 }
  0x61   : > { %p410_p5 = scmp.eq.s32.totalorder %s6154_s27, 1  ;;  %p416_p10 = scmp.eq.s32.totalorder %s4835_s30, 1 }
  0x62   : > { %5398 = dma.hbm_to_vmem [thread:$0]  (!%p6168_p6), %s7862_s13, 512, %s538_s29, [#allocation21], %s7814_s20, %s7814_s20, %s7816_s16  }
  0x63   : > { %s6241_s5 = scalar_select %p46_p0, %s6018_s23, %s48_s17  }
  0x64   : > { %p57_p8 = por %p56_p4, %p55_p13  ;;  %p6245_p9 = por %p7821_p1, %p61_p2 }
  0x65   : > { %7864 = sst [smem:[#allocation39_spill]] %s6241_s5  ;;  %p6249_p11 = por %p410_p5, %p55_p13 }
  0x66   : > { %s7865_s29 = scalar_select %p6245_p9, 1, 0 }
  0x67   : > { %s7866_s6 = scalar_select %p6249_p11, 1, 0 }
  0x68   : > { %p5430_p12 = scmp.lt.s32.totalorder %s6022_s24, 2  ;;  %s6255_s26 = sand.u32 1, %s6018_s23  }
  0x69   : > { %p6257_p3 = por %p416_p10, %p61_p2  ;;  %s594_s17 = sand.u32 1, %s6022_s24  }
  0x6a   : > { %p6262_p0 = pnand %p5430_p12, %p57_p8  ;;  %s4852_s20 = sshll.u32 %s6255_s26, 3 }
  0x6b   : > { %s7867_s28 = scalar_select %p6257_p3, 1, 0 }
  0x6c   : > { %s7869_s18 = scalar_select %p6262_p0, 1, 0 }
  0x6d   : > { %7868 = sst [smem:[#allocation40_spill]] %s7867_s28  ;;  %s4853_s16 = sshll.u32 %s6022_s24, 7 }
  0x6e   : > { %s7870_s1 = sld [smem:[#allocation59_spill]]  ;;  %s598_s9 = scalar_lea.vmem [#allocation5], %s4852_s20 }
  0x6f   : > { %s605_s11 = sshll.u32 %s598_s9, 4  ;;  %s6274_s5 = scalar_lea.sflag [#allocation6], %s594_s17  ;;  %s606_s11 = int_to_ptr.vmem [resolvable:$true] %s605_s11 }
  0x70   : > { %p6280_p4 = pneg %p6262_p0 }
  0x72   : > { %s7871_s25 = scalar_select %p6280_p4, 1, 0 }
  0x74   : > { %s6271_s30 = scalar_lea.hbm %s7870_s1, %s4853_s16  ;;  %s5695_s20 = scalar_lea.hbm %s7870_s1, 256 }
  0x75   : > { %s5690_s23 = scalar_lea.hbm %s6271_s30, 128  ;;  %p5696_p8 = scmp.lt.s32.totalorder %s6271_s30, %s7870_s1 }
  0x76   : > { %p5691_p13 = scmp.ne.s32.totalorder %s6271_s30, %s5690_s23  ;;  %p5697_p10 = scmp.lt.s32.totalorder %s5695_s20, %s5690_s23 }
  0x78   : > { %p5693_p2 = pnand %p6280_p4, %p5691_p13  ;;  %p5698_p12 = por %p5697_p10, %p5696_p8 }
  0x7a   : > { %p5694_p5 = pneg %p5693_p2 }
  0x7c   : > { %p5699_p1 = pnand %p5698_p12, %p5694_p5 }
  0x7e   : > { %5702 = shalt.err (!%p5699_p1)
}
  0x7f   : > { %s5703_s17 = scalar_lea.vmem %s606_s11, 128  ;;  %s6033_s13 = smov [#allocation5]  }
  0x80   : > { %p5704_p3 = scmp.ne.s32.totalorder %s606_s11, %s5703_s17  ;;  %s5708_s28 = sshll.u32 %s6033_s13, 4  ;;  %s5709_s28 = int_to_ptr.vmem [resolvable:$false] %s5708_s28 }
  0x81   : > { %s5710_s21 = scalar_lea.vmem %s5709_s28, 256  ;;  %p5711_p13 = scmp.lt.s32.totalorder %s606_s11, %s5709_s28 }
  0x82   : > { %p5706_p11 = pnand %p5704_p3, %p6280_p4  ;;  %p5712_p2 = scmp.lt.s32.totalorder %s5710_s21, %s5703_s17 }
  0x84   : > { %p5707_p9 = pneg %p5706_p11  ;;  %p5713_p6 = por %p5712_p2, %p5711_p13 }
  0x86   : > { %p5714_p7 = pnand %p5713_p6, %p5707_p9 }
  0x88   : > { %5717 = shalt.err (!%p5714_p7)
}
  0x89   : > { %5411 = dma.hbm_to_vmem [thread:$0]  (!%p6262_p0), %s6271_s30, 128, %s606_s11, %s6274_s5  }
  0x8a   : > { %s6034_s23 = smov [#allocation10]   ;;  %s6035_s7 = smov [#allocation13]  }
  0x8b   : > { %s449_s3 = sshll.u32 %s6034_s23, 4  ;;  %s476_s20 = sshll.u32 %s6035_s7, 4  ;;  %s450_s3 = int_to_ptr.vmem [resolvable:$true] %s449_s3  ;;  %s477_s20 = int_to_ptr.vmem [resolvable:$true] %s476_s20 }
  0x8c   : > { %s5729_s13 = scalar_lea.vmem %s450_s3, 48  ;;  %p7872_p3 = scmp.ne.s32.totalorder %s7857_s19, 0 }
  0x8d   : > { %p5730_p1 = scmp.ne.s32.totalorder %s450_s3, %s5729_s13  ;;  %s5736_s21 = scalar_lea.vmem %s450_s3, 64 }
  0x8e   : > { %p5737_p6 = scmp.lt.s32.totalorder %s450_s3, %s450_s3  ;;  %p5738_p7 = scmp.lt.s32.totalorder %s5736_s21, %s5729_s13 }
  0x8f   : > { %p5732_p11 = pnand %p5730_p1, %p7872_p3 }
  0x90   : > { %p5739_p9 = por %p5738_p7, %p5737_p6 }
  0x91   : > { %p5733_p5 = pneg %p5732_p11 }
  0x93   : > { %p5740_p8 = pnand %p5739_p9, %p5733_p5 }
  0x95   : > { %5743 = shalt.err (!%p5740_p8)
}
  0x96   : > { %p7873_p10 = scmp.ne.s32.totalorder %s7856_s0, 0  ;;  %s7874_s4 = sld [smem:[#allocation61_spill]] }
  0x97   : > { %s5755_s30 = scalar_lea.vmem %s477_s20, 512  ;;  %p5763_p1 = scmp.lt.s32.totalorder %s477_s20, %s477_s20 }
  0x98   : > { %p5756_p12 = scmp.ne.s32.totalorder %s477_s20, %s5755_s30  ;;  %p5764_p11 = scmp.lt.s32.totalorder %s5755_s30, %s5755_s30 }
  0x9a   : > { %p5758_p13 = pnand %p5756_p12, %p7872_p3  ;;  %p5765_p0 = por %p5764_p11, %p5763_p1 }
  0x9c   : > { %5377 = dma.hbm_to_vmem [thread:$0]  (!%p7873_p10), %s7874_s4, 48, %s450_s3, [#allocation9]  }
  0x9d   : > { %p5759_p2 = pneg %p5758_p13 }
  0x9f   : > { %p5766_p4 = pnand %p5765_p0, %p5759_p2 }
  0xa1   : > { %5769 = shalt.err (!%p5766_p4)
}
  0xa2   : > { %s7875_s9 = smov 8   ;;  %s7876_s16 = smov 128  }
  0xa3   : > { %5383 = dma.hbm_to_vmem [thread:$0]  (!%p7873_p10), %s7799_s8, 512, %s477_s20, [#allocation12], %s7876_s16, %s7876_s16, %s7875_s9  }
  0xa4   : > { %s6036_s3 = smov [#allocation16]   ;;  %s6037_s13 = smov [#allocation19]  }
  0xa5   : > { %s500_s7 = sshll.u32 %s6036_s3, 4  ;;  %s527_s21 = sshll.u32 %s6037_s13, 4  ;;  %s501_s7 = int_to_ptr.vmem [resolvable:$true] %s500_s7  ;;  %s528_s21 = int_to_ptr.vmem [resolvable:$true] %s527_s21 }
  0xa6   : > { %s5781_s11 = scalar_lea.vmem %s501_s7, 512  ;;  %p5789_p6 = scmp.lt.s32.totalorder %s501_s7, %s501_s7 }
  0xa7   : > { %p5782_p5 = scmp.ne.s32.totalorder %s501_s7, %s5781_s11  ;;  %p5790_p7 = scmp.lt.s32.totalorder %s5781_s11, %s5781_s11 }
  0xa9   : > { %p5784_p0 = pnand %p5782_p5, %p7872_p3  ;;  %p5791_p9 = por %p5790_p7, %p5789_p6 }
  0xab   : > { %p5785_p4 = pneg %p5784_p0 }
  0xad   : > { %p5792_p8 = pnand %p5791_p9, %p5785_p4 }
  0xaf   : > { %5795 = shalt.err (!%p5792_p8)
}
  0xb0   : > { %5389 = dma.hbm_to_vmem [thread:$0]  (!%p7873_p10), %s7801_s10, 512, %s501_s7, [#allocation15], %s7876_s16, %s7876_s16, %s7875_s9  }
  0xb1   : > { %s5807_s30 = scalar_lea.vmem %s528_s21, 16  ;;  %s5814_s17 = scalar_lea.vmem %s528_s21, 32 }
  0xb2   : > { %p5808_p12 = scmp.ne.s32.totalorder %s528_s21, %s5807_s30  ;;  %p5815_p1 = scmp.lt.s32.totalorder %s528_s21, %s528_s21 }
  0xb3   : > { %p5816_p11 = scmp.lt.s32.totalorder %s5814_s17, %s5807_s30 }
  0xb4   : > { %p5810_p13 = pnand %p5808_p12, %p7872_p3 }
  0xb5   : > { %p5817_p5 = por %p5816_p11, %p5815_p1 }
  0xb6   : > { %p5811_p2 = pneg %p5810_p13 }
  0xb8   : > { %p5818_p0 = pnand %p5817_p5, %p5811_p2 }
  0xba   : > { %5821 = shalt.err (!%p5818_p0)
}
  0xbb   : > { %5395 = dma.hbm_to_vmem [thread:$0]  (!%p7873_p10), %s7803_s12, 16, %s528_s21, [#allocation18]  }
  0xbc   : > { %s6038_s13 = smov [#allocation22]   ;;  %s6039_s11 = smov [#allocation23]  }
  0xbd   : > { %s551_s7 = sshll.u32 %s6038_s13, 4  ;;  %s562_s20 = sshll.u32 %s6039_s11, 4  ;;  %s552_s7 = int_to_ptr.vmem [resolvable:$true] %s551_s7  ;;  %s563_s20 = int_to_ptr.vmem [resolvable:$true] %s562_s20 }
  0xbe   : > { %s5833_s28 = scalar_lea.vmem %s552_s7, 16  ;;  %s5840_s30 = scalar_lea.vmem %s552_s7, 32 }
  0xbf   : > { %p5834_p4 = scmp.ne.s32.totalorder %s552_s7, %s5833_s28  ;;  %p5841_p9 = scmp.lt.s32.totalorder %s552_s7, %s552_s7 }
  0xc0   : > { %p5842_p8 = scmp.lt.s32.totalorder %s5840_s30, %s5833_s28 }
  0xc1   : > { %p5836_p6 = pnand %p5834_p4, %p7872_p3 }
  0xc2   : > { %p5843_p12 = por %p5842_p8, %p5841_p9 }
  0xc3   : > { %p5837_p7 = pneg %p5836_p6 }
  0xc5   : > { %p5844_p13 = pnand %p5843_p12, %p5837_p7 }
  0xc7   : > { %5847 = shalt.err (!%p5844_p13)
}
  0xc8   : > { %5401 = dma.hbm_to_vmem [thread:$0]  (!%p7873_p10), %s7805_s14, 16, %s552_s7, [#allocation21]  }
  0xc9   : > { %s5859_s23 = scalar_lea.vmem %s563_s20, 16  ;;  %s5866_s3 = scalar_lea.vmem %s563_s20, 32 }
  0xca   : > { %p5860_p2 = scmp.ne.s32.totalorder %s563_s20, %s5859_s23  ;;  %p5867_p5 = scmp.lt.s32.totalorder %s563_s20, %s563_s20 }
  0xcb   : > { %p5868_p0 = scmp.lt.s32.totalorder %s5866_s3, %s5859_s23 }
  0xcc   : > { %p5862_p1 = pnand %p5860_p2, %p7872_p3 }
  0xcd   : > { %p5869_p4 = por %p5868_p0, %p5867_p5 }
  0xce   : > { %p5863_p11 = pneg %p5862_p1 }
  0xd0   : > { %p5870_p6 = pnand %p5869_p4, %p5863_p11 }
  0xd2   : > { %5873 = shalt.err (!%p5870_p6)
}
  0xd3   : > { %5404 = dma.hbm_to_vmem [thread:$0]  (!%p7873_p10), %s7806_s15, 16, %s563_s20, [#allocation24]  }
  0xd4   : > { %s4849_s7 = sshll.u32 %s6255_s26, 6  ;;  %s5028_s19 = sshll.u32 %s6022_s24, 10 }
  0xd5   : > { %s7877_s21 = sld [smem:[#allocation58_spill]]  ;;  %s577_s23 = scalar_lea.vmem [#allocation2], %s4849_s7 }
  0xd6   : > { %s584_s0 = sshll.u32 %s577_s23, 4  ;;  %s574_s3 = scalar_lea.sflag [#allocation3], %s6255_s26  ;;  %s6354_s0 = int_to_ptr.vmem [resolvable:$true] %s584_s0 }
  0xd7   : > { %p7879_p7 = scmp.ne.s32.totalorder %s7871_s25, 0 }
  0xdb   : > { %s7878_s17 = smov %s7877_s21  ;;  %s6352_s1 = scalar_lea.hbm %s7877_s21, %s5028_s19 }
  0xdc   : > { %s5874_s13 = scalar_lea.hbm %s6352_s1, 1024  ;;  %s5879_s4 = scalar_lea.hbm %s7878_s17, 2048 }
  0xdd   : > { %p5875_p3 = scmp.ne.s32.totalorder %s6352_s1, %s5874_s13  ;;  %p5880_p8 = scmp.lt.s32.totalorder %s6352_s1, %s7878_s17 }
  0xde   : > { %p5881_p12 = scmp.lt.s32.totalorder %s5879_s4, %s5874_s13 }
  0xdf   : > { %p5877_p9 = pnand %p5875_p3, %p7879_p7 }
  0xe0   : > { %p5882_p13 = por %p5881_p12, %p5880_p8 }
  0xe1   : > { %p5878_p10 = pneg %p5877_p9 }
  0xe3   : > { %p5883_p2 = pnand %p5882_p13, %p5878_p10 }
  0xe5   : > { %5886 = shalt.err (!%p5883_p2)
}
  0xe6   : > { %s5887_s7 = scalar_lea.vmem %s6354_s0, 1024  ;;  %s6040_s30 = smov [#allocation2]  }
  0xe7   : > { %p5888_p1 = scmp.ne.s32.totalorder %s6354_s0, %s5887_s7  ;;  %s5892_s21 = sshll.u32 %s6040_s30, 4  ;;  %s5893_s21 = int_to_ptr.vmem [resolvable:$false] %s5892_s21 }
  0xe8   : > { %s5894_s23 = scalar_lea.vmem %s5893_s21, 2048  ;;  %p5895_p0 = scmp.lt.s32.totalorder %s6354_s0, %s5893_s21 }
  0xe9   : > { %p5890_p11 = pnand %p5888_p1, %p7879_p7  ;;  %p5896_p4 = scmp.lt.s32.totalorder %s5894_s23, %s5887_s7 }
  0xeb   : > { %p5891_p5 = pneg %p5890_p11  ;;  %p5897_p6 = por %p5896_p4, %p5895_p0 }
  0xed   : > { %p5898_p3 = pnand %p5897_p6, %p5891_p5 }
  0xef   : > { %5901 = shalt.err (!%p5898_p3)
}
  0xf0   : > { %p7880_p9 = scmp.ne.s32.totalorder %s7869_s18, 0  ;;  %s5030_s4 = sshll.u32 %s6022_s24, 11 }
  0xf1   : > { %s7881_s13 = sshll.u32 %s6255_s26, 7  ;;  %s6386_s7 = scalar_lea.hbm %s7793_s2, %s5030_s4 }
  0xf2   : > { %5408 = dma.hbm_to_vmem [thread:$0]  (!%p7880_p9), %s6352_s1, 1024, %s6354_s0, %s574_s3, %s7876_s16, %s7876_s16, %s7875_s9  }
  0xf3   : > { %s616_s20 = scalar_lea.vmem [#allocation7], %s7881_s13  ;;  %s5902_s30 = scalar_lea.hbm %s6386_s7, 2048 }
  0xf4   : > { %s624_s11 = sshll.u32 %s616_s20, 4  ;;  %p5903_p10 = scmp.ne.s32.totalorder %s6386_s7, %s5902_s30  ;;  %s6388_s11 = int_to_ptr.vmem [resolvable:$true] %s624_s11 }
  0xf5   : > { %s5907_s26 = scalar_lea.hbm %s7793_s2, 4096  ;;  %p5908_p13 = scmp.lt.s32.totalorder %s6386_s7, %s7793_s2 }
  0xf6   : > { %p5905_p8 = pnand %p5903_p10, %p7879_p7  ;;  %p5909_p2 = scmp.lt.s32.totalorder %s5907_s26, %s5902_s30 }
  0xf8   : > { %p5906_p12 = pneg %p5905_p8  ;;  %p5910_p1 = por %p5909_p2, %p5908_p13 }
  0xfa   : > { %p5911_p11 = pnand %p5910_p1, %p5906_p12 }
  0xfc   : > { %5914 = shalt.err (!%p5911_p11)
}
  0xfd   : > { %s5915_s3 = scalar_lea.vmem %s6388_s11, 2048  ;;  %s6041_s21 = smov [#allocation7]  }
  0xfe   : > { %p5916_p5 = scmp.ne.s32.totalorder %s6388_s11, %s5915_s3  ;;  %s5920_s23 = sshll.u32 %s6041_s21, 4  ;;  %s5921_s23 = int_to_ptr.vmem [resolvable:$false] %s5920_s23 }
  0xff   : > { %s5922_s4 = scalar_lea.vmem %s5921_s23, 4096  ;;  %p5923_p6 = scmp.lt.s32.totalorder %s6388_s11, %s5921_s23 }
 0x100   : > { %p5918_p0 = pnand %p5916_p5, %p7879_p7  ;;  %p5924_p3 = scmp.lt.s32.totalorder %s5922_s4, %s5915_s3 }
 0x102   : > { %p5919_p4 = pneg %p5918_p0  ;;  %p5925_p10 = por %p5924_p3, %p5923_p6 }
 0x104   : > { %p5926_p8 = pnand %p5925_p10, %p5919_p4 }
 0x106   : > { %5929 = shalt.err (!%p5926_p8)
}
 0x107   : > { %s6042_s13 = smov 256   ;;  %s6043_s20 = smov 16  }
 0x108   : > { %5414 = dma.hbm_to_vmem [thread:$0]  (!%p7880_p9), %s6386_s7, 2048, %s6388_s11, %s6274_s5, %s6042_s13, %s6042_s13, %s6043_s20  }
 0x109   : > { %s7882_s25 = sld [smem:[#allocation37_spill]] }
 0x10f   : > { %p7883_p7 = scmp.ne.s32.totalorder %s7882_s25, 0 }
 0x111   : > { %636 = sbr.rel (%p7883_p7) target bundleno = 2024 (0x7e8), region = 84 }
 0x116   : > { %s6414_s28 = sand.u32 1, %s6014_s22   ;;  %p7884_p12 = scmp.ne.s32.totalorder %s7865_s29, 0 }
 0x117   : > { %s4859_s19 = sshll.u32 %s6414_s28, 6  ;;  %s639_s30 = scalar_lea.sflag [#allocation3], %s6414_s28 }
 0x118   : > { %s6418_s1 = scalar_lea.vmem [#allocation2], %s4859_s19 }
 0x119   : > { %5973 = dma.done.wait (%p7884_p12), %s639_s30, 1024  }
 0x11a   : > { %5975 = vsyncadd (%p7884_p12), %s639_s30, 4294966272  ;;  %s647_s5 = sand.u32 1, %s6154_s27   ;;  %s4860_s18 = sshll.u32 %s6414_s28, 3 }
 0x11b   : > { %s648_s11 = scalar_lea.sflag [#allocation6], %s647_s5  ;;  %s6428_s7 = scalar_lea.vmem [#allocation5], %s4860_s18 }
 0x11c   : > { %5977 = dma.done.wait (%p7884_p12), %s648_s11, 2176  }
 0x11d   : > { %5979 = vsyncadd (%p7884_p12), %s648_s11, 4294965120  ;;  %s4861_s9 = sshll.u32 %s6414_s28, 7  ;;  %p7885_p9 = scmp.eq.s32.totalorder %s6154_s27, 0 }
 0x11e   : > { %s6435_s26 = scalar_lea.vmem [#allocation7], %s4861_s9 }
 0x11f   : > { %5981 = dma.done.wait (%p7885_p9), [#allocation9], 82992   ;;  %p7886_p13 = pmov %p7885_p9 }
 0x120   : > { %p7887_p2 = pmov %p7885_p9 }
 0x121   : > { %5983 = vsyncadd (%p7886_p13), [#allocation9], 4294884304 }
 0x122   : > { %5985 = dma.done.wait (%p7887_p2), [#allocation12], 528   ;;  %p7888_p1 = pmov %p7887_p2 }
 0x124   : > { %5987 = vsyncadd (%p7888_p1), [#allocation12], 4294966768  ;;  %p7889_p11 = pmov %p7888_p1 }
 0x125   : > { %p7890_p5 = pmov %p7888_p1 }
 0x126   : > { %5989 = dma.done.wait (%p7889_p11), [#allocation15], 528  }
 0x127   : > { %5991 = vsyncadd (%p7890_p5), [#allocation15], 4294966768  ;;  %p7891_p0 = pmov %p7888_p1 }
 0x129   : > { %5993 = dma.done.wait (%p7891_p0), [#allocation18], 528   ;;  %p7892_p4 = pmov %p7891_p0 }
 0x12a   : > { %p7893_p6 = pmov %p7891_p0 }
 0x12b   : > { %5995 = vsyncadd (%p7892_p4), [#allocation18], 4294966768 }
 0x12c   : > { %5997 = dma.done.wait (%p7893_p6), [#allocation21], 528   ;;  %p7894_p3 = pmov %p7891_p0 }
 0x12d   : > { %p7895_p10 = pmov %p7891_p0 }
 0x12e   : > { %5999 = vsyncadd (%p7894_p3), [#allocation21], 4294966768 }
 0x12f   : > { %6001 = dma.done.wait (%p7895_p10), [#allocation24], 16   ;;  %p7896_p8 = pmov %p7891_p0 }
 0x130   : > { %s7897_s0 = sld [smem:[#allocation63_spill]]  ;;  %v1341_v1 = vld [vmem:[#allocation8 + $0xcb0] sm:$0xff]  ;;  %v1340_v2 = vld [vmem:[#allocation8 + $0xca8] sm:$0xff]  ;;  %v1314_v4 = vld [vmem:[#allocation8 + $0xbd8] sm:$0xff]  ;;  %vm805_vm0 = vcmask 523264   ;;  %vm6045_vm1 = vmmov 0  }
 0x131   : > { %6003 = vsyncadd (%p7896_p8), [#allocation24], 4294967280  ;;  %1607 = vmatprep.subr.mxu1 %v1341_v1  ;;  %v1313_v5 = vld [vmem:[#allocation8 + $0xbd0] sm:$0xff]  ;;  %v1287_v7 = vld [vmem:[#allocation8 + $0xb00] sm:$0xff]  ;;  %s7908_s21 = sld [smem:[#allocation62_spill]]  ;;  %vm3723_vm2 = vcmask 261120  }
 0x132   : > { %1608 = vmatpush1.msra.mxu1 %v1340_v2  ;;  %v1286_v8 = vld [vmem:[#allocation8 + $0xaf8] sm:$0xff]  ;;  %v1260_v10 = vld [vmem:[#allocation8 + $0xa28] sm:$0xff]  ;;  %v1259_v11 = vld [vmem:[#allocation8 + $0xa20] sm:$0xff]  ;;  %vm4587_vm3 = vcmask 1041409   ;;  %vm4589_vm4 = vcmask 1042434   ;;  %vm4591_vm5 = vcmask 1043459  }
 0x133   : > { %1609 = vmatprep.subr.mxu1 %v1314_v4  ;;  %v1233_v13 = vld [vmem:[#allocation8 + $0x950] sm:$0xff]  ;;  %v1232_v14 = vld [vmem:[#allocation8 + $0x948] sm:$0xff]  ;;  %v1206_v16 = vld [vmem:[#allocation8 + $0x878] sm:$0xff]  ;;  %vm4593_vm6 = vcmask 1044484   ;;  %vm4595_vm7 = vcmask 1045509   ;;  %vm4597_vm8 = vcmask 1046534  }
 0x134   : > { %1610 = vmatpush1.msra.mxu1 %v1313_v5  ;;  %v1205_v17 = vld [vmem:[#allocation8 + $0x870] sm:$0xff]  ;;  %v1179_v19 = vld [vmem:[#allocation8 + $0x7a0] sm:$0xff]  ;;  %v1178_v20 = vld [vmem:[#allocation8 + $0x798] sm:$0xff]  ;;  %s762_s30 = scalar_lea.vmem [#allocation25], %s4860_s18  ;;  %vm4599_vm9 = vcmask 1047559   ;;  %s7945_s9 = sld [smem:[#allocation68_spill]] }
 0x135   : > { %1611 = vmatprep.subr.mxu1 %v1287_v7  ;;  %v1152_v22 = vld [vmem:[#allocation8 + $0x6c8] sm:$0xff]  ;;  %v765_v23 = vld [vmem:[%s6418_s1] sm:$0xff]  ;;  %v1151_v24 = vld [vmem:[#allocation8 + $0x6c0] sm:$0xff]  ;;  %s4604_s16 = scalar_lea.sflag [#allocation4], %s6414_s28  ;;  %p7946_p12 = scmp.ne.s32.totalorder %s7866_s6, 0 }
 0x136   : > { %v797_v0 = vld [vmem:[%s7897_s0 + $0x38] sm:$0xff]  ;;  %v796_v3 = vld [vmem:[%s7897_s0 + $0x30] sm:$0xff]  ;;  %v795_v6 = vld [vmem:[%s7897_s0 + $0x28] sm:$0xff]  ;;  %1612 = vmatpush1.msra.mxu1 %v1286_v8  ;;  %5184 = vmatprep.mubr.msk.f32.mxu0 %vm805_vm0, %v765_v23 }
 0x137   : > { %5168 = vmatprep.subr.mxu0 %v797_v0  ;;  %v794_v9 = vld [vmem:[%s7897_s0 + $0x20] sm:$0xff]  ;;  %v793_v12 = vld [vmem:[%s7897_s0 + $0x18] sm:$0xff]  ;;  %1613 = vmatprep.subr.mxu1 %v1260_v10  ;;  %v792_v15 = vld [vmem:[%s7897_s0 + $0x10] sm:$0xff]  ;;  %s7909_s4 = smov %s7908_s21 }
 0x138   : > { %5169 = vmatpush3.msra.mxu0 %v797_v0  ;;  %1614 = vmatpush1.msra.mxu1 %v1259_v11  ;;  %v791_v18 = vld [vmem:[%s7897_s0 + $0x8] sm:$0xff]  ;;  %v790_v21 = vld [vmem:[%s7897_s0] sm:$0xff]  ;;  %v1343_v27 = vld [vmem:[#allocation8 + $0xcc0] sm:$0xff] }
 0x139   : > { %5170 = vmatprep.subr.mxu0 %v796_v3  ;;  %1615 = vmatprep.subr.mxu1 %v1233_v13  ;;  %v766_v25 = vld [vmem:[%s6418_s1 + $0x8] sm:$0xff]  ;;  %v1125_v26 = vld [vmem:[#allocation8 + $0x5f0] sm:$0xff]  ;;  %v1124_v28 = vld [vmem:[#allocation8 + $0x5e8] sm:$0xff] }
 0x13a   : > { %5171 = vmatpush3.msra.mxu0 %v796_v3  ;;  %1616 = vmatpush1.msra.mxu1 %v1232_v14  ;;  %v1342_v29 = vld [vmem:[#allocation8 + $0xcb8] sm:$0xff]  ;;  %v1316_v31 = vld [vmem:[#allocation8 + $0xbe8] sm:$0xff]  ;;  %v1097_v32 = vld [vmem:[#allocation8 + $0x510] sm:$0xff] }
 0x13b   : > { %5172 = vmatprep.subr.mxu0 %v795_v6  ;;  %1617 = vmatprep.subr.mxu1 %v1206_v16  ;;  %v1098_v30 = vld [vmem:[#allocation8 + $0x518] sm:$0xff]  ;;  %v1315_v33 = vld [vmem:[#allocation8 + $0xbe0] sm:$0xff]  ;;  %v1289_v35 = vld [vmem:[#allocation8 + $0xb10] sm:$0xff] }
 0x13c   : > { %5173 = vmatpush3.msra.mxu0 %v795_v6  ;;  %1618 = vmatpush1.msra.mxu1 %v1205_v17  ;;  %v1071_v34 = vld [vmem:[#allocation8 + $0x440] sm:$0xff]  ;;  %v1070_v36 = vld [vmem:[#allocation8 + $0x438] sm:$0xff]  ;;  %v1288_v37 = vld [vmem:[#allocation8 + $0xb08] sm:$0xff] }
 0x13d   : > { %5174 = vmatprep.subr.mxu0 %v794_v9  ;;  %1619 = vmatprep.subr.mxu1 %v1179_v19  ;;  %v1044_v38 = vld [vmem:[#allocation8 + $0x368] sm:$0xff]  ;;  %v1262_v39 = vld [vmem:[#allocation8 + $0xa38] sm:$0xff]  ;;  %v1043_v40 = vld [vmem:[#allocation8 + $0x360] sm:$0xff] }
 0x13e   : > { %5175 = vmatpush3.msra.mxu0 %v794_v9  ;;  %1620 = vmatpush1.msra.mxu1 %v1178_v20  ;;  %v1261_v41 = vld [vmem:[#allocation8 + $0xa30] sm:$0xff]  ;;  %v1235_v43 = vld [vmem:[#allocation8 + $0x960] sm:$0xff]  ;;  %v1016_v44 = vld [vmem:[#allocation8 + $0x288] sm:$0xff] }
 0x13f   : > { %5176 = vmatprep.subr.mxu0 %v793_v12  ;;  %1621 = vmatprep.subr.mxu1 %v1152_v22  ;;  %v1017_v42 = vld [vmem:[#allocation8 + $0x290] sm:$0xff]  ;;  %v1234_v45 = vld [vmem:[#allocation8 + $0x958] sm:$0xff]  ;;  %v1208_v47 = vld [vmem:[#allocation8 + $0x888] sm:$0xff] }
 0x140   : > { %5177 = vmatpush3.msra.mxu0 %v793_v12  ;;  %1622 = vmatpush1.msra.mxu1 %v1151_v24  ;;  %v990_v46 = vld [vmem:[#allocation8 + $0x1b8] sm:$0xff]  ;;  %v989_v48 = vld [vmem:[#allocation8 + $0x1b0] sm:$0xff]  ;;  %v1207_v49 = vld [vmem:[#allocation8 + $0x880] sm:$0xff] }
 0x141   : > { %5178 = vmatprep.subr.mxu0 %v792_v15  ;;  %1623 = vmatprep.subr.mxu1 %v1125_v26  ;;  %v963_v50 = vld [vmem:[#allocation8 + $0xe0] sm:$0xff]  ;;  %v1181_v51 = vld [vmem:[#allocation8 + $0x7b0] sm:$0xff]  ;;  %v962_v52 = vld [vmem:[#allocation8 + $0xd8] sm:$0xff] }
 0x142   : > { %5179 = vmatpush3.msra.mxu0 %v792_v15  ;;  %1624 = vmatpush1.msra.mxu1 %v1124_v28  ;;  %v1180_v53 = vld [vmem:[#allocation8 + $0x7a8] sm:$0xff]  ;;  %v1154_v55 = vld [vmem:[#allocation8 + $0x6d8] sm:$0xff]  ;;  %v935_v56 = vld [vmem:[#allocation8] sm:$0xff] }
 0x143   : > { %5180 = vmatprep.subr.mxu0 %v791_v18  ;;  %1625 = vmatprep.subr.mxu1 %v1098_v30  ;;  %v936_v54 = vld [vmem:[#allocation8 + $0x8] sm:$0xff]  ;;  %v1153_v57 = vld [vmem:[#allocation8 + $0x6d0] sm:$0xff]  ;;  %v1127_v59 = vld [vmem:[#allocation8 + $0x600] sm:$0xff] }
 0x144   : > { %5181 = vmatpush3.msra.mxu0 %v791_v18  ;;  %1626 = vmatpush1.msra.mxu1 %v1097_v32  ;;  %v1557_v58 = vld [vmem:[#allocation8 + $0x1370] sm:$0xff]  ;;  %v1556_v60 = vld [vmem:[#allocation8 + $0x1368] sm:$0xff]  ;;  %v1126_v61 = vld [vmem:[#allocation8 + $0x5f8] sm:$0xff] }
 0x145   : > { %5182 = vmatprep.subr.mxu0 %v790_v21  ;;  %1627 = vmatprep.subr.mxu1 %v1071_v34  ;;  %v1530_v62 = vld [vmem:[#allocation8 + $0x1298] sm:$0xff]  ;;  %v1100_v63 = vld [vmem:[#allocation8 + $0x528] sm:$0xff]  ;;  %v1529_v0 = vld [vmem:[#allocation8 + $0x1290] sm:$0xff] }
 0x146   : > { %5183 = vmatpush3.msra.mxu0 %v790_v21  ;;  %1628 = vmatpush1.msra.mxu1 %v1070_v36  ;;  %v1099_v1 = vld [vmem:[#allocation8 + $0x520] sm:$0xff]  ;;  %v1073_v3 = vld [vmem:[#allocation8 + $0x450] sm:$0xff]  ;;  %v1502_v4 = vld [vmem:[#allocation8 + $0x11b8] sm:$0xff] }
 0x147   : > { %5185 = vmatmul.mubr.msk.f32.vlgmr.msra.gmra.mxu0 %vm805_vm0, %v766_v25  ;;  %1720 = vmatprep.subr.mxu0 %v1343_v27  ;;  %v1503_v2 = vld [vmem:[#allocation8 + $0x11c0] sm:$0xff]  ;;  %v1072_v5 = vld [vmem:[#allocation8 + $0x448] sm:$0xff]  ;;  %v1046_v7 = vld [vmem:[#allocation8 + $0x378] sm:$0xff] }
 0x148   : > { %1721 = vmatpush1.msra.mxu0 %v1342_v29  ;;  %1629 = vmatprep.subr.mxu1 %v1044_v38  ;;  %v1476_v6 = vld [vmem:[#allocation8 + $0x10e8] sm:$0xff]  ;;  %v1475_v8 = vld [vmem:[#allocation8 + $0x10e0] sm:$0xff]  ;;  %v1045_v9 = vld [vmem:[#allocation8 + $0x370] sm:$0xff] }
 0x149   : > { %1722 = vmatprep.subr.mxu0 %v1316_v31  ;;  %1630 = vmatpush1.msra.mxu1 %v1043_v40  ;;  %v1449_v10 = vld [vmem:[#allocation8 + $0x1010] sm:$0xff]  ;;  %v1019_v11 = vld [vmem:[#allocation8 + $0x2a0] sm:$0xff]  ;;  %v1448_v12 = vld [vmem:[#allocation8 + $0x1008] sm:$0xff] }
 0x14a   : > { %1723 = vmatpush1.msra.mxu0 %v1315_v33  ;;  %1631 = vmatprep.subr.mxu1 %v1017_v42  ;;  %v1018_v13 = vld [vmem:[#allocation8 + $0x298] sm:$0xff]  ;;  %v992_v15 = vld [vmem:[#allocation8 + $0x1c8] sm:$0xff]  ;;  %v1421_v16 = vld [vmem:[#allocation8 + $0xf30] sm:$0xff] }
 0x14b   : > { %1724 = vmatprep.subr.mxu0 %v1289_v35  ;;  %1632 = vmatpush1.msra.mxu1 %v1016_v44  ;;  %v1422_v14 = vld [vmem:[#allocation8 + $0xf38] sm:$0xff]  ;;  %v991_v17 = vld [vmem:[#allocation8 + $0x1c0] sm:$0xff]  ;;  %v965_v19 = vld [vmem:[#allocation8 + $0xf0] sm:$0xff] }
 0x14c   : > { %1725 = vmatpush1.msra.mxu0 %v1288_v37  ;;  %1633 = vmatprep.subr.mxu1 %v990_v46  ;;  %v1395_v18 = vld [vmem:[#allocation8 + $0xe60] sm:$0xff]  ;;  %v1394_v20 = vld [vmem:[#allocation8 + $0xe58] sm:$0xff]  ;;  %v964_v21 = vld [vmem:[#allocation8 + $0xe8] sm:$0xff] }
 0x14d   : > { %1726 = vmatprep.subr.mxu0 %v1262_v39  ;;  %1634 = vmatpush1.msra.mxu1 %v989_v48  ;;  %v1368_v22 = vld [vmem:[#allocation8 + $0xd88] sm:$0xff]  ;;  %v938_v23 = vld [vmem:[#allocation8 + $0x18] sm:$0xff]  ;;  %v1367_v24 = vld [vmem:[#allocation8 + $0xd80] sm:$0xff] }
 0x14e   : > { %1727 = vmatpush1.msra.mxu0 %v1261_v41  ;;  %1635 = vmatprep.subr.mxu1 %v963_v50  ;;  %v937_v25 = vld [vmem:[#allocation8 + $0x10] sm:$0xff]  ;;  %v6490_v26 = vld [vmem:[%s6435_s26 + $0x8] sm:$0xff]  ;;  %v1559_v27 = vld [vmem:[#allocation8 + $0x1380] sm:$0xff] }
 0x14f   : > { %1728 = vmatprep.subr.mxu0 %v1235_v43  ;;  %1636 = vmatpush1.msra.mxu1 %v962_v52  ;;  %v1345_v28 = vld [vmem:[#allocation8 + $0xcd0] sm:$0xff]  ;;  %v6493_v29 = vld [vmem:[%s6435_s26] sm:$0xff]  ;;  %v1558_v30 = vld [vmem:[#allocation8 + $0x1378] sm:$0xff] }
 0x150   : > { %1729 = vmatpush1.msra.mxu0 %v1234_v45  ;;  %1637 = vmatprep.subr.mxu1 %v936_v54  ;;  %v1344_v31 = vld [vmem:[#allocation8 + $0xcc8] sm:$0xff]  ;;  %v767_v32 = vld [vmem:[%s6418_s1 + $0x10] sm:$0xff]  ;;  %v1318_v34 = vld [vmem:[#allocation8 + $0xbf8] sm:$0xff] }
 0x151   : > { %1730 = vmatprep.subr.mxu0 %v1208_v47  ;;  %1638 = vmatpush1.msra.mxu1 %v935_v56  ;;  %v1532_v33 = vld [vmem:[#allocation8 + $0x12a8] sm:$0xff]  ;;  %v1531_v36 = vld [vmem:[#allocation8 + $0x12a0] sm:$0xff]  ;;  %v1317_v37 = vld [vmem:[#allocation8 + $0xbf0] sm:$0xff] }
 0x152   : > { %1731 = vmatpush1.msra.mxu0 %v1207_v49  ;;  %1655 = vmatprep.subr.mxu1 %v1557_v58  ;;  %v768_v35 = vld [vmem:[%s6418_s1 + $0x18] sm:$0xff]  ;;  %v1505_v38 = vld [vmem:[#allocation8 + $0x11d0] sm:$0xff]  ;;  %v1291_v39 = vld [vmem:[#allocation8 + $0xb20] sm:$0xff] }
 0x153   : > { %1732 = vmatprep.subr.mxu0 %v1181_v51  ;;  %1656 = vmatpush2.msra.mxu1 %v1556_v60  ;;  %v1504_v40 = vld [vmem:[#allocation8 + $0x11c8] sm:$0xff]  ;;  %v1290_v41 = vld [vmem:[#allocation8 + $0xb18] sm:$0xff]  ;;  %v769_v42 = vld [vmem:[%s6418_s1 + $0x20] sm:$0xff] }
 0x154   : > { %1733 = vmatpush1.msra.mxu0 %v1180_v53  ;;  %1657 = vmatprep.subr.mxu1 %v1530_v62  ;;  %v1478_v43 = vld [vmem:[#allocation8 + $0x10f8] sm:$0xff]  ;;  %v1264_v44 = vld [vmem:[#allocation8 + $0xa48] sm:$0xff]  ;;  %v1477_v46 = vld [vmem:[#allocation8 + $0x10f0] sm:$0xff] }
 0x155   : > { %1734 = vmatprep.subr.mxu0 %v1154_v55  ;;  %1658 = vmatpush2.msra.mxu1 %v1529_v0  ;;  %v770_v45 = vld [vmem:[%s6418_s1 + $0x28] sm:$0xff]  ;;  %v1263_v47 = vld [vmem:[#allocation8 + $0xa40] sm:$0xff]  ;;  %v1237_v49 = vld [vmem:[#allocation8 + $0x970] sm:$0xff] }
 0x156   : > { %1735 = vmatpush1.msra.mxu0 %v1153_v57  ;;  %1659 = vmatprep.subr.mxu1 %v1503_v2  ;;  %v1451_v48 = vld [vmem:[#allocation8 + $0x1020] sm:$0xff]  ;;  %v1450_v50 = vld [vmem:[#allocation8 + $0x1018] sm:$0xff]  ;;  %v1236_v51 = vld [vmem:[#allocation8 + $0x968] sm:$0xff] }
 0x157   : > { %1736 = vmatprep.subr.mxu0 %v1127_v59  ;;  %1660 = vmatpush2.msra.mxu1 %v1502_v4  ;;  %v771_v52 = vld [vmem:[%s6418_s1 + $0x30] sm:$0xff]  ;;  %v1424_v53 = vld [vmem:[#allocation8 + $0xf48] sm:$0xff]  ;;  %v1210_v54 = vld [vmem:[#allocation8 + $0x898] sm:$0xff] }
 0x158   : > { %1737 = vmatpush1.msra.mxu0 %v1126_v61  ;;  %1661 = vmatprep.subr.mxu1 %v1476_v6  ;;  %v772_v55 = vld [vmem:[%s6418_s1 + $0x38] sm:$0xff]  ;;  %v1423_v56 = vld [vmem:[#allocation8 + $0xf40] sm:$0xff]  ;;  %v1209_v57 = vld [vmem:[#allocation8 + $0x890] sm:$0xff] }
 0x159   : > { %1738 = vmatprep.subr.mxu0 %v1100_v63  ;;  %1662 = vmatpush2.msra.mxu1 %v1475_v8  ;;  %v1397_v58 = vld [vmem:[#allocation8 + $0xe70] sm:$0xff]  ;;  %v1183_v59 = vld [vmem:[#allocation8 + $0x7c0] sm:$0xff]  ;;  %v1396_v60 = vld [vmem:[#allocation8 + $0xe68] sm:$0xff] }
 0x15a   : > { %1739 = vmatpush1.msra.mxu0 %v1099_v1  ;;  %1663 = vmatprep.subr.mxu1 %v1449_v10  ;;  %v1182_v61 = vld [vmem:[#allocation8 + $0x7b8] sm:$0xff]  ;;  %v1156_v63 = vld [vmem:[#allocation8 + $0x6e8] sm:$0xff]  ;;  %v1369_v0 = vld [vmem:[#allocation8 + $0xd90] sm:$0xff] }
 0x15b   : > { %1740 = vmatprep.subr.mxu0 %v1073_v3  ;;  %1664 = vmatpush2.msra.mxu1 %v1448_v12  ;;  %v1370_v62 = vld [vmem:[#allocation8 + $0xd98] sm:$0xff]  ;;  %v1155_v1 = vld [vmem:[#allocation8 + $0x6e0] sm:$0xff]  ;;  %v1129_v2 = vld [vmem:[#allocation8 + $0x610] sm:$0xff] }
 0x15c   : > { %1741 = vmatpush1.msra.mxu0 %v1072_v5  ;;  %1665 = vmatprep.subr.mxu1 %v1422_v14  ;;  %v1347_v3 = vld [vmem:[#allocation8 + $0xce0] sm:$0xff]  ;;  %v1128_v4 = vld [vmem:[#allocation8 + $0x608] sm:$0xff]  ;;  %v1346_v5 = vld [vmem:[#allocation8 + $0xcd8] sm:$0xff] }
 0x15d   : > { %1742 = vmatprep.subr.mxu0 %v1046_v7  ;;  %1666 = vmatpush2.msra.mxu1 %v1421_v16  ;;  %v1102_v6 = vld [vmem:[#allocation8 + $0x538] sm:$0xff]  ;;  %v1320_v7 = vld [vmem:[#allocation8 + $0xc08] sm:$0xff]  ;;  %v1101_v8 = vld [vmem:[#allocation8 + $0x530] sm:$0xff] }
 0x15e   : > { %1743 = vmatpush1.msra.mxu0 %v1045_v9  ;;  %1667 = vmatprep.subr.mxu1 %v1395_v18  ;;  %v1319_v9 = vld [vmem:[#allocation8 + $0xc00] sm:$0xff]  ;;  %v6514_v10 = vld [vmem:[%s6435_s26 + $0x18] sm:$0xff]  ;;  %v1293_v12 = vld [vmem:[#allocation8 + $0xb30] sm:$0xff] }
 0x15f   : > { %1744 = vmatprep.subr.mxu0 %v1019_v11  ;;  %1668 = vmatpush2.msra.mxu1 %v1394_v20  ;;  %v1075_v11 = vld [vmem:[#allocation8 + $0x460] sm:$0xff]  ;;  %v1074_v14 = vld [vmem:[#allocation8 + $0x458] sm:$0xff]  ;;  %v1048_v16 = vld [vmem:[#allocation8 + $0x388] sm:$0xff] }
 0x160   : > { %1745 = vmatpush1.msra.mxu0 %v1018_v13  ;;  %1669 = vmatprep.subr.mxu1 %v1368_v22  ;;  %v6517_v13 = vld [vmem:[%s6435_s26 + $0x10] sm:$0xff]  ;;  %v1047_v18 = vld [vmem:[#allocation8 + $0x380] sm:$0xff]  ;;  %v6523_v20 = vld [vmem:[%s6435_s26 + $0x28] sm:$0xff] }
 0x161   : > { %1746 = vmatprep.subr.mxu0 %v992_v15  ;;  %1670 = vmatpush2.msra.mxu1 %v1367_v24  ;;  %v1292_v15 = vld [vmem:[#allocation8 + $0xb28] sm:$0xff]  ;;  %v1239_v22 = vld [vmem:[#allocation8 + $0x980] sm:$0xff] }
 0x162   : > { %1747 = vmatpush1.msra.mxu0 %v991_v17  ;;  %4883 = vmatprep.mubr.msk.f32.mxu1 %vm805_vm0, %v6490_v26  ;;  %v1266_v17 = vld [vmem:[#allocation8 + $0xa58] sm:$0xff]  ;;  %v1020_v24 = vld [vmem:[#allocation8 + $0x2a8] sm:$0xff] }
 0x163   : > { %1748 = vmatprep.subr.mxu0 %v965_v19  ;;  %1833 = vmatprep.subr.mxu1 %v1345_v28  ;;  %v1265_v19 = vld [vmem:[#allocation8 + $0xa50] sm:$0xff]  ;;  %v1212_v28 = vld [vmem:[#allocation8 + $0x8a8] sm:$0xff] }
 0x164   : > { %1749 = vmatpush1.msra.mxu0 %v964_v21  ;;  %1672 = vmatmul.mubr.f32.vlgmr.msra.gmra.mxu1 %v6493_v29  ;;  %v1021_v21 = vld [vmem:[#allocation8 + $0x2b0] sm:$0xff] }
 0x165   : > { %1750 = vmatprep.subr.mxu0 %v938_v23  ;;  %1834 = vmatpush1.msra.mxu1 %v1344_v31  ;;  %v6526_v23 = vld [vmem:[%s6435_s26 + $0x20] sm:$0xff] }
 0x166   : > { %1751 = vmatpush1.msra.mxu0 %v937_v25  ;;  %5187 = vmatprep.mubr.msk.f32.mxu0 %vm805_vm0, %v767_v32  ;;  %v1238_v25 = vld [vmem:[#allocation8 + $0x978] sm:$0xff]  ;;  %v1211_v31 = vld [vmem:[#allocation8 + $0x8a0] sm:$0xff] }
 0x167   : > { %1768 = vmatprep.subr.mxu0 %v1559_v27  ;;  %1835 = vmatprep.subr.mxu1 %v1318_v34  ;;  %v994_v27 = vld [vmem:[#allocation8 + $0x1d8] sm:$0xff]  ;;  %v1185_v34 = vld [vmem:[#allocation8 + $0x7d0] sm:$0xff] }
 0x168   : > { %1769 = vmatpush2.msra.mxu0 %v1558_v30  ;;  %1836 = vmatpush1.msra.mxu1 %v1317_v37  ;;  %v993_v30 = vld [vmem:[#allocation8 + $0x1d0] sm:$0xff]  ;;  %v6532_v32 = vld [vmem:[%s6435_s26 + $0x38] sm:$0xff]  ;;  %v1184_v37 = vld [vmem:[#allocation8 + $0x7c8] sm:$0xff] }
 0x169   : > { %1770 = vmatprep.subr.mxu0 %v1532_v33  ;;  %5188 = vmatmul.mubr.msk.f32.gmra.mxu0 %vm805_vm0, %v768_v35  ;;  %v967_v33 = vld [vmem:[#allocation8 + $0x100] sm:$0xff]  ;;  %v6535_v35 = vld [vmem:[%s6435_s26 + $0x30] sm:$0xff] }
 0x16a   : > { %1771 = vmatpush2.msra.mxu0 %v1531_v36  ;;  %1837 = vmatprep.subr.mxu1 %v1291_v39  ;;  %v966_v36 = vld [vmem:[#allocation8 + $0xf8] sm:$0xff] }
 0x16b   : > { %1772 = vmatprep.subr.mxu0 %v1505_v38  ;;  %1838 = vmatpush1.msra.mxu1 %v1290_v41  ;;  %v940_v38 = vld [vmem:[#allocation8 + $0x28] sm:$0xff]  ;;  %v1158_v39 = vld [vmem:[#allocation8 + $0x6f8] sm:$0xff]  ;;  %v1157_v41 = vld [vmem:[#allocation8 + $0x6f0] sm:$0xff] }
 0x16c   : > { %1773 = vmatpush2.msra.mxu0 %v1504_v40  ;;  %5190 = vmatprep.mubr.msk.f32.mxu0 %vm805_vm0, %v769_v42  ;;  %v939_v40 = vld [vmem:[#allocation8 + $0x20] sm:$0xff]  ;;  %v6541_v42 = vld [vmem:[%s6435_s26 + $0x48] sm:$0xff] }
 0x16d   : > { %1774 = vmatprep.subr.mxu0 %v1478_v43  ;;  %1839 = vmatprep.subr.mxu1 %v1264_v44  ;;  %v1561_v43 = vld [vmem:[#allocation8 + $0x1390] sm:$0xff]  ;;  %v1131_v44 = vld [vmem:[#allocation8 + $0x620] sm:$0xff] }
 0x16e   : > { %5191 = vmatmul.mubr.msk.f32.gmra.mxu0 %vm805_vm0, %v770_v45  ;;  %1840 = vmatpush1.msra.mxu1 %v1263_v47  ;;  %v6544_v45 = vld [vmem:[%s6435_s26 + $0x40] sm:$0xff]  ;;  %v1130_v47 = vld [vmem:[#allocation8 + $0x618] sm:$0xff] }
 0x16f   : > { %1775 = vmatpush2.msra.mxu0 %v1477_v46  ;;  %1841 = vmatprep.subr.mxu1 %v1237_v49  ;;  %v1560_v46 = vld [vmem:[#allocation8 + $0x1388] sm:$0xff] }
 0x170   : > { %1776 = vmatprep.subr.mxu0 %v1451_v48  ;;  %1842 = vmatpush1.msra.mxu1 %v1236_v51  ;;  %v1534_v48 = vld [vmem:[#allocation8 + $0x12b8] sm:$0xff]  ;;  %v1104_v49 = vld [vmem:[#allocation8 + $0x548] sm:$0xff]  ;;  %v1103_v51 = vld [vmem:[#allocation8 + $0x540] sm:$0xff] }
 0x171   : > { %1777 = vmatpush2.msra.mxu0 %v1450_v50  ;;  %5193 = vmatprep.mubr.msk.f32.mxu0 %vm805_vm0, %v771_v52  ;;  %v1533_v50 = vld [vmem:[#allocation8 + $0x12b0] sm:$0xff]  ;;  %v6553_v52 = vld [vmem:[%s6435_s26 + $0x58] sm:$0xff] }
 0x172   : > { %1778 = vmatprep.subr.mxu0 %v1424_v53  ;;  %1843 = vmatprep.subr.mxu1 %v1210_v54  ;;  %v1507_v53 = vld [vmem:[#allocation8 + $0x11e0] sm:$0xff]  ;;  %v1077_v54 = vld [vmem:[#allocation8 + $0x470] sm:$0xff] }
 0x173   : > { %5194 = vmatmul.mubr.msk.f32.gmra.mxu0 %vm805_vm0, %v772_v55  ;;  %1844 = vmatpush1.msra.mxu1 %v1209_v57  ;;  %v6556_v55 = vld [vmem:[%s6435_s26 + $0x50] sm:$0xff]  ;;  %v1076_v57 = vld [vmem:[#allocation8 + $0x468] sm:$0xff] }
 0x174   : > { %1779 = vmatpush2.msra.mxu0 %v1423_v56  ;;  %1845 = vmatprep.subr.mxu1 %v1183_v59  ;;  %v1506_v56 = vld [vmem:[#allocation8 + $0x11d8] sm:$0xff] }
 0x175   : > { %1780 = vmatprep.subr.mxu0 %v1397_v58  ;;  %1846 = vmatpush1.msra.mxu1 %v1182_v61  ;;  %v1480_v58 = vld [vmem:[#allocation8 + $0x1108] sm:$0xff]  ;;  %v1050_v59 = vld [vmem:[#allocation8 + $0x398] sm:$0xff]  ;;  %v1049_v61 = vld [vmem:[#allocation8 + $0x390] sm:$0xff] }
 0x176   : > { %1781 = vmatpush2.msra.mxu0 %v1396_v60  ;;  %1847 = vmatprep.subr.mxu1 %v1156_v63  ;;  %v1479_v60 = vld [vmem:[#allocation8 + $0x1100] sm:$0xff]  ;;  %v1453_v63 = vld [vmem:[#allocation8 + $0x1030] sm:$0xff] }
 0x177   : > { %1782 = vmatprep.subr.mxu0 %v1370_v62  ;;  %4891 = vmatprep.mubr.msk.f32.mxu0 %vm805_vm0, %v6490_v26  ;;  %v6565_v62 = vld [vmem:[%s6435_s26 + $0x68] sm:$0xff] }
 0x178   : > { %1783 = vmatpush2.msra.mxu0 %v1369_v0  ;;  %1848 = vmatpush1.msra.mxu1 %v1155_v1  ;;  %v1023_v0 = vld [vmem:[#allocation8 + $0x2c0] sm:$0xff] }
 0x179   : > { %1785 = vmatmul.mubr.f32.vlgmr.msra.gmra.mxu0 %v6493_v29  ;;  %1849 = vmatprep.subr.mxu1 %v1129_v2  ;;  %v6568_v1 = vld [vmem:[%s6435_s26 + $0x60] sm:$0xff]  ;;  %v1452_v2 = vld [vmem:[#allocation8 + $0x1028] sm:$0xff] }
 0x17a   : > { %1946 = vmatprep.subr.mxu0 %v1347_v3  ;;  %1850 = vmatpush1.msra.mxu1 %v1128_v4  ;;  %v1022_v3 = vld [vmem:[#allocation8 + $0x2b8] sm:$0xff] }
 0x17b   : > { %1947 = vmatpush1.msra.mxu0 %v1346_v5  ;;  %1851 = vmatprep.subr.mxu1 %v1102_v6  ;;  %v1426_v4 = vld [vmem:[#allocation8 + $0xf58] sm:$0xff]  ;;  %v996_v5 = vld [vmem:[#allocation8 + $0x1e8] sm:$0xff]  ;;  %v1425_v6 = vld [vmem:[#allocation8 + $0xf50] sm:$0xff] }
 0x17c   : > { %1948 = vmatprep.subr.mxu0 %v1320_v7  ;;  %1852 = vmatpush1.msra.mxu1 %v1101_v8  ;;  %v995_v7 = vld [vmem:[#allocation8 + $0x1e0] sm:$0xff]  ;;  %v6577_v8 = vld [vmem:[%s6435_s26 + $0x78] sm:$0xff] }
 0x17d   : > { %1949 = vmatpush1.msra.mxu0 %v1319_v9  ;;  %4884 = vmatprep.mubr.msk.f32.mxu1 %vm805_vm0, %v6514_v10  ;;  %v1399_v9 = vld [vmem:[#allocation8 + $0xe80] sm:$0xff] }
 0x17e   : > { %1853 = vmatprep.subr.mxu1 %v1075_v11  ;;  %1950 = vmatprep.subr.mxu0 %v1293_v12  ;;  %v969_v11 = vld [vmem:[#allocation8 + $0x110] sm:$0xff] }
 0x17f   : > { %1678 = vmatmul.mubr.f32.gmra.mxu1 %v6517_v13  ;;  %1951 = vmatpush1.msra.mxu0 %v1292_v15  ;;  %v6580_v12 = vld [vmem:[%s6435_s26 + $0x70] sm:$0xff]  ;;  %v968_v15 = vld [vmem:[#allocation8 + $0x108] sm:$0xff] }
 0x180   : > { %1854 = vmatpush1.msra.mxu1 %v1074_v14  ;;  %1952 = vmatprep.subr.mxu0 %v1266_v17  ;;  %v1398_v14 = vld [vmem:[#allocation8 + $0xe78] sm:$0xff] }
 0x181   : > { %1855 = vmatprep.subr.mxu1 %v1048_v16  ;;  %1953 = vmatpush1.msra.mxu0 %v1265_v19  ;;  %v1372_v16 = vld [vmem:[#allocation8 + $0xda8] sm:$0xff]  ;;  %v942_v17 = vld [vmem:[#allocation8 + $0x38] sm:$0xff]  ;;  %v941_v19 = vld [vmem:[#allocation8 + $0x30] sm:$0xff] }
 0x182   : > { %1856 = vmatpush1.msra.mxu1 %v1047_v18  ;;  %4885 = vmatprep.mubr.msk.f32.mxu1 %vm805_vm0, %v6523_v20  ;;  %v1371_v18 = vld [vmem:[#allocation8 + $0xda0] sm:$0xff] }
 0x183   : > { %1857 = vmatprep.subr.mxu1 %v1021_v21  ;;  %1954 = vmatprep.subr.mxu0 %v1239_v22  ;;  %v1563_v21 = vld [vmem:[#allocation8 + $0x13a0] sm:$0xff]  ;;  %v1349_v22 = vld [vmem:[#allocation8 + $0xcf0] sm:$0xff] }
 0x184   : > { %1684 = vmatmul.mubr.f32.gmra.mxu1 %v6526_v23  ;;  %1955 = vmatpush1.msra.mxu0 %v1238_v25  ;;  %v1348_v25 = vld [vmem:[#allocation8 + $0xce8] sm:$0xff] }
 0x185   : > { %1858 = vmatpush1.msra.mxu1 %v1020_v24  ;;  %1956 = vmatprep.subr.mxu0 %v1212_v28  ;;  %v1562_v24 = vld [vmem:[#allocation8 + $0x1398] sm:$0xff] }
 0x186   : > { %1859 = vmatprep.subr.mxu1 %v994_v27  ;;  %1957 = vmatpush1.msra.mxu0 %v1211_v31  ;;  %v1536_v27 = vld [vmem:[#allocation8 + $0x12c8] sm:$0xff]  ;;  %v1322_v28 = vld [vmem:[#allocation8 + $0xc18] sm:$0xff]  ;;  %v1321_v31 = vld [vmem:[#allocation8 + $0xc10] sm:$0xff] }
 0x187   : > { %1860 = vmatpush1.msra.mxu1 %v993_v30  ;;  %4886 = vmatprep.mubr.msk.f32.mxu1 %vm805_vm0, %v6532_v32  ;;  %v1535_v30 = vld [vmem:[#allocation8 + $0x12c0] sm:$0xff] }
 0x188   : > { %1861 = vmatprep.subr.mxu1 %v967_v33  ;;  %1958 = vmatprep.subr.mxu0 %v1185_v34  ;;  %v1509_v33 = vld [vmem:[#allocation8 + $0x11f0] sm:$0xff]  ;;  %v1295_v34 = vld [vmem:[#allocation8 + $0xb40] sm:$0xff] }
 0x189   : > { %1690 = vmatmul.mubr.f32.gmra.mxu1 %v6535_v35  ;;  %1959 = vmatpush1.msra.mxu0 %v1184_v37  ;;  %v1294_v37 = vld [vmem:[#allocation8 + $0xb38] sm:$0xff] }
 0x18a   : > { %1862 = vmatpush1.msra.mxu1 %v966_v36  ;;  %1960 = vmatprep.subr.mxu0 %v1158_v39  ;;  %v1508_v36 = vld [vmem:[#allocation8 + $0x11e8] sm:$0xff] }
 0x18b   : > { %1863 = vmatprep.subr.mxu1 %v940_v38  ;;  %1961 = vmatpush1.msra.mxu0 %v1157_v41  ;;  %v1482_v38 = vld [vmem:[#allocation8 + $0x1118] sm:$0xff]  ;;  %v1268_v39 = vld [vmem:[#allocation8 + $0xa68] sm:$0xff]  ;;  %v1267_v41 = vld [vmem:[#allocation8 + $0xa60] sm:$0xff] }
 0x18c   : > { %1864 = vmatpush1.msra.mxu1 %v939_v40  ;;  %4887 = vmatprep.mubr.msk.f32.mxu1 %vm805_vm0, %v6541_v42  ;;  %v1481_v40 = vld [vmem:[#allocation8 + $0x1110] sm:$0xff] }
 0x18d   : > { %4892 = vmatprep.mubr.msk.f32.mxu0 %vm805_vm0, %v6514_v10  ;;  %1881 = vmatprep.subr.mxu1 %v1561_v43  ;;  %v1455_v43 = vld [vmem:[#allocation8 + $0x1040] sm:$0xff] }
 0x18e   : > { %1962 = vmatprep.subr.mxu0 %v1131_v44  ;;  %1696 = vmatmul.mubr.f32.gmra.mxu1 %v6544_v45  ;;  %v1241_v44 = vld [vmem:[#allocation8 + $0x990] sm:$0xff] }
 0x18f   : > { %1791 = vmatmul.mubr.f32.gmra.mxu0 %v6517_v13  ;;  %1882 = vmatpush2.msra.mxu1 %v1560_v46  ;;  %v1454_v46 = vld [vmem:[#allocation8 + $0x1038] sm:$0xff] }
 0x190   : > { %1963 = vmatpush1.msra.mxu0 %v1130_v47  ;;  %1883 = vmatprep.subr.mxu1 %v1534_v48  ;;  %v1240_v47 = vld [vmem:[#allocation8 + $0x988] sm:$0xff] }
 0x191   : > { %1964 = vmatprep.subr.mxu0 %v1104_v49  ;;  %1884 = vmatpush2.msra.mxu1 %v1533_v50  ;;  %v1428_v48 = vld [vmem:[#allocation8 + $0xf68] sm:$0xff]  ;;  %v1214_v49 = vld [vmem:[#allocation8 + $0x8b8] sm:$0xff]  ;;  %v1427_v50 = vld [vmem:[#allocation8 + $0xf60] sm:$0xff] }
 0x192   : > { %1965 = vmatpush1.msra.mxu0 %v1103_v51  ;;  %4888 = vmatprep.mubr.msk.f32.mxu1 %vm805_vm0, %v6553_v52  ;;  %v1213_v51 = vld [vmem:[#allocation8 + $0x8b0] sm:$0xff] }
 0x193   : > { %4893 = vmatprep.mubr.msk.f32.mxu0 %vm805_vm0, %v6523_v20  ;;  %1885 = vmatprep.subr.mxu1 %v1507_v53  ;;  %v1401_v53 = vld [vmem:[#allocation8 + $0xe90] sm:$0xff] }
 0x194   : > { %1966 = vmatprep.subr.mxu0 %v1077_v54  ;;  %1702 = vmatmul.mubr.f32.gmra.mxu1 %v6556_v55  ;;  %v1187_v54 = vld [vmem:[#allocation8 + $0x7e0] sm:$0xff] }
 0x195   : > { %1797 = vmatmul.mubr.f32.gmra.mxu0 %v6526_v23  ;;  %1886 = vmatpush2.msra.mxu1 %v1506_v56  ;;  %v1400_v56 = vld [vmem:[#allocation8 + $0xe88] sm:$0xff] }
 0x196   : > { %1967 = vmatpush1.msra.mxu0 %v1076_v57  ;;  %1887 = vmatprep.subr.mxu1 %v1480_v58  ;;  %v1186_v57 = vld [vmem:[#allocation8 + $0x7d8] sm:$0xff] }
 0x197   : > { %1968 = vmatprep.subr.mxu0 %v1050_v59  ;;  %1888 = vmatpush2.msra.mxu1 %v1479_v60  ;;  %v1374_v58 = vld [vmem:[#allocation8 + $0xdb8] sm:$0xff]  ;;  %v1160_v59 = vld [vmem:[#allocation8 + $0x708] sm:$0xff]  ;;  %v1373_v60 = vld [vmem:[#allocation8 + $0xdb0] sm:$0xff] }
 0x198   : > { %1969 = vmatpush1.msra.mxu0 %v1049_v61  ;;  %4889 = vmatprep.mubr.msk.f32.mxu1 %vm805_vm0, %v6565_v62  ;;  %v1159_v61 = vld [vmem:[#allocation8 + $0x700] sm:$0xff] }
 0x199   : > { %4894 = vmatprep.mubr.msk.f32.mxu0 %vm805_vm0, %v6532_v32  ;;  %1889 = vmatprep.subr.mxu1 %v1453_v63  ;;  %v1133_v63 = vld [vmem:[#allocation8 + $0x630] sm:$0xff] }
 0x19a   : > { %1970 = vmatprep.subr.mxu0 %v1023_v0  ;;  %1708 = vmatmul.mubr.f32.gmra.mxu1 %v6568_v1  ;;  %v1351_v0 = vld [vmem:[#allocation8 + $0xd00] sm:$0xff] }
 0x19b   : > { %1803 = vmatmul.mubr.f32.gmra.mxu0 %v6535_v35  ;;  %1890 = vmatpush2.msra.mxu1 %v1452_v2  ;;  %v1132_v2 = vld [vmem:[#allocation8 + $0x628] sm:$0xff] }
 0x19c   : > { %1971 = vmatpush1.msra.mxu0 %v1022_v3  ;;  %1891 = vmatprep.subr.mxu1 %v1426_v4  ;;  %v1350_v3 = vld [vmem:[#allocation8 + $0xcf8] sm:$0xff] }
 0x19d   : > { %1972 = vmatprep.subr.mxu0 %v996_v5  ;;  %1892 = vmatpush2.msra.mxu1 %v1425_v6  ;;  %v1106_v4 = vld [vmem:[#allocation8 + $0x558] sm:$0xff]  ;;  %v1324_v5 = vld [vmem:[#allocation8 + $0xc28] sm:$0xff]  ;;  %v1105_v6 = vld [vmem:[#allocation8 + $0x550] sm:$0xff] }
 0x19e   : > { %1973 = vmatpush1.msra.mxu0 %v995_v7  ;;  %4890 = vmatprep.mubr.msk.f32.mxu1 %vm805_vm0, %v6577_v8  ;;  %v1323_v7 = vld [vmem:[#allocation8 + $0xc20] sm:$0xff] }
 0x19f   : > { %4895 = vmatprep.mubr.msk.f32.mxu0 %vm805_vm0, %v6541_v42  ;;  %1893 = vmatprep.subr.mxu1 %v1399_v9  ;;  %v1079_v9 = vld [vmem:[#allocation8 + $0x480] sm:$0xff] }
 0x1a0   : > { %1974 = vmatprep.subr.mxu0 %v969_v11  ;;  %1714 = vmatmul.mubr.f32.gmra.mxu1 %v6580_v12  ;;  %v1297_v11 = vld [vmem:[#allocation8 + $0xb50] sm:$0xff] }
 0x1a1   : > { %1809 = vmatmul.mubr.f32.gmra.mxu0 %v6544_v45  ;;  %1894 = vmatpush2.msra.mxu1 %v1398_v14  ;;  %v1078_v14 = vld [vmem:[#allocation8 + $0x478] sm:$0xff] }
 0x1a2   : > { %1975 = vmatpush1.msra.mxu0 %v968_v15  ;;  %1895 = vmatprep.subr.mxu1 %v1372_v16  ;;  %v1296_v15 = vld [vmem:[#allocation8 + $0xb48] sm:$0xff] }
 0x1a3   : > { %1976 = vmatprep.subr.mxu0 %v942_v17  ;;  %1896 = vmatpush2.msra.mxu1 %v1371_v18  ;;  %v1052_v16 = vld [vmem:[#allocation8 + $0x3a8] sm:$0xff]  ;;  %v1270_v17 = vld [vmem:[#allocation8 + $0xa78] sm:$0xff]  ;;  %v1051_v18 = vld [vmem:[#allocation8 + $0x3a0] sm:$0xff] }
 0x1a4   : > { %1977 = vmatpush1.msra.mxu0 %v941_v19  ;;  %4896 = vmatprep.mubr.msk.f32.mxu0 %vm805_vm0, %v6553_v52  ;;  %v1269_v19 = vld [vmem:[#allocation8 + $0xa70] sm:$0xff] }
 0x1a5   : > { %4899 = vmatprep.mubr.msk.f32.mxu1 %vm805_vm0, %v6490_v26  ;;  %1994 = vmatprep.subr.mxu0 %v1563_v21  ;;  %v1025_v21 = vld [vmem:[#allocation8 + $0x2d0] sm:$0xff] }
 0x1a6   : > { %2059 = vmatprep.subr.mxu1 %v1349_v22  ;;  %1815 = vmatmul.mubr.f32.gmra.mxu0 %v6556_v55  ;;  %v1243_v22 = vld [vmem:[#allocation8 + $0x9a0] sm:$0xff] }
 0x1a7   : > { %1898 = vmatmul.mubr.f32.vlgmr.msra.gmra.mxu1 %v6493_v29  ;;  %1995 = vmatpush2.msra.mxu0 %v1562_v24  ;;  %v1024_v24 = vld [vmem:[#allocation8 + $0x2c8] sm:$0xff] }
 0x1a8   : > { %2060 = vmatpush1.msra.mxu1 %v1348_v25  ;;  %1996 = vmatprep.subr.mxu0 %v1536_v27  ;;  %v1242_v25 = vld [vmem:[#allocation8 + $0x998] sm:$0xff] }
 0x1a9   : > { %2061 = vmatprep.subr.mxu1 %v1322_v28  ;;  %1997 = vmatpush2.msra.mxu0 %v1535_v30  ;;  %v998_v27 = vld [vmem:[#allocation8 + $0x1f8] sm:$0xff]  ;;  %v1216_v28 = vld [vmem:[#allocation8 + $0x8c8] sm:$0xff]  ;;  %v997_v30 = vld [vmem:[#allocation8 + $0x1f0] sm:$0xff] }
 0x1aa   : > { %2062 = vmatpush1.msra.mxu1 %v1321_v31  ;;  %4897 = vmatprep.mubr.msk.f32.mxu0 %vm805_vm0, %v6565_v62  ;;  %v1215_v31 = vld [vmem:[#allocation8 + $0x8c0] sm:$0xff] }
 0x1ab   : > { %1998 = vmatprep.subr.mxu0 %v1509_v33  ;;  %2063 = vmatprep.subr.mxu1 %v1295_v34  ;;  %v971_v33 = vld [vmem:[#allocation8 + $0x120] sm:$0xff]  ;;  %v1189_v34 = vld [vmem:[#allocation8 + $0x7f0] sm:$0xff] }
 0x1ac   : > { %1821 = vmatmul.mubr.f32.gmra.mxu0 %v6568_v1  ;;  %2064 = vmatpush1.msra.mxu1 %v1294_v37  ;;  %v1188_v37 = vld [vmem:[#allocation8 + $0x7e8] sm:$0xff] }
 0x1ad   : > { %1999 = vmatpush2.msra.mxu0 %v1508_v36  ;;  %2065 = vmatprep.subr.mxu1 %v1268_v39  ;;  %v970_v36 = vld [vmem:[#allocation8 + $0x118] sm:$0xff] }
 0x1ae   : > { %2000 = vmatprep.subr.mxu0 %v1482_v38  ;;  %2066 = vmatpush1.msra.mxu1 %v1267_v41  ;;  %v944_v38 = vld [vmem:[#allocation8 + $0x48] sm:$0xff]  ;;  %v1162_v39 = vld [vmem:[#allocation8 + $0x718] sm:$0xff]  ;;  %v1161_v41 = vld [vmem:[#allocation8 + $0x710] sm:$0xff] }
 0x1af   : > { %2001 = vmatpush2.msra.mxu0 %v1481_v40  ;;  %4898 = vmatprep.mubr.msk.f32.mxu0 %vm805_vm0, %v6577_v8  ;;  %v943_v40 = vld [vmem:[#allocation8 + $0x40] sm:$0xff] }
 0x1b0   : > { %2002 = vmatprep.subr.mxu0 %v1455_v43  ;;  %2067 = vmatprep.subr.mxu1 %v1241_v44  ;;  %v1565_v43 = vld [vmem:[#allocation8 + $0x13b0] sm:$0xff]  ;;  %v1135_v44 = vld [vmem:[#allocation8 + $0x640] sm:$0xff] }
 0x1b1   : > { %1827 = vmatmul.mubr.f32.gmra.mxu0 %v6580_v12  ;;  %2068 = vmatpush1.msra.mxu1 %v1240_v47  ;;  %v1134_v47 = vld [vmem:[#allocation8 + $0x638] sm:$0xff] }
 0x1b2   : > { %2003 = vmatpush2.msra.mxu0 %v1454_v46  ;;  %2069 = vmatprep.subr.mxu1 %v1214_v49  ;;  %v1564_v46 = vld [vmem:[#allocation8 + $0x13a8] sm:$0xff] }
 0x1b3   : > { %2004 = vmatprep.subr.mxu0 %v1428_v48  ;;  %2070 = vmatpush1.msra.mxu1 %v1213_v51  ;;  %v1538_v48 = vld [vmem:[#allocation8 + $0x12d8] sm:$0xff]  ;;  %v1108_v49 = vld [vmem:[#allocation8 + $0x568] sm:$0xff]  ;;  %v1107_v51 = vld [vmem:[#allocation8 + $0x560] sm:$0xff] }
 0x1b4   : > { %2005 = vmatpush2.msra.mxu0 %v1427_v50  ;;  %2071 = vmatprep.subr.mxu1 %v1187_v54  ;;  %v1537_v50 = vld [vmem:[#allocation8 + $0x12d0] sm:$0xff] }
 0x1b5   : > { %2006 = vmatprep.subr.mxu0 %v1401_v53  ;;  %2072 = vmatpush1.msra.mxu1 %v1186_v57  ;;  %v1511_v53 = vld [vmem:[#allocation8 + $0x1200] sm:$0xff]  ;;  %v1081_v54 = vld [vmem:[#allocation8 + $0x490] sm:$0xff]  ;;  %v1080_v57 = vld [vmem:[#allocation8 + $0x488] sm:$0xff] }
 0x1b6   : > { %2007 = vmatpush2.msra.mxu0 %v1400_v56  ;;  %2073 = vmatprep.subr.mxu1 %v1160_v59  ;;  %v1510_v56 = vld [vmem:[#allocation8 + $0x11f8] sm:$0xff] }
 0x1b7   : > { %2008 = vmatprep.subr.mxu0 %v1374_v58  ;;  %4907 = vmatprep.mubr.msk.f32.mxu0 %vm805_vm0, %v6490_v26  ;;  %v1484_v58 = vld [vmem:[#allocation8 + $0x1128] sm:$0xff]  ;;  %v1054_v59 = vld [vmem:[#allocation8 + $0x3b8] sm:$0xff] }
 0x1b8   : > { %2009 = vmatpush2.msra.mxu0 %v1373_v60  ;;  %2074 = vmatpush1.msra.mxu1 %v1159_v61  ;;  %v1483_v60 = vld [vmem:[#allocation8 + $0x1120] sm:$0xff]  ;;  %v1053_v61 = vld [vmem:[#allocation8 + $0x3b0] sm:$0xff] }
 0x1b9   : > { %2011 = vmatmul.mubr.f32.vlgmr.msra.gmra.mxu0 %v6493_v29  ;;  %2075 = vmatprep.subr.mxu1 %v1133_v63  ;;  %v1457_v63 = vld [vmem:[#allocation8 + $0x1050] sm:$0xff] }
 0x1ba   : > { %2172 = vmatprep.subr.mxu0 %v1351_v0  ;;  %2076 = vmatpush1.msra.mxu1 %v1132_v2  ;;  %v1027_v0 = vld [vmem:[#allocation8 + $0x2e0] sm:$0xff]  ;;  %v1456_v2 = vld [vmem:[#allocation8 + $0x1048] sm:$0xff] }
 0x1bb   : > { %2173 = vmatpush1.msra.mxu0 %v1350_v3  ;;  %2077 = vmatprep.subr.mxu1 %v1106_v4  ;;  %v1026_v3 = vld [vmem:[#allocation8 + $0x2d8] sm:$0xff] }
 0x1bc   : > { %2174 = vmatprep.subr.mxu0 %v1324_v5  ;;  %4900 = vmatprep.mubr.msk.f32.mxu1 %vm805_vm0, %v6514_v10  ;;  %v1430_v4 = vld [vmem:[#allocation8 + $0xf78] sm:$0xff]  ;;  %v1000_v5 = vld [vmem:[#allocation8 + $0x208] sm:$0xff] }
 0x1bd   : > { %4908 = vmatprep.mubr.msk.f32.mxu0 %vm805_vm0, %v6514_v10  ;;  %2078 = vmatpush1.msra.mxu1 %v1105_v6  ;;  %v1429_v6 = vld [vmem:[#allocation8 + $0xf70] sm:$0xff] }
 0x1be   : > { %2175 = vmatpush1.msra.mxu0 %v1323_v7  ;;  %1904 = vmatmul.mubr.f32.gmra.mxu1 %v6517_v13  ;;  %v999_v7 = vld [vmem:[#allocation8 + $0x200] sm:$0xff] }
 0x1bf   : > { %2017 = vmatmul.mubr.f32.gmra.mxu0 %v6517_v13  ;;  %2079 = vmatprep.subr.mxu1 %v1079_v9  ;;  %v1403_v9 = vld [vmem:[#allocation8 + $0xea0] sm:$0xff] }
 0x1c0   : > { %2176 = vmatprep.subr.mxu0 %v1297_v11  ;;  %2080 = vmatpush1.msra.mxu1 %v1078_v14  ;;  %v973_v11 = vld [vmem:[#allocation8 + $0x130] sm:$0xff]  ;;  %v1402_v14 = vld [vmem:[#allocation8 + $0xe98] sm:$0xff] }
 0x1c1   : > { %2177 = vmatpush1.msra.mxu0 %v1296_v15  ;;  %2081 = vmatprep.subr.mxu1 %v1052_v16  ;;  %v972_v15 = vld [vmem:[#allocation8 + $0x128] sm:$0xff] }
 0x1c2   : > { %2178 = vmatprep.subr.mxu0 %v1270_v17  ;;  %4901 = vmatprep.mubr.msk.f32.mxu1 %vm805_vm0, %v6523_v20  ;;  %v1376_v16 = vld [vmem:[#allocation8 + $0xdc8] sm:$0xff]  ;;  %v946_v17 = vld [vmem:[#allocation8 + $0x58] sm:$0xff] }
 0x1c3   : > { %4909 = vmatprep.mubr.msk.f32.mxu0 %vm805_vm0, %v6523_v20  ;;  %2082 = vmatpush1.msra.mxu1 %v1051_v18  ;;  %v1375_v18 = vld [vmem:[#allocation8 + $0xdc0] sm:$0xff] }
 0x1c4   : > { %2179 = vmatpush1.msra.mxu0 %v1269_v19  ;;  %1910 = vmatmul.mubr.f32.gmra.mxu1 %v6526_v23  ;;  %v945_v19 = vld [vmem:[#allocation8 + $0x50] sm:$0xff] }
 0x1c5   : > { %2023 = vmatmul.mubr.f32.gmra.mxu0 %v6526_v23  ;;  %2083 = vmatprep.subr.mxu1 %v1025_v21  ;;  %v1567_v21 = vld [vmem:[#allocation8 + $0x13c0] sm:$0xff] }
 0x1c6   : > { %2180 = vmatprep.subr.mxu0 %v1243_v22  ;;  %2084 = vmatpush1.msra.mxu1 %v1024_v24  ;;  %v1353_v22 = vld [vmem:[#allocation8 + $0xd10] sm:$0xff]  ;;  %v1566_v24 = vld [vmem:[#allocation8 + $0x13b8] sm:$0xff] }
 0x1c7   : > { %2181 = vmatpush1.msra.mxu0 %v1242_v25  ;;  %2085 = vmatprep.subr.mxu1 %v998_v27  ;;  %v1352_v25 = vld [vmem:[#allocation8 + $0xd08] sm:$0xff] }
 0x1c8   : > { %2182 = vmatprep.subr.mxu0 %v1216_v28  ;;  %4902 = vmatprep.mubr.msk.f32.mxu1 %vm805_vm0, %v6532_v32  ;;  %v1540_v27 = vld [vmem:[#allocation8 + $0x12e8] sm:$0xff]  ;;  %v1326_v28 = vld [vmem:[#allocation8 + $0xc38] sm:$0xff] }
 0x1c9   : > { %4910 = vmatprep.mubr.msk.f32.mxu0 %vm805_vm0, %v6532_v32  ;;  %2086 = vmatpush1.msra.mxu1 %v997_v30  ;;  %v1539_v30 = vld [vmem:[#allocation8 + $0x12e0] sm:$0xff] }
 0x1ca   : > { %2183 = vmatpush1.msra.mxu0 %v1215_v31  ;;  %1916 = vmatmul.mubr.f32.gmra.mxu1 %v6535_v35  ;;  %v1325_v31 = vld [vmem:[#allocation8 + $0xc30] sm:$0xff] }
 0x1cb   : > { %2029 = vmatmul.mubr.f32.gmra.mxu0 %v6535_v35  ;;  %2087 = vmatprep.subr.mxu1 %v971_v33  ;;  %v1513_v33 = vld [vmem:[#allocation8 + $0x1210] sm:$0xff] }
 0x1cc   : > { %2184 = vmatprep.subr.mxu0 %v1189_v34  ;;  %2088 = vmatpush1.msra.mxu1 %v970_v36  ;;  %v1299_v34 = vld [vmem:[#allocation8 + $0xb60] sm:$0xff]  ;;  %v1298_v36 = vld [vmem:[#allocation8 + $0xb58] sm:$0xff] }
 0x1cd   : > { %2185 = vmatpush1.msra.mxu0 %v1188_v37  ;;  %2089 = vmatprep.subr.mxu1 %v944_v38  ;;  %v1272_v37 = vld [vmem:[#allocation8 + $0xa88] sm:$0xff]  ;;  %v1485_v38 = vld [vmem:[#allocation8 + $0x1130] sm:$0xff] }
 0x1ce   : > { %2186 = vmatprep.subr.mxu0 %v1162_v39  ;;  %4903 = vmatprep.mubr.msk.f32.mxu1 %vm805_vm0, %v6541_v42  ;;  %v1271_v39 = vld [vmem:[#allocation8 + $0xa80] sm:$0xff] }
 0x1cf   : > { %4911 = vmatprep.mubr.msk.f32.mxu0 %vm805_vm0, %v6541_v42  ;;  %2090 = vmatpush1.msra.mxu1 %v943_v40  ;;  %v1459_v40 = vld [vmem:[#allocation8 + $0x1060] sm:$0xff] }
 0x1d0   : > { %2187 = vmatpush1.msra.mxu0 %v1161_v41  ;;  %1922 = vmatmul.mubr.f32.gmra.mxu1 %v6544_v45  ;;  %v1245_v41 = vld [vmem:[#allocation8 + $0x9b0] sm:$0xff] }
 0x1d1   : > { %2035 = vmatmul.mubr.f32.gmra.mxu0 %v6544_v45  ;;  %2107 = vmatprep.subr.mxu1 %v1565_v43  ;;  %v1244_v43 = vld [vmem:[#allocation8 + $0x9a8] sm:$0xff] }
 0x1d2   : > { %2188 = vmatprep.subr.mxu0 %v1135_v44  ;;  %2108 = vmatpush2.msra.mxu1 %v1564_v46  ;;  %v1432_v44 = vld [vmem:[#allocation8 + $0xf88] sm:$0xff]  ;;  %v1218_v46 = vld [vmem:[#allocation8 + $0x8d8] sm:$0xff] }
 0x1d3   : > { %2189 = vmatpush1.msra.mxu0 %v1134_v47  ;;  %2109 = vmatprep.subr.mxu1 %v1538_v48  ;;  %v1217_v47 = vld [vmem:[#allocation8 + $0x8d0] sm:$0xff] }
 0x1d4   : > { %2190 = vmatprep.subr.mxu0 %v1108_v49  ;;  %4904 = vmatprep.mubr.msk.f32.mxu1 %vm805_vm0, %v6553_v52  ;;  %v1405_v48 = vld [vmem:[#allocation8 + $0xeb0] sm:$0xff]  ;;  %v1191_v49 = vld [vmem:[#allocation8 + $0x800] sm:$0xff] }
 0x1d5   : > { %4912 = vmatprep.mubr.msk.f32.mxu0 %vm805_vm0, %v6553_v52  ;;  %2110 = vmatpush2.msra.mxu1 %v1537_v50  ;;  %v1190_v50 = vld [vmem:[#allocation8 + $0x7f8] sm:$0xff] }
 0x1d6   : > { %2191 = vmatpush1.msra.mxu0 %v1107_v51  ;;  %1928 = vmatmul.mubr.f32.gmra.mxu1 %v6556_v55  ;;  %v1378_v51 = vld [vmem:[#allocation8 + $0xdd8] sm:$0xff] }
 0x1d7   : > { %2041 = vmatmul.mubr.f32.gmra.mxu0 %v6556_v55  ;;  %2111 = vmatprep.subr.mxu1 %v1511_v53  ;;  %v1377_v53 = vld [vmem:[#allocation8 + $0xdd0] sm:$0xff] }
 0x1d8   : > { %2192 = vmatprep.subr.mxu0 %v1081_v54  ;;  %2112 = vmatpush2.msra.mxu1 %v1510_v56  ;;  %v1163_v54 = vld [vmem:[#allocation8 + $0x720] sm:$0xff] }
 0x1d9   : > { %2193 = vmatpush1.msra.mxu0 %v1080_v57  ;;  %2113 = vmatprep.subr.mxu1 %v1484_v58  ;;  %v1355_v56 = vld [vmem:[#allocation8 + $0xd20] sm:$0xff]  ;;  %v6660_v57 = vld [vmem:[%s6435_s26 + $0x8] sm:$0xff]  ;;  %v1354_v58 = vld [vmem:[#allocation8 + $0xd18] sm:$0xff] }
 0x1da   : > { %2194 = vmatprep.subr.mxu0 %v1054_v59  ;;  %4905 = vmatprep.mubr.msk.f32.mxu1 %vm805_vm0, %v6565_v62  ;;  %v6666_v59 = vld [vmem:[%s6435_s26] sm:$0xff] }
 0x1db   : > { %4913 = vmatprep.mubr.msk.f32.mxu0 %vm805_vm0, %v6565_v62  ;;  %2114 = vmatpush2.msra.mxu1 %v1483_v60  ;;  %v1110_v60 = vld [vmem:[#allocation8 + $0x578] sm:$0xff] }
 0x1dc   : > { %2195 = vmatpush1.msra.mxu0 %v1053_v61  ;;  %1934 = vmatmul.mubr.f32.gmra.mxu1 %v6568_v1  ;;  %v1328_v61 = vld [vmem:[#allocation8 + $0xc48] sm:$0xff] }
 0x1dd   : > { %2047 = vmatmul.mubr.f32.gmra.mxu0 %v6568_v1  ;;  %2115 = vmatprep.subr.mxu1 %v1457_v63  ;;  %v1327_v63 = vld [vmem:[#allocation8 + $0xc40] sm:$0xff] }
 0x1de   : > { %2196 = vmatprep.subr.mxu0 %v1027_v0  ;;  %2116 = vmatpush2.msra.mxu1 %v1456_v2  ;;  %v1083_v0 = vld [vmem:[#allocation8 + $0x4a0] sm:$0xff]  ;;  %v1301_v2 = vld [vmem:[#allocation8 + $0xb70] sm:$0xff] }
 0x1df   : > { %2197 = vmatpush1.msra.mxu0 %v1026_v3  ;;  %2117 = vmatprep.subr.mxu1 %v1430_v4  ;;  %v1300_v3 = vld [vmem:[#allocation8 + $0xb68] sm:$0xff] }
 0x1e0   : > { %2198 = vmatprep.subr.mxu0 %v1000_v5  ;;  %4906 = vmatprep.mubr.msk.f32.mxu1 %vm805_vm0, %v6577_v8  ;;  %v1056_v4 = vld [vmem:[#allocation8 + $0x3c8] sm:$0xff]  ;;  %v1274_v5 = vld [vmem:[#allocation8 + $0xa98] sm:$0xff] }
 0x1e1   : > { %4914 = vmatprep.mubr.msk.f32.mxu0 %vm805_vm0, %v6577_v8  ;;  %2118 = vmatpush2.msra.mxu1 %v1429_v6  ;;  %v1055_v6 = vld [vmem:[#allocation8 + $0x3c0] sm:$0xff] }
 0x1e2   : > { %2199 = vmatpush1.msra.mxu0 %v999_v7  ;;  %1940 = vmatmul.mubr.f32.gmra.mxu1 %v6580_v12  ;;  %v1273_v7 = vld [vmem:[#allocation8 + $0xa90] sm:$0xff] }
 0x1e3   : > { %2053 = vmatmul.mubr.f32.gmra.mxu0 %v6580_v12  ;;  %2119 = vmatprep.subr.mxu1 %v1403_v9  ;;  %v1029_v9 = vld [vmem:[#allocation8 + $0x2f0] sm:$0xff] }
 0x1e4   : > { %2200 = vmatprep.subr.mxu0 %v973_v11  ;;  %2120 = vmatpush2.msra.mxu1 %v1402_v14  ;;  %v1247_v11 = vld [vmem:[#allocation8 + $0x9c0] sm:$0xff]  ;;  %v1246_v14 = vld [vmem:[#allocation8 + $0x9b8] sm:$0xff] }
 0x1e5   : > { %2201 = vmatpush1.msra.mxu0 %v972_v15  ;;  %2121 = vmatprep.subr.mxu1 %v1376_v16  ;;  %v1220_v15 = vld [vmem:[#allocation8 + $0x8e8] sm:$0xff]  ;;  %v1001_v16 = vld [vmem:[#allocation8 + $0x210] sm:$0xff] }
 0x1e6   : > { %2202 = vmatprep.subr.mxu0 %v946_v17  ;;  %2122 = vmatpush2.msra.mxu1 %v1375_v18  ;;  %v1219_v17 = vld [vmem:[#allocation8 + $0x8e0] sm:$0xff] }
 0x1e7   : > { %4915 = vmatprep.mubr.msk.f32.mxu1 %vm805_vm0, %v6490_v26  ;;  %2203 = vmatpush1.msra.mxu0 %v945_v19  ;;  %v1512_v26 = vld [vmem:[#allocation8 + $0x1208] sm:$0xff]  ;;  %v975_v18 = vld [vmem:[#allocation8 + $0x140] sm:$0xff]  ;;  %v1193_v19 = vld [vmem:[#allocation8 + $0x810] sm:$0xff] }
 0x1e8   : > { %2124 = vmatmul.mubr.f32.vlgmr.msra.gmra.mxu1 %v6493_v29  ;;  %2220 = vmatprep.subr.mxu0 %v1567_v21  ;;  %v1486_v29 = vld [vmem:[#allocation8 + $0x1138] sm:$0xff]  ;;  %v1192_v21 = vld [vmem:[#allocation8 + $0x808] sm:$0xff] }
 0x1e9   : > { %2285 = vmatprep.subr.mxu1 %v1353_v22  ;;  %2221 = vmatpush2.msra.mxu0 %v1566_v24  ;;  %v1166_v22 = vld [vmem:[#allocation8 + $0x738] sm:$0xff]  ;;  %v947_v24 = vld [vmem:[#allocation8 + $0x60] sm:$0xff] }
 0x1ea   : > { %2286 = vmatpush1.msra.mxu1 %v1352_v25  ;;  %2222 = vmatprep.subr.mxu0 %v1540_v27  ;;  %v1165_v25 = vld [vmem:[#allocation8 + $0x730] sm:$0xff] }
 0x1eb   : > { %2287 = vmatprep.subr.mxu1 %v1326_v28  ;;  %4916 = vmatprep.mubr.msk.f32.mxu1 %vm805_vm0, %v6514_v10  ;;  %v1458_v10 = vld [vmem:[#allocation8 + $0x1058] sm:$0xff]  ;;  %v1569_v27 = vld [vmem:[#allocation8 + $0x13d0] sm:$0xff]  ;;  %v1139_v28 = vld [vmem:[#allocation8 + $0x660] sm:$0xff] }
 0x1ec   : > { %2223 = vmatpush2.msra.mxu0 %v1539_v30  ;;  %2288 = vmatpush1.msra.mxu1 %v1325_v31  ;;  %v1138_v30 = vld [vmem:[#allocation8 + $0x658] sm:$0xff] }
 0x1ed   : > { %2224 = vmatprep.subr.mxu0 %v1513_v33  ;;  %2130 = vmatmul.mubr.f32.gmra.mxu1 %v6517_v13  ;;  %v1431_v13 = vld [vmem:[#allocation8 + $0xf80] sm:$0xff]  ;;  %v1542_v31 = vld [vmem:[#allocation8 + $0x12f8] sm:$0xff]  ;;  %v1541_v33 = vld [vmem:[#allocation8 + $0x12f0] sm:$0xff] }
 0x1ee   : > { %2289 = vmatprep.subr.mxu1 %v1299_v34  ;;  %2225 = vmatpush2.msra.mxu0 %v1512_v26  ;;  %v1111_v34 = vld [vmem:[#allocation8 + $0x580] sm:$0xff]  ;;  %v6679_v26 = vld [vmem:[%s6435_s26 + $0x18] sm:$0xff] }
 0x1ef   : > { %2290 = vmatpush1.msra.mxu1 %v1298_v36  ;;  %2226 = vmatprep.subr.mxu0 %v1486_v29  ;;  %v1515_v36 = vld [vmem:[#allocation8 + $0x1220] sm:$0xff]  ;;  %v1085_v29 = vld [vmem:[#allocation8 + $0x4b0] sm:$0xff] }
 0x1f0   : > { %2291 = vmatprep.subr.mxu1 %v1272_v37  ;;  %4917 = vmatprep.mubr.msk.f32.mxu1 %vm805_vm0, %v6523_v20  ;;  %v1404_v20 = vld [vmem:[#allocation8 + $0xea8] sm:$0xff]  ;;  %v6684_v37 = vld [vmem:[%s6435_s26 + $0x10] sm:$0xff] }
 0x1f1   : > { %2227 = vmatpush2.msra.mxu0 %v1485_v38  ;;  %2292 = vmatpush1.msra.mxu1 %v1271_v39  ;;  %v1514_v38 = vld [vmem:[#allocation8 + $0x1218] sm:$0xff]  ;;  %v1084_v39 = vld [vmem:[#allocation8 + $0x4a8] sm:$0xff] }
 0x1f2   : > { %2228 = vmatprep.subr.mxu0 %v1459_v40  ;;  %2136 = vmatmul.mubr.f32.gmra.mxu1 %v6526_v23  ;;  %v1164_v23 = vld [vmem:[#allocation8 + $0x728] sm:$0xff] }
 0x1f3   : > { %2293 = vmatprep.subr.mxu1 %v1245_v41  ;;  %2229 = vmatpush2.msra.mxu0 %v1458_v10  ;;  %v1488_v40 = vld [vmem:[#allocation8 + $0x1148] sm:$0xff]  ;;  %v1058_v41 = vld [vmem:[#allocation8 + $0x3d8] sm:$0xff]  ;;  %v1487_v10 = vld [vmem:[#allocation8 + $0x1140] sm:$0xff] }
 0x1f4   : > { %2294 = vmatpush1.msra.mxu1 %v1244_v43  ;;  %2230 = vmatprep.subr.mxu0 %v1432_v44  ;;  %v1057_v43 = vld [vmem:[#allocation8 + $0x3d0] sm:$0xff]  ;;  %v6688_v44 = vld [vmem:[%s6435_s26 + $0x28] sm:$0xff] }
 0x1f5   : > { %2295 = vmatprep.subr.mxu1 %v1218_v46  ;;  %4918 = vmatprep.mubr.msk.f32.mxu1 %vm805_vm0, %v6532_v32  ;;  %v1137_v32 = vld [vmem:[#allocation8 + $0x650] sm:$0xff] }
 0x1f6   : > { %2231 = vmatpush2.msra.mxu0 %v1431_v13  ;;  %2296 = vmatpush1.msra.mxu1 %v1217_v47  ;;  %v1461_v46 = vld [vmem:[#allocation8 + $0x1070] sm:$0xff]  ;;  %v1031_v13 = vld [vmem:[#allocation8 + $0x300] sm:$0xff] }
 0x1f7   : > { %2232 = vmatprep.subr.mxu0 %v1405_v48  ;;  %2142 = vmatmul.mubr.f32.gmra.mxu1 %v6535_v35  ;;  %v1136_v35 = vld [vmem:[#allocation8 + $0x648] sm:$0xff]  ;;  %v6693_v47 = vld [vmem:[%s6435_s26 + $0x20] sm:$0xff] }
 0x1f8   : > { %2297 = vmatprep.subr.mxu1 %v1191_v49  ;;  %2233 = vmatpush2.msra.mxu0 %v1404_v20  ;;  %v1460_v48 = vld [vmem:[#allocation8 + $0x1068] sm:$0xff]  ;;  %v1030_v49 = vld [vmem:[#allocation8 + $0x2f8] sm:$0xff] }
 0x1f9   : > { %2298 = vmatpush1.msra.mxu1 %v1190_v50  ;;  %2234 = vmatprep.subr.mxu0 %v1378_v51  ;;  %v1434_v20 = vld [vmem:[#allocation8 + $0xf98] sm:$0xff]  ;;  %v1004_v50 = vld [vmem:[#allocation8 + $0x228] sm:$0xff]  ;;  %v1433_v51 = vld [vmem:[#allocation8 + $0xf90] sm:$0xff] }
 0x1fa   : > { %2299 = vmatprep.subr.mxu1 %v1164_v23  ;;  %4919 = vmatprep.mubr.msk.f32.mxu1 %vm805_vm0, %v6541_v42  ;;  %v1109_v42 = vld [vmem:[#allocation8 + $0x570] sm:$0xff]  ;;  %v1003_v23 = vld [vmem:[#allocation8 + $0x220] sm:$0xff] }
 0x1fb   : > { %2235 = vmatpush2.msra.mxu0 %v1377_v53  ;;  %4923 = vmatprep.mubr.msk.f32.mxu0 %vm805_vm0, %v6660_v57  ;;  %v6697_v53 = vld [vmem:[%s6435_s26 + $0x38] sm:$0xff] }
 0x1fc   : > { %2300 = vmatpush1.msra.mxu1 %v1163_v54  ;;  %2237 = vmatmul.mubr.f32.vlgmr.msra.gmra.mxu0 %v6666_v59  ;;  %v1407_v54 = vld [vmem:[#allocation8 + $0xec0] sm:$0xff] }
 0x1fd   : > { %2148 = vmatmul.mubr.f32.gmra.mxu1 %v6544_v45  ;;  %2301 = vmatprep.subr.mxu1 %v1137_v32  ;;  %v1082_v45 = vld [vmem:[#allocation8 + $0x498] sm:$0xff]  ;;  %v977_v32 = vld [vmem:[#allocation8 + $0x150] sm:$0xff] }
 0x1fe   : > { %2398 = vmatprep.subr.mxu0 %v1355_v56  ;;  %2302 = vmatpush1.msra.mxu1 %v1136_v35  ;;  %v6702_v56 = vld [vmem:[%s6435_s26 + $0x30] sm:$0xff]  ;;  %v1406_v35 = vld [vmem:[#allocation8 + $0xeb8] sm:$0xff] }
 0x1ff   : > { %2399 = vmatpush1.msra.mxu0 %v1354_v58  ;;  %2303 = vmatprep.subr.mxu1 %v1110_v60  ;;  %v976_v58 = vld [vmem:[#allocation8 + $0x148] sm:$0xff] }
 0x200   : > { %2400 = vmatprep.subr.mxu0 %v1328_v61  ;;  %4920 = vmatprep.mubr.msk.f32.mxu1 %vm805_vm0, %v6553_v52  ;;  %v1028_v52 = vld [vmem:[#allocation8 + $0x2e8] sm:$0xff]  ;;  %v950_v61 = vld [vmem:[#allocation8 + $0x78] sm:$0xff] }
 0x201   : > { %2304 = vmatpush1.msra.mxu1 %v1109_v42  ;;  %2401 = vmatpush1.msra.mxu0 %v1327_v63  ;;  %v1380_v60 = vld [vmem:[#allocation8 + $0xde8] sm:$0xff]  ;;  %v1379_v42 = vld [vmem:[#allocation8 + $0xde0] sm:$0xff] }
 0x202   : > { %2154 = vmatmul.mubr.f32.gmra.mxu1 %v6556_v55  ;;  %2305 = vmatprep.subr.mxu1 %v1083_v0  ;;  %v1002_v55 = vld [vmem:[#allocation8 + $0x218] sm:$0xff]  ;;  %v6706_v63 = vld [vmem:[%s6435_s26 + $0x48] sm:$0xff]  ;;  %v949_v0 = vld [vmem:[#allocation8 + $0x70] sm:$0xff] }
 0x203   : > { %2402 = vmatprep.subr.mxu0 %v1301_v2  ;;  %2306 = vmatpush1.msra.mxu1 %v1082_v45  ;;  %v6711_v2 = vld [vmem:[%s6435_s26 + $0x40] sm:$0xff] }
 0x204   : > { %2403 = vmatpush1.msra.mxu0 %v1300_v3  ;;  %2307 = vmatprep.subr.mxu1 %v1056_v4  ;;  %v1571_v45 = vld [vmem:[#allocation8 + $0x13e0] sm:$0xff]  ;;  %v1357_v3 = vld [vmem:[#allocation8 + $0xd30] sm:$0xff] }
 0x205   : > { %2404 = vmatprep.subr.mxu0 %v1274_v5  ;;  %4921 = vmatprep.mubr.msk.f32.mxu1 %vm805_vm0, %v6565_v62  ;;  %v974_v62 = vld [vmem:[#allocation8 + $0x138] sm:$0xff] }
 0x206   : > { %2308 = vmatpush1.msra.mxu1 %v1055_v6  ;;  %2405 = vmatpush1.msra.mxu0 %v1273_v7  ;;  %v1570_v5 = vld [vmem:[#allocation8 + $0x13d8] sm:$0xff]  ;;  %v1356_v6 = vld [vmem:[#allocation8 + $0xd28] sm:$0xff] }
 0x207   : > { %2160 = vmatmul.mubr.f32.gmra.mxu1 %v6568_v1  ;;  %2309 = vmatprep.subr.mxu1 %v1029_v9  ;;  %v948_v1 = vld [vmem:[#allocation8 + $0x68] sm:$0xff]  ;;  %v6714_v4 = vpop.f32.mrf.mxu0  ;;  %v1330_v9 = vld [vmem:[#allocation8 + $0xc58] sm:$0xff] }
 0x208   : > { %2406 = vmatprep.subr.mxu0 %v1247_v11  ;;  %2310 = vmatpush1.msra.mxu1 %v1028_v52  ;;  %7898 = vst [vmem:[#allocation41_spill] sm:$0xff] %v6714_v4  ;;  %v1544_v7 = vld [vmem:[#allocation8 + $0x1308] sm:$0xff]  ;;  %v1543_v11 = vld [vmem:[#allocation8 + $0x1300] sm:$0xff]  ;;  %v3479_v4 = vld [vmem:[%s7909_s4 + $0x148] sm:$0xff] }
 0x209   : > { %2407 = vmatpush1.msra.mxu0 %v1246_v14  ;;  %2311 = vmatprep.subr.mxu1 %v1002_v55  ;;  %v6719_v52 = vpop.f32.mrf.mxu0  ;;  %v6722_v14 = vld [vmem:[%s6435_s26 + $0x58] sm:$0xff]  ;;  %v1329_v55 = vld [vmem:[#allocation8 + $0xc50] sm:$0xff] }
 0x20a   : > { %2408 = vmatprep.subr.mxu0 %v1220_v15  ;;  %4922 = vmatprep.mubr.msk.f32.mxu1 %vm805_vm0, %v6577_v8  ;;  %v1568_v8 = vld [vmem:[#allocation8 + $0x13c8] sm:$0xff]  ;;  %7899 = vst [vmem:[#allocation42_spill] sm:$0xff] %v6719_v52  ;;  %v1517_v15 = vld [vmem:[#allocation8 + $0x1230] sm:$0xff] }
 0x20b   : > { %2312 = vmatpush1.msra.mxu1 %v1001_v16  ;;  %2409 = vmatpush1.msra.mxu0 %v1219_v17  ;;  %v6727_v16 = vld [vmem:[%s6435_s26 + $0x50] sm:$0xff]  ;;  %v1303_v17 = vld [vmem:[#allocation8 + $0xb80] sm:$0xff] }
 0x20c   : > { %2166 = vmatmul.mubr.f32.gmra.mxu1 %v6580_v12  ;;  %2313 = vmatprep.subr.mxu1 %v975_v18  ;;  %v1112_v12 = vld [vmem:[#allocation8 + $0x588] sm:$0xff] }
 0x20d   : > { %2410 = vmatprep.subr.mxu0 %v1193_v19  ;;  %2314 = vmatpush1.msra.mxu1 %v974_v62  ;;  %v1516_v19 = vld [vmem:[#allocation8 + $0x1228] sm:$0xff]  ;;  %v1302_v62 = vld [vmem:[#allocation8 + $0xb78] sm:$0xff] }
 0x20e   : > { %2411 = vmatpush1.msra.mxu0 %v1192_v21  ;;  %2315 = vmatprep.subr.mxu1 %v948_v1  ;;  %v1490_v21 = vld [vmem:[#allocation8 + $0x1158] sm:$0xff] }
 0x20f   : > { %2412 = vmatprep.subr.mxu0 %v1166_v22  ;;  %2316 = vmatpush1.msra.mxu1 %v947_v24  ;;  %v1276_v22 = vld [vmem:[#allocation8 + $0xaa8] sm:$0xff]  ;;  %v1489_v24 = vld [vmem:[#allocation8 + $0x1150] sm:$0xff] }
 0x210   : > { %2413 = vmatpush1.msra.mxu0 %v1165_v25  ;;  %2333 = vmatprep.subr.mxu1 %v1569_v27  ;;  %v6738_v25 = vld [vmem:[%s6435_s26 + $0x68] sm:$0xff]  ;;  %v1275_v27 = vld [vmem:[#allocation8 + $0xaa0] sm:$0xff] }
 0x211   : > { %2414 = vmatprep.subr.mxu0 %v1139_v28  ;;  %2334 = vmatpush2.msra.mxu1 %v1568_v8  ;;  %v1463_v28 = vld [vmem:[#allocation8 + $0x1080] sm:$0xff] }
 0x212   : > { %2415 = vmatpush1.msra.mxu0 %v1138_v30  ;;  %4924 = vmatprep.mubr.msk.f32.mxu0 %vm805_vm0, %v6679_v26  ;;  %v6745_v30 = vld [vmem:[%s6435_s26 + $0x60] sm:$0xff] }
 0x213   : > { %2335 = vmatprep.subr.mxu1 %v1542_v31  ;;  %2416 = vmatprep.subr.mxu0 %v1112_v12  ;;  %v1249_v31 = vld [vmem:[#allocation8 + $0x9d0] sm:$0xff]  ;;  %v1462_v12 = vld [vmem:[#allocation8 + $0x1078] sm:$0xff] }
 0x214   : > { %2243 = vmatmul.mubr.f32.gmra.mxu0 %v6684_v37  ;;  %2336 = vmatpush2.msra.mxu1 %v1541_v33  ;;  %v1248_v33 = vld [vmem:[#allocation8 + $0x9c8] sm:$0xff] }
 0x215   : > { %2417 = vmatpush1.msra.mxu0 %v1111_v34  ;;  %2337 = vmatprep.subr.mxu1 %v1515_v36  ;;  %v1436_v36 = vld [vmem:[#allocation8 + $0xfa8] sm:$0xff] }
 0x216   : > { %2418 = vmatprep.subr.mxu0 %v1085_v29  ;;  %2338 = vmatpush2.msra.mxu1 %v1514_v38  ;;  %v1222_v29 = vld [vmem:[#allocation8 + $0x8f8] sm:$0xff]  ;;  %v1435_v38 = vld [vmem:[#allocation8 + $0xfa0] sm:$0xff] }
 0x217   : > { %2419 = vmatpush1.msra.mxu0 %v1084_v39  ;;  %4925 = vmatprep.mubr.msk.f32.mxu0 %vm805_vm0, %v6688_v44 }
 0x218   : > { %2339 = vmatprep.subr.mxu1 %v1488_v40  ;;  %2420 = vmatprep.subr.mxu0 %v1058_v41  ;;  %v6756_v40 = vld [vmem:[%s6435_s26 + $0x78] sm:$0xff]  ;;  %v1221_v41 = vld [vmem:[#allocation8 + $0x8f0] sm:$0xff] }
 0x219   : > { %2249 = vmatmul.mubr.f32.gmra.mxu0 %v6693_v47  ;;  %2340 = vmatpush2.msra.mxu1 %v1487_v10  ;;  %v1409_v10 = vld [vmem:[#allocation8 + $0xed0] sm:$0xff] }
 0x21a   : > { %2421 = vmatpush1.msra.mxu0 %v1057_v43  ;;  %2341 = vmatprep.subr.mxu1 %v1461_v46  ;;  %v6761_v43 = vld [vmem:[%s6435_s26 + $0x70] sm:$0xff]  ;;  %v1195_v46 = vld [vmem:[#allocation8 + $0x820] sm:$0xff] }
 0x21b   : > { %2422 = vmatprep.subr.mxu0 %v1031_v13  ;;  %2342 = vmatpush2.msra.mxu1 %v1460_v48 }
 0x21c   : > { %2423 = vmatpush1.msra.mxu0 %v1030_v49  ;;  %4926 = vmatprep.mubr.msk.f32.mxu0 %vm805_vm0, %v6697_v53  ;;  %v1408_v49 = vld [vmem:[#allocation8 + $0xec8] sm:$0xff] }
 0x21d   : > { %2343 = vmatprep.subr.mxu1 %v1434_v20  ;;  %2424 = vmatprep.subr.mxu0 %v1004_v50  ;;  %v1194_v20 = vld [vmem:[#allocation8 + $0x818] sm:$0xff] }
 0x21e   : > { %2255 = vmatmul.mubr.f32.gmra.mxu0 %v6702_v56  ;;  %2344 = vmatpush2.msra.mxu1 %v1433_v51  ;;  %v1382_v50 = vld [vmem:[#allocation8 + $0xdf8] sm:$0xff]  ;;  %v1168_v51 = vld [vmem:[#allocation8 + $0x748] sm:$0xff] }
 0x21f   : > { %2425 = vmatpush1.msra.mxu0 %v1003_v23  ;;  %2345 = vmatprep.subr.mxu1 %v1407_v54  ;;  %v1381_v23 = vld [vmem:[#allocation8 + $0xdf0] sm:$0xff]  ;;  %v1167_v54 = vld [vmem:[#allocation8 + $0x740] sm:$0xff] }
 0x220   : > { %2426 = vmatprep.subr.mxu0 %v977_v32  ;;  %2346 = vmatpush2.msra.mxu1 %v1406_v35 }
 0x221   : > { %2427 = vmatpush1.msra.mxu0 %v976_v58  ;;  %4927 = vmatprep.mubr.msk.f32.mxu0 %vm805_vm0, %v6706_v63  ;;  %v1141_v58 = vld [vmem:[#allocation8 + $0x670] sm:$0xff] }
 0x222   : > { %2347 = vmatprep.subr.mxu1 %v1380_v60  ;;  %2428 = vmatprep.subr.mxu0 %v950_v61  ;;  %v1359_v60 = vld [vmem:[#allocation8 + $0xd40] sm:$0xff] }
 0x223   : > { %2261 = vmatmul.mubr.f32.gmra.mxu0 %v6711_v2  ;;  %2348 = vmatpush2.msra.mxu1 %v1379_v42  ;;  %v1140_v42 = vld [vmem:[#allocation8 + $0x668] sm:$0xff] }
 0x224   : > { %4931 = vmatprep.mubr.msk.f32.mxu1 %vm805_vm0, %v6660_v57  ;;  %2429 = vmatpush1.msra.mxu0 %v949_v0  ;;  %v1673_v48 = vpop.f32.mrf.mxu1  ;;  %v1358_v0 = vld [vmem:[#allocation8 + $0xd38] sm:$0xff] }
 0x225   : > { %2350 = vmatmul.mubr.f32.vlgmr.msra.gmra.mxu1 %v6666_v59  ;;  %2446 = vmatprep.subr.mxu0 %v1571_v45 }
 0x226   : > { %2511 = vmatprep.subr.mxu1 %v1357_v3  ;;  %2447 = vmatpush2.msra.mxu0 %v1570_v5  ;;  %v1675_v32 = vpop.f32.mrf.mxu1  ;;  %v1114_v5 = vld [vmem:[#allocation8 + $0x598] sm:$0xff] }
 0x227   : > { %2512 = vmatpush1.msra.mxu1 %v1356_v6  ;;  %4928 = vmatprep.mubr.msk.f32.mxu0 %vm805_vm0, %v6722_v14  ;;  %v3181_v45 = vmax.f32 %v1673_v48, %v1675_v32  ;;  %v1332_v6 = vld [vmem:[#allocation8 + $0xc68] sm:$0xff]  ;;  %v1223_v48 = vld [vmem:[#allocation8 + $0x900] sm:$0xff]  ;;  %v1170_v32 = vld [vmem:[#allocation8 + $0x758] sm:$0xff] }
 0x228   : > { %2448 = vmatprep.subr.mxu0 %v1544_v7  ;;  %2513 = vmatprep.subr.mxu1 %v1330_v9  ;;  %v1113_v7 = vld [vmem:[#allocation8 + $0x590] sm:$0xff] }
 0x229   : > { %2267 = vmatmul.mubr.f32.gmra.mxu0 %v6727_v16  ;;  %v6730_v18 = vpop.f32.mrf.mxu0  ;;  %4932 = vmatprep.mubr.msk.f32.mxu1 %vm805_vm0, %v6679_v26 }
 0x22a   : > { %7900 = vst [vmem:[#allocation43_spill] sm:$0xff] %v6730_v18  ;;  %2449 = vmatpush2.msra.mxu0 %v1543_v11  ;;  %2514 = vmatpush1.msra.mxu1 %v1329_v55  ;;  %v1331_v11 = vld [vmem:[#allocation8 + $0xc60] sm:$0xff] }
 0x22b   : > { %2450 = vmatprep.subr.mxu0 %v1517_v15  ;;  %v6734_v1 = vpop.f32.mrf.mxu0  ;;  %2356 = vmatmul.mubr.f32.gmra.mxu1 %v6684_v37  ;;  %v1087_v15 = vld [vmem:[#allocation8 + $0x4c0] sm:$0xff] }
 0x22c   : > { %7901 = vst [vmem:[#allocation44_spill] sm:$0xff] %v6734_v1  ;;  %2515 = vmatprep.subr.mxu1 %v1303_v17  ;;  %2451 = vmatpush2.msra.mxu0 %v1516_v19  ;;  %v1305_v17 = vld [vmem:[#allocation8 + $0xb90] sm:$0xff]  ;;  %v1086_v19 = vld [vmem:[#allocation8 + $0x4b8] sm:$0xff]  ;;  %v3375_v1 = vlaneseq }
 0x22d   : > { %2516 = vmatpush1.msra.mxu1 %v1302_v62  ;;  %4929 = vmatprep.mubr.msk.f32.mxu0 %vm805_vm0, %v6738_v25  ;;  %v1304_v62 = vld [vmem:[#allocation8 + $0xb88] sm:$0xff] }
 0x22e   : > { %2452 = vmatprep.subr.mxu0 %v1490_v21  ;;  %v6742_v8 = vpop.f32.mrf.mxu0  ;;  %2517 = vmatprep.subr.mxu1 %v1276_v22  ;;  %v1060_v22 = vld [vmem:[#allocation8 + $0x3e8] sm:$0xff] }
 0x22f   : > { %7902 = vst [vmem:[#allocation45_spill] sm:$0xff] %v6742_v8  ;;  %2273 = vmatmul.mubr.f32.gmra.mxu0 %v6745_v30  ;;  %4933 = vmatprep.mubr.msk.f32.mxu1 %vm805_vm0, %v6688_v44  ;;  %v3481_v8 = vld [vmem:[%s7909_s4 + $0x158] sm:$0xff] }
 0x230   : > { %2453 = vmatpush2.msra.mxu0 %v1489_v24  ;;  %v6750_v34 = vpop.f32.mrf.mxu0  ;;  %2518 = vmatpush1.msra.mxu1 %v1275_v27  ;;  %v1278_v24 = vld [vmem:[#allocation8 + $0xab8] sm:$0xff]  ;;  %v1059_v27 = vld [vmem:[#allocation8 + $0x3e0] sm:$0xff] }
 0x231   : > { %7903 = vst [vmem:[#allocation46_spill] sm:$0xff] %v6750_v34  ;;  %2454 = vmatprep.subr.mxu0 %v1463_v28  ;;  %2362 = vmatmul.mubr.f32.gmra.mxu1 %v6693_v47  ;;  %v1277_v28 = vld [vmem:[#allocation8 + $0xab0] sm:$0xff] }
 0x232   : > { %2519 = vmatprep.subr.mxu1 %v1249_v31  ;;  %2455 = vmatpush2.msra.mxu0 %v1462_v12  ;;  %v1033_v12 = vld [vmem:[#allocation8 + $0x310] sm:$0xff] }
 0x233   : > { %2520 = vmatpush1.msra.mxu1 %v1248_v33  ;;  %v6753_v39 = vpop.f32.mrf.mxu0  ;;  %4930 = vmatprep.mubr.msk.f32.mxu0 %vm805_vm0, %v6756_v40  ;;  %v1251_v33 = vld [vmem:[#allocation8 + $0x9e0] sm:$0xff]  ;;  %v3482_v34 = vld [vmem:[%s7909_s4 + $0x160] sm:$0xff] }
 0x234   : > { %7904 = vst [vmem:[#allocation47_spill] sm:$0xff] %v6753_v39  ;;  %2456 = vmatprep.subr.mxu0 %v1436_v36  ;;  %2521 = vmatprep.subr.mxu1 %v1222_v29  ;;  %v1032_v36 = vld [vmem:[#allocation8 + $0x308] sm:$0xff]  ;;  %v1250_v29 = vld [vmem:[#allocation8 + $0x9d8] sm:$0xff] }
 0x235   : > { %2279 = vmatmul.mubr.f32.gmra.mxu0 %v6761_v43  ;;  %v6764_v13 = vpop.f32.mrf.mxu0  ;;  %4934 = vmatprep.mubr.msk.f32.mxu1 %vm805_vm0, %v6697_v53 }
 0x236   : > { %7905 = vst [vmem:[#allocation48_spill] sm:$0xff] %v6764_v13  ;;  %2457 = vmatpush2.msra.mxu0 %v1435_v38  ;;  %2522 = vmatpush1.msra.mxu1 %v1221_v41  ;;  %v1006_v38 = vld [vmem:[#allocation8 + $0x238] sm:$0xff]  ;;  %v1224_v41 = vld [vmem:[#allocation8 + $0x908] sm:$0xff] }
 0x237   : > { %2458 = vmatprep.subr.mxu0 %v1409_v10  ;;  %2368 = vmatmul.mubr.f32.gmra.mxu1 %v6702_v56 }
 0x238   : > { %2523 = vmatprep.subr.mxu1 %v1195_v46  ;;  %2459 = vmatpush2.msra.mxu0 %v1408_v49  ;;  %v1005_v46 = vld [vmem:[#allocation8 + $0x230] sm:$0xff]  ;;  %v979_v49 = vld [vmem:[#allocation8 + $0x160] sm:$0xff] }
 0x239   : > { %2524 = vmatpush1.msra.mxu1 %v1194_v20  ;;  %v1786_v35 = vpop.f32.mrf.mxu0  ;;  %2460 = vmatprep.subr.mxu0 %v1382_v50  ;;  %v1197_v20 = vld [vmem:[#allocation8 + $0x830] sm:$0xff]  ;;  %v978_v50 = vld [vmem:[#allocation8 + $0x158] sm:$0xff] }
 0x23a   : > { %2525 = vmatprep.subr.mxu1 %v1168_v51  ;;  %4935 = vmatprep.mubr.msk.f32.mxu1 %vm805_vm0, %v6706_v63  ;;  %v1196_v51 = vld [vmem:[#allocation8 + $0x828] sm:$0xff] }
 0x23b   : > { %2461 = vmatpush2.msra.mxu0 %v1381_v23  ;;  %v1788_v61 = vpop.f32.mrf.mxu0  ;;  %4939 = vmatprep.mubr.msk.f32.mxu0 %vm805_vm0, %v6660_v57 }
 0x23c   : > { %2526 = vmatpush1.msra.mxu1 %v1167_v54  ;;  %v3189_v3 = vmax.f32 %v1786_v35, %v1788_v61  ;;  %2463 = vmatmul.mubr.f32.vlgmr.msra.gmra.mxu0 %v6666_v59  ;;  %v952_v54 = vld [vmem:[#allocation8 + $0x88] sm:$0xff]  ;;  %v951_v35 = vld [vmem:[#allocation8 + $0x80] sm:$0xff] }
 0x23d   : > { %2374 = vmatmul.mubr.f32.gmra.mxu1 %v6711_v2  ;;  %2527 = vmatprep.subr.mxu1 %v1141_v58  ;;  %v1169_v58 = vld [vmem:[#allocation8 + $0x750] sm:$0xff]  ;;  %v1143_v61 = vld [vmem:[#allocation8 + $0x680] sm:$0xff] }
 0x23e   : > { %2624 = vmatprep.subr.mxu0 %v1359_v60  ;;  %v6775_v9 = vmax.f32 %v3181_v45, %v3189_v3  ;;  %2528 = vmatpush1.msra.mxu1 %v1140_v42  ;;  %v1573_v60 = vld [vmem:[#allocation8 + $0x13f0] sm:$0xff]  ;;  %v1572_v42 = vld [vmem:[#allocation8 + $0x13e8] sm:$0xff] }
 0x23f   : > { %2625 = vmatpush1.msra.mxu0 %v1358_v0  ;;  %v6777_v55 = vpop.f32.mrf.mxu1  ;;  %2529 = vmatprep.subr.mxu1 %v1114_v5  ;;  %v1142_v0 = vld [vmem:[#allocation8 + $0x678] sm:$0xff] }
 0x240   : > { %2626 = vmatprep.subr.mxu0 %v1332_v6  ;;  %4936 = vmatprep.mubr.msk.f32.mxu1 %vm805_vm0, %v6722_v14  ;;  %v1546_v5 = vld [vmem:[#allocation8 + $0x1318] sm:$0xff] }
 0x241   : > { %2530 = vmatpush1.msra.mxu1 %v1113_v7  ;;  %v6781_v21 = vpop.f32.mrf.mxu1  ;;  %2627 = vmatpush1.msra.mxu0 %v1331_v11  ;;  %v1116_v7 = vld [vmem:[#allocation8 + $0x5a8] sm:$0xff] }
 0x242   : > { %2380 = vmatmul.mubr.f32.gmra.mxu1 %v6727_v16  ;;  %2531 = vmatprep.subr.mxu1 %v1087_v15  ;;  %v3182_v6 = vmax.f32 %v6777_v55, %v6781_v21  ;;  %v1545_v15 = vld [vmem:[#allocation8 + $0x1310] sm:$0xff]  ;;  %v1518_v55 = vld [vmem:[#allocation8 + $0x1238] sm:$0xff]  ;;  %v1088_v21 = vld [vmem:[#allocation8 + $0x4c8] sm:$0xff] }
 0x243   : > { %2628 = vmatprep.subr.mxu0 %v1305_v17  ;;  %2532 = vmatpush1.msra.mxu1 %v1086_v19  ;;  %v1115_v17 = vld [vmem:[#allocation8 + $0x5a0] sm:$0xff] }
 0x244   : > { %2629 = vmatpush1.msra.mxu0 %v1304_v62  ;;  %v6784_v31 = vpop.f32.mrf.mxu1  ;;  %2533 = vmatprep.subr.mxu1 %v1060_v22  ;;  %v1519_v62 = vld [vmem:[#allocation8 + $0x1240] sm:$0xff]  ;;  %v1089_v22 = vld [vmem:[#allocation8 + $0x4d0] sm:$0xff] }
 0x245   : > { %2630 = vmatprep.subr.mxu0 %v1278_v24  ;;  %4937 = vmatprep.mubr.msk.f32.mxu1 %vm805_vm0, %v6738_v25 }
 0x246   : > { %2534 = vmatpush1.msra.mxu1 %v1059_v27  ;;  %2631 = vmatpush1.msra.mxu0 %v1277_v28  ;;  %v6789_v10 = vpop.f32.mrf.mxu1  ;;  %v1492_v28 = vld [vmem:[#allocation8 + $0x1168] sm:$0xff] }
 0x247   : > { %2386 = vmatmul.mubr.f32.gmra.mxu1 %v6745_v30  ;;  %2535 = vmatprep.subr.mxu1 %v1033_v12 }
 0x248   : > { %2632 = vmatprep.subr.mxu0 %v1251_v33  ;;  %2536 = vmatpush1.msra.mxu1 %v1032_v36  ;;  %v1062_v33 = vld [vmem:[#allocation8 + $0x3f8] sm:$0xff]  ;;  %v3183_v36 = vmax.f32 %v6784_v31, %v6789_v10 }
 0x249   : > { %2633 = vmatpush1.msra.mxu0 %v1250_v29  ;;  %2537 = vmatprep.subr.mxu1 %v1006_v38  ;;  %v6793_v23 = vpop.f32.mrf.mxu1  ;;  %v1491_v29 = vld [vmem:[#allocation8 + $0x1160] sm:$0xff]  ;;  %v1061_v38 = vld [vmem:[#allocation8 + $0x3f0] sm:$0xff]  ;;  %v1438_v31 = vld [vmem:[#allocation8 + $0xfb8] sm:$0xff] }
 0x24a   : > { %2634 = vmatprep.subr.mxu0 %v1224_v41  ;;  %4938 = vmatprep.mubr.msk.f32.mxu1 %vm805_vm0, %v6756_v40 }
 0x24b   : > { %2538 = vmatpush1.msra.mxu1 %v1005_v46  ;;  %2635 = vmatpush1.msra.mxu0 %v1223_v48  ;;  %v6796_v3 = vpop.f32.mrf.mxu1  ;;  %v1465_v48 = vld [vmem:[#allocation8 + $0x1090] sm:$0xff] }
 0x24c   : > { %2392 = vmatmul.mubr.f32.gmra.mxu1 %v6761_v43  ;;  %2539 = vmatprep.subr.mxu1 %v979_v49  ;;  %v1035_v49 = vld [vmem:[#allocation8 + $0x320] sm:$0xff] }
 0x24d   : > { %2636 = vmatprep.subr.mxu0 %v1197_v20  ;;  %2540 = vmatpush1.msra.mxu1 %v978_v50  ;;  %v1464_v50 = vld [vmem:[#allocation8 + $0x1088] sm:$0xff] }
 0x24e   : > { %2637 = vmatpush1.msra.mxu0 %v1196_v51  ;;  %2541 = vmatprep.subr.mxu1 %v952_v54  ;;  %v6802_v24 = vpop.f32.mrf.mxu1  ;;  %v1034_v51 = vld [vmem:[#allocation8 + $0x318] sm:$0xff]  ;;  %v1008_v54 = vld [vmem:[#allocation8 + $0x248] sm:$0xff] }
 0x24f   : > { %2638 = vmatprep.subr.mxu0 %v1170_v32  ;;  %v1792_v45 = vpop.f32.mrf.mxu0  ;;  %2542 = vmatpush1.msra.mxu1 %v951_v35 }
 0x250   : > { %2639 = vmatpush1.msra.mxu0 %v1169_v58  ;;  %2559 = vmatprep.subr.mxu1 %v1573_v60  ;;  %v6809_v46 = vpop.f32.mrf.mxu1  ;;  %v1437_v58 = vld [vmem:[#allocation8 + $0xfb0] sm:$0xff]  ;;  %v1007_v60 = vld [vmem:[#allocation8 + $0x240] sm:$0xff] }
 0x251   : > { %2640 = vmatprep.subr.mxu0 %v1143_v61  ;;  %v1794_v11 = vpop.f32.mrf.mxu0  ;;  %2560 = vmatpush2.msra.mxu1 %v1572_v42  ;;  %v3184_v61 = vmax.f32 %v6793_v23, %v6796_v3  ;;  %v1411_v42 = vld [vmem:[#allocation8 + $0xee0] sm:$0xff]  ;;  %v954_v23 = vld [vmem:[#allocation8 + $0x98] sm:$0xff] }
 0x252   : > { %2641 = vmatpush1.msra.mxu0 %v1142_v0  ;;  %v3190_v19 = vmax.f32 %v1792_v45, %v1794_v11  ;;  %4940 = vmatprep.mubr.msk.f32.mxu0 %vm805_vm0, %v6679_v26  ;;  %v981_v0 = vld [vmem:[#allocation8 + $0x170] sm:$0xff]  ;;  %v1384_v11 = vld [vmem:[#allocation8 + $0xe08] sm:$0xff] }
 0x253   : > { %2561 = vmatprep.subr.mxu1 %v1546_v5  ;;  %2642 = vmatprep.subr.mxu0 %v1116_v7  ;;  %v1410_v5 = vld [vmem:[#allocation8 + $0xed8] sm:$0xff] }
 0x254   : > { %2469 = vmatmul.mubr.f32.gmra.mxu0 %v6684_v37  ;;  %v6805_v27 = vmax.f32 %v3182_v6, %v3190_v19  ;;  %2562 = vmatpush2.msra.mxu1 %v1545_v15  ;;  %v6816_v35 = vpop.f32.mrf.mxu1  ;;  %v980_v6 = vld [vmem:[#allocation8 + $0x168] sm:$0xff] }
 0x255   : > { %2643 = vmatpush1.msra.mxu0 %v1115_v17  ;;  %v1798_v12 = vpop.f32.mrf.mxu0  ;;  %2563 = vmatprep.subr.mxu1 %v1519_v62  ;;  %v1383_v17 = vld [vmem:[#allocation8 + $0xe00] sm:$0xff]  ;;  %v953_v62 = vld [vmem:[#allocation8 + $0x90] sm:$0xff] }
 0x256   : > { %2644 = vmatprep.subr.mxu0 %v1089_v22  ;;  %2564 = vmatpush2.msra.mxu1 %v1518_v55  ;;  %v1705_v15 = vpop.f32.mrf.mxu1  ;;  %v3185_v22 = vmax.f32 %v6802_v24, %v6809_v46  ;;  %v1575_v55 = vld [vmem:[#allocation8 + $0x1400] sm:$0xff]  ;;  %v1334_v24 = vld [vmem:[#allocation8 + $0xc78] sm:$0xff] }
 0x257   : > { %2645 = vmatpush1.msra.mxu0 %v1088_v21  ;;  %v1800_v41 = vpop.f32.mrf.mxu0  ;;  %4941 = vmatprep.mubr.msk.f32.mxu0 %vm805_vm0, %v6688_v44  ;;  %v1361_v21 = vld [vmem:[#allocation8 + $0xd50] sm:$0xff]  ;;  %v1547_v46 = vld [vmem:[#allocation8 + $0x1320] sm:$0xff] }
 0x258   : > { %2565 = vmatprep.subr.mxu1 %v1492_v28  ;;  %v3191_v20 = vmax.f32 %v1798_v12, %v1800_v41  ;;  %2646 = vmatprep.subr.mxu0 %v1062_v33  ;;  %v1574_v33 = vld [vmem:[#allocation8 + $0x13f8] sm:$0xff] }
 0x259   : > { %2475 = vmatmul.mubr.f32.gmra.mxu0 %v6693_v47  ;;  %2566 = vmatpush2.msra.mxu1 %v1491_v29 }
 0x25a   : > { %2647 = vmatpush1.msra.mxu0 %v1061_v38  ;;  %v6814_v10 = vmax.f32 %v3183_v36, %v3191_v20  ;;  %2567 = vmatprep.subr.mxu1 %v1465_v48  ;;  %v6830_v12 = vpop.f32.mrf.mxu1  ;;  %v1360_v36 = vld [vmem:[#allocation8 + $0xd48] sm:$0xff]  ;;  %v1521_v20 = vld [vmem:[#allocation8 + $0x1250] sm:$0xff] }
 0x25b   : > { %2648 = vmatprep.subr.mxu0 %v1035_v49  ;;  %v1804_v32 = vpop.f32.mrf.mxu0  ;;  %2568 = vmatpush2.msra.mxu1 %v1464_v50  ;;  %v1548_v38 = vld [vmem:[#allocation8 + $0x1328] sm:$0xff]  ;;  %v3186_v50 = vmax.f32 %v6816_v35, %v1705_v15 }
 0x25c   : > { %2649 = vmatpush1.msra.mxu0 %v1034_v51  ;;  %4942 = vmatprep.mubr.msk.f32.mxu0 %vm805_vm0, %v6697_v53  ;;  %v1711_v49 = vpop.f32.mrf.mxu1  ;;  %v1280_v35 = vld [vmem:[#allocation8 + $0xac8] sm:$0xff] }
 0x25d   : > { %2569 = vmatprep.subr.mxu1 %v1438_v31  ;;  %v1806_v45 = vpop.f32.mrf.mxu0  ;;  %2650 = vmatprep.subr.mxu0 %v1008_v54  ;;  %v1520_v31 = vld [vmem:[#allocation8 + $0x1248] sm:$0xff]  ;;  %v1306_v54 = vld [vmem:[#allocation8 + $0xb98] sm:$0xff] }
 0x25e   : > { %2481 = vmatmul.mubr.f32.gmra.mxu0 %v6702_v56  ;;  %v3192_v7 = vmax.f32 %v1804_v32, %v1806_v45  ;;  %2570 = vmatpush2.msra.mxu1 %v1437_v58  ;;  %v1494_v58 = vld [vmem:[#allocation8 + $0x1178] sm:$0xff]  ;;  %v3187_v45 = vmax.f32 %v6830_v12, %v1711_v49  ;;  %v1439_v12 = vld [vmem:[#allocation8 + $0xfc0] sm:$0xff] }
 0x25f   : > { %2651 = vmatpush1.msra.mxu0 %v1007_v60  ;;  %2571 = vmatprep.subr.mxu1 %v1411_v42  ;;  %v1198_v49 = vld [vmem:[#allocation8 + $0x838] sm:$0xff] }
 0x260   : > { %2652 = vmatprep.subr.mxu0 %v981_v0  ;;  %v6823_v3 = vmax.f32 %v3184_v61, %v3192_v7  ;;  %2572 = vmatpush2.msra.mxu1 %v1410_v5  ;;  %v1715_v60 = vpop.f32.mrf.mxu1  ;;  %v1493_v0 = vld [vmem:[#allocation8 + $0x1170] sm:$0xff]  ;;  %v1279_v5 = vld [vmem:[#allocation8 + $0xac0] sm:$0xff] }
 0x261   : > { %2653 = vmatpush1.msra.mxu0 %v980_v6  ;;  %v1810_v19 = vpop.f32.mrf.mxu0  ;;  %4943 = vmatprep.mubr.msk.f32.mxu0 %vm805_vm0, %v6706_v63  ;;  %v1467_v6 = vld [vmem:[#allocation8 + $0x10a0] sm:$0xff] }
 0x262   : > { %2573 = vmatprep.subr.mxu1 %v1384_v11  ;;  %2654 = vmatprep.subr.mxu0 %v954_v23  ;;  %v1253_v11 = vld [vmem:[#allocation8 + $0x9f0] sm:$0xff]  ;;  %v1717_v23 = vpop.f32.mrf.mxu1 }
 0x263   : > { %2487 = vmatmul.mubr.f32.gmra.mxu0 %v6711_v2  ;;  %v1812_v28 = vpop.f32.mrf.mxu0  ;;  %2574 = vmatpush2.msra.mxu1 %v1383_v17  ;;  %v1466_v17 = vld [vmem:[#allocation8 + $0x1098] sm:$0xff] }
 0x264   : > { %4947 = vmatprep.mubr.msk.f32.mxu1 %vm805_vm0, %v6660_v57  ;;  %v3193_v29 = vmax.f32 %v1810_v19, %v1812_v28  ;;  %2655 = vmatpush1.msra.mxu0 %v953_v62  ;;  %v1333_v57 = vld [vmem:[#allocation8 + $0xc70] sm:$0xff]  ;;  %v1252_v19 = vld [vmem:[#allocation8 + $0x9e8] sm:$0xff]  ;;  %v3188_v28 = vmax.f32 %v1715_v60, %v1717_v23 }
 0x265   : > { %2576 = vmatmul.mubr.f32.vlgmr.msra.gmra.mxu1 %v6666_v59  ;;  %2672 = vmatprep.subr.mxu0 %v1575_v55  ;;  %v1307_v59 = vld [vmem:[#allocation8 + $0xba0] sm:$0xff]  ;;  %v1440_v62 = vld [vmem:[#allocation8 + $0xfc8] sm:$0xff]  ;;  %v1117_v23 = vld [vmem:[#allocation8 + $0x5b0] sm:$0xff] }
 0x266   : > { %2737 = vmatprep.subr.mxu1 %v1361_v21  ;;  %v6835_v41 = vmax.f32 %v3185_v22, %v3193_v29  ;;  %2673 = vmatpush2.msra.mxu0 %v1574_v33  ;;  %v1816_v48 = vpop.f32.mrf.mxu0  ;;  %v1226_v21 = vld [vmem:[#allocation8 + $0x918] sm:$0xff]  ;;  %v1413_v29 = vld [vmem:[#allocation8 + $0xef0] sm:$0xff] }
 0x267   : > { %2738 = vmatpush1.msra.mxu1 %v1360_v36  ;;  %4944 = vmatprep.mubr.msk.f32.mxu0 %vm805_vm0, %v6722_v14  ;;  %v1225_v36 = vld [vmem:[#allocation8 + $0x910] sm:$0xff] }
 0x268   : > { %2674 = vmatprep.subr.mxu0 %v1548_v38  ;;  %2739 = vmatprep.subr.mxu1 %v1334_v24  ;;  %v1818_v51 = vpop.f32.mrf.mxu0  ;;  %v1199_v24 = vld [vmem:[#allocation8 + $0x840] sm:$0xff] }
 0x269   : > { %2493 = vmatmul.mubr.f32.gmra.mxu0 %v6727_v16  ;;  %4948 = vmatprep.mubr.msk.f32.mxu1 %vm805_vm0, %v6679_v26  ;;  %v3194_v32 = vmax.f32 %v1816_v48, %v1818_v51  ;;  %v1412_v48 = vld [vmem:[#allocation8 + $0xee8] sm:$0xff]  ;;  %v1171_v51 = vld [vmem:[#allocation8 + $0x760] sm:$0xff] }
 0x26a   : > { %2675 = vmatpush2.msra.mxu0 %v1547_v46  ;;  %2740 = vmatpush1.msra.mxu1 %v1333_v57  ;;  %v1899_v46 = vpop.f32.mrf.mxu1 }
 0x26b   : > { %2676 = vmatprep.subr.mxu0 %v1521_v20  ;;  %2582 = vmatmul.mubr.f32.gmra.mxu1 %v6684_v37  ;;  %v6844_v61 = vmax.f32 %v3186_v50, %v3194_v32  ;;  %v1386_v20 = vld [vmem:[#allocation8 + $0xe18] sm:$0xff]  ;;  %v1172_v50 = vld [vmem:[#allocation8 + $0x768] sm:$0xff]  ;;  %v1145_v32 = vld [vmem:[#allocation8 + $0x690] sm:$0xff] }
 0x26c   : > { %2741 = vmatprep.subr.mxu1 %v1307_v59  ;;  %v1822_v42 = vpop.f32.mrf.mxu0  ;;  %2677 = vmatpush2.msra.mxu0 %v1520_v31  ;;  %v1385_v59 = vld [vmem:[#allocation8 + $0xe10] sm:$0xff]  ;;  %v1901_v31 = vpop.f32.mrf.mxu1 }
 0x26d   : > { %2742 = vmatpush1.msra.mxu1 %v1306_v54  ;;  %4945 = vmatprep.mubr.msk.f32.mxu0 %vm805_vm0, %v6738_v25 }
 0x26e   : > { %2678 = vmatprep.subr.mxu0 %v1494_v58  ;;  %v1824_v7 = vpop.f32.mrf.mxu0  ;;  %2743 = vmatprep.subr.mxu1 %v1280_v35  ;;  %v1363_v58 = vld [vmem:[#allocation8 + $0xd60] sm:$0xff]  ;;  %v6866_v35 = vld [vmem:[%s6435_s26 + $0x8] sm:$0xff] }
 0x26f   : > { %2499 = vmatmul.mubr.f32.gmra.mxu0 %v6745_v30  ;;  %v3195_v15 = vmax.f32 %v1822_v42, %v1824_v7  ;;  %4949 = vmatprep.mubr.msk.f32.mxu1 %vm805_vm0, %v6688_v44  ;;  %v1144_v42 = vld [vmem:[#allocation8 + $0x688] sm:$0xff]  ;;  %v1118_v7 = vld [vmem:[#allocation8 + $0x5b8] sm:$0xff] }
 0x270   : > { %2679 = vmatpush2.msra.mxu0 %v1493_v0  ;;  %2744 = vmatpush1.msra.mxu1 %v1279_v5  ;;  %v1362_v0 = vld [vmem:[#allocation8 + $0xd58] sm:$0xff] }
 0x271   : > { %2680 = vmatprep.subr.mxu0 %v1467_v6  ;;  %v6852_v22 = vmax.f32 %v3187_v45, %v3195_v15  ;;  %v1828_v55 = vpop.f32.mrf.mxu0  ;;  %2588 = vmatmul.mubr.f32.gmra.mxu1 %v6693_v47  ;;  %v3197_v45 = vmax.f32 %v1899_v46, %v1901_v31  ;;  %v6872_v6 = vld [vmem:[%s6435_s26] sm:$0xff]  ;;  %v1064_v46 = vld [vmem:[#allocation8 + $0x408] sm:$0xff] }
 0x272   : > { %2745 = vmatprep.subr.mxu1 %v1253_v11  ;;  %2681 = vmatpush2.msra.mxu0 %v1466_v17  ;;  %v1336_v11 = vld [vmem:[#allocation8 + $0xc88] sm:$0xff]  ;;  %v1335_v17 = vld [vmem:[#allocation8 + $0xc80] sm:$0xff] }
 0x273   : > { %2746 = vmatpush1.msra.mxu1 %v1252_v19  ;;  %v1830_v33 = vpop.f32.mrf.mxu0  ;;  %4946 = vmatprep.mubr.msk.f32.mxu0 %vm805_vm0, %v6756_v40  ;;  %v1255_v31 = vld [vmem:[#allocation8 + $0xa00] sm:$0xff] }
 0x274   : > { %2682 = vmatprep.subr.mxu0 %v1440_v62  ;;  %v3196_v38 = vmax.f32 %v1828_v55, %v1830_v33  ;;  %2747 = vmatprep.subr.mxu1 %v1226_v21  ;;  %v1091_v21 = vld [vmem:[#allocation8 + $0x4e0] sm:$0xff] }
 0x275   : > { %2505 = vmatmul.mubr.f32.gmra.mxu0 %v6761_v43  ;;  %4950 = vmatprep.mubr.msk.f32.mxu1 %vm805_vm0, %v6697_v53 }
 0x276   : > { %2683 = vmatpush2.msra.mxu0 %v1439_v12  ;;  %v6860_v57 = vmax.f32 %v3188_v28, %v3196_v38  ;;  %2748 = vmatpush1.msra.mxu1 %v1225_v36  ;;  %v1309_v28 = vld [vmem:[#allocation8 + $0xbb0] sm:$0xff]  ;;  %v1090_v36 = vld [vmem:[#allocation8 + $0x4d8] sm:$0xff] }
 0x277   : > { %2684 = vmatprep.subr.mxu0 %v1413_v29  ;;  %2594 = vmatmul.mubr.f32.gmra.mxu1 %v6702_v56  ;;  %v1308_v29 = vld [vmem:[#allocation8 + $0xba8] sm:$0xff] }
 0x278   : > { %2749 = vmatprep.subr.mxu1 %v1199_v24  ;;  %2685 = vmatpush2.msra.mxu0 %v1412_v48  ;;  %v1282_v48 = vld [vmem:[#allocation8 + $0xad8] sm:$0xff] }
 0x279   : > { %2750 = vmatpush1.msra.mxu1 %v1198_v49  ;;  %v2012_v54 = vpop.f32.mrf.mxu0  ;;  %2686 = vmatprep.subr.mxu0 %v1386_v20  ;;  %v1281_v20 = vld [vmem:[#allocation8 + $0xad0] sm:$0xff] }
 0x27a   : > { %2751 = vmatprep.subr.mxu1 %v1172_v50  ;;  %4951 = vmatprep.mubr.msk.f32.mxu1 %vm805_vm0, %v6706_v63 }
 0x27b   : > { %2687 = vmatpush2.msra.mxu0 %v1385_v59  ;;  %v2014_v60 = vpop.f32.mrf.mxu0  ;;  %4955 = vmatprep.mubr.msk.f32.mxu0 %vm805_vm0, %v6866_v35 }
 0x27c   : > { %2752 = vmatpush1.msra.mxu1 %v1171_v51  ;;  %v3205_v5 = vmax.f32 %v2012_v54, %v2014_v60  ;;  %2689 = vmatmul.mubr.f32.vlgmr.msra.gmra.mxu0 %v6872_v6  ;;  %v1254_v60 = vld [vmem:[#allocation8 + $0x9f8] sm:$0xff] }
 0x27d   : > { %2600 = vmatmul.mubr.f32.gmra.mxu1 %v6711_v2  ;;  %2753 = vmatprep.subr.mxu1 %v1145_v32 }
 0x27e   : > { %2850 = vmatprep.subr.mxu0 %v1363_v58  ;;  %v6875_v15 = vmax.f32 %v3197_v45, %v3205_v5  ;;  %2754 = vmatpush1.msra.mxu1 %v1144_v42  ;;  %v1905_v19 = vpop.f32.mrf.mxu1  ;;  %v1036_v58 = vld [vmem:[#allocation8 + $0x328] sm:$0xff]  ;;  %v1010_v45 = vld [vmem:[#allocation8 + $0x258] sm:$0xff] }
 0x27f   : > { %2851 = vmatpush1.msra.mxu0 %v1362_v0  ;;  %v2018_v62 = vpop.f32.mrf.mxu0  ;;  %2755 = vmatprep.subr.mxu1 %v1118_v7  ;;  %v1228_v5 = vld [vmem:[#allocation8 + $0x928] sm:$0xff] }
 0x280   : > { %2852 = vmatprep.subr.mxu0 %v1336_v11  ;;  %v3237_v55 = vmax.f32 %v6775_v9, %v6875_v15  ;;  %4952 = vmatprep.mubr.msk.f32.mxu1 %vm805_vm0, %v6722_v14  ;;  %v1907_v12 = vpop.f32.mrf.mxu1  ;;  %v1227_v11 = vld [vmem:[#allocation8 + $0x920] sm:$0xff]  ;;  %v1470_v9 = vld [vmem:[#allocation8 + $0x10b8] sm:$0xff]  ;;  %v1256_v15 = vld [vmem:[#allocation8 + $0xa08] sm:$0xff] }
 0x281   : > { %4956 = vmatprep.mubr.msk.f32.mxu0 %vm805_vm0, %v6679_v26  ;;  %v2020_v33 = vpop.f32.mrf.mxu0  ;;  %2756 = vmatpush1.msra.mxu1 %v1117_v23  ;;  %v3198_v38 = vmax.f32 %v1905_v19, %v1907_v12  ;;  %v1063_v26 = vld [vmem:[#allocation8 + $0x400] sm:$0xff]  ;;  %v982_v12 = vld [vmem:[#allocation8 + $0x178] sm:$0xff] }
 0x282   : > { %2853 = vmatpush1.msra.mxu0 %v1335_v17  ;;  %v3206_v24 = vmax.f32 %v2018_v62, %v2020_v33  ;;  %2606 = vmatmul.mubr.f32.gmra.mxu1 %v6727_v16  ;;  %v1201_v62 = vld [vmem:[#allocation8 + $0x850] sm:$0xff]  ;;  %v1200_v33 = vld [vmem:[#allocation8 + $0x848] sm:$0xff] }
 0x283   : > { %2695 = vmatmul.mubr.f32.gmra.mxu0 %v6684_v37  ;;  %2757 = vmatprep.subr.mxu1 %v1091_v21  ;;  %v1037_v37 = vld [vmem:[#allocation8 + $0x330] sm:$0xff] }
 0x284   : > { %2854 = vmatprep.subr.mxu0 %v1309_v28  ;;  %v6885_v49 = vmax.f32 %v3198_v38, %v3206_v24  ;;  %2758 = vmatpush1.msra.mxu1 %v1090_v36  ;;  %v1911_v50 = vpop.f32.mrf.mxu1  ;;  %v956_v38 = vld [vmem:[#allocation8 + $0xa8] sm:$0xff]  ;;  %v1174_v24 = vld [vmem:[#allocation8 + $0x778] sm:$0xff] }
 0x285   : > { %2855 = vmatpush1.msra.mxu0 %v1308_v29  ;;  %v2024_v59 = vpop.f32.mrf.mxu0  ;;  %2759 = vmatprep.subr.mxu1 %v1064_v46  ;;  %v955_v46 = vld [vmem:[#allocation8 + $0xa0] sm:$0xff] }
 0x286   : > { %2856 = vmatprep.subr.mxu0 %v1282_v48  ;;  %v3238_v51 = vmax.f32 %v6805_v27, %v6885_v49  ;;  %4953 = vmatprep.mubr.msk.f32.mxu1 %vm805_vm0, %v6738_v25  ;;  %v1913_v54 = vpop.f32.mrf.mxu1  ;;  %v1173_v48 = vld [vmem:[#allocation8 + $0x770] sm:$0xff]  ;;  %v1202_v27 = vld [vmem:[#allocation8 + $0x858] sm:$0xff] }
 0x287   : > { %4957 = vmatprep.mubr.msk.f32.mxu0 %vm805_vm0, %v6688_v44  ;;  %v2026_v32 = vpop.f32.mrf.mxu0  ;;  %2760 = vmatpush1.msra.mxu1 %v1063_v26  ;;  %v3199_v42 = vmax.f32 %v1911_v50, %v1913_v54  ;;  %v1009_v44 = vld [vmem:[#allocation8 + $0x250] sm:$0xff] }
 0x288   : > { %2857 = vmatpush1.msra.mxu0 %v1281_v20  ;;  %v3207_v0 = vmax.f32 %v2024_v59, %v2026_v32  ;;  %2612 = vmatmul.mubr.f32.gmra.mxu1 %v6745_v30  ;;  %v1577_v26 = vld [vmem:[#allocation8 + $0x1410] sm:$0xff]  ;;  %v1147_v59 = vld [vmem:[#allocation8 + $0x6a0] sm:$0xff] }
 0x289   : > { %2701 = vmatmul.mubr.f32.gmra.mxu0 %v6693_v47  ;;  %2761 = vmatprep.subr.mxu1 %v1037_v37  ;;  %v983_v47 = vld [vmem:[#allocation8 + $0x180] sm:$0xff] }
 0x28a   : > { %2858 = vmatprep.subr.mxu0 %v1255_v31  ;;  %v6895_v7 = vmax.f32 %v3199_v42, %v3207_v0  ;;  %2762 = vmatpush1.msra.mxu1 %v1036_v58  ;;  %v1917_v23 = vpop.f32.mrf.mxu1  ;;  %v1146_v31 = vld [vmem:[#allocation8 + $0x698] sm:$0xff] }
 0x28b   : > { %2859 = vmatpush1.msra.mxu0 %v1254_v60  ;;  %v2030_v17 = vpop.f32.mrf.mxu0  ;;  %2763 = vmatprep.subr.mxu1 %v1010_v45  ;;  %v1550_v58 = vld [vmem:[#allocation8 + $0x1338] sm:$0xff]  ;;  %v1120_v60 = vld [vmem:[#allocation8 + $0x5c8] sm:$0xff]  ;;  %v1549_v45 = vld [vmem:[#allocation8 + $0x1330] sm:$0xff] }
 0x28c   : > { %2860 = vmatprep.subr.mxu0 %v1228_v5  ;;  %v3239_v19 = vmax.f32 %v6814_v10, %v6895_v7  ;;  %4954 = vmatprep.mubr.msk.f32.mxu1 %vm805_vm0, %v6756_v40  ;;  %v1919_v21 = vpop.f32.mrf.mxu1  ;;  %v1119_v5 = vld [vmem:[#allocation8 + $0x5c0] sm:$0xff]  ;;  %v1148_v10 = vld [vmem:[#allocation8 + $0x6a8] sm:$0xff]  ;;  %v1366_v7 = vld [vmem:[#allocation8 + $0xd78] sm:$0xff] }
 0x28d   : > { %4958 = vmatprep.mubr.msk.f32.mxu0 %vm805_vm0, %v6697_v53  ;;  %v2032_v28 = vpop.f32.mrf.mxu0  ;;  %2764 = vmatpush1.msra.mxu1 %v1009_v44  ;;  %v3200_v36 = vmax.f32 %v1917_v23, %v1919_v21  ;;  %v1523_v44 = vld [vmem:[#allocation8 + $0x1260] sm:$0xff]  ;;  %v1496_v21 = vld [vmem:[#allocation8 + $0x1188] sm:$0xff] }
 0x28e   : > { %2861 = vmatpush1.msra.mxu0 %v1227_v11  ;;  %v3208_v29 = vmax.f32 %v2030_v17, %v2032_v28  ;;  %2618 = vmatmul.mubr.f32.gmra.mxu1 %v6761_v43  ;;  %v1093_v11 = vld [vmem:[#allocation8 + $0x4f0] sm:$0xff]  ;;  %v1066_v28 = vld [vmem:[#allocation8 + $0x418] sm:$0xff] }
 0x28f   : > { %2707 = vmatmul.mubr.f32.gmra.mxu0 %v6702_v56  ;;  %2765 = vmatprep.subr.mxu1 %v983_v47  ;;  %v1576_v56 = vld [vmem:[#allocation8 + $0x1408] sm:$0xff]  ;;  %v1522_v47 = vld [vmem:[#allocation8 + $0x1258] sm:$0xff] }
 0x290   : > { %2862 = vmatprep.subr.mxu0 %v1201_v62  ;;  %v6905_v53 = vmax.f32 %v3200_v36, %v3208_v29  ;;  %2766 = vmatpush1.msra.mxu1 %v982_v12  ;;  %v1923_v20 = vpop.f32.mrf.mxu1  ;;  %v1092_v62 = vld [vmem:[#allocation8 + $0x4e8] sm:$0xff]  ;;  %v1495_v36 = vld [vmem:[#allocation8 + $0x1180] sm:$0xff] }
 0x291   : > { %2863 = vmatpush1.msra.mxu0 %v1200_v33  ;;  %v2036_v50 = vpop.f32.mrf.mxu0  ;;  %2767 = vmatprep.subr.mxu1 %v956_v38 }
 0x292   : > { %2864 = vmatprep.subr.mxu0 %v1174_v24  ;;  %v3240_v37 = vmax.f32 %v6823_v3, %v6905_v53  ;;  %4959 = vmatprep.mubr.msk.f32.mxu0 %vm805_vm0, %v6706_v63  ;;  %v1925_v54 = vpop.f32.mrf.mxu1  ;;  %v1469_v24 = vld [vmem:[#allocation8 + $0x10b0] sm:$0xff]  ;;  %v1095_v3 = vld [vmem:[#allocation8 + $0x500] sm:$0xff]  ;;  %v1094_v53 = vld [vmem:[#allocation8 + $0x4f8] sm:$0xff] }
 0x293   : > { %2768 = vmatpush1.msra.mxu1 %v955_v46  ;;  %v2038_v32 = vpop.f32.mrf.mxu0  ;;  %2865 = vmatpush1.msra.mxu0 %v1173_v48  ;;  %v3201_v42 = vmax.f32 %v1923_v20, %v1925_v54  ;;  %v1039_v46 = vld [vmem:[#allocation8 + $0x340] sm:$0xff]  ;;  %v1038_v20 = vld [vmem:[#allocation8 + $0x338] sm:$0xff]  ;;  %v1441_v54 = vld [vmem:[#allocation8 + $0xfd0] sm:$0xff] }
 0x294   : > { %2785 = vmatprep.subr.mxu1 %v1577_v26  ;;  %v3209_v0 = vmax.f32 %v2036_v50, %v2038_v32  ;;  %2713 = vmatmul.mubr.f32.gmra.mxu0 %v6711_v2  ;;  %v1468_v26 = vld [vmem:[#allocation8 + $0x10a8] sm:$0xff] }
 0x295   : > { %2866 = vmatprep.subr.mxu0 %v1147_v59  ;;  %2786 = vmatpush2.msra.mxu1 %v1576_v56  ;;  %v1442_v59 = vld [vmem:[#allocation8 + $0xfd8] sm:$0xff]  ;;  %v1012_v56 = vld [vmem:[#allocation8 + $0x268] sm:$0xff] }
 0x296   : > { %2867 = vmatpush1.msra.mxu0 %v1146_v31  ;;  %v6912_v63 = vmax.f32 %v3201_v42, %v3209_v0  ;;  %2787 = vmatprep.subr.mxu1 %v1550_v58  ;;  %v1929_v23 = vpop.f32.mrf.mxu1 }
 0x297   : > { %2868 = vmatprep.subr.mxu0 %v1120_v60  ;;  %v2042_v17 = vpop.f32.mrf.mxu0  ;;  %4960 = vmatprep.mubr.msk.f32.mxu0 %vm805_vm0, %v6722_v14  ;;  %v1065_v14 = vld [vmem:[#allocation8 + $0x410] sm:$0xff]  ;;  %v1415_v60 = vld [vmem:[#allocation8 + $0xf00] sm:$0xff] }
 0x298   : > { %2788 = vmatpush2.msra.mxu1 %v1549_v45  ;;  %v3241_v2 = vmax.f32 %v6835_v41, %v6912_v63  ;;  %2869 = vmatpush1.msra.mxu0 %v1119_v5  ;;  %v1931_v12 = vpop.f32.mrf.mxu1  ;;  %v985_v45 = vld [vmem:[#allocation8 + $0x190] sm:$0xff]  ;;  %v1414_v5 = vld [vmem:[#allocation8 + $0xef8] sm:$0xff] }
 0x299   : > { %2789 = vmatprep.subr.mxu1 %v1523_v44  ;;  %v2044_v33 = vpop.f32.mrf.mxu0  ;;  %2719 = vmatmul.mubr.f32.gmra.mxu0 %v6727_v16  ;;  %v3202_v29 = vmax.f32 %v1929_v23, %v1931_v12  ;;  %v984_v44 = vld [vmem:[#allocation8 + $0x188] sm:$0xff]  ;;  %v958_v23 = vld [vmem:[#allocation8 + $0xb8] sm:$0xff]  ;;  %v1285_v41 = vld [vmem:[#allocation8 + $0xaf0] sm:$0xff] }
 0x29a   : > { %2870 = vmatprep.subr.mxu0 %v1093_v11  ;;  %v3210_v38 = vmax.f32 %v2042_v17, %v2044_v33  ;;  %2790 = vmatpush2.msra.mxu1 %v1522_v47  ;;  %v1388_v11 = vld [vmem:[#allocation8 + $0xe28] sm:$0xff]  ;;  %v1579_v33 = vld [vmem:[#allocation8 + $0x1420] sm:$0xff] }
 0x29b   : > { %2871 = vmatpush1.msra.mxu0 %v1092_v62  ;;  %2791 = vmatprep.subr.mxu1 %v1496_v21  ;;  %v1387_v62 = vld [vmem:[#allocation8 + $0xe20] sm:$0xff] }
 0x29c   : > { %2872 = vmatprep.subr.mxu0 %v1066_v28  ;;  %v6919_v48 = vmax.f32 %v3202_v29, %v3210_v38  ;;  %4961 = vmatprep.mubr.msk.f32.mxu0 %vm805_vm0, %v6738_v25  ;;  %v1935_v16 = vpop.f32.mrf.mxu1  ;;  %v1011_v25 = vld [vmem:[#allocation8 + $0x260] sm:$0xff] }
 0x29d   : > { %2792 = vmatpush2.msra.mxu1 %v1495_v36  ;;  %v2048_v50 = vpop.f32.mrf.mxu0  ;;  %2873 = vmatpush1.msra.mxu0 %v1065_v14  ;;  %v1365_v36 = vld [vmem:[#allocation8 + $0xd70] sm:$0xff]  ;;  %v1364_v14 = vld [vmem:[#allocation8 + $0xd68] sm:$0xff] }
 0x29e   : > { %2793 = vmatprep.subr.mxu1 %v1469_v24  ;;  %v3242_v31 = vmax.f32 %v6844_v61, %v6919_v48  ;;  %2725 = vmatmul.mubr.f32.gmra.mxu0 %v6745_v30  ;;  %v1937_v32 = vpop.f32.mrf.mxu1  ;;  %v1552_v24 = vld [vmem:[#allocation8 + $0x1348] sm:$0xff]  ;;  %v1013_v48 = vld [vmem:[#allocation8 + $0x270] sm:$0xff] }
 0x29f   : > { %2874 = vmatprep.subr.mxu0 %v1039_v46  ;;  %v2050_v58 = vpop.f32.mrf.mxu0  ;;  %2794 = vmatpush2.msra.mxu1 %v1468_v26  ;;  %v3203_v42 = vmax.f32 %v1935_v16, %v1937_v32  ;;  %v1338_v46 = vld [vmem:[#allocation8 + $0xc98] sm:$0xff]  ;;  %v1551_v16 = vld [vmem:[#allocation8 + $0x1340] sm:$0xff] }
 0x2a0   : > { %2875 = vmatpush1.msra.mxu0 %v1038_v20  ;;  %v3211_v0 = vmax.f32 %v2048_v50, %v2050_v58  ;;  %2795 = vmatprep.subr.mxu1 %v1442_v59  ;;  %v1337_v50 = vld [vmem:[#allocation8 + $0xc90] sm:$0xff]  ;;  %v1311_v32 = vld [vmem:[#allocation8 + $0xbc0] sm:$0xff] }
 0x2a1   : > { %2876 = vmatprep.subr.mxu0 %v1012_v56  ;;  %4962 = vmatprep.mubr.msk.f32.mxu0 %vm805_vm0, %v6756_v40  ;;  %v957_v40 = vld [vmem:[#allocation8 + $0xb0] sm:$0xff] }
 0x2a2   : > { %2796 = vmatpush2.msra.mxu1 %v1441_v54  ;;  %v6928_v30 = vmax.f32 %v3203_v42, %v3211_v0  ;;  %2877 = vmatpush1.msra.mxu0 %v1011_v25  ;;  %v1941_v17 = vpop.f32.mrf.mxu1  ;;  %v1525_v59 = vld [vmem:[#allocation8 + $0x1270] sm:$0xff]  ;;  %v6941_v25 = vld [vmem:[%s6435_s26 + $0x18] sm:$0xff] }
 0x2a3   : > { %2797 = vmatprep.subr.mxu1 %v1415_v60  ;;  %v2054_v47 = vpop.f32.mrf.mxu0  ;;  %2731 = vmatmul.mubr.f32.gmra.mxu0 %v6761_v43  ;;  %v1578_v43 = vld [vmem:[#allocation8 + $0x1418] sm:$0xff]  ;;  %v1524_v60 = vld [vmem:[#allocation8 + $0x1268] sm:$0xff] }
 0x2a4   : > { %2878 = vmatprep.subr.mxu0 %v985_v45  ;;  %v3243_v21 = vmax.f32 %v6852_v22, %v6928_v30  ;;  %2798 = vmatpush2.msra.mxu1 %v1414_v5  ;;  %v1943_v28 = vpop.f32.mrf.mxu1  ;;  %v1310_v42 = vld [vmem:[#allocation8 + $0xbb8] sm:$0xff]  ;;  %v1284_v45 = vld [vmem:[#allocation8 + $0xae8] sm:$0xff]  ;;  %v7054_v22 = vld [vmem:[%s6435_s26 + $0x70] sm:$0xff] }
 0x2a5   : > { %2879 = vmatpush1.msra.mxu0 %v984_v44  ;;  %v2056_v12 = vpop.f32.mrf.mxu0  ;;  %2799 = vmatprep.subr.mxu1 %v1388_v11  ;;  %v3204_v29 = vmax.f32 %v1941_v17, %v1943_v28  ;;  %v1498_v0 = vld [vmem:[#allocation8 + $0x1198] sm:$0xff]  ;;  %v6951_v44 = vld [vmem:[%s6435_s26 + $0x10] sm:$0xff]  ;;  %v1283_v17 = vld [vmem:[#allocation8 + $0xae0] sm:$0xff] }
 0x2a6   : > { %2880 = vmatprep.subr.mxu0 %v958_v23  ;;  %v3212_v38 = vmax.f32 %v2054_v47, %v2056_v12  ;;  %2800 = vmatpush2.msra.mxu1 %v1387_v62  ;;  %v1497_v11 = vld [vmem:[#allocation8 + $0x1190] sm:$0xff]  ;;  %v1471_v47 = vld [vmem:[#allocation8 + $0x10c0] sm:$0xff]  ;;  %v6955_v28 = vld [vmem:[%s6435_s26 + $0x28] sm:$0xff] }
 0x2a7   : > { %4963 = vmatprep.mubr.msk.f32.mxu1 %vm805_vm0, %v6866_v35  ;;  %2881 = vmatpush1.msra.mxu0 %v957_v40  ;;  %v1257_v62 = vld [vmem:[#allocation8 + $0xa10] sm:$0xff]  ;;  %v1444_v12 = vld [vmem:[#allocation8 + $0xfe8] sm:$0xff] }
 0x2a8   : > { %2802 = vmatmul.mubr.f32.vlgmr.msra.gmra.mxu1 %v6872_v6  ;;  %v6936_v26 = vmax.f32 %v3204_v29, %v3212_v38  ;;  %v2125_v20 = vpop.f32.mrf.mxu1  ;;  %2898 = vmatprep.subr.mxu0 %v1579_v33  ;;  %v1230_v33 = vld [vmem:[#allocation8 + $0x938] sm:$0xff]  ;;  %v1443_v29 = vld [vmem:[#allocation8 + $0xfe0] sm:$0xff]  ;;  %v960_v30 = vld [vmem:[#allocation8 + $0xc8] sm:$0xff] }
 0x2a9   : > { %2963 = vmatprep.subr.mxu1 %v1365_v36  ;;  %2899 = vmatpush2.msra.mxu0 %v1578_v43  ;;  %v6960_v36 = vld [vmem:[%s6435_s26 + $0x20] sm:$0xff] }
 0x2aa   : > { %2964 = vmatpush1.msra.mxu1 %v1364_v14  ;;  %v2127_v56 = vpop.f32.mrf.mxu1  ;;  %v3244_v54 = vmax.f32 %v6860_v57, %v6936_v26  ;;  %2900 = vmatprep.subr.mxu0 %v1552_v24  ;;  %v1229_v14 = vld [vmem:[#allocation8 + $0x930] sm:$0xff]  ;;  %v1123_v26 = vld [vmem:[#allocation8 + $0x5e0] sm:$0xff] }
 0x2ab   : > { %2965 = vmatprep.subr.mxu1 %v1338_v46  ;;  %v3213_v58 = vmax.f32 %v2125_v20, %v2127_v56  ;;  %4964 = vmatprep.mubr.msk.f32.mxu1 %vm805_vm0, %v6941_v25  ;;  %v1417_v24 = vld [vmem:[#allocation8 + $0xf10] sm:$0xff]  ;;  %v1203_v46 = vld [vmem:[#allocation8 + $0x860] sm:$0xff] }
 0x2ac   : > { %2901 = vmatpush2.msra.mxu0 %v1551_v16  ;;  %2966 = vmatpush1.msra.mxu1 %v1337_v50  ;;  %v6969_v16 = vld [vmem:[%s6435_s26 + $0x38] sm:$0xff]  ;;  %v1416_v50 = vld [vmem:[#allocation8 + $0xf08] sm:$0xff]  ;;  %v6974_v56 = vld [vmem:[%s6435_s26 + $0x30] sm:$0xff] }
 0x2ad   : > { %2902 = vmatprep.subr.mxu0 %v1525_v59  ;;  %v6948_v5 = vmax.f32 %v3237_v55, %v3213_v58  ;;  %2808 = vmatmul.mubr.f32.gmra.mxu1 %v6951_v44  ;;  %v2131_v23 = vpop.f32.mrf.mxu1  ;;  %v1176_v59 = vld [vmem:[#allocation8 + $0x788] sm:$0xff]  ;;  %v1553_v57 = vld [vmem:[#allocation8 + $0x1350] sm:$0xff] }
 0x2ae   : > { %2967 = vmatprep.subr.mxu1 %v1311_v32  ;;  %2903 = vmatpush2.msra.mxu0 %v1524_v60  ;;  %v1389_v32 = vld [vmem:[#allocation8 + $0xe30] sm:$0xff] }
 0x2af   : > { %2968 = vmatpush1.msra.mxu1 %v1310_v42  ;;  %2904 = vmatprep.subr.mxu0 %v1498_v0  ;;  %v2133_v40 = vpop.f32.mrf.mxu1  ;;  %v1175_v42 = vld [vmem:[#allocation8 + $0x780] sm:$0xff] }
 0x2b0   : > { %2969 = vmatprep.subr.mxu1 %v1284_v45  ;;  %4965 = vmatprep.mubr.msk.f32.mxu1 %vm805_vm0, %v6955_v28  ;;  %v3214_v55 = vmax.f32 %v2131_v23, %v2133_v40  ;;  %v6983_v45 = vld [vmem:[%s6435_s26 + $0x48] sm:$0xff]  ;;  %v7834_v40 = vmov 0.0  }
 0x2b1   : > { %2905 = vmatpush2.msra.mxu0 %v1497_v11  ;;  %2970 = vmatpush1.msra.mxu1 %v1283_v17  ;;  %v1149_v11 = vld [vmem:[#allocation8 + $0x6b0] sm:$0xff]  ;;  %v1122_v17 = vld [vmem:[#allocation8 + $0x5d8] sm:$0xff] }
 0x2b2   : > { %2906 = vmatprep.subr.mxu0 %v1471_v47  ;;  %2814 = vmatmul.mubr.f32.gmra.mxu1 %v6960_v36  ;;  %v6966_v38 = vmax.f32 %v3238_v51, %v3214_v55  ;;  %v2137_v43 = vpop.f32.mrf.mxu1  ;;  %v1390_v51 = vld [vmem:[#allocation8 + $0xe38] sm:$0xff] }
 0x2b3   : > { %2971 = vmatprep.subr.mxu1 %v1257_v62  ;;  %2907 = vmatpush2.msra.mxu0 %v1470_v9  ;;  %v1121_v9 = vld [vmem:[#allocation8 + $0x5d0] sm:$0xff] }
 0x2b4   : > { %2972 = vmatpush1.msra.mxu1 %v1256_v15  ;;  %2908 = vmatprep.subr.mxu0 %v1444_v12  ;;  %v2139_v20 = vpop.f32.mrf.mxu1  ;;  %v1339_v15 = vld [vmem:[#allocation8 + $0xca0] sm:$0xff] }
 0x2b5   : > { %2973 = vmatprep.subr.mxu1 %v1230_v33  ;;  %4966 = vmatprep.mubr.msk.f32.mxu1 %vm805_vm0, %v6969_v16  ;;  %v3215_v49 = vmax.f32 %v2137_v43, %v2139_v20  ;;  %v7002_v33 = vld [vmem:[%s6435_s26 + $0x58] sm:$0xff]  ;;  %v1067_v20 = vld [vmem:[#allocation8 + $0x420] sm:$0xff] }
 0x2b6   : > { %2909 = vmatpush2.msra.mxu0 %v1443_v29  ;;  %2974 = vmatpush1.msra.mxu1 %v1229_v14  ;;  %v7014_v14 = vld [vmem:[%s6435_s26 + $0x50] sm:$0xff] }
 0x2b7   : > { %2910 = vmatprep.subr.mxu0 %v1417_v24  ;;  %2820 = vmatmul.mubr.f32.gmra.mxu1 %v6974_v56  ;;  %v6980_v58 = vmax.f32 %v3239_v19, %v3215_v49  ;;  %v2143_v60 = vpop.f32.mrf.mxu1  ;;  %v6990_v19 = vld [vmem:[%s6435_s26 + $0x40] sm:$0xff]  ;;  %v1068_v24 = vld [vmem:[#allocation8 + $0x428] sm:$0xff] }
 0x2b8   : > { %2975 = vmatprep.subr.mxu1 %v1203_v46  ;;  %2911 = vmatpush2.msra.mxu0 %v1416_v50  ;;  %v1041_v50 = vld [vmem:[#allocation8 + $0x350] sm:$0xff] }
 0x2b9   : > { %2976 = vmatpush1.msra.mxu1 %v1202_v27  ;;  %2912 = vmatprep.subr.mxu0 %v1390_v51  ;;  %v2145_v0 = vpop.f32.mrf.mxu1  ;;  %v1040_v51 = vld [vmem:[#allocation8 + $0x348] sm:$0xff] }
 0x2ba   : > { %2977 = vmatprep.subr.mxu1 %v1176_v59  ;;  %4967 = vmatprep.mubr.msk.f32.mxu1 %vm805_vm0, %v6983_v45  ;;  %v3216_v23 = vmax.f32 %v2143_v60, %v2145_v0  ;;  %v1258_v59 = vld [vmem:[#allocation8 + $0xa18] sm:$0xff] }
 0x2bb   : > { %2913 = vmatpush2.msra.mxu0 %v1389_v32  ;;  %4971 = vmatprep.mubr.msk.f32.mxu0 %vm805_vm0, %v6866_v35  ;;  %v7033_v32 = vld [vmem:[%s6435_s26 + $0x60] sm:$0xff]  ;;  %v1014_v60 = vld [vmem:[#allocation8 + $0x278] sm:$0xff] }
 0x2bc   : > { %2978 = vmatpush1.msra.mxu1 %v1175_v42  ;;  %2915 = vmatmul.mubr.f32.vlgmr.msra.gmra.mxu0 %v6872_v6  ;;  %v6997_v47 = vmax.f32 %v3240_v37, %v3216_v23  ;;  %v1312_v37 = vld [vmem:[#allocation8 + $0xbc8] sm:$0xff]  ;;  %v7045_v23 = vld [vmem:[%s6435_s26 + $0x78] sm:$0xff] }
 0x2bd   : > { %2826 = vmatmul.mubr.f32.gmra.mxu1 %v6990_v19  ;;  %v2149_v62 = vpop.f32.mrf.mxu1  ;;  %2979 = vmatprep.subr.mxu1 %v1149_v11 }
 0x2be   : > { %3076 = vmatprep.subr.mxu0 %v7834_v40  ;;  %2980 = vmatpush1.msra.mxu1 %v1148_v10  ;;  %v987_v10 = vld [vmem:[#allocation8 + $0x1a0] sm:$0xff] }
 0x2bf   : > { %3077 = vmatpush1.msra.mxu0 %v1366_v7  ;;  %v2151_v55 = vpop.f32.mrf.mxu1  ;;  %2981 = vmatprep.subr.mxu1 %v1122_v17  ;;  %v986_v7 = vld [vmem:[#allocation8 + $0x198] sm:$0xff]  ;;  %v1204_v17 = vld [vmem:[#allocation8 + $0x868] sm:$0xff] }
 0x2c0   : > { %3078 = vmatprep.subr.mxu0 %v7834_v40  ;;  %v3217_v12 = vmax.f32 %v2149_v62, %v2151_v55  ;;  %4968 = vmatprep.mubr.msk.f32.mxu1 %vm805_vm0, %v7002_v33  ;;  %v7051_v62 = vpop.f32.mrf.mxu0  ;;  %v1177_v55 = vld [vmem:[#allocation8 + $0x790] sm:$0xff] }
 0x2c1   : > { %4972 = vmatprep.mubr.msk.f32.mxu0 %vm805_vm0, %v6941_v25  ;;  %2982 = vmatpush1.msra.mxu1 %v1121_v9 }
 0x2c2   : > { %3079 = vmatpush1.msra.mxu0 %v1339_v15  ;;  %v7011_v29 = vmax.f32 %v3241_v2, %v3217_v12  ;;  %v2155_v43 = vpop.f32.mrf.mxu1  ;;  %2832 = vmatmul.mubr.f32.gmra.mxu1 %v7014_v14  ;;  %v7021_v2 = vld [vmem:[%s6435_s26 + $0x68] sm:$0xff]  ;;  %v959_v15 = vld [vmem:[#allocation8 + $0xc0] sm:$0xff]  ;;  %v1581_v12 = vld [vmem:[#allocation8 + $0x1430] sm:$0xff] }
 0x2c3   : > { %2921 = vmatmul.mubr.f32.gmra.mxu0 %v6951_v44  ;;  %2983 = vmatprep.subr.mxu1 %v1095_v3 }
 0x2c4   : > { %3080 = vmatprep.subr.mxu0 %v7834_v40  ;;  %v2157_v46 = vpop.f32.mrf.mxu1  ;;  %2984 = vmatpush1.msra.mxu1 %v1094_v53  ;;  %v7065_v53 = vpop.f32.mrf.mxu0 }
 0x2c5   : > { %3081 = vmatpush1.msra.mxu0 %v1312_v37  ;;  %v3218_v63 = vmax.f32 %v2155_v43, %v2157_v46  ;;  %2985 = vmatprep.subr.mxu1 %v1068_v24  ;;  %v1580_v37 = vld [vmem:[#allocation8 + $0x1428] sm:$0xff]  ;;  %v1150_v43 = vld [vmem:[#allocation8 + $0x6b8] sm:$0xff] }
 0x2c6   : > { %3082 = vmatprep.subr.mxu0 %v7834_v40  ;;  %4969 = vmatprep.mubr.msk.f32.mxu1 %vm805_vm0, %v7021_v2  ;;  %v1554_v24 = vld [vmem:[#allocation8 + $0x1358] sm:$0xff] }
 0x2c7   : > { %4973 = vmatprep.mubr.msk.f32.mxu0 %vm805_vm0, %v6955_v28  ;;  %v7030_v27 = vmax.f32 %v3242_v31, %v3218_v63  ;;  %v2161_v49 = vpop.f32.mrf.mxu1  ;;  %2986 = vmatpush1.msra.mxu1 %v1067_v20  ;;  %v1231_v31 = vld [vmem:[#allocation8 + $0x940] sm:$0xff]  ;;  %v1096_v63 = vld [vmem:[#allocation8 + $0x508] sm:$0xff] }
 0x2c8   : > { %3083 = vmatpush1.msra.mxu0 %v1285_v41  ;;  %2838 = vmatmul.mubr.f32.gmra.mxu1 %v7033_v32  ;;  %v1526_v41 = vld [vmem:[#allocation8 + $0x1278] sm:$0xff] }
 0x2c9   : > { %2927 = vmatmul.mubr.f32.gmra.mxu0 %v6960_v36  ;;  %v2163_v42 = vpop.f32.mrf.mxu1  ;;  %2987 = vmatprep.subr.mxu1 %v1041_v50  ;;  %v1500_v50 = vld [vmem:[#allocation8 + $0x11a8] sm:$0xff] }
 0x2ca   : > { %3084 = vmatprep.subr.mxu0 %v7834_v40  ;;  %v3219_v61 = vmax.f32 %v2161_v49, %v2163_v42  ;;  %2988 = vmatpush1.msra.mxu1 %v1040_v51  ;;  %v1499_v51 = vld [vmem:[#allocation8 + $0x11a0] sm:$0xff] }
 0x2cb   : > { %3085 = vmatpush1.msra.mxu0 %v1258_v59  ;;  %2989 = vmatprep.subr.mxu1 %v1014_v60  ;;  %v1069_v59 = vld [vmem:[#allocation8 + $0x430] sm:$0xff] }
 0x2cc   : > { %3086 = vmatprep.subr.mxu0 %v7834_v40  ;;  %v7042_v0 = vmax.f32 %v3243_v21, %v3219_v61  ;;  %v2167_v11 = vpop.f32.mrf.mxu1  ;;  %4970 = vmatprep.mubr.msk.f32.mxu1 %vm805_vm0, %v7045_v23  ;;  %v1473_v60 = vld [vmem:[#allocation8 + $0x10d0] sm:$0xff]  ;;  %v1472_v61 = vld [vmem:[#allocation8 + $0x10c8] sm:$0xff] }
 0x2cd   : > { %4974 = vmatprep.mubr.msk.f32.mxu0 %vm805_vm0, %v6969_v16  ;;  %2990 = vmatpush1.msra.mxu1 %v1013_v48  ;;  %v1042_v48 = vld [vmem:[#allocation8 + $0x358] sm:$0xff] }
 0x2ce   : > { %7906 = vst [vmem:[#allocation49_spill] sm:$0xff] %v7042_v0  ;;  %3087 = vmatpush1.msra.mxu0 %v1231_v31  ;;  %v2169_v9 = vpop.f32.mrf.mxu1  ;;  %2844 = vmatmul.mubr.f32.gmra.mxu1 %v7054_v22  ;;  %v1446_v31 = vld [vmem:[#allocation8 + $0xff8] sm:$0xff] }
 0x2cf   : > { %2933 = vmatmul.mubr.f32.gmra.mxu0 %v6974_v56  ;;  %v3220_v21 = vmax.f32 %v2167_v11, %v2169_v9  ;;  %2991 = vmatprep.subr.mxu1 %v987_v10  ;;  %v1445_v10 = vld [vmem:[#allocation8 + $0xff0] sm:$0xff] }
 0x2d0   : > { %3088 = vmatprep.subr.mxu0 %v7834_v40  ;;  %2992 = vmatpush1.msra.mxu1 %v986_v7  ;;  %v1015_v7 = vld [vmem:[#allocation8 + $0x280] sm:$0xff] }
 0x2d1   : > { %3089 = vmatpush1.msra.mxu0 %v1204_v17  ;;  %v7062_v3 = vmax.f32 %v3244_v54, %v3220_v21  ;;  %2993 = vmatprep.subr.mxu1 %v960_v30  ;;  %v1527_v54 = vld [vmem:[#allocation8 + $0x1280] sm:$0xff]  ;;  %v1418_v30 = vld [vmem:[#allocation8 + $0xf18] sm:$0xff]  ;;  %v988_v21 = vld [vmem:[#allocation8 + $0x1a8] sm:$0xff] }
 0x2d2   : > { %3090 = vmatprep.subr.mxu0 %v7834_v40  ;;  %4975 = vmatprep.mubr.msk.f32.mxu0 %vm805_vm0, %v6983_v45  ;;  %v1419_v17 = vld [vmem:[#allocation8 + $0xf20] sm:$0xff] }
 0x2d3   : > { %7907 = vst [vmem:[#allocation50_spill] sm:$0xff] %v7062_v3  ;;  %2994 = vmatpush1.msra.mxu1 %v959_v15  ;;  %3091 = vmatpush1.msra.mxu0 %v1177_v55  ;;  %v1392_v15 = vld [vmem:[#allocation8 + $0xe48] sm:$0xff]  ;;  %v7359_v3 = vshrl.u32 %v3375_v1, 7 }
 0x2d4   : > { %3011 = vmatprep.subr.mxu1 %v1581_v12  ;;  %v7069_v46 = vpop.f32.mrf.mxu0  ;;  %2939 = vmatmul.mubr.f32.gmra.mxu0 %v6990_v19  ;;  %v1391_v12 = vld [vmem:[#allocation8 + $0xe40] sm:$0xff]  ;;  %v3477_v1 = vld [vmem:[%s7909_s4 + $0x138] sm:$0xff] }
 0x2d5   : > { %3092 = vmatprep.subr.mxu0 %v7834_v40  ;;  %3012 = vmatpush2.msra.mxu1 %v1580_v37  ;;  %v961_v37 = vld [vmem:[#allocation8 + $0xd0] sm:$0xff]  ;;  %7914 = vst [vmem:[#allocation55_spill] sm:$0xff] %v7359_v3 }
 0x2d6   : > { %3093 = vmatpush1.msra.mxu0 %v1150_v43  ;;  %v7073_v20 = vpop.f32.mrf.mxu0  ;;  %3013 = vmatprep.subr.mxu1 %v1554_v24  ;;  %v3483_v24 = vld [vmem:[%s7909_s4 + $0x168] sm:$0xff] }
 0x2d7   : > { %3094 = vmatprep.subr.mxu0 %v7834_v40  ;;  %4976 = vmatprep.mubr.msk.f32.mxu0 %vm805_vm0, %v7002_v33 }
 0x2d8   : > { %3014 = vmatpush2.msra.mxu1 %v1553_v57  ;;  %3095 = vmatpush1.msra.mxu0 %v1123_v26  ;;  %v1582_v57 = vld [vmem:[#allocation8 + $0x1438] sm:$0xff] }
 0x2d9   : > { %3015 = vmatprep.subr.mxu1 %v1527_v54  ;;  %v7078_v49 = vpop.f32.mrf.mxu0  ;;  %2945 = vmatmul.mubr.f32.gmra.mxu0 %v7014_v14  ;;  %v3469_v54 = vld [vmem:[%s7908_s21 + $0xf8] sm:$0xff] }
 0x2da   : > { %3096 = vmatprep.subr.mxu0 %v7834_v40  ;;  %3016 = vmatpush2.msra.mxu1 %v1526_v41  ;;  %v1555_v41 = vld [vmem:[#allocation8 + $0x1360] sm:$0xff] }
 0x2db   : > { %3097 = vmatpush1.msra.mxu0 %v1096_v63  ;;  %v7082_v42 = vpop.f32.mrf.mxu0  ;;  %3017 = vmatprep.subr.mxu1 %v1500_v50  ;;  %v1528_v50 = vld [vmem:[#allocation8 + $0x1288] sm:$0xff] }
 0x2dc   : > { %3098 = vmatprep.subr.mxu0 %v7834_v40  ;;  %4977 = vmatprep.mubr.msk.f32.mxu0 %vm805_vm0, %v7021_v2 }
 0x2dd   : > { %3018 = vmatpush2.msra.mxu1 %v1499_v51  ;;  %3099 = vmatpush1.msra.mxu0 %v1069_v59  ;;  %v3453_v59 = vld [vmem:[%s7909_s4 + $0x78] sm:$0xff] }
 0x2de   : > { %3019 = vmatprep.subr.mxu1 %v1473_v60  ;;  %v7087_v11 = vpop.f32.mrf.mxu0  ;;  %2951 = vmatmul.mubr.f32.gmra.mxu0 %v7033_v32  ;;  %v3484_v60 = vld [vmem:[%s7909_s4 + $0x170] sm:$0xff] }
 0x2df   : > { %3100 = vmatprep.subr.mxu0 %v7834_v40  ;;  %3020 = vmatpush2.msra.mxu1 %v1472_v61  ;;  %v1501_v61 = vld [vmem:[#allocation8 + $0x11b0] sm:$0xff] }
 0x2e0   : > { %3101 = vmatpush1.msra.mxu0 %v1042_v48  ;;  %v7091_v9 = vpop.f32.mrf.mxu0  ;;  %3021 = vmatprep.subr.mxu1 %v1446_v31  ;;  %v1474_v48 = vld [vmem:[#allocation8 + $0x10d8] sm:$0xff] }
 0x2e1   : > { %3102 = vmatprep.subr.mxu0 %v7834_v40  ;;  %4978 = vmatprep.mubr.msk.f32.mxu0 %vm805_vm0, %v7045_v23 }
 0x2e2   : > { %3022 = vmatpush2.msra.mxu1 %v1445_v10  ;;  %3103 = vmatpush1.msra.mxu0 %v1015_v7  ;;  %v3452_v7 = vld [vmem:[%s7909_s4 + $0x70] sm:$0xff] }
 0x2e3   : > { %3023 = vmatprep.subr.mxu1 %v1419_v17  ;;  %v7096_v55 = vpop.f32.mrf.mxu0  ;;  %2957 = vmatmul.mubr.f32.gmra.mxu0 %v7054_v22  ;;  %v3467_v17 = vld [vmem:[%s7909_s4 + $0xe8] sm:$0xff] }
 0x2e4   : > { %3104 = vmatprep.subr.mxu0 %v7834_v40  ;;  %3024 = vmatpush2.msra.mxu1 %v1418_v30  ;;  %v1447_v30 = vld [vmem:[#allocation8 + $0x1000] sm:$0xff] }
 0x2e5   : > { %3105 = vmatpush1.msra.mxu0 %v988_v21  ;;  %v7100_v43 = vpop.f32.mrf.mxu0  ;;  %3025 = vmatprep.subr.mxu1 %v1392_v15  ;;  %v7107_v26 = vpop.f32.mrf.mxu1 }
 0x2e6   : > { %3106 = vmatprep.subr.mxu0 %v7834_v40  ;;  %3026 = vmatpush2.msra.mxu1 %v1391_v12  ;;  %v1420_v12 = vld [vmem:[#allocation8 + $0xf28] sm:$0xff] }
 0x2e7   : > { %4979 = vmatprep.mubr.msk.f32.mxu1 %vm805_vm0, %v6866_v35  ;;  %3107 = vmatpush1.msra.mxu0 %v961_v37 }
 0x2e8   : > { %3028 = vmatmul.mubr.f32.vlgmr.msra.gmra.mxu1 %v6872_v6  ;;  %3124 = vmatprep.subr.mxu0 %v7834_v40  ;;  %v7121_v6 = vpop.f32.mrf.mxu1 }
 0x2e9   : > { %4980 = vmatprep.mubr.msk.f32.mxu1 %vm805_vm0, %v6941_v25  ;;  %v7116_v63 = vpop.f32.mrf.mxu0  ;;  %3125 = vmatpush2.msra.mxu0 %v1582_v57  ;;  %v3451_v57 = vld [vmem:[%s7909_s4 + $0x68] sm:$0xff]  ;;  %v3261_v0 = vmax.f32 %v7107_v26, %v7121_v6  ;;  %v3381_v26 = vsub.s32 1, %v7359_v3 }
 0x2ea   : > { %4987 = vmatprep.mubr.msk.f32.mxu0 %vm805_vm0, %v6866_v35  ;;  %3126 = vmatprep.subr.mxu0 %v7834_v40  ;;  %v3468_v35 = vld [vmem:[%s7909_s4 + $0xf0] sm:$0xff] }
 0x2eb   : > { %v7123_v51 = vpop.f32.mrf.mxu0  ;;  %5047 = vmatprep.subr.mxu1 %v3469_v54  ;;  %3127 = vmatpush2.msra.mxu0 %v1555_v41  ;;  %v7138_v31 = vpop.f32.mrf.mxu1  ;;  %v3466_v54 = vld [vmem:[%s7909_s4 + $0xe0] sm:$0xff] }
 0x2ec   : > { %3034 = vmatmul.mubr.f32.gmra.mxu1 %v6951_v44  ;;  %3128 = vmatprep.subr.mxu0 %v7834_v40  ;;  %v1393_v41 = vld [vmem:[#allocation8 + $0xe50] sm:$0xff] }
 0x2ed   : > { %4981 = vmatprep.mubr.msk.f32.mxu1 %vm805_vm0, %v6955_v28  ;;  %3129 = vmatpush2.msra.mxu0 %v1528_v50  ;;  %v7157_v37 = vpop.f32.mrf.mxu1 }
 0x2ee   : > { %5048 = vmatpush3.msra.mxu1 %v3453_v59  ;;  %3130 = vmatprep.subr.mxu0 %v7834_v40 }
 0x2ef   : > { %v7140_v10 = vpop.f32.mrf.mxu0  ;;  %5049 = vmatprep.subr.mxu1 %v3468_v35  ;;  %3131 = vmatpush2.msra.mxu0 %v1501_v61  ;;  %v3450_v61 = vld [vmem:[%s7909_s4 + $0x60] sm:$0xff] }
 0x2f0   : > { %3040 = vmatmul.mubr.f32.gmra.mxu1 %v6960_v36  ;;  %3132 = vmatprep.subr.mxu0 %v7834_v40 }
 0x2f1   : > { %4982 = vmatprep.mubr.msk.f32.mxu1 %vm805_vm0, %v6969_v16  ;;  %v7152_v21 = vpop.f32.mrf.mxu0  ;;  %3133 = vmatpush2.msra.mxu0 %v1474_v48  ;;  %v7172_v59 = vpop.f32.mrf.mxu1 }
 0x2f2   : > { %5050 = vmatpush3.msra.mxu1 %v3452_v7  ;;  %3134 = vmatprep.subr.mxu0 %v7834_v40  ;;  %v3465_v7 = vld [vmem:[%s7909_s4 + $0xd8] sm:$0xff] }
 0x2f3   : > { %5051 = vmatprep.subr.mxu1 %v3467_v17  ;;  %3135 = vmatpush2.msra.mxu0 %v1447_v30  ;;  %v5559_v17 = vld [vmem:[%s6435_s26] sm:$0xff]  ;;  %v7190_v30 = vpop.f32.mrf.mxu1  ;;  %s4617_s26 = sshll.u32 %s762_s30, 4  ;;  %s4618_s26 = int_to_ptr.vmem [resolvable:$true] %s4617_s26 }
 0x2f4   : > { %3046 = vmatmul.mubr.f32.gmra.mxu1 %v6974_v56  ;;  %3136 = vmatprep.subr.mxu0 %v7834_v40  ;;  %s5930_s1 = scalar_lea.vmem %s4618_s26, 128 }
 0x2f5   : > { %4983 = vmatprep.mubr.msk.f32.mxu1 %vm805_vm0, %v6983_v45  ;;  %v7169_v50 = vpop.f32.mrf.mxu0  ;;  %3137 = vmatpush2.msra.mxu0 %v1420_v12  ;;  %v3449_v12 = vld [vmem:[%s7909_s4 + $0x58] sm:$0xff]  ;;  %p5931_p7 = scmp.ne.s32.totalorder %s4618_s26, %s5930_s1 }
 0x2f6   : > { %7910 = vst [vmem:[#allocation51_spill] sm:$0xff] %v7169_v50  ;;  %5052 = vmatpush3.msra.mxu1 %v3451_v57  ;;  %3138 = vmatprep.subr.mxu0 %v7834_v40  ;;  %v3464_v57 = vld [vmem:[%s7909_s4 + $0xd0] sm:$0xff] }
 0x2f7   : > { %v7174_v35 = vpop.f32.mrf.mxu0  ;;  %5053 = vmatprep.subr.mxu1 %v3466_v54  ;;  %3139 = vmatpush2.msra.mxu0 %v1393_v41  ;;  %v3448_v54 = vld [vmem:[%s7909_s4 + $0x50] sm:$0xff]  ;;  %p5932_p9 = pnand %p5931_p7, %p7946_p12 }
 0x2f8   : > { %7911 = vst [vmem:[#allocation52_spill] sm:$0xff] %v7174_v35  ;;  %3052 = vmatmul.mubr.f32.gmra.mxu1 %v6990_v19  ;;  %3141 = vmatmul.mubr.f32.vlgmr.msra.gmra.mxu0 %v5559_v17 }
 0x2f9   : > { %4984 = vmatprep.mubr.msk.f32.mxu1 %vm805_vm0, %v7002_v33  ;;  %4988 = vmatprep.mubr.msk.f32.mxu0 %vm805_vm0, %v6941_v25  ;;  %v7204_v25 = vpop.f32.mrf.mxu1  ;;  %p5933_p13 = pneg %p5932_p9 }
 0x2fa   : > { %5054 = vmatpush3.msra.mxu1 %v3450_v61  ;;  %v3462_v61 = vld [vmem:[%s7909_s4 + $0xc0] sm:$0xff] }
 0x2fb   : > { %5055 = vmatprep.subr.mxu1 %v3465_v7  ;;  %v7221_v41 = vpop.f32.mrf.mxu1  ;;  %v3445_v7 = vld [vmem:[%s7909_s4 + $0x38] sm:$0xff] }
 0x2fc   : > { %3058 = vmatmul.mubr.f32.gmra.mxu1 %v7014_v14  ;;  %3146 = vmatmul.mubr.f32.gmra.mxu0 %v6951_v44  ;;  %v3463_v44 = vld [vmem:[%s7909_s4 + $0xc8] sm:$0xff] }
 0x2fd   : > { %4985 = vmatprep.mubr.msk.f32.mxu1 %vm805_vm0, %v7021_v2  ;;  %4989 = vmatprep.mubr.msk.f32.mxu0 %vm805_vm0, %v6955_v28  ;;  %v3447_v28 = vld [vmem:[%s7909_s4 + $0x48] sm:$0xff]  ;;  %v7239_v17 = vpop.f32.mrf.mxu1 }
 0x2fe   : > { %5056 = vmatpush3.msra.mxu1 %v3449_v12  ;;  %v3444_v12 = vld [vmem:[%s7909_s4 + $0x30] sm:$0xff] }
 0x2ff   : > { %5057 = vmatprep.subr.mxu1 %v3464_v57  ;;  %v3443_v57 = vld [vmem:[%s7909_s4 + $0x28] sm:$0xff] }
 0x300   : > { %3064 = vmatmul.mubr.f32.gmra.mxu1 %v7033_v32  ;;  %3151 = vmatmul.mubr.f32.gmra.mxu0 %v6960_v36  ;;  %v3446_v36 = vld [vmem:[%s7909_s4 + $0x40] sm:$0xff] }
 0x301   : > { %4986 = vmatprep.mubr.msk.f32.mxu1 %vm805_vm0, %v7045_v23  ;;  %4990 = vmatprep.mubr.msk.f32.mxu0 %vm805_vm0, %v6969_v16  ;;  %v3461_v16 = vld [vmem:[%s7909_s4 + $0xb8] sm:$0xff] }
 0x302   : > { %5058 = vmatpush3.msra.mxu1 %v3448_v54  ;;  %v7256_v54 = vpop.f32.mrf.mxu1 }
 0x303   : > { %5059 = vmatprep.subr.mxu1 %v3463_v44  ;;  %v3442_v44 = vld [vmem:[%s7909_s4 + $0x20] sm:$0xff] }
 0x304   : > { %3070 = vmatmul.mubr.f32.gmra.mxu1 %v7054_v22  ;;  %3156 = vmatmul.mubr.f32.gmra.mxu0 %v6974_v56  ;;  %v3460_v56 = vld [vmem:[%s7909_s4 + $0xb0] sm:$0xff] }
 0x305   : > { %5060 = vmatpush3.msra.mxu1 %v3447_v28  ;;  %4991 = vmatprep.mubr.msk.f32.mxu0 %vm805_vm0, %v6983_v45  ;;  %v3459_v45 = vld [vmem:[%s7909_s4 + $0xa8] sm:$0xff]  ;;  %v7270_v28 = vpop.f32.mrf.mxu0 }
 0x306   : > { %5061 = vmatprep.subr.mxu1 %v3462_v61  ;;  %v3441_v61 = vld [vmem:[%s7909_s4 + $0x18] sm:$0xff] }
 0x307   : > { %5062 = vmatpush3.msra.mxu1 %v3446_v36  ;;  %v7275_v36 = vpop.f32.mrf.mxu1 }
 0x308   : > { %5063 = vmatprep.subr.mxu1 %v3461_v16  ;;  %3161 = vmatmul.mubr.f32.gmra.mxu0 %v6990_v19  ;;  %v3458_v19 = vld [vmem:[%s7909_s4 + $0xa0] sm:$0xff]  ;;  %v3440_v16 = vld [vmem:[%s7909_s4 + $0x10] sm:$0xff] }
 0x309   : > { %5064 = vmatpush3.msra.mxu1 %v3445_v7  ;;  %4992 = vmatprep.mubr.msk.f32.mxu0 %vm805_vm0, %v7002_v33  ;;  %v3457_v33 = vld [vmem:[%s7909_s4 + $0x98] sm:$0xff]  ;;  %v7289_v7 = vpop.f32.mrf.mxu0 }
 0x30a   : > { %5065 = vmatprep.subr.mxu1 %v3460_v56  ;;  %v3439_v56 = vld [vmem:[%s7909_s4 + $0x8] sm:$0xff] }
 0x30b   : > { %5066 = vmatpush3.msra.mxu1 %v3444_v12  ;;  %v7294_v12 = vpop.f32.mrf.mxu1 }
 0x30c   : > { %5067 = vmatprep.subr.mxu1 %v3459_v45  ;;  %3166 = vmatmul.mubr.f32.gmra.mxu0 %v7014_v14  ;;  %v3456_v14 = vld [vmem:[%s7909_s4 + $0x90] sm:$0xff] }
 0x30d   : > { %5068 = vmatpush3.msra.mxu1 %v3443_v57  ;;  %4993 = vmatprep.mubr.msk.f32.mxu0 %vm805_vm0, %v7021_v2  ;;  %v3455_v2 = vld [vmem:[%s7909_s4 + $0x88] sm:$0xff] }
 0x30e   : > { %5069 = vmatprep.subr.mxu1 %v3458_v19  ;;  %v7307_v19 = vpop.f32.mrf.mxu1 }
 0x30f   : > { %5070 = vmatpush3.msra.mxu1 %v3442_v44 }
 0x310   : > { %5071 = vmatprep.subr.mxu1 %v3457_v33  ;;  %3171 = vmatmul.mubr.f32.gmra.mxu0 %v7033_v32  ;;  %v3454_v32 = vld [vmem:[%s7909_s4 + $0x80] sm:$0xff]  ;;  %v7312_v33 = vpop.f32.mrf.mxu1 }
 0x311   : > { %5072 = vmatpush3.msra.mxu1 %v3441_v61  ;;  %4994 = vmatprep.mubr.msk.f32.mxu0 %vm805_vm0, %v7045_v23  ;;  %v3438_v23 = vld [vmem:[%s7909_s4] sm:$0xff] }
 0x312   : > { %5073 = vmatprep.subr.mxu1 %v3456_v14 }
 0x313   : > { %5074 = vmatpush3.msra.mxu1 %v3440_v16  ;;  %v7318_v16 = vpop.f32.mrf.mxu1 }
 0x314   : > { %v7299_v45 = vpop.f32.mrf.mxu0  ;;  %5075 = vmatprep.subr.mxu1 %v3455_v2  ;;  %3176 = vmatmul.mubr.f32.gmra.mxu0 %v7054_v22  ;;  %7912 = vst [vmem:[#allocation53_spill] sm:$0xff] %v7318_v16  ;;  %v3269_v16 = vmax.f32 %v7270_v28, %v7289_v7  ;;  %v3476_v28 = vld [vmem:[%s7909_s4 + $0x130] sm:$0xff] }
 0x315   : > { %5076 = vmatpush3.msra.mxu1 %v3439_v56  ;;  %v7322_v2 = vpop.f32.mrf.mxu1 }
 0x316   : > { %v7305_v57 = vpop.f32.mrf.mxu0  ;;  %5077 = vmatprep.subr.mxu1 %v3454_v32  ;;  %7913 = vst [vmem:[#allocation54_spill] sm:$0xff] %v7322_v2 }
 0x317   : > { %5078 = vmatpush3.msra.mxu1 %v3438_v23 }
 0x318   : > { %5260 = vmatprep.subr.mxu1 %v7834_v40  ;;  %v3485_v40 = vld [vmem:[%s7909_s4 + $0x178] sm:$0xff] }
 0x319   : > { %v7310_v44 = vpop.f32.mrf.mxu0  ;;  %5196 = vmatprep.subr.mxu0 %v3485_v40 }
 0x31a   : > { %5197 = vmatpush3.msra.mxu0 %v3485_v40 }
 0x31b   : > { %v7314_v61 = vpop.f32.mrf.mxu0  ;;  %5198 = vmatprep.subr.mxu0 %v3484_v60 }
 0x31c   : > { %5199 = vmatpush3.msra.mxu0 %v3484_v60 }
 0x31d   : > { %5200 = vmatprep.subr.mxu0 %v3483_v24 }
 0x31e   : > { %v7316_v14 = vpop.f32.mrf.mxu0  ;;  %5201 = vmatpush3.msra.mxu0 %v3483_v24  ;;  %v3480_v24 = vld [vmem:[%s7909_s4 + $0x150] sm:$0xff] }
 0x31f   : > { %5202 = vmatprep.subr.mxu0 %v3482_v34 }
 0x320   : > { %v7320_v22 = vpop.f32.mrf.mxu0  ;;  %5203 = vmatpush3.msra.mxu0 %v3482_v34 }
 0x321   : > { %5204 = vmatprep.subr.mxu0 %v3481_v8 }
 0x322   : > { %5205 = vmatpush3.msra.mxu0 %v3481_v8  ;;  %v3478_v8 = vld [vmem:[%s7909_s4 + $0x140] sm:$0xff] }
 0x323   : > { %v7324_v56 = vpop.f32.mrf.mxu0  ;;  %5206 = vmatprep.subr.mxu0 %v3480_v24 }
 0x324   : > { %5207 = vmatpush3.msra.mxu0 %v3480_v24 }
 0x325   : > { %v2577_v32 = vpop.f32.mrf.mxu1  ;;  %v7326_v23 = vpop.f32.mrf.mxu0  ;;  %5208 = vmatprep.subr.mxu0 %v3479_v4 }
 0x326   : > { %5209 = vmatpush3.msra.mxu0 %v3479_v4  ;;  %v7376_v4 = vld [vmem:[#allocation10] sm:$0x7] }
 0x327   : > { %v2579_v48 = vpop.f32.mrf.mxu1  ;;  %5210 = vmatprep.subr.mxu0 %v3478_v8 }
 0x328   : > { %v3277_v35 = vmax.f32 %v2577_v32, %v2579_v48  ;;  %v7374_v48 = vsub.s32 0, %v7359_v3  ;;  %5211 = vmatpush3.msra.mxu0 %v3478_v8  ;;  %v3253_v32 = vmax.f32 %v7051_v62, %v7065_v53  ;;  %v3475_v53 = vld [vmem:[%s7909_s4 + $0x128] sm:$0xff] }
 0x329   : > { %v7331_v15 = vpop.f32.mrf.mxu0  ;;  %5212 = vmatprep.subr.mxu0 %v3477_v1 }
 0x32a   : > { %7916 = vst [vmem:[#allocation57_spill] sm:$0xff] %v7374_v48  ;;  %v3293_v24 = vmax.f32 %v3269_v16, %v3277_v35  ;;  %5213 = vmatpush3.msra.mxu0 %v3477_v1  ;;  %v3285_v7 = vmax.f32 %v3253_v32, %v3261_v0  ;;  %v7392_v62 = vrot.slane %v7376_v4, %v7374_v48  ;;  %v3474_v32 = vld [vmem:[%s7909_s4 + $0x120] sm:$0xff] }
 0x32b   : > { %v7339_v13 = vpop.f32.mrf.mxu0  ;;  %v2583_v39 = vpop.f32.mrf.mxu1  ;;  %5214 = vmatprep.subr.mxu0 %v3476_v28  ;;  %v3262_v35 = vmax.f32 %v7138_v31, %v7157_v37  ;;  %v3270_v16 = vmax.f32 %v7299_v45, %v7305_v57 }
 0x32c   : > { %5215 = vmatpush3.msra.mxu0 %v3476_v28  ;;  %v3301_v0 = vmax.f32 %v3285_v7, %v3293_v24  ;;  %v3254_v28 = vmax.f32 %v7069_v46, %v7073_v20  ;;  %v3390_v45 = vadd.f32 %v7392_v62, %v6948_v5  ;;  %v3473_v24 = vld [vmem:[%s7909_s4 + $0x118] sm:$0xff]  ;;  %v3472_v46 = vld [vmem:[%s7909_s4 + $0x110] sm:$0xff]  ;;  %v3263_v5 = vmax.f32 %v7172_v59, %v7190_v30 }
 0x32d   : > { %v2585_v40 = vpop.f32.mrf.mxu1  ;;  %5216 = vmatprep.subr.mxu0 %v3475_v53  ;;  %v3271_v20 = vmax.f32 %v7310_v44, %v7314_v61  ;;  %v3393_v59 = vadd.f32 %v7392_v62, %v6966_v38  ;;  %v3470_v44 = vld [vmem:[%s7909_s4 + $0x100] sm:$0xff]  ;;  %v3272_v38 = vmax.f32 %v7316_v14, %v7320_v22 }
 0x32e   : > { %v3278_v8 = vmax.f32 %v2583_v39, %v2585_v40  ;;  %v7402_v39 = vrot.slane %v7376_v4, %v3381_v26  ;;  %5217 = vmatpush3.msra.mxu0 %v3475_v53  ;;  %v3286_v26 = vmax.f32 %v3254_v28, %v3262_v35  ;;  %v3414_v35 = vmax.f32 %v3390_v45, 0.0 }
 0x32f   : > { %v7347_v18 = vpop.f32.mrf.mxu0  ;;  %5218 = vmatprep.subr.mxu0 %v3474_v32 }
 0x330   : > { %v3294_v31 = vmax.f32 %v3270_v16, %v3278_v8  ;;  %5219 = vmatpush3.msra.mxu0 %v3474_v32 }
 0x331   : > { %v7349_v52 = vpop.f32.mrf.mxu0  ;;  %v7354_v60 = vpop.f32.mrf.mxu1  ;;  %5220 = vmatprep.subr.mxu0 %v3473_v24 }
 0x332   : > { %5221 = vmatpush3.msra.mxu0 %v3473_v24  ;;  %v3302_v16 = vmax.f32 %v3286_v26, %v3294_v31  ;;  %v3264_v31 = vmax.f32 %v7204_v25, %v7221_v41  ;;  %v3417_v26 = vmax.f32 %v3393_v59, 0.0 }
 0x333   : > { %v2591_v34 = vpop.f32.mrf.mxu1  ;;  %5222 = vmatprep.subr.mxu0 %v3472_v46 }
 0x334   : > { %v3279_v7 = vmax.f32 %v7354_v60, %v2591_v34  ;;  %5223 = vmatpush3.msra.mxu0 %v3472_v46  ;;  %v3471_v34 = vld [vmem:[%s7909_s4 + $0x108] sm:$0xff] }
 0x335   : > { %v7361_v50 = vpop.f32.mrf.mxu0  ;;  %5224 = vmatprep.subr.mxu0 %v3471_v34 }
 0x336   : > { %7915 = vst [vmem:[#allocation56_spill] sm:$0xff] %v7361_v50  ;;  %5225 = vmatpush3.msra.mxu0 %v3471_v34 }
 0x337   : > { %v7380_v50 = vpop.f32.mrf.mxu1  ;;  %v7383_v6 = vpop.f32.mrf.mxu0  ;;  %5226 = vmatprep.subr.mxu0 %v3470_v44 }
 0x338   : > { %5227 = vmatpush3.msra.mxu0 %v3470_v44 }
 0x339   : > { %v7388_v2 = vpop.f32.mrf.mxu1 }
 0x33c   : > { %v2690_v1 = vpop.f32.mrf.mxu0 }
 0x33d   : > { %v7404_v40 = vpop.f32.mrf.mxu1  ;;  %v3309_v37 = vmax.f32 %v3301_v0, %v2690_v1  ;;  %v3255_v0 = vmax.f32 %v7078_v49, %v7082_v42  ;;  %v3295_v1 = vmax.f32 %v3271_v20, %v3279_v7  ;;  %v3280_v49 = vmax.f32 %v7380_v50, %v7388_v2 }
 0x33e   : > { %v7413_v57 = vpop.f32.mrf.mxu0  ;;  %v3396_v2 = vadd.f32 %v7392_v62, %v6980_v58  ;;  %v3265_v20 = vmax.f32 %v7239_v17, %v7256_v54  ;;  %v7917_v17 = vmax.f32 %v7096_v55, %v7100_v43  ;;  %v3402_v55 = vadd.f32 %v7392_v62, %v7011_v29 }
 0x33f   : > { %v3391_v53 = vadd.f32 %v7402_v39, %v3309_v37  ;;  %v2603_v48 = vpop.f32.mrf.mxu1  ;;  %v3287_v61 = vmax.f32 %v3255_v0, %v3263_v5  ;;  %v3296_v46 = vmax.f32 %v3272_v38, %v3280_v49  ;;  %v7918_v43 = vmax.f32 %v7116_v63, %v7123_v51 }
 0x340   : > { %v3281_v41 = vmax.f32 %v7404_v40, %v2603_v48  ;;  %v3399_v48 = vadd.f32 %v7392_v62, %v6997_v47  ;;  %v3289_v54 = vmax.f32 %v7917_v17, %v3265_v20  ;;  %v3405_v51 = vadd.f32 %v7392_v62, %v7030_v27 }
 0x341   : > { %v3415_v8 = vmax.f32 %v3391_v53, 0.0  ;;  %v3303_v24 = vmax.f32 %v3287_v61, %v3295_v1  ;;  %v3256_v53 = vmax.f32 %v7087_v11, %v7091_v9  ;;  %v3273_v11 = vmax.f32 %v7324_v56, %v7326_v23 }
 0x342   : > { %v2607_v32 = vpop.f32.mrf.mxu1  ;;  %v3266_v23 = vmax.f32 %v7275_v36, %v7294_v12  ;;  %v3274_v1 = vmax.f32 %v7331_v15, %v7339_v13  ;;  %v3423_v47 = vmax.f32 %v3399_v48, 0.0  ;;  %v3267_v13 = vmax.f32 %v7307_v19, %v7312_v33 }
 0x343   : > { %v2696_v60 = vpop.f32.mrf.mxu0  ;;  %3550 = vmatprep.mubr.f32.mxu1 %v3415_v8  ;;  %v3288_v25 = vmax.f32 %v3256_v53, %v3264_v31  ;;  %v3297_v58 = vmax.f32 %v3273_v11, %v3281_v41  ;;  %v3275_v15 = vmax.f32 %v7347_v18, %v7349_v52  ;;  %v7919_v53 = vmax.f32 %v7140_v10, %v7152_v21  ;;  %v7920_v52 = vld [vmem:[#allocation54_spill] sm:$0xff]  ;;  %v7921_v18 = vld [vmem:[#allocation53_spill] sm:$0xff] }
 0x344   : > { %v3310_v28 = vmax.f32 %v3302_v16, %v2696_v60  ;;  %3551 = vmatmul.mubr.f32.vlgmr.msra.gmra.mxu1 %v3414_v35  ;;  %v2609_v45 = vpop.f32.mrf.mxu1  ;;  %v3420_v16 = vmax.f32 %v3396_v2, 0.0  ;;  %v3290_v31 = vmax.f32 %v7918_v43, %v3266_v23  ;;  %v3429_v20 = vmax.f32 %v3405_v51, 0.0  ;;  %v7923_v10 = vld [vmem:[#allocation49_spill] sm:$0xff] }
 0x345   : > { %v7434_v30 = vpop.f32.mrf.mxu0  ;;  %v3304_v8 = vmax.f32 %v3288_v25, %v3296_v46  ;;  %v3282_v40 = vmax.f32 %v2607_v32, %v2609_v45  ;;  %v3305_v44 = vmax.f32 %v3289_v54, %v3297_v58  ;;  %v3291_v19 = vmax.f32 %v7919_v53, %v3267_v13  ;;  %v7927_v54 = vld [vmem:[#allocation50_spill] sm:$0xff] }
 0x346   : > { %v3394_v42 = vadd.f32 %v7402_v39, %v3310_v28  ;;  %v3268_v46 = vmax.f32 %v7921_v18, %v7920_v52  ;;  %v3408_v21 = vadd.f32 %v7392_v62, %v7923_v10 }
 0x347   : > { %v3298_v32 = vmax.f32 %v3274_v1, %v3282_v40 }
 0x348   : > { %v3418_v37 = vmax.f32 %v3394_v42, 0.0  ;;  %v2613_v14 = vpop.f32.mrf.mxu1  ;;  %v3432_v40 = vmax.f32 %v3408_v21, 0.0 }
 0x349   : > { %v2702_v7 = vpop.f32.mrf.mxu0 }
 0x34a   : > { %v3311_v50 = vmax.f32 %v3303_v24, %v2702_v7  ;;  %3555 = vmatprep.mubr.f32.mxu1 %v3418_v37  ;;  %v2615_v60 = vpop.f32.mrf.mxu1  ;;  %v3306_v37 = vmax.f32 %v3290_v31, %v3298_v32 }
 0x34b   : > { %v7450_v5 = vpop.f32.mrf.mxu0  ;;  %3556 = vmatmul.mubr.f32.gmra.mxu1 %v3417_v26  ;;  %v3283_v49 = vmax.f32 %v2613_v14, %v2615_v60  ;;  %v3426_v26 = vmax.f32 %v3402_v55, 0.0 }
 0x34c   : > { %v3397_v22 = vadd.f32 %v7402_v39, %v3311_v50  ;;  %v7922_v50 = vld [vmem:[#allocation56_spill] sm:$0xff] }
 0x34d   : > { %v3299_v45 = vmax.f32 %v3275_v15, %v3283_v49  ;;  %v3276_v2 = vmax.f32 %v7922_v50, %v7383_v6 }
 0x34e   : > { %v3421_v9 = vmax.f32 %v3397_v22, 0.0  ;;  %v2619_v28 = vpop.f32.mrf.mxu1 }
 0x34f   : > { %v2708_v35 = vpop.f32.mrf.mxu0  ;;  %v3307_v41 = vmax.f32 %v3291_v19, %v3299_v45 }
 0x350   : > { %v3312_v34 = vmax.f32 %v3304_v8, %v2708_v35  ;;  %3560 = vmatprep.mubr.f32.mxu1 %v3421_v9  ;;  %v2621_v12 = vpop.f32.mrf.mxu1  ;;  %v7924_v9 = vld [vmem:[#allocation51_spill] sm:$0xff]  ;;  %v7925_v8 = vld [vmem:[#allocation52_spill] sm:$0xff] }
 0x351   : > { %v7460_v0 = vpop.f32.mrf.mxu0  ;;  %3561 = vmatmul.mubr.f32.gmra.mxu1 %v3420_v16  ;;  %v3284_v7 = vmax.f32 %v2619_v28, %v2621_v12  ;;  %v7926_v16 = vmax.f32 %v7924_v9, %v7925_v8 }
 0x352   : > { %v3400_v56 = vadd.f32 %v7402_v39, %v3312_v34 }
 0x353   : > { %v3300_v14 = vmax.f32 %v3276_v2, %v3284_v7  ;;  %v3292_v35 = vmax.f32 %v7926_v16, %v3268_v46  ;;  %v3385_v16 = vsub.s32 2, %v7359_v3 }
 0x354   : > { %v3424_v59 = vmax.f32 %v3400_v56, 0.0  ;;  %v2714_v61 = vpop.f32.mrf.mxu0  ;;  %v3411_v56 = vadd.f32 %v7392_v62, %v7927_v54 }
 0x355   : > { %v3313_v42 = vmax.f32 %v3305_v44, %v2714_v61  ;;  %v3308_v60 = vmax.f32 %v3292_v35, %v3300_v14 }
 0x356   : > { %3565 = vmatprep.mubr.f32.mxu1 %v3424_v59  ;;  %v7475_v36 = vpop.f32.mrf.mxu0  ;;  %v3435_v28 = vmax.f32 %v3411_v56, 0.0 }
 0x357   : > { %3566 = vmatmul.mubr.f32.gmra.mxu1 %v3423_v47  ;;  %v3403_v38 = vadd.f32 %v7402_v39, %v3313_v42 }
 0x359   : > { %v3427_v24 = vmax.f32 %v3403_v38, 0.0  ;;  %v2720_v29 = vpop.f32.mrf.mxu0 }
 0x35a   : > { %v3314_v63 = vmax.f32 %v3306_v37, %v2720_v29 }
 0x35b   : > { %v7487_v33 = vpop.f32.mrf.mxu0  ;;  %3570 = vmatprep.mubr.f32.mxu1 %v3427_v24 }
 0x35c   : > { %v3406_v25 = vadd.f32 %v7402_v39, %v3314_v63  ;;  %3571 = vmatmul.mubr.f32.gmra.mxu1 %v3426_v26 }
 0x35e   : > { %v3430_v22 = vmax.f32 %v3406_v25, 0.0  ;;  %v2726_v27 = vpop.f32.mrf.mxu0 }
 0x35f   : > { %v3315_v11 = vmax.f32 %v3307_v41, %v2726_v27 }
 0x360   : > { %v7499_v58 = vpop.f32.mrf.mxu0  ;;  %3575 = vmatprep.mubr.f32.mxu1 %v3430_v22 }
 0x361   : > { %v3409_v6 = vadd.f32 %v7402_v39, %v3315_v11  ;;  %3576 = vmatmul.mubr.f32.gmra.mxu1 %v3429_v20 }
 0x363   : > { %v3433_v34 = vmax.f32 %v3409_v6, 0.0  ;;  %v2732_v48 = vpop.f32.mrf.mxu0 }
 0x364   : > { %v3316_v17 = vmax.f32 %v3308_v60, %v2732_v48 }
 0x365   : > { %3580 = vmatprep.mubr.f32.mxu1 %v3433_v34  ;;  %v7505_v61 = vpop.f32.mrf.mxu0 }
 0x366   : > { %v3412_v23 = vadd.f32 %v7402_v39, %v3316_v17  ;;  %3581 = vmatmul.mubr.f32.gmra.mxu1 %v3432_v40  ;;  %7928 = vst [vmem:[#allocation54_spill] sm:$0xff] %v7505_v61 }
 0x368   : > { %v3436_v1 = vmax.f32 %v3412_v23, 0.0  ;;  %v2803_v59 = vpop.f32.mrf.mxu1  ;;  %v7554_v23 = vrot.slane %v7376_v4, %v3385_v16 }
 0x369   : > { %v3317_v6 = vmax.f32 %v7413_v57, %v2803_v59 }
 0x36a   : > { %3585 = vmatprep.mubr.f32.mxu1 %v3436_v1  ;;  %v2805_v44 = vpop.f32.mrf.mxu1 }
 0x36b   : > { %3586 = vmatmul.mubr.f32.gmra.mxu1 %v3435_v28 }
 0x36d   : > { %v2809_v47 = vpop.f32.mrf.mxu1 }
 0x36e   : > { %v3318_v28 = vmax.f32 %v7434_v30, %v2809_v47 }
 0x36f   : > { %v2811_v32 = vpop.f32.mrf.mxu1 }
 0x372   : > { %v7507_v49 = vpop.f32.mrf.mxu1 }
 0x374   : > { %v7509_v55 = vpop.f32.mrf.mxu1 }
 0x377   : > { %v7511_v43 = vpop.f32.mrf.mxu1 }
 0x379   : > { %v7513_v31 = vpop.f32.mrf.mxu1 }
 0x37c   : > { %v2916_v42 = vpop.f32.mrf.mxu0 }
 0x37d   : > { %v7515_v15 = vpop.f32.mrf.mxu1  ;;  %v3325_v8 = vmax.f32 %v2805_v44, %v2916_v42 }
 0x37e   : > { %v2918_v62 = vpop.f32.mrf.mxu0 }
 0x37f   : > { %v7517_v38 = vpop.f32.mrf.mxu1  ;;  %v3349_v17 = vmax.f32 %v3317_v6, %v3325_v8 }
 0x382   : > { %v7519_v45 = vpop.f32.mrf.mxu1 }
 0x383   : > { %v2922_v39 = vpop.f32.mrf.mxu0 }
 0x384   : > { %v7523_v29 = vpop.f32.mrf.mxu1  ;;  %v3326_v54 = vmax.f32 %v2811_v32, %v2922_v39  ;;  %v3319_v32 = vmax.f32 %v7450_v5, %v7507_v49 }
 0x385   : > { %v2924_v13 = vpop.f32.mrf.mxu0 }
 0x388   : > { %v7527_v7 = vpop.f32.mrf.mxu1 }
 0x389   : > { %v2928_v12 = vpop.f32.mrf.mxu0 }
 0x38a   : > { %v7531_v51 = vpop.f32.mrf.mxu1  ;;  %v3327_v57 = vmax.f32 %v7509_v55, %v2928_v12  ;;  %v3320_v12 = vmax.f32 %v7460_v0, %v7511_v43 }
 0x38b   : > { %v2930_v37 = vpop.f32.mrf.mxu0 }
 0x38e   : > { %v7535_v19 = vpop.f32.mrf.mxu1 }
 0x38f   : > { %v7521_v24 = vpop.f32.mrf.mxu0  ;;  %7929 = vst [vmem:[#allocation53_spill] sm:$0xff] %v7535_v19  ;;  %v3350_v19 = vmax.f32 %v3318_v28, %v3326_v54 }
 0x390   : > { %v7539_v18 = vpop.f32.mrf.mxu1 }
 0x391   : > { %v7525_v26 = vpop.f32.mrf.mxu0 }
 0x394   : > { %v7529_v63 = vpop.f32.mrf.mxu0 }
 0x395   : > { %v3329_v16 = vmax.f32 %v7517_v38, %v7529_v63 }
 0x396   : > { %v7533_v53 = vpop.f32.mrf.mxu0 }
 0x399   : > { %v7537_v52 = vpop.f32.mrf.mxu0 }
 0x39b   : > { %v7541_v50 = vpop.f32.mrf.mxu0 }
 0x39e   : > { %v7543_v41 = vpop.f32.mrf.mxu0 }
 0x39f   : > { %v3331_v28 = vmax.f32 %v7531_v51, %v7543_v41 }
 0x3a0   : > { %v7545_v27 = vpop.f32.mrf.mxu0 }
 0x3a3   : > { %v7547_v10 = vpop.f32.mrf.mxu0 }
 0x3a5   : > { %v7549_v21 = vpop.f32.mrf.mxu0 }
 0x3a6   : > { %7930 = vst [vmem:[#allocation56_spill] sm:$0xff] %v7549_v21 }
 0x3a8   : > { %v3029_v46 = vpop.f32.mrf.mxu1 }
 0x3a9   : > { %v3333_v60 = vmax.f32 %v2918_v62, %v3029_v46 }
 0x3aa   : > { %v3031_v2 = vpop.f32.mrf.mxu1 }
 0x3ac   : > { %v3035_v25 = vpop.f32.mrf.mxu1 }
 0x3ad   : > { %v3334_v21 = vmax.f32 %v2924_v13, %v3035_v25  ;;  %v3351_v13 = vmax.f32 %v3319_v32, %v3327_v57 }
 0x3ae   : > { %v3037_v14 = vpop.f32.mrf.mxu1 }
 0x3b0   : > { %v3041_v22 = vpop.f32.mrf.mxu1 }
 0x3b1   : > { %v3335_v4 = vmax.f32 %v2930_v37, %v3041_v22 }
 0x3b2   : > { %v3043_v20 = vpop.f32.mrf.mxu1 }
 0x3b4   : > { %v3047_v11 = vpop.f32.mrf.mxu1 }
 0x3b5   : > { %v3336_v5 = vmax.f32 %v7525_v26, %v3047_v11 }
 0x3b6   : > { %v3049_v9 = vpop.f32.mrf.mxu1 }
 0x3b8   : > { %v3142_v35 = vpop.f32.mrf.mxu0  ;;  %v3053_v48 = vpop.f32.mrf.mxu1 }
 0x3b9   : > { %v3341_v34 = vmax.f32 %v3031_v2, %v3142_v35  ;;  %v3321_v35 = vmax.f32 %v7475_v36, %v7515_v15  ;;  %v3337_v43 = vmax.f32 %v7533_v53, %v3053_v48 }
 0x3ba   : > { %v3144_v40 = vpop.f32.mrf.mxu0  ;;  %v3055_v3 = vpop.f32.mrf.mxu1 }
 0x3bb   : > { %v3357_v56 = vmax.f32 %v3333_v60, %v3341_v34  ;;  %v3353_v34 = vmax.f32 %v3321_v35, %v3329_v16  ;;  %v3330_v40 = vmax.f32 %v7523_v29, %v7537_v52  ;;  %v3862_v16 = vld [vmem:[#allocation17 + $0x8] sm:$0xff] }
 0x3bc   : > { %v3147_v1 = vpop.f32.mrf.mxu0  ;;  %v3059_v30 = vpop.f32.mrf.mxu1 }
 0x3bd   : > { %v3365_v44 = vmax.f32 %v3349_v17, %v3357_v56  ;;  %v3342_v42 = vmax.f32 %v3037_v14, %v3147_v1  ;;  %v3322_v17 = vmax.f32 %v7487_v33, %v7519_v45  ;;  %v3338_v15 = vmax.f32 %v7541_v50, %v3059_v30 }
 0x3be   : > { %v3149_v61 = vpop.f32.mrf.mxu0  ;;  %v3061_v22 = vpop.f32.mrf.mxu1 }
 0x3bf   : > { %v3358_v59 = vmax.f32 %v3334_v21, %v3342_v42  ;;  %v3392_v62 = vadd.f32 %v7554_v23, %v3365_v44  ;;  %v3328_v61 = vmax.f32 %v7513_v31, %v7521_v24  ;;  %v3354_v1 = vmax.f32 %v3322_v17, %v3330_v40  ;;  %v4874_v40 = vld [vmem:[#allocation11] ss:$0 sm:$0xff] }
 0x3c0   : > { %v3152_v39 = vpop.f32.mrf.mxu0  ;;  %v3323_v44 = vmax.f32 %v7499_v58, %v7527_v7 }
 0x3c1   : > { %v3366_v46 = vmax.f32 %v3350_v19, %v3358_v59  ;;  %v3343_v2 = vmax.f32 %v3043_v20, %v3152_v39  ;;  %v3416_v8 = vmax.f32 %v3392_v62, 0.0  ;;  %v3352_v21 = vmax.f32 %v3320_v12, %v3328_v61 }
 0x3c2   : > { %v3154_v47 = vpop.f32.mrf.mxu0  ;;  %v3355_v32 = vmax.f32 %v3323_v44, %v3331_v28  ;;  %v3332_v39 = vmax.f32 %v7539_v18, %v7547_v10 }
 0x3c3   : > { %v3395_v25 = vadd.f32 %v7554_v23, %v3366_v46  ;;  %v3359_v55 = vmax.f32 %v3335_v4, %v3343_v2  ;;  %5228 = vmatprep.mubr.f32.mxu0 %v3416_v8  ;;  %v7931_v4 = vld [vmem:[#allocation53_spill] sm:$0xff]  ;;  %v7932_v46 = vld [vmem:[#allocation54_spill] sm:$0xff]  ;;  %v7933_v8 = vld [vmem:[#allocation56_spill] sm:$0xff] }
 0x3c4   : > { %v3157_v14 = vpop.f32.mrf.mxu0  ;;  %v3324_v2 = vmax.f32 %v7932_v46, %v7931_v4 }
 0x3c5   : > { %v3419_v49 = vmax.f32 %v3395_v25, 0.0  ;;  %v3367_v37 = vmax.f32 %v3351_v13, %v3359_v55  ;;  %v3344_v19 = vmax.f32 %v3049_v9, %v3157_v14  ;;  %v3065_v9 = vpop.f32.mrf.mxu1 }
 0x3c6   : > { %v3159_v20 = vpop.f32.mrf.mxu0  ;;  %v3339_v45 = vmax.f32 %v7545_v27, %v3065_v9  ;;  %v3356_v25 = vmax.f32 %v3324_v2, %v3332_v39 }
 0x3c7   : > { %v3360_v31 = vmax.f32 %v3336_v5, %v3344_v19  ;;  %5229 = vmatmul.mubr.f32.vlgmr.msra.gmra.mxu0 %v3419_v49  ;;  %v3398_v24 = vadd.f32 %v7554_v23, %v3367_v37  ;;  %v3067_v54 = vpop.f32.mrf.mxu1  ;;  %v3715_v49 = vld [vmem:[#allocation13 + $0x18] sm:$0xff]  ;;  %v3714_v37 = vld [vmem:[#allocation13 + $0x10] sm:$0xff]  ;;  %v3713_v19 = vld [vmem:[#allocation13 + $0x8] sm:$0xff] }
 0x3c8   : > { %v3162_v0 = vpop.f32.mrf.mxu0  ;;  %5240 = vmatprep.subr.mxu0 %v3715_v49  ;;  %v3864_v20 = vld [vmem:[#allocation17 + $0x18] sm:$0xff] }
 0x3c9   : > { %v3368_v26 = vmax.f32 %v3352_v21, %v3360_v31  ;;  %v3345_v11 = vmax.f32 %v3055_v3, %v3162_v0  ;;  %v3422_v6 = vmax.f32 %v3398_v24, 0.0  ;;  %v3071_v59 = vpop.f32.mrf.mxu1  ;;  %5241 = vmatpush3.msra.mxu0 %v3715_v49  ;;  %v3863_v21 = vld [vmem:[#allocation17 + $0x10] sm:$0xff]  ;;  %5261 = vmatpush3.msra.mxu1 %v3864_v20  ;;  %v3861_v31 = vld [vmem:[#allocation17] sm:$0xff] }
 0x3ca   : > { %v3164_v60 = vpop.f32.mrf.mxu0  ;;  %v3340_v27 = vmax.f32 %v7933_v8, %v3071_v59  ;;  %5242 = vmatprep.subr.mxu0 %v3714_v37 }
 0x3cb   : > { %v3401_v38 = vadd.f32 %v7554_v23, %v3368_v26  ;;  %v3361_v63 = vmax.f32 %v3337_v43, %v3345_v11  ;;  %5231 = vmatprep.mubr.f32.mxu0 %v3422_v6  ;;  %v3073_v58 = vpop.f32.mrf.mxu1  ;;  %5243 = vmatpush3.msra.mxu0 %v3714_v37 }
 0x3cc   : > { %v3167_v36 = vpop.f32.mrf.mxu0  ;;  %5244 = vmatprep.subr.mxu0 %v3713_v19 }
 0x3cd   : > { %v3425_v53 = vmax.f32 %v3401_v38, 0.0  ;;  %v3369_v48 = vmax.f32 %v3353_v34, %v3361_v63  ;;  %v3346_v3 = vmax.f32 %v3061_v22, %v3167_v36  ;;  %5245 = vmatpush3.msra.mxu0 %v3713_v19  ;;  %v3712_v22 = vld [vmem:[#allocation13] sm:$0xff] }
 0x3ce   : > { %v3169_v56 = vpop.f32.mrf.mxu0  ;;  %5246 = vmatprep.subr.mxu0 %v3712_v22 }
 0x3cf   : > { %v3362_v29 = vmax.f32 %v3338_v15, %v3346_v3  ;;  %5232 = vmatmul.mubr.f32.gmra.mxu0 %v3425_v53  ;;  %v3404_v52 = vadd.f32 %v7554_v23, %v3369_v48  ;;  %v7935_v53 = vld [vmem:[#allocation41_spill] sm:$0xff] }
 0x3d0   : > { %v3172_v33 = vpop.f32.mrf.mxu0  ;;  %5247 = vmatpush3.msra.mxu0 %v3712_v22  ;;  %v902_v48 = vadd.f32 %v7935_v53, %v4874_v40 }
 0x3d1   : > { %v3370_v50 = vmax.f32 %v3354_v1, %v3362_v29  ;;  %v3347_v42 = vmax.f32 %v3067_v54, %v3172_v33  ;;  %v3428_v57 = vmax.f32 %v3404_v52, 0.0  ;;  %v7936_v54 = vld [vmem:[#allocation42_spill] sm:$0xff] }
 0x3d2   : > { %v3174_v62 = vpop.f32.mrf.mxu0  ;;  %v897_v56 = vadd.f32 %v4874_v40, %v7936_v54 }
 0x3d3   : > { %v3407_v51 = vadd.f32 %v7554_v23, %v3370_v50  ;;  %v3363_v41 = vmax.f32 %v3339_v45, %v3347_v42  ;;  %5234 = vmatprep.mubr.f32.mxu0 %v3428_v57  ;;  %v7937_v62 = vld [vmem:[#allocation43_spill] sm:$0xff] }
 0x3d4   : > { %v3177_v7 = vpop.f32.mrf.mxu0 }
 0x3d5   : > { %v3431_v30 = vmax.f32 %v3407_v51, 0.0  ;;  %v3371_v47 = vmax.f32 %v3355_v32, %v3363_v41  ;;  %v3348_v13 = vmax.f32 %v3073_v58, %v3177_v7  ;;  %v912_v32 = vadd.f32 %v7937_v62, %v4874_v40  ;;  %v7938_v51 = vld [vmem:[#allocation44_spill] sm:$0xff] }
 0x3d6   : > { %v3179_v61 = vpop.f32.mrf.mxu0  ;;  %v907_v41 = vadd.f32 %v4874_v40, %v7938_v51 }
 0x3d7   : > { %v3364_v55 = vmax.f32 %v3340_v27, %v3348_v13  ;;  %5235 = vmatmul.mubr.f32.gmra.mxu0 %v3431_v30  ;;  %v3410_v18 = vadd.f32 %v7554_v23, %v3371_v47 }
 0x3d9   : > { %v3372_v10 = vmax.f32 %v3356_v25, %v3364_v55  ;;  %v3434_v12 = vmax.f32 %v3410_v18, 0.0  ;;  %v7939_v25 = vld [vmem:[#allocation45_spill] sm:$0xff] }
 0x3da   : > { %v922_v55 = vadd.f32 %v7939_v25, %v4874_v40  ;;  %v7943_v25 = vld [vmem:[#allocation55_spill] sm:$0xff] }
 0x3db   : > { %v3413_v14 = vadd.f32 %v7554_v23, %v3372_v10  ;;  %5237 = vmatprep.mubr.f32.mxu0 %v3434_v12  ;;  %v7934_v23 = vmov 0.0   ;;  %v7940_v10 = vld [vmem:[#allocation46_spill] sm:$0xff] }
 0x3dc   : > { %5268 = vmatprep.mubr.msk.f32.mxu1 %vm6045_vm1, %v7934_v23  ;;  %5262 = vmatprep.subr.mxu1 %v7934_v23  ;;  %v917_v12 = vadd.f32 %v4874_v40, %v7940_v10 }
 0x3dd   : > { %v3437_v5 = vmax.f32 %v3413_v14, 0.0  ;;  %5263 = vmatpush3.msra.mxu1 %v3863_v21 }
 0x3de   : > { %5264 = vmatprep.subr.mxu1 %v7934_v23 }
 0x3df   : > { %5238 = vmatmul.mubr.f32.gmra.mxu0 %v3437_v5  ;;  %5265 = vmatpush3.msra.mxu1 %v3862_v16 }
 0x3e0   : > { %5266 = vmatprep.subr.mxu1 %v7934_v23 }
 0x3e1   : > { %5267 = vmatpush3.msra.mxu1 %v3861_v31  ;;  %v7941_v31 = vld [vmem:[#allocation47_spill] sm:$0xff] }
 0x404   : > { %v5079_v24 = vpop.f32.mrf.mxu1 }
 0x406   : > { %v5080_v35 = vpop.f32.mrf.mxu1 }
 0x407   : > { %v5081_v36 = vadd.f32 %v5080_v35, %v5079_v24  ;;  %v932_v24 = vadd.f32 %v7941_v31, %v4874_v40 }
 0x40b   : > { %v5082_v0 = vpop.f32.mrf.mxu1 }
 0x40d   : > { %v5083_v43 = vpop.f32.mrf.mxu1 }
 0x40e   : > { %v5084_v38 = vadd.f32 %v5083_v43, %v5082_v0  ;;  %v7942_v0 = vld [vmem:[#allocation48_spill] sm:$0xff] }
 0x40f   : > { %v927_v43 = vadd.f32 %v4874_v40, %v7942_v0  ;;  %v3938_v40 = vld [vmem:[#allocation16] sm:$0xff] }
 0x411   : > { %v5085_v26 = vpop.f32.mrf.mxu1 }
 0x413   : > { %v5086_v11 = vpop.f32.mrf.mxu1 }
 0x414   : > { %v5087_v57 = vadd.f32 %v5086_v11, %v5085_v26 }
 0x417   : > { %v5088_v6 = vpop.f32.mrf.mxu1 }
 0x419   : > { %v5089_v9 = vpop.f32.mrf.mxu1 }
 0x41a   : > { %v5090_v44 = vadd.f32 %v5089_v9, %v5088_v6 }
 0x41c   : > { %v5091_v60 = vpop.f32.mrf.mxu1 }
 0x41e   : > { %v5092_v34 = vpop.f32.mrf.mxu1 }
 0x41f   : > { %v5093_v13 = vadd.f32 %v5092_v34, %v5091_v60  ;;  %v773_v34 = vld [vmem:[%s6428_s7] sm:$0xff]  ;;  %s5025_s7 = sshll.u32 %s6154_s27, 7  ;;  %s6047_s27 = smov [#allocation25]  }
 0x420   : > { %5269 = vmatmul.mubr.msk.f32.vlgmr.msra.gmra.mxu1 %vm3723_vm2, %v773_v34  ;;  %s7753_s29 = scalar_lea.hbm %s7945_s9, %s5025_s7  ;;  %s5934_s18 = sshll.u32 %s6047_s27, 4  ;;  %s5935_s18 = int_to_ptr.vmem [resolvable:$false] %s5934_s18 }
 0x421   : > { %v5094_v63 = vpop.f32.mrf.mxu1  ;;  %s5936_s3 = scalar_lea.vmem %s5935_s18, 256  ;;  %p5937_p2 = scmp.lt.s32.totalorder %s4618_s26, %s5935_s18 }
 0x422   : > { %p5938_p1 = scmp.lt.s32.totalorder %s5936_s3, %s5930_s1 }
 0x423   : > { %v5095_v28 = vpop.f32.mrf.mxu1 }
 0x424   : > { %v5096_v7 = vadd.f32 %v5095_v28, %v5094_v63  ;;  %v3940_v63 = vld [vmem:[#allocation16 + $0x10] sm:$0xff]  ;;  %p5939_p11 = por %p5938_p1, %p5937_p2 }
 0x426   : > { %v5097_v45 = vpop.f32.mrf.mxu1  ;;  %p5940_p5 = pnand %p5939_p11, %p5933_p13 }
 0x428   : > { %v5098_v46 = vpop.f32.mrf.mxu1 }
 0x429   : > { %v5099_v23 = vadd.f32 %v5098_v46, %v5097_v45 }
 0x42b   : > { %v5100_v27 = vpop.f32.mrf.mxu1 }
 0x42d   : > { %v5101_v5 = vpop.f32.mrf.mxu1 }
 0x42e   : > { %v5102_v19 = vadd.f32 %v5101_v5, %v5100_v27  ;;  %v4193_v27 = vld [vmem:[#allocation20 + $0x8] sm:$0xff]  ;;  %v7944_v5 = vld [vmem:[#allocation57_spill] sm:$0xff] }
 0x487   : > { %v5230_v17 = vpop.f32.mrf.mxu0 }
 0x488   : > { %v3663_v15 = vadd.f32 %v5230_v17, %v5084_v38  ;;  %v3941_v38 = vld [vmem:[#allocation16 + $0x18] sm:$0xff]  ;;  %v3939_v17 = vld [vmem:[#allocation16 + $0x8] sm:$0xff] }
 0x489   : > { %v3657_v3 = vpop.f32.mrf.mxu0  ;;  %5271 = vmatprep.subr.mxu1 %v3941_v38 }
 0x48a   : > { %v3658_v1 = vadd.f32 %v5081_v36, %v3657_v3  ;;  %v3697_v29 = vadd.f32 %v3663_v15, %v902_v48  ;;  %5272 = vmatpush3.msra.mxu1 %v3941_v38  ;;  %v4995_v36 = vld [vmem:[#allocation14] ss:$0 sm:$0xff] }
 0x48b   : > { %5273 = vmatprep.subr.mxu1 %v3940_v63 }
 0x48c   : > { %v3696_v52 = vadd.f32 %v3658_v1, %v897_v56  ;;  %v3705_v50 = vmax.f32 %v3697_v29, 0.0  ;;  %5274 = vmatpush3.msra.mxu1 %v3940_v63 }
 0x48d   : > { %5275 = vmatprep.subr.mxu1 %v3939_v17 }
 0x48e   : > { %v3704_v33 = vmax.f32 %v3696_v52, 0.0  ;;  %5276 = vmatpush3.msra.mxu1 %v3939_v17 }
 0x48f   : > { %v5233_v42 = vpop.f32.mrf.mxu0  ;;  %5277 = vmatprep.subr.mxu1 %v3938_v40 }
 0x490   : > { %v3673_v59 = vadd.f32 %v5233_v42, %v5090_v44  ;;  %5248 = vmatprep.mubr.msk.f32.mxu0 %vm3723_vm2, %v3704_v33  ;;  %5278 = vmatpush3.msra.mxu1 %v3938_v40 }
 0x491   : > { %v3667_v39 = vpop.f32.mrf.mxu0  ;;  %5249 = vmatmul.mubr.msk.f32.vlgmr.msra.gmra.mxu0 %vm3723_vm2, %v3705_v50 }
 0x492   : > { %v3668_v4 = vadd.f32 %v5087_v57, %v3667_v39  ;;  %v3699_v2 = vadd.f32 %v3673_v59, %v912_v32 }
 0x494   : > { %v3698_v58 = vadd.f32 %v3668_v4, %v907_v41  ;;  %v3707_v30 = vmax.f32 %v3699_v2, 0.0 }
 0x496   : > { %v3706_v8 = vmax.f32 %v3698_v58, 0.0 }
 0x497   : > { %v5236_v47 = vpop.f32.mrf.mxu0 }
 0x498   : > { %v3683_v61 = vadd.f32 %v5236_v47, %v5096_v7  ;;  %5251 = vmatprep.mubr.msk.f32.mxu0 %vm3723_vm2, %v3706_v8  ;;  %v4195_v7 = vld [vmem:[#allocation20 + $0x18] sm:$0xff]  ;;  %v4194_v8 = vld [vmem:[#allocation20 + $0x10] sm:$0xff]  ;;  %v6046_v47 = vmov 1966171168  }
 0x499   : > { %v3677_v18 = vpop.f32.mrf.mxu0  ;;  %5252 = vmatmul.mubr.msk.f32.gmra.mxu0 %vm3723_vm2, %v3707_v30  ;;  %5291 = vmatprep.subr.mxu0 %v4195_v7  ;;  %v4192_v30 = vld [vmem:[#allocation20] sm:$0xff] }
 0x49a   : > { %v3678_v14 = vadd.f32 %v5093_v13, %v3677_v18  ;;  %v3701_v49 = vadd.f32 %v3683_v61, %v922_v55  ;;  %5311 = vmatprep.subr.mxu1 %v4195_v7  ;;  %5292 = vmatpush3.msra.mxu0 %v4195_v7  ;;  %v4074_v13 = vunpack.c.l.s4 %v6046_v47 }
 0x49b   : > { %5293 = vmatprep.subr.mxu0 %v4194_v8 }
 0x49c   : > { %v3700_v37 = vadd.f32 %v3678_v14, %v917_v12  ;;  %v3709_v20 = vmax.f32 %v3701_v49, 0.0  ;;  %5294 = vmatpush3.msra.mxu0 %v4194_v8  ;;  %v4075_v61 = vunpack.c.0.s8 %v4074_v13 }
 0x49d   : > { %5295 = vmatprep.subr.mxu0 %v4193_v27 }
 0x49e   : > { %v3708_v22 = vmax.f32 %v3700_v37, 0.0  ;;  %5296 = vmatpush3.msra.mxu0 %v4193_v27  ;;  %v4078_v55 = vsub.s32 %v4075_v61, %v7943_v25 }
 0x49f   : > { %v5239_v21 = vpop.f32.mrf.mxu0  ;;  %5297 = vmatprep.subr.mxu0 %v4192_v30 }
 0x4a0   : > { %v3693_v16 = vadd.f32 %v5239_v21, %v5102_v19  ;;  %5254 = vmatprep.mubr.msk.f32.mxu0 %vm3723_vm2, %v3708_v22  ;;  %5298 = vmatpush3.msra.mxu0 %v4192_v30  ;;  %v5013_v21 = vld [vmem:[#allocation19] ss:$0 sm:$0xff] }
 0x4a1   : > { %v3687_v35 = vpop.f32.mrf.mxu0  ;;  %5255 = vmatmul.mubr.msk.f32.gmra.mxu0 %vm3723_vm2, %v3709_v20 }
 0x4a2   : > { %v3688_v26 = vadd.f32 %v5099_v23, %v3687_v35  ;;  %v3703_v11 = vadd.f32 %v3693_v16, %v932_v24 }
 0x4a4   : > { %v3702_v6 = vadd.f32 %v3688_v26, %v927_v43  ;;  %v3711_v60 = vmax.f32 %v3703_v11, 0.0 }
 0x4a6   : > { %v3710_v9 = vmax.f32 %v3702_v6, 0.0 }
 0x4a8   : > { %5257 = vmatprep.mubr.msk.f32.mxu0 %vm3723_vm2, %v3710_v9 }
 0x4a9   : > { %5258 = vmatmul.mubr.msk.f32.gmra.mxu0 %vm3723_vm2, %v3711_v60 }
 0x4e0   : > { %v3934_v2 = vpop.f32.mrf.mxu1 }
 0x4e1   : > { %v4079_v18 = vrot.slane %v3934_v2, %v4078_v55  ;;  %v4072_v37 = vcombine.high %v3934_v2, %v3934_v2 }
 0x4e2   : > { %v5270_v58 = vpop.f32.mrf.mxu1 }
 0x4e3   : > { %v4087_v10 = vcombine.high %v4079_v18, %v4079_v18  ;;  %v4095_v14 = vrot.slane %v4079_v18, %v4078_v55  ;;  %v4086_v31 = vrot.slane %v4072_v37, %v4078_v55 }
 0x4e5   : > { %v4109_v12 = vrot.slane %v4087_v10, %v4078_v55  ;;  %v4124_v19 = vrot.slane %v4095_v14, %v7944_v5  ;;  %v4117_v35 = vcombine.high %v4095_v14, %v4095_v14  ;;  %v4088_v11 = vcombine.high %v4086_v31, %v4086_v31 }
 0x4e7   : > { %v4128_v49 = vrot.slane %v4109_v12, %v7944_v5  ;;  %v4119_v23 = vcombine.high %v4109_v12, %v4109_v12  ;;  %v4132_v9 = vrot.slane %v4117_v35, %v7944_v5  ;;  %v4116_v40 = vrot.slane %v4088_v11, %v4078_v55 }
 0x4e9   : > { %v4136_v26 = vrot.slane %v4119_v23, %v7944_v5 }
 0x551   : > { %v5250_v15 = vpop.f32.mrf.mxu0 }
 0x552   : > { %v7615_v53 = vadd.f32 %v5250_v15, %v4995_v36 }
 0x553   : > { %v3814_v48 = vpop.f32.mrf.mxu0 }
 0x554   : > { %v7617_v3 = vadd.f32 %v4995_v36, %v3814_v48  ;;  %v3854_v56 = vmax.f32 %v7615_v53, 0.0  ;;  %v4102_v48 = vrot.slane %v4086_v31, %v4078_v55  ;;  %v5023_v31 = vld [vmem:[#allocation23] ss:$0 sm:$0xff] }
 0x556   : > { %v3853_v54 = vmax.f32 %v7617_v3, 0.0 }
 0x558   : > { %5279 = vmatprep.mubr.msk.f32.mxu1 %vm3723_vm2, %v3853_v54 }
 0x559   : > { %v5253_v1 = vpop.f32.mrf.mxu0  ;;  %5280 = vmatmul.mubr.msk.f32.vlgmr.msra.gmra.mxu1 %vm3723_vm2, %v3854_v56 }
 0x55a   : > { %v7627_v28 = vadd.f32 %v5253_v1, %v4995_v36  ;;  %5315 = vmatpush3.msra.mxu1 %v4195_v7  ;;  %v4120_v7 = vcombine.high %v4116_v40, %v4116_v40 }
 0x55b   : > { %v3824_v29 = vpop.f32.mrf.mxu0  ;;  %5312 = vmatprep.subr.mxu1 %v4194_v8 }
 0x55c   : > { %v7629_v52 = vadd.f32 %v4995_v36, %v3824_v29  ;;  %v3856_v33 = vmax.f32 %v7627_v28, 0.0  ;;  %5316 = vmatpush3.msra.mxu1 %v4194_v8  ;;  %v4144_v29 = vrot.slane %v4116_v40, %v7944_v5  ;;  %v4152_v13 = vrot.slane %v4120_v7, %v7944_v5 }
 0x55d   : > { %5313 = vmatprep.subr.mxu1 %v4193_v27 }
 0x55e   : > { %v3855_v44 = vmax.f32 %v7629_v52, 0.0  ;;  %5317 = vmatpush3.msra.mxu1 %v4193_v27 }
 0x55f   : > { %5314 = vmatprep.subr.mxu1 %v4192_v30 }
 0x560   : > { %5282 = vmatprep.mubr.msk.f32.mxu1 %vm3723_vm2, %v3855_v44  ;;  %5318 = vmatpush3.msra.mxu1 %v4192_v30  ;;  %v4118_v30 = vcombine.high %v4102_v48, %v4102_v48 }
 0x561   : > { %v5256_v45 = vpop.f32.mrf.mxu0  ;;  %5283 = vmatmul.mubr.msk.f32.gmra.mxu1 %vm3723_vm2, %v3856_v33 }
 0x562   : > { %v7639_v50 = vadd.f32 %v5256_v45, %v4995_v36  ;;  %v4148_v18 = vrot.slane %v4118_v30, %v7944_v5 }
 0x563   : > { %v3834_v42 = vpop.f32.mrf.mxu0 }
 0x564   : > { %v7641_v57 = vadd.f32 %v4995_v36, %v3834_v42  ;;  %v3858_v62 = vmax.f32 %v7639_v50, 0.0 }
 0x566   : > { %v3857_v59 = vmax.f32 %v7641_v57, 0.0 }
 0x568   : > { %5285 = vmatprep.mubr.msk.f32.mxu1 %vm3723_vm2, %v3857_v59 }
 0x569   : > { %v5259_v32 = vpop.f32.mrf.mxu0  ;;  %5286 = vmatmul.mubr.msk.f32.gmra.mxu1 %vm3723_vm2, %v3858_v62 }
 0x56a   : > { %v7651_v39 = vadd.f32 %v5259_v32, %v4995_v36 }
 0x56b   : > { %v3844_v51 = vpop.f32.mrf.mxu0 }
 0x56c   : > { %v7653_v41 = vadd.f32 %v4995_v36, %v3844_v51  ;;  %v3860_v46 = vmax.f32 %v7651_v39, 0.0  ;;  %v4140_v51 = vrot.slane %v4102_v48, %v7944_v5 }
 0x56e   : > { %v3859_v4 = vmax.f32 %v7653_v41, 0.0 }
 0x570   : > { %5288 = vmatprep.mubr.msk.f32.mxu1 %vm3723_vm2, %v3859_v4 }
 0x571   : > { %5289 = vmatmul.mubr.msk.f32.gmra.mxu1 %vm3723_vm2, %v3860_v46 }
 0x619   : > { %v5281_v22 = vpop.f32.mrf.mxu1 }
 0x61a   : > { %v4162_v20 = vadd.f32 %v5281_v22, %v4128_v49  ;;  %v5014_v22 = vld [vmem:[#allocation22] ss:$0 sm:$0xff] }
 0x61b   : > { %v4032_v16 = vpop.f32.mrf.mxu1 }
 0x61c   : > { %v4161_v24 = vadd.f32 %v4124_v19, %v4032_v16  ;;  %v4177_v0 = vadd.f32 %v5013_v21, %v4162_v20 }
 0x61e   : > { %v4176_v43 = vadd.f32 %v5013_v21, %v4161_v24  ;;  %v4185_v60 = vmax.f32 %v4177_v0, 0.0 }
 0x620   : > { %v4184_v6 = vmax.f32 %v4176_v43, 0.0 }
 0x621   : > { %v5284_v34 = vpop.f32.mrf.mxu1 }
 0x622   : > { %v4164_v38 = vadd.f32 %v5284_v34, %v4136_v26  ;;  %5299 = vmatprep.mubr.msk.f32.mxu0 %vm3723_vm2, %v4184_v6 }
 0x623   : > { %v4042_v63 = vpop.f32.mrf.mxu1  ;;  %5300 = vmatmul.mubr.msk.f32.vlgmr.msra.gmra.mxu0 %vm3723_vm2, %v4185_v60 }
 0x624   : > { %v4163_v17 = vadd.f32 %v4132_v9, %v4042_v63  ;;  %v4179_v36 = vadd.f32 %v5013_v21, %v4164_v38 }
 0x626   : > { %v4178_v15 = vadd.f32 %v5013_v21, %v4163_v17  ;;  %v4187_v45 = vmax.f32 %v4179_v36, 0.0 }
 0x628   : > { %v4186_v1 = vmax.f32 %v4178_v15, 0.0 }
 0x629   : > { %v5287_v42 = vpop.f32.mrf.mxu1 }
 0x62a   : > { %v4166_v32 = vadd.f32 %v5287_v42, %v4144_v29  ;;  %5302 = vmatprep.mubr.msk.f32.mxu0 %vm3723_vm2, %v4186_v1 }
 0x62b   : > { %v4052_v2 = vpop.f32.mrf.mxu1  ;;  %5303 = vmatmul.mubr.msk.f32.gmra.mxu0 %vm3723_vm2, %v4187_v45 }
 0x62c   : > { %v4165_v58 = vadd.f32 %v4140_v51, %v4052_v2  ;;  %v4181_v8 = vadd.f32 %v5013_v21, %v4166_v32 }
 0x62e   : > { %v4180_v27 = vadd.f32 %v5013_v21, %v4165_v58  ;;  %v4189_v61 = vmax.f32 %v4181_v8, 0.0 }
 0x630   : > { %v4188_v47 = vmax.f32 %v4180_v27, 0.0 }
 0x631   : > { %v5290_v25 = vpop.f32.mrf.mxu1 }
 0x632   : > { %v4168_v55 = vadd.f32 %v5290_v25, %v4152_v13  ;;  %5305 = vmatprep.mubr.msk.f32.mxu0 %vm3723_vm2, %v4188_v47 }
 0x633   : > { %v4062_v10 = vpop.f32.mrf.mxu1  ;;  %5306 = vmatmul.mubr.msk.f32.gmra.mxu0 %vm3723_vm2, %v4189_v61 }
 0x634   : > { %v4167_v12 = vadd.f32 %v4148_v18, %v4062_v10  ;;  %v4183_v14 = vadd.f32 %v5013_v21, %v4168_v55 }
 0x636   : > { %v4182_v49 = vadd.f32 %v5013_v21, %v4167_v12  ;;  %v4191_v19 = vmax.f32 %v4183_v14, 0.0 }
 0x638   : > { %v4190_v37 = vmax.f32 %v4182_v49, 0.0 }
 0x63a   : > { %5308 = vmatprep.mubr.msk.f32.mxu1 %vm3723_vm2, %v4190_v37 }
 0x63b   : > { %5309 = vmatmul.mubr.msk.f32.vlgmr.msra.gmra.mxu1 %vm3723_vm2, %v4191_v19 }
 0x6e3   : > { %v5301_v20 = vpop.f32.mrf.mxu0 }
 0x6e4   : > { %v4299_v23 = vadd.f32 %v5301_v20, %v5014_v22 }
 0x6e5   : > { %v4293_v16 = vpop.f32.mrf.mxu0 }
 0x6e6   : > { %v4333_v24 = vmax.f32 %v4299_v23, 0.0  ;;  %v4294_v35 = vadd.f32 %v5014_v22, %v4293_v16 }
 0x6e8   : > { %v4332_v5 = vmax.f32 %v4294_v35, 0.0  ;;  %v4348_v0 = vmul.f32 %v5023_v31, %v4333_v24 }
 0x6ea   : > { %v4358_v43 = vsel %vm3723_vm2, %v4348_v0, 0.0  ;;  %v4347_v26 = vmul.f32 %v5023_v31, %v4332_v5 }
 0x6eb   : > { %4359 = vadd.xlane.f32.xlu0 %v4358_v43  ;;  %v5304_v21 = vpop.f32.mrf.mxu0 }
 0x6ec   : > { %v4309_v11 = vadd.f32 %v5304_v21, %v5014_v22  ;;  %v4355_v34 = vsel %vm3723_vm2, %v4347_v26, 0.0 }
 0x6ed   : > { %v4303_v6 = vpop.f32.mrf.mxu0 }
 0x6ee   : > { %v4335_v9 = vmax.f32 %v4309_v11, 0.0  ;;  %v4304_v60 = vadd.f32 %v5014_v22, %v4303_v6 }
 0x6ef   : > { %4356 = vadd.xlane.f32.xlu0 %v4355_v34 }
 0x6f0   : > { %v4334_v38 = vmax.f32 %v4304_v60, 0.0  ;;  %v4350_v63 = vmul.f32 %v5023_v31, %v4335_v9 }
 0x6f2   : > { %v4364_v17 = vsel %vm3723_vm2, %v4350_v63, 0.0  ;;  %v4349_v40 = vmul.f32 %v5023_v31, %v4334_v38 }
 0x6f3   : > { %4365 = vadd.xlane.f32.xlu1 %v4364_v17  ;;  %v5307_v36 = vpop.f32.mrf.mxu0 }
 0x6f4   : > { %v4319_v15 = vadd.f32 %v5307_v36, %v5014_v22  ;;  %v4361_v45 = vsel %vm3723_vm2, %v4349_v40, 0.0 }
 0x6f5   : > { %v4313_v48 = vpop.f32.mrf.mxu0 }
 0x6f6   : > { %v4337_v1 = vmax.f32 %v4319_v15, 0.0  ;;  %v4314_v29 = vadd.f32 %v5014_v22, %v4313_v48 }
 0x6f7   : > { %4362 = vadd.xlane.f32.xlu1 %v4361_v45 }
 0x6f8   : > { %v4336_v42 = vmax.f32 %v4314_v29, 0.0  ;;  %v4352_v32 = vmul.f32 %v5023_v31, %v4337_v1 }
 0x6fa   : > { %v4370_v51 = vsel %vm3723_vm2, %v4352_v32, 0.0  ;;  %v4351_v2 = vmul.f32 %v5023_v31, %v4336_v42 }
 0x6fb   : > { %4371 = vadd.xlane.f32.xlu1 %v4370_v51  ;;  %v5310_v58 = vpop.f32.mrf.mxu1 }
 0x6fc   : > { %v4329_v7 = vadd.f32 %v5310_v58, %v5014_v22  ;;  %v4367_v8 = vsel %vm3723_vm2, %v4351_v2, 0.0 }
 0x6fd   : > { %4368 = vadd.xlane.f32.xlu0 %v4367_v8  ;;  %v4323_v27 = vpop.f32.mrf.mxu1 }
 0x6fe   : > { %v4339_v30 = vmax.f32 %v4329_v7, 0.0  ;;  %v4324_v47 = vadd.f32 %v5014_v22, %v4323_v27 }
 0x700   : > { %v4338_v13 = vmax.f32 %v4324_v47, 0.0  ;;  %v4354_v61 = vmul.f32 %v5023_v31, %v4339_v30 }
 0x702   : > { %v4376_v25 = vsel %vm3723_vm2, %v4354_v61, 0.0  ;;  %v4353_v55 = vmul.f32 %v5023_v31, %v4338_v13 }
 0x703   : > { %4377 = vadd.xlane.f32.xlu1 %v4376_v25 }
 0x704   : > { %v4373_v18 = vsel %vm3723_vm2, %v4353_v55, 0.0 }
 0x705   : > { %4374 = vadd.xlane.f32.xlu0 %v4373_v18 }
 0x774   : > { %v4360_v10 = vpop.xlane.xlu0 %4359 }
 0x775   : > { %v4385_v12 = vrot.slane %v4360_v10, 4 }
 0x777   : > { %v4386_v14 = vmax.f32 %v4360_v10, %v4385_v12 }
 0x778   : > { %v4357_v49 = vpop.xlane.xlu0 %4356 }
 0x779   : > { %v4387_v37 = vrot.slane %v4386_v14, 2  ;;  %v4379_v19 = vrot.slane %v4357_v49, 4 }
 0x77b   : > { %v4388_v20 = vmax.f32 %v4386_v14, %v4387_v37  ;;  %v4380_v23 = vmax.f32 %v4357_v49, %v4379_v19 }
 0x77c   : > { %v4366_v16 = vpop.xlane.xlu1 %4365 }
 0x77d   : > { %v4389_v24 = vrot.slane %v4388_v20, 1  ;;  %v4381_v22 = vrot.slane %v4380_v23, 2  ;;  %v4397_v35 = vrot.slane %v4366_v16, 4 }
 0x77f   : > { %v4390_v5 = vmax.f32 %v4388_v20, %v4389_v24  ;;  %v4382_v0 = vmax.f32 %v4380_v23, %v4381_v22  ;;  %v4398_v43 = vmax.f32 %v4366_v16, %v4397_v35 }
 0x780   : > { %v4363_v31 = vpop.xlane.xlu1 %4362 }
 0x781   : > { %v4428_v26 = vsub.f32 %v4360_v10, %v4390_v5  ;;  %v4383_v21 = vrot.slane %v4382_v0, 1  ;;  %v4399_v11 = vrot.slane %v4398_v43, 2  ;;  %v4391_v6 = vrot.slane %v4363_v31, 4 }
 0x783   : > { %v4437_v9 = vmul.f32 1.442695, %v4428_v26  ;;  %v4384_v60 = vmax.f32 %v4382_v0, %v4383_v21  ;;  %v4400_v34 = vmax.f32 %v4398_v43, %v4399_v11  ;;  %v4392_v38 = vmax.f32 %v4363_v31, %v4391_v6 }
 0x784   : > { %v4372_v63 = vpop.xlane.xlu1 %4371 }
 0x785   : > { %5495 = vpow2.f32 %v4437_v9  ;;  %v4427_v17 = vsub.f32 %v4357_v49, %v4384_v60  ;;  %v4401_v40 = vrot.slane %v4400_v34, 1  ;;  %v4393_v36 = vrot.slane %v4392_v38, 2 }
 0x786   : > { %v4409_v15 = vrot.slane %v4372_v63, 4  ;;  %v4369_v48 = vpop.xlane.xlu0 %4368 }
 0x787   : > { %v4435_v1 = vmul.f32 1.442695, %v4427_v17  ;;  %v4402_v29 = vmax.f32 %v4400_v34, %v4401_v40  ;;  %v4394_v45 = vmax.f32 %v4392_v38, %v4393_v36  ;;  %v4403_v42 = vrot.slane %v4369_v48, 4 }
 0x788   : > { %v4410_v32 = vmax.f32 %v4372_v63, %v4409_v15 }
 0x789   : > { %5497 = vpow2.f32 %v4435_v1  ;;  %v4430_v51 = vsub.f32 %v4366_v16, %v4402_v29  ;;  %v4395_v2 = vrot.slane %v4394_v45, 1  ;;  %v4404_v58 = vmax.f32 %v4369_v48, %v4403_v42 }
 0x78a   : > { %v4411_v7 = vrot.slane %v4410_v32, 2 }
 0x78b   : > { %v4441_v8 = vmul.f32 1.442695, %v4430_v51  ;;  %v4396_v27 = vmax.f32 %v4394_v45, %v4395_v2  ;;  %v4405_v30 = vrot.slane %v4404_v58, 2 }
 0x78c   : > { %v4412_v47 = vmax.f32 %v4410_v32, %v4411_v7  ;;  %v4378_v13 = vpop.xlane.xlu1 %4377 }
 0x78d   : > { %5499 = vpow2.f32 %v4441_v8  ;;  %v4429_v61 = vsub.f32 %v4363_v31, %v4396_v27  ;;  %v4406_v25 = vmax.f32 %v4404_v58, %v4405_v30  ;;  %v4421_v55 = vrot.slane %v4378_v13, 4 }
 0x78e   : > { %v4413_v18 = vrot.slane %v4412_v47, 1  ;;  %v4375_v10 = vpop.xlane.xlu0 %4374 }
 0x78f   : > { %v4439_v12 = vmul.f32 1.442695, %v4429_v61  ;;  %v4407_v14 = vrot.slane %v4406_v25, 1  ;;  %v4422_v49 = vmax.f32 %v4378_v13, %v4421_v55  ;;  %v4415_v37 = vrot.slane %v4375_v10, 4 }
 0x790   : > { %v4414_v19 = vmax.f32 %v4412_v47, %v4413_v18 }
 0x791   : > { %5501 = vpow2.f32 %v4439_v12  ;;  %v4408_v20 = vmax.f32 %v4406_v25, %v4407_v14  ;;  %v4423_v23 = vrot.slane %v4422_v49, 2  ;;  %v4416_v16 = vmax.f32 %v4375_v10, %v4415_v37 }
 0x792   : > { %v7688_v24 = vpop.eup %5495  ;;  %v4432_v22 = vsub.f32 %v4372_v63, %v4414_v19 }
 0x793   : > { %v4457_v35 = vrot.slane %v7688_v24, 4  ;;  %v4431_v5 = vsub.f32 %v4369_v48, %v4408_v20  ;;  %v4424_v0 = vmax.f32 %v4422_v49, %v4423_v23  ;;  %v4417_v43 = vrot.slane %v4416_v16, 2 }
 0x794   : > { %v4445_v31 = vmul.f32 1.442695, %v4432_v22 }
 0x795   : > { %v4458_v26 = vadd.f32 %v7688_v24, %v4457_v35  ;;  %v4443_v21 = vmul.f32 1.442695, %v4431_v5  ;;  %v4425_v11 = vrot.slane %v4424_v0, 1  ;;  %v4418_v6 = vmax.f32 %v4416_v16, %v4417_v43 }
 0x796   : > { %v7692_v9 = vpop.eup %5497  ;;  %5503 = vpow2.f32 %v4445_v31 }
 0x797   : > { %v4459_v60 = vrot.slane %v4458_v26, 2  ;;  %v4451_v34 = vrot.slane %v7692_v9, 4  ;;  %5505 = vpow2.f32 %v4443_v21  ;;  %v4426_v38 = vmax.f32 %v4424_v0, %v4425_v11 }
 0x798   : > { %v4419_v63 = vrot.slane %v4418_v6, 1 }
 0x799   : > { %v4460_v17 = vadd.f32 %v4459_v60, %v4458_v26  ;;  %v4452_v40 = vadd.f32 %v7692_v9, %v4451_v34  ;;  %v4434_v36 = vsub.f32 %v4378_v13, %v4426_v38 }
 0x79a   : > { %v7696_v15 = vpop.eup %5499  ;;  %v4420_v48 = vmax.f32 %v4418_v6, %v4419_v63 }
 0x79b   : > { %v4461_v1 = vrot.slane %v4460_v17, 1  ;;  %v4453_v29 = vrot.slane %v4452_v40, 2  ;;  %v4469_v45 = vrot.slane %v7696_v15, 4  ;;  %v4449_v42 = vmul.f32 1.442695, %v4434_v36 }
 0x79c   : > { %v4433_v32 = vsub.f32 %v4375_v10, %v4420_v48 }
 0x79d   : > { %v4462_v51 = vadd.f32 %v4461_v1, %v4460_v17  ;;  %v4454_v2 = vadd.f32 %v4453_v29, %v4452_v40  ;;  %v4470_v58 = vadd.f32 %v7696_v15, %v4469_v45  ;;  %5507 = vpow2.f32 %v4449_v42 }
 0x79e   : > { %v7700_v7 = vpop.eup %5501  ;;  %v4447_v8 = vmul.f32 1.442695, %v4433_v32 }
 0x79f   : > { %5509 = vrcp.f32 %v4462_v51  ;;  %v4455_v27 = vrot.slane %v4454_v2, 1  ;;  %v4471_v30 = vrot.slane %v4470_v58, 2  ;;  %v4463_v47 = vrot.slane %v7700_v7, 4 }
 0x7a0   : > { %5511 = vpow2.f32 %v4447_v8 }
 0x7a1   : > { %v4456_v13 = vadd.f32 %v4455_v27, %v4454_v2  ;;  %v4472_v61 = vadd.f32 %v4471_v30, %v4470_v58  ;;  %v4464_v25 = vadd.f32 %v7700_v7, %v4463_v47 }
 0x7a3   : > { %v7704_v55 = vpop.eup %5503  ;;  %5513 = vrcp.f32 %v4456_v13  ;;  %v4473_v18 = vrot.slane %v4472_v61, 1  ;;  %v4465_v10 = vrot.slane %v4464_v25, 2 }
 0x7a4   : > { %v5506_v12 = vpop.eup %5505  ;;  %v4481_v14 = vrot.slane %v7704_v55, 4 }
 0x7a5   : > { %v4474_v49 = vadd.f32 %v4473_v18, %v4472_v61  ;;  %v4466_v37 = vadd.f32 %v4465_v10, %v4464_v25  ;;  %v4475_v19 = vrot.slane %v5506_v12, 4 }
 0x7a6   : > { %v4482_v20 = vadd.f32 %v7704_v55, %v4481_v14 }
 0x7a7   : > { %5515 = vrcp.f32 %v4474_v49  ;;  %v4467_v23 = vrot.slane %v4466_v37, 1  ;;  %v4476_v16 = vadd.f32 %v5506_v12, %v4475_v19 }
 0x7a8   : > { %v4483_v22 = vrot.slane %v4482_v20, 2 }
 0x7a9   : > { %v4468_v35 = vadd.f32 %v4467_v23, %v4466_v37  ;;  %v4477_v5 = vrot.slane %v4476_v16, 2 }
 0x7aa   : > { %v7708_v0 = vpop.eup %5507  ;;  %v4484_v43 = vadd.f32 %v4483_v22, %v4482_v20 }
 0x7ab   : > { %5517 = vrcp.f32 %v4468_v35  ;;  %v4478_v31 = vadd.f32 %v4477_v5, %v4476_v16  ;;  %v4493_v26 = vrot.slane %v7708_v0, 4 }
 0x7ac   : > { %v5510_v21 = vpop.eup %5509  ;;  %v4485_v11 = vrot.slane %v4484_v43, 1 }
 0x7ad   : > { %v7711_v6 = vpop.eup %5511  ;;  %v4479_v60 = vrot.slane %v4478_v31, 1  ;;  %v4494_v34 = vadd.f32 %v7708_v0, %v4493_v26  ;;  %v4502_v38 = vmul.f32 %v5510_v21, %v7688_v24 }
 0x7ae   : > { %v4486_v63 = vadd.f32 %v4485_v11, %v4484_v43  ;;  %v4487_v17 = vrot.slane %v7711_v6, 4 }
 0x7af   : > { %v4480_v40 = vadd.f32 %v4479_v60, %v4478_v31  ;;  %v4495_v36 = vrot.slane %v4494_v34, 2  ;;  %v4516_v32 = vmul.f32 %v4502_v38, %v3854_v56 }
 0x7b0   : > { %v5514_v48 = vpop.eup %5513  ;;  %5519 = vrcp.f32 %v4486_v63  ;;  %v4488_v1 = vadd.f32 %v7711_v6, %v4487_v17 }
 0x7b1   : > { %v4500_v29 = vmul.f32 %v5514_v48, %v7692_v9  ;;  %5521 = vrcp.f32 %v4480_v40  ;;  %v4496_v45 = vadd.f32 %v4495_v36, %v4494_v34  ;;  %v4530_v9 = vsel %vm3723_vm2, %v4516_v32, 0.0 }
 0x7b2   : > { %v4489_v42 = vrot.slane %v4488_v1, 2 }
 0x7b3   : > { %v4497_v51 = vrot.slane %v4496_v45, 1  ;;  %v4515_v24 = vmul.f32 %v4500_v29, %v3853_v54  ;;  %v4531_v54 = vrot.slane %v4530_v9, 4 }
 0x7b4   : > { %v5516_v2 = vpop.eup %5515  ;;  %v4490_v58 = vadd.f32 %v4489_v42, %v4488_v1 }
 0x7b5   : > { %v4498_v8 = vadd.f32 %v4497_v51, %v4496_v45  ;;  %v4506_v27 = vmul.f32 %v5516_v2, %v7696_v15  ;;  %v4523_v30 = vsel %vm3723_vm2, %v4515_v24, 0.0  ;;  %v4532_v14 = vadd.f32 %v4531_v54, %v4530_v9 }
 0x7b6   : > { %v4491_v47 = vrot.slane %v4490_v58, 1  ;;  %v4524_v61 = vrot.slane %v4523_v30, 4 }
 0x7b7   : > { %5523 = vrcp.f32 %v4498_v8  ;;  %v4518_v13 = vmul.f32 %v4506_v27, %v3856_v33 }
 0x7b8   : > { %v5518_v53 = vpop.eup %5517  ;;  %v4492_v56 = vadd.f32 %v4491_v47, %v4490_v58  ;;  %v4525_v18 = vadd.f32 %v4524_v61, %v4523_v30 }
 0x7b9   : > { %v4504_v3 = vmul.f32 %v5518_v53, %v7700_v7  ;;  %v4544_v25 = vsel %vm3723_vm2, %v4518_v13, 0.0 }
 0x7ba   : > { %5525 = vrcp.f32 %v4492_v56  ;;  %v4545_v37 = vrot.slane %v4544_v25, 4  ;;  %v4526_v23 = vrot.slane %v4525_v18, 2 }
 0x7bb   : > { %v4517_v15 = vmul.f32 %v4504_v3, %v3855_v44  ;;  %v4533_v44 = vrot.slane %v4532_v14, 2 }
 0x7bc   : > { %v4546_v22 = vadd.f32 %v4545_v37, %v4544_v25 }
 0x7bd   : > { %v5520_v10 = vpop.eup %5519  ;;  %v4537_v49 = vsel %vm3723_vm2, %v4517_v15, 0.0  ;;  %v4534_v50 = vadd.f32 %v4533_v44, %v4532_v14 }
 0x7be   : > { %v5522_v28 = vpop.eup %5521  ;;  %v4510_v33 = vmul.f32 %v5520_v10, %v7704_v55  ;;  %v4538_v19 = vrot.slane %v4537_v49, 4  ;;  %v4527_v55 = vadd.f32 %v4526_v23, %v4525_v18  ;;  %v4547_v11 = vrot.slane %v4546_v22, 2 }
 0x7bf   : > { %v4508_v20 = vmul.f32 %v5522_v28, %v5506_v12  ;;  %v4535_v40 = vrot.slane %v4534_v50, 1 }
 0x7c0   : > { %v4520_v7 = vmul.f32 %v4510_v33, %v3858_v62  ;;  %v4539_v16 = vadd.f32 %v4538_v19, %v4537_v49  ;;  %v4528_v63 = vrot.slane %v4527_v55, 1  ;;  %v4548_v48 = vadd.f32 %v4547_v11, %v4546_v22 }
 0x7c1   : > { %v4519_v52 = vmul.f32 %v4508_v20, %v3857_v59  ;;  %v4536_v2 = vadd.f32 %v4535_v40, %v4534_v50 }
 0x7c2   : > { %v4540_v35 = vrot.slane %v4539_v16, 2  ;;  %v4558_v5 = vsel %vm3723_vm2, %v4520_v7, 0.0  ;;  %v4529_v32 = vadd.f32 %v4528_v63, %v4527_v55  ;;  %v4549_v58 = vrot.slane %v4548_v48, 1 }
 0x7c3   : > { %v4551_v43 = vsel %vm3723_vm2, %v4519_v52, 0.0  ;;  %v4559_v31 = vrot.slane %v4558_v5, 4 }
 0x7c4   : > { %v5524_v26 = vpop.eup %5523  ;;  %v4552_v21 = vrot.slane %v4551_v43, 4  ;;  %v4541_v62 = vadd.f32 %v4540_v35, %v4539_v16  ;;  %v4588_v41 = vsel %vm4587_vm3, %v4536_v2, %v4529_v32  ;;  %v4550_v53 = vadd.f32 %v4549_v58, %v4548_v48 }
 0x7c5   : > { %v4514_v12 = vmul.f32 %v5524_v26, %v7708_v0  ;;  %v4560_v34 = vadd.f32 %v4559_v31, %v4558_v5 }
 0x7c6   : > { %v4553_v60 = vadd.f32 %v4552_v21, %v4551_v43  ;;  %v4542_v36 = vrot.slane %v4541_v62, 1 }
 0x7c7   : > { %v5526_v57 = vpop.eup %5525  ;;  %v4522_v59 = vmul.f32 %v4514_v12, %v3860_v46  ;;  %v4561_v45 = vrot.slane %v4560_v34, 2 }
 0x7c8   : > { %v4512_v38 = vmul.f32 %v5526_v57, %v7711_v6  ;;  %v4554_v17 = vrot.slane %v4553_v60, 2  ;;  %v4543_v46 = vadd.f32 %v4542_v36, %v4541_v62 }
 0x7c9   : > { %v4572_v1 = vsel %vm3723_vm2, %v4522_v59, 0.0  ;;  %v4562_v8 = vadd.f32 %v4561_v45, %v4560_v34 }
 0x7ca   : > { %v4521_v0 = vmul.f32 %v4512_v38, %v3859_v4  ;;  %v4555_v29 = vadd.f32 %v4554_v17, %v4553_v60  ;;  %v4573_v42 = vrot.slane %v4572_v1, 4  ;;  %v4590_v13 = vsel %vm4589_vm4, %v4543_v46, %v4588_v41 }
 0x7cb   : > { %v4563_v56 = vrot.slane %v4562_v8, 1  ;;  %v4592_v54 = vsel %vm4591_vm5, %v4550_v53, %v4590_v13 }
 0x7cc   : > { %v4565_v51 = vsel %vm3723_vm2, %v4521_v0, 0.0  ;;  %v4574_v39 = vadd.f32 %v4573_v42, %v4572_v1  ;;  %v4556_v6 = vrot.slane %v4555_v29, 1 }
 0x7cd   : > { %v4566_v24 = vrot.slane %v4565_v51, 4  ;;  %v4564_v18 = vadd.f32 %v4563_v56, %v4562_v8 }
 0x7ce   : > { %v4575_v27 = vrot.slane %v4574_v39, 2  ;;  %v4557_v4 = vadd.f32 %v4556_v6, %v4555_v29 }
 0x7cf   : > { %v4567_v30 = vadd.f32 %v4566_v24, %v4565_v51 }
 0x7d0   : > { %v4576_v47 = vadd.f32 %v4575_v27, %v4574_v39  ;;  %v4594_v15 = vsel %vm4593_vm6, %v4557_v4, %v4592_v54 }
 0x7d1   : > { %v4568_v9 = vrot.slane %v4567_v30, 2  ;;  %v4596_v49 = vsel %vm4595_vm7, %v4564_v18, %v4594_v15 }
 0x7d2   : > { %v4577_v3 = vrot.slane %v4576_v47, 1 }
 0x7d3   : > { %v4569_v61 = vadd.f32 %v4568_v9, %v4567_v30 }
 0x7d4   : > { %v4578_v14 = vadd.f32 %v4577_v3, %v4576_v47 }
 0x7d5   : > { %v4570_v25 = vrot.slane %v4569_v61, 1 }
 0x7d7   : > { %v4571_v10 = vadd.f32 %v4570_v25, %v4569_v61 }
 0x7d9   : > { %v4598_v37 = vsel %vm4597_vm8, %v4571_v10, %v4596_v49 }
 0x7da   : > { %v4600_v28 = vsel %vm4599_vm9, %v4578_v14, %v4598_v37 }
 0x7db   : > { %4602 = vst.msk [vmem:[%s762_s30] sm:$0xff] %vm3723_vm2, %v4600_v28 }
 0x7dc   : > { %5943 = shalt.err (!%p5940_p5)
}
 0x7dd   : > { %s5944_s21 = scalar_lea.hbm %s7753_s29, 128  ;;  %s5948_s13 = scalar_lea.hbm %s7945_s9, 256 }
 0x7de   : > { %p5945_p0 = scmp.ne.s32.totalorder %s7753_s29, %s5944_s21  ;;  %p5949_p3 = scmp.lt.s32.totalorder %s7753_s29, %s7945_s9 }
 0x7df   : > { %p5950_p10 = scmp.lt.s32.totalorder %s5948_s13, %s5944_s21 }
 0x7e0   : > { %p5946_p4 = pnand %p5945_p0, %p7946_p12 }
 0x7e1   : > { %p5951_p8 = por %p5950_p10, %p5949_p3 }
 0x7e2   : > { %p5947_p6 = pneg %p5946_p4 }
 0x7e4   : > { %p5952_p7 = pnand %p5951_p8, %p5947_p6 }
 0x7e6   : > { %5955 = shalt.err (!%p5952_p7)
}
 0x7e7   : > { %5369 = dma.vmem_to_hbm [thread:$0]  (%p7946_p12), %s4618_s26, 128, %s7753_s29, %s4604_s16  }
 0x7e8 PF: > { %s7947_s19 = sld [smem:[#allocation35_spill]]  ;;  %p7950_p13 = scmp.ge.s32.totalorder %s6022_s24, 2 }
 0x7e9   : > { %s7948_s7 = sld [smem:[#allocation40_spill]] }
 0x7ee   : > { %s4629_s30 = sand.u32 1, %s7947_s19  }
 0x7ef   : > { %p7949_p9 = scmp.ne.s32.totalorder %s7948_s7, 0  ;;  %s4630_s5 = scalar_lea.sflag [#allocation4], %s4629_s30 }
 0x7f1   : > { %p5416_p2 = pnand %p7950_p13, %p7949_p9 }
 0x7f3   : > { %p5417_p1 = pneg %p5416_p2 }
 0x7f5   : > { %6005 = dma.done.wait (%p5417_p1), %s4630_s5, 128  }
 0x7f6   : > { %6007 = vsyncadd (%p5417_p1), %s4630_s5, 4294967168  ;;  %s7951_s24 = sld [smem:[#allocation38_spill]]  ;;  %s7954_s21 = smov %s6014_s22 }
 0x7f7   : > { %s7952_s11 = sld [smem:[#allocation36_spill]] }
 0x7f8   : > { %s7953_s23 = sld [smem:[#allocation39_spill]] }
 0x7fc   : > { %p38_p11 = scmp.ge.s32.totalorder %s7951_s24, 4  }
 0x7fd   : > { %s7955_s22 = smov %s7952_s11 }
 0x7fe   :  { %40 = sbr.rel (!%p38_p11) target bundleno = 25 (0x19), region = 197 }
 0x803   :  { %4635 = vsyncpa [#allocation3], 1 }
 0x804   :  { %4637 = vsyncpa [#allocation3 + $0x1], 1 }
 0x805   :  { %4638 = vsyncpa [#allocation6], 1 }
 0x806   :  { %4640 = vsyncpa [#allocation6 + $0x1], 1 }
 0x807   :  { %4641 = vsyncpa [#allocation9], 1 }
 0x808   :  { %4642 = vsyncpa [#allocation12], 1 }
 0x809   :  { %4643 = vsyncpa [#allocation15], 1 }
 0x80a   :  { %4644 = vsyncpa [#allocation18], 1 }
 0x80b   :  { %4645 = vsyncpa [#allocation21], 1 }
 0x80c   :  { %4646 = vsyncpa [#allocation24], 1 }
 0x80d   :  { %4647 = vsyncpa [#allocation4], 1 }
 0x80e   :  { %4649 = vsyncpa [#allocation4 + $0x1], 1 }

// kernel: tpu_custom_call.1
= control target key start
LH: loop header
LB: loop body
LE: loop exit
PB: predicated region body
PF: predicated region fallthrough
CT: control target
= control target key end

     0   :  { %s7791_s0 = inlined_call_operand.hbm [shape: f32[16,8,64], index: 0, kind: input, shape index: {}]   ;;  %s7792_s1 = inlined_call_operand.hbm [shape: f32[16,32], index: 1, kind: input, shape index: {}]   ;;  %s7793_s2 = inlined_call_operand.hbm [shape: f32[16,8,192], index: 2, kind: input, shape index: {}]   ;;  %s7794_s3 = inlined_call_operand.hbm [shape: f32[192,3456], index: 3, kind: input, shape index: {}]   ;;  %s7795_s4 = inlined_call_operand.hbm [shape: f32[1,384], index: 4, kind: input, shape index: {}]   ;;  %s7796_s5 = inlined_call_operand.vmem [shape: f32[384,32], index: 5, kind: input, shape index: {}]   ;;  %s7797_s6 = inlined_call_operand.vmem [shape: f32[64,32], index: 6, kind: input, shape index: {}]   ;;  %s7798_s7 = inlined_call_operand.hbm [shape: f32[1,32], index: 7, kind: input, shape index: {}]   ;;  %s7799_s8 = inlined_call_operand.hbm [shape: f32[32,32], index: 8, kind: input, shape index: {}]   ;;  %s7800_s9 = inlined_call_operand.hbm [shape: f32[1,32], index: 9, kind: input, shape index: {}]   ;;  %s7801_s10 = inlined_call_operand.hbm [shape: f32[32,32], index: 10, kind: input, shape index: {}]   ;;  %s7802_s11 = inlined_call_operand.hbm [shape: f32[32,32], index: 11, kind: input, shape index: {}]   ;;  %s7803_s12 = inlined_call_operand.hbm [shape: f32[1,32], index: 12, kind: input, shape index: {}]   ;;  %s7804_s13 = inlined_call_operand.hbm [shape: f32[32,32], index: 13, kind: input, shape index: {}]   ;;  %s7805_s14 = inlined_call_operand.hbm [shape: f32[1,32], index: 14, kind: input, shape index: {}]   ;;  %s7806_s15 = inlined_call_operand.hbm [shape: f32[1,32], index: 15, kind: input, shape index: {}]   ;;  %s7807_s16 = inlined_call_operand.hbm [shape: f32[16,32], index: 16, kind: output, shape index: {}]  }
   0x1   :  { %7841 = sst [smem:[#allocation58_spill]] %s7791_s0 }
   0x2   :  { %7842 = sst [smem:[#allocation59_spill]] %s7792_s1 }
   0x3   :  { %7843 = sst [smem:[#allocation60_spill]] %s7794_s3 }
   0x4   :  { %7844 = sst [smem:[#allocation61_spill]] %s7795_s4 }
   0x5   :  { %7845 = sst [smem:[#allocation62_spill]] %s7796_s5 }
   0x6   :  { %7846 = sst [smem:[#allocation63_spill]] %s7797_s6 }
   0x7   :  { %7847 = sst [smem:[#allocation64_spill]] %s7798_s7 }
   0x8   :  { %7848 = sst [smem:[#allocation65_spill]] %s7800_s9 }
   0x9   :  { %7849 = sst [smem:[#allocation66_spill]] %s7802_s11 }
   0xa   :  { %7850 = sst [smem:[#allocation67_spill]] %s7804_s13 }
   0xb   :  { %7851 = sst [smem:[#allocation68_spill]] %s7807_s16 }
   0xc   :  { %21 = vsyncpa [#allocation3], 0 }
   0xd   :  { %23 = vsyncpa [#allocation3 + $0x1], 0 }
   0xe   :  { %24 = vsyncpa [#allocation6], 0 }
   0xf   :  { %26 = vsyncpa [#allocation6 + $0x1], 0 }
  0x10   :  { %27 = vsyncpa [#allocation9], 0 }
  0x11   :  { %28 = vsyncpa [#allocation12], 0 }
  0x12   :  { %29 = vsyncpa [#allocation15], 0 }
  0x13   :  { %30 = vsyncpa [#allocation18], 0 }
  0x14   :  { %31 = vsyncpa [#allocation21], 0 }
  0x15   :  { %32 = vsyncpa [#allocation24], 0 }
  0x16   :  { %33 = vsyncpa [#allocation4], 0 }
  0x17   :  { %35 = vsyncpa [#allocation4 + $0x1], 0  ;;  %s6133_s21 = smov 0   ;;  %s6135_s22 = smov 0  }
  0x18   :  { %s6137_s23 = smov 0   ;;  %s6139_s24 = smov 0  }
  0x19 LB: > { %7852 = sst [smem:[#allocation35_spill]] %s6010_s21  ;;  %s6024_s25 = smov [#allocation8]   ;;  %s6022_s24 = sphi %s6139_s24, %s7951_s24   ;;  %s6018_s23 = sphi %s6137_s23, %s7953_s23   ;;  %s6014_s22 = sphi %s6135_s22, %s7955_s22   ;;  %s6010_s21 = sphi %s6133_s21, %s7954_s21  }
  0x1a   : > { %7853 = sst [smem:[#allocation36_spill]] %s6018_s23  ;;  %s435_s26 = sshll.u32 %s6024_s25, 4  ;;  %s436_s26 = int_to_ptr.vmem [resolvable:$true] %s435_s26 }
  0x1b   : > { %s6154_s27 = sadd.s32 4294967295, %s6022_s24   ;;  %p4836_p0 = scmp.ge.s32.totalorder %s6022_s24, 1 }
  0x1c   : > { %p7821_p1 = scmp.eq.s32.totalorder %s6154_s27, 0  ;;  %p423_p2 = scmp.lt.s32.totalorder %s6022_s24, 3 }
  0x1d   : > { %s6025_s29 = smov [#allocation11]   ;;  %s6026_s17 = smov [#allocation14]  }
  0x1e   : > { %p6159_p3 = pnand %p4836_p0, %p423_p2  ;;  %s466_s30 = sshll.u32 %s6025_s29, 4  ;;  %s467_s30 = int_to_ptr.vmem [resolvable:$true] %s466_s30 }
  0x1f   : > { %s490_s18 = sshll.u32 %s6026_s17, 4  ;;  %s5571_s20 = scalar_lea.vmem %s436_s26, 82944  ;;  %s6172_s18 = int_to_ptr.vmem [resolvable:$true] %s490_s18 }
  0x20   : > { %s7854_s28 = scalar_select %p6159_p3, 1, 0 }
  0x21   : > { %p5371_p5 = pneg %p6159_p3  ;;  %p5572_p8 = scmp.ne.s32.totalorder %s436_s26, %s5571_s20 }
  0x22   : > { %7855 = sst [smem:[#allocation37_spill]] %s7854_s28  ;;  %p5579_p11 = scmp.lt.s32.totalorder %s436_s26, %s436_s26 }
  0x23   : > { %p6168_p6 = pnand %p5371_p5, %p7821_p1  ;;  %p5580_p12 = scmp.lt.s32.totalorder %s5571_s20, %s5571_s20 }
  0x25   : > { %s7856_s0 = scalar_select %p6168_p6, 1, 0 }
  0x26   : > { %p6176_p7 = pneg %p6168_p6  ;;  %p5581_p13 = por %p5580_p12, %p5579_p11 }
  0x28   : > { %s7857_s19 = scalar_select %p6176_p7, 1, 0 }
  0x29   : > { %p5574_p9 = pnand %p5572_p8, %p6176_p7 }
  0x2b   : > { %p5575_p10 = pneg %p5574_p9 }
  0x2d   : > { %p5582_p0 = pnand %p5581_p13, %p5575_p10 }
  0x2f   : > { %5585 = shalt.err (!%p5582_p0)
}
  0x30   : > { %s6027_s25 = smov 3456   ;;  %s6028_s29 = smov 216  }
  0x31   : > { %s7858_s3 = sld [smem:[#allocation60_spill]]  ;;  %s5597_s5 = scalar_lea.vmem %s467_s30, 16 }
  0x32   : > { %p5598_p2 = scmp.ne.s32.totalorder %s467_s30, %s5597_s5  ;;  %s5604_s6 = scalar_lea.vmem %s467_s30, 32 }
  0x33   : > { %p5605_p9 = scmp.lt.s32.totalorder %s467_s30, %s467_s30  ;;  %p5606_p4 = scmp.lt.s32.totalorder %s5604_s6, %s5597_s5 }
  0x34   : > { %p5600_p5 = pnand %p5598_p2, %p6176_p7 }
  0x35   : > { %p5607_p11 = por %p5606_p4, %p5605_p9 }
  0x36   : > { %p5601_p8 = pneg %p5600_p5 }
  0x37   : > { %5374 = dma.hbm_to_vmem [thread:$0]  (!%p6168_p6), %s7858_s3, 82944, %s436_s26, [#allocation9], %s6027_s25, %s6027_s25, %s6028_s29  }
  0x38   : > { %p5608_p10 = pnand %p5607_p11, %p5601_p8 }
  0x3a   : > { %5611 = shalt.err (!%p5608_p10)
}
  0x3b   : > { %s7859_s7 = sld [smem:[#allocation64_spill]]  ;;  %s5623_s16 = scalar_lea.vmem %s6172_s18, 16 }
  0x3c   : > { %p5624_p12 = scmp.ne.s32.totalorder %s6172_s18, %s5623_s16  ;;  %s5630_s5 = scalar_lea.vmem %s6172_s18, 32 }
  0x3d   : > { %p5631_p4 = scmp.lt.s32.totalorder %s6172_s18, %s6172_s18  ;;  %p5632_p2 = scmp.lt.s32.totalorder %s5630_s5, %s5623_s16 }
  0x3e   : > { %p5626_p13 = pnand %p5624_p12, %p6176_p7 }
  0x3f   : > { %p5633_p5 = por %p5632_p2, %p5631_p4 }
  0x40   : > { %p5627_p0 = pneg %p5626_p13 }
  0x41   : > { %5380 = dma.hbm_to_vmem [thread:$0]  (!%p6168_p6), %s7859_s7, 16, %s467_s30, [#allocation12]  }
  0x42   : > { %p5634_p8 = pnand %p5633_p5, %p5627_p0 }
  0x44   : > { %5637 = shalt.err (!%p5634_p8)
}
  0x45   : > { %s7860_s9 = sld [smem:[#allocation65_spill]]  ;;  %s6029_s28 = smov [#allocation17]  }
  0x46   : > { %s513_s30 = sshll.u32 %s6029_s28, 4  ;;  %s6030_s25 = smov [#allocation20]   ;;  %s514_s30 = int_to_ptr.vmem [resolvable:$true] %s513_s30 }
  0x47   : > { %s537_s29 = sshll.u32 %s6030_s25, 4  ;;  %s5649_s17 = scalar_lea.vmem %s514_s30, 512  ;;  %s538_s29 = int_to_ptr.vmem [resolvable:$true] %s537_s29 }
  0x48   : > { %p5650_p9 = scmp.ne.s32.totalorder %s514_s30, %s5649_s17  ;;  %p5657_p12 = scmp.lt.s32.totalorder %s514_s30, %s514_s30 }
  0x49   : > { %p5658_p13 = scmp.lt.s32.totalorder %s5649_s17, %s5649_s17 }
  0x4a   : > { %p5652_p11 = pnand %p5650_p9, %p6176_p7 }
  0x4b   : > { %5386 = dma.hbm_to_vmem [thread:$0]  (!%p6168_p6), %s7860_s9, 16, %s6172_s18, [#allocation15]  }
  0x4c   : > { %p5653_p10 = pneg %p5652_p11  ;;  %p5659_p0 = por %p5658_p13, %p5657_p12 }
  0x4e   : > { %p5660_p4 = pnand %p5659_p0, %p5653_p10 }
  0x50   : > { %5663 = shalt.err (!%p5660_p4)
}
  0x51   : > { %s7814_s20 = smov 128   ;;  %s7816_s16 = smov 8  }
  0x52   : > { %s7861_s11 = sld [smem:[#allocation66_spill]]  ;;  %s5675_s6 = scalar_lea.vmem %s538_s29, 512 }
  0x53   : > { %p5676_p2 = scmp.ne.s32.totalorder %s538_s29, %s5675_s6  ;;  %p5683_p9 = scmp.lt.s32.totalorder %s538_s29, %s538_s29 }
  0x54   : > { %p5684_p11 = scmp.lt.s32.totalorder %s5675_s6, %s5675_s6 }
  0x55   : > { %p5678_p5 = pnand %p5676_p2, %p6176_p7 }
  0x56   : > { %p5685_p10 = por %p5684_p11, %p5683_p9 }
  0x57   : > { %p5679_p8 = pneg %p5678_p5 }
  0x58   : > { %5392 = dma.hbm_to_vmem [thread:$0]  (!%p6168_p6), %s7861_s11, 512, %s514_s30, [#allocation18], %s7814_s20, %s7814_s20, %s7816_s16  }
  0x59   : > { %p5686_p12 = pnand %p5685_p10, %p5679_p8 }
  0x5b   : > { %5689 = shalt.err (!%p5686_p12)
}
  0x5c   : > { %s7862_s13 = sld [smem:[#allocation67_spill]]  ;;  %s4835_s30 = sadd.s32 4294967294, %s6022_s24  }
  0x5d   : > { %s6229_s25 = sadd.s32 1, %s6022_s24   ;;  %s48_s17 = sadd.s32 1, %s6018_s23 }
  0x5e   : > { %7863 = sst [smem:[#allocation38_spill]] %s6229_s25  ;;  %s45_s18 = ssub.s32 %s6022_s24, %s6229_s25 }
  0x5f   : > { %p55_p13 = scmp.ne.s32.totalorder %s6018_s23, %s6014_s22  ;;  %p46_p0 = scmp.eq.s32.totalorder %s45_s18, 0 }
  0x60   : > { %p56_p4 = scmp.eq.s32.totalorder %s6022_s24, 0  ;;  %p61_p2 = scmp.ne.s32.totalorder %s6014_s22, %s6010_s21 }
  0x61   : > { %p410_p5 = scmp.eq.s32.totalorder %s6154_s27, 1  ;;  %p416_p10 = scmp.eq.s32.totalorder %s4835_s30, 1 }
  0x62   : > { %5398 = dma.hbm_to_vmem [thread:$0]  (!%p6168_p6), %s7862_s13, 512, %s538_s29, [#allocation21], %s7814_s20, %s7814_s20, %s7816_s16  }
  0x63   : > { %s6241_s5 = scalar_select %p46_p0, %s6018_s23, %s48_s17  }
  0x64   : > { %p57_p8 = por %p56_p4, %p55_p13  ;;  %p6245_p9 = por %p7821_p1, %p61_p2 }
  0x65   : > { %7864 = sst [smem:[#allocation39_spill]] %s6241_s5  ;;  %p6249_p11 = por %p410_p5, %p55_p13 }
  0x66   : > { %s7865_s29 = scalar_select %p6245_p9, 1, 0 }
  0x67   : > { %s7866_s6 = scalar_select %p6249_p11, 1, 0 }
  0x68   : > { %p5430_p12 = scmp.lt.s32.totalorder %s6022_s24, 2  ;;  %s6255_s26 = sand.u32 1, %s6018_s23  }
  0x69   : > { %p6257_p3 = por %p416_p10, %p61_p2  ;;  %s594_s17 = sand.u32 1, %s6022_s24  }
  0x6a   : > { %p6262_p0 = pnand %p5430_p12, %p57_p8  ;;  %s4852_s20 = sshll.u32 %s6255_s26, 3 }
  0x6b   : > { %s7867_s28 = scalar_select %p6257_p3, 1, 0 }
  0x6c   : > { %s7869_s18 = scalar_select %p6262_p0, 1, 0 }
  0x6d   : > { %7868 = sst [smem:[#allocation40_spill]] %s7867_s28  ;;  %s4853_s16 = sshll.u32 %s6022_s24, 7 }
  0x6e   : > { %s7870_s1 = sld [smem:[#allocation59_spill]]  ;;  %s598_s9 = scalar_lea.vmem [#allocation5], %s4852_s20 }
  0x6f   : > { %s605_s11 = sshll.u32 %s598_s9, 4  ;;  %s6274_s5 = scalar_lea.sflag [#allocation6], %s594_s17  ;;  %s606_s11 = int_to_ptr.vmem [resolvable:$true] %s605_s11 }
  0x70   : > { %p6280_p4 = pneg %p6262_p0 }
  0x72   : > { %s7871_s25 = scalar_select %p6280_p4, 1, 0 }
  0x74   : > { %s6271_s30 = scalar_lea.hbm %s7870_s1, %s4853_s16  ;;  %s5695_s20 = scalar_lea.hbm %s7870_s1, 256 }
  0x75   : > { %s5690_s23 = scalar_lea.hbm %s6271_s30, 128  ;;  %p5696_p8 = scmp.lt.s32.totalorder %s6271_s30, %s7870_s1 }
  0x76   : > { %p5691_p13 = scmp.ne.s32.totalorder %s6271_s30, %s5690_s23  ;;  %p5697_p10 = scmp.lt.s32.totalorder %s5695_s20, %s5690_s23 }
  0x78   : > { %p5693_p2 = pnand %p6280_p4, %p5691_p13  ;;  %p5698_p12 = por %p5697_p10, %p5696_p8 }
  0x7a   : > { %p5694_p5 = pneg %p5693_p2 }
  0x7c   : > { %p5699_p1 = pnand %p5698_p12, %p5694_p5 }
  0x7e   : > { %5702 = shalt.err (!%p5699_p1)
}
  0x7f   : > { %s5703_s17 = scalar_lea.vmem %s606_s11, 128  ;;  %s6033_s13 = smov [#allocation5]  }
  0x80   : > { %p5704_p3 = scmp.ne.s32.totalorder %s606_s11, %s5703_s17  ;;  %s5708_s28 = sshll.u32 %s6033_s13, 4  ;;  %s5709_s28 = int_to_ptr.vmem [resolvable:$false] %s5708_s28 }
  0x81   : > { %s5710_s21 = scalar_lea.vmem %s5709_s28, 256  ;;  %p5711_p13 = scmp.lt.s32.totalorder %s606_s11, %s5709_s28 }
  0x82   : > { %p5706_p11 = pnand %p5704_p3, %p6280_p4  ;;  %p5712_p2 = scmp.lt.s32.totalorder %s5710_s21, %s5703_s17 }
  0x84   : > { %p5707_p9 = pneg %p5706_p11  ;;  %p5713_p6 = por %p5712_p2, %p5711_p13 }
  0x86   : > { %p5714_p7 = pnand %p5713_p6, %p5707_p9 }
  0x88   : > { %5717 = shalt.err (!%p5714_p7)
}
  0x89   : > { %5411 = dma.hbm_to_vmem [thread:$0]  (!%p6262_p0), %s6271_s30, 128, %s606_s11, %s6274_s5  }
  0x8a   : > { %s6034_s23 = smov [#allocation10]   ;;  %s6035_s7 = smov [#allocation13]  }
  0x8b   : > { %s449_s3 = sshll.u32 %s6034_s23, 4  ;;  %s476_s20 = sshll.u32 %s6035_s7, 4  ;;  %s450_s3 = int_to_ptr.vmem [resolvable:$true] %s449_s3  ;;  %s477_s20 = int_to_ptr.vmem [resolvable:$true] %s476_s20 }
  0x8c   : > { %s5729_s13 = scalar_lea.vmem %s450_s3, 48  ;;  %p7872_p3 = scmp.ne.s32.totalorder %s7857_s19, 0 }
  0x8d   : > { %p5730_p1 = scmp.ne.s32.totalorder %s450_s3, %s5729_s13  ;;  %s5736_s21 = scalar_lea.vmem %s450_s3, 64 }
  0x8e   : > { %p5737_p6 = scmp.lt.s32.totalorder %s450_s3, %s450_s3  ;;  %p5738_p7 = scmp.lt.s32.totalorder %s5736_s21, %s5729_s13 }
  0x8f   : > { %p5732_p11 = pnand %p5730_p1, %p7872_p3 }
  0x90   : > { %p5739_p9 = por %p5738_p7, %p5737_p6 }
  0x91   : > { %p5733_p5 = pneg %p5732_p11 }
  0x93   : > { %p5740_p8 = pnand %p5739_p9, %p5733_p5 }
  0x95   : > { %5743 = shalt.err (!%p5740_p8)
}
  0x96   : > { %p7873_p10 = scmp.ne.s32.totalorder %s7856_s0, 0  ;;  %s7874_s4 = sld [smem:[#allocation61_spill]] }
  0x97   : > { %s5755_s30 = scalar_lea.vmem %s477_s20, 512  ;;  %p5763_p1 = scmp.lt.s32.totalorder %s477_s20, %s477_s20 }
  0x98   : > { %p5756_p12 = scmp.ne.s32.totalorder %s477_s20, %s5755_s30  ;;  %p5764_p11 = scmp.lt.s32.totalorder %s5755_s30, %s5755_s30 }
  0x9a   : > { %p5758_p13 = pnand %p5756_p12, %p7872_p3  ;;  %p5765_p0 = por %p5764_p11, %p5763_p1 }
  0x9c   : > { %5377 = dma.hbm_to_vmem [thread:$0]  (!%p7873_p10), %s7874_s4, 48, %s450_s3, [#allocation9]  }
  0x9d   : > { %p5759_p2 = pneg %p5758_p13 }
  0x9f   : > { %p5766_p4 = pnand %p5765_p0, %p5759_p2 }
  0xa1   : > { %5769 = shalt.err (!%p5766_p4)
}
  0xa2   : > { %s7875_s9 = smov 8   ;;  %s7876_s16 = smov 128  }
  0xa3   : > { %5383 = dma.hbm_to_vmem [thread:$0]  (!%p7873_p10), %s7799_s8, 512, %s477_s20, [#allocation12], %s7876_s16, %s7876_s16, %s7875_s9  }
  0xa4   : > { %s6036_s3 = smov [#allocation16]   ;;  %s6037_s13 = smov [#allocation19]  }
  0xa5   : > { %s500_s7 = sshll.u32 %s6036_s3, 4  ;;  %s527_s21 = sshll.u32 %s6037_s13, 4  ;;  %s501_s7 = int_to_ptr.vmem [resolvable:$true] %s500_s7  ;;  %s528_s21 = int_to_ptr.vmem [resolvable:$true] %s527_s21 }
  0xa6   : > { %s5781_s11 = scalar_lea.vmem %s501_s7, 512  ;;  %p5789_p6 = scmp.lt.s32.totalorder %s501_s7, %s501_s7 }
  0xa7   : > { %p5782_p5 = scmp.ne.s32.totalorder %s501_s7, %s5781_s11  ;;  %p5790_p7 = scmp.lt.s32.totalorder %s5781_s11, %s5781_s11 }
  0xa9   : > { %p5784_p0 = pnand %p5782_p5, %p7872_p3  ;;  %p5791_p9 = por %p5790_p7, %p5789_p6 }
  0xab   : > { %p5785_p4 = pneg %p5784_p0 }
  0xad   : > { %p5792_p8 = pnand %p5791_p9, %p5785_p4 }
  0xaf   : > { %5795 = shalt.err (!%p5792_p8)
}
  0xb0   : > { %5389 = dma.hbm_to_vmem [thread:$0]  (!%p7873_p10), %s7801_s10, 512, %s501_s7, [#allocation15], %s7876_s16, %s7876_s16, %s7875_s9  }
  0xb1   : > { %s5807_s30 = scalar_lea.vmem %s528_s21, 16  ;;  %s5814_s17 = scalar_lea.vmem %s528_s21, 32 }
  0xb2   : > { %p5808_p12 = scmp.ne.s32.totalorder %s528_s21, %s5807_s30  ;;  %p5815_p1 = scmp.lt.s32.totalorder %s528_s21, %s528_s21 }
  0xb3   : > { %p5816_p11 = scmp.lt.s32.totalorder %s5814_s17, %s5807_s30 }
  0xb4   : > { %p5810_p13 = pnand %p5808_p12, %p7872_p3 }
  0xb5   : > { %p5817_p5 = por %p5816_p11, %p5815_p1 }
  0xb6   : > { %p5811_p2 = pneg %p5810_p13 }
  0xb8   : > { %p5818_p0 = pnand %p5817_p5, %p5811_p2 }
  0xba   : > { %5821 = shalt.err (!%p5818_p0)
}
  0xbb   : > { %5395 = dma.hbm_to_vmem [thread:$0]  (!%p7873_p10), %s7803_s12, 16, %s528_s21, [#allocation18]  }
  0xbc   : > { %s6038_s13 = smov [#allocation22]   ;;  %s6039_s11 = smov [#allocation23]  }
  0xbd   : > { %s551_s7 = sshll.u32 %s6038_s13, 4  ;;  %s562_s20 = sshll.u32 %s6039_s11, 4  ;;  %s552_s7 = int_to_ptr.vmem [resolvable:$true] %s551_s7  ;;  %s563_s20 = int_to_ptr.vmem [resolvable:$true] %s562_s20 }
  0xbe   : > { %s5833_s28 = scalar_lea.vmem %s552_s7, 16  ;;  %s5840_s30 = scalar_lea.vmem %s552_s7, 32 }
  0xbf   : > { %p5834_p4 = scmp.ne.s32.totalorder %s552_s7, %s5833_s28  ;;  %p5841_p9 = scmp.lt.s32.totalorder %s552_s7, %s552_s7 }
  0xc0   : > { %p5842_p8 = scmp.lt.s32.totalorder %s5840_s30, %s5833_s28 }
  0xc1   : > { %p5836_p6 = pnand %p5834_p4, %p7872_p3 }
  0xc2   : > { %p5843_p12 = por %p5842_p8, %p5841_p9 }
  0xc3   : > { %p5837_p7 = pneg %p5836_p6 }
  0xc5   : > { %p5844_p13 = pnand %p5843_p12, %p5837_p7 }
  0xc7   : > { %5847 = shalt.err (!%p5844_p13)
}
  0xc8   : > { %5401 = dma.hbm_to_vmem [thread:$0]  (!%p7873_p10), %s7805_s14, 16, %s552_s7, [#allocation21]  }
  0xc9   : > { %s5859_s23 = scalar_lea.vmem %s563_s20, 16  ;;  %s5866_s3 = scalar_lea.vmem %s563_s20, 32 }
  0xca   : > { %p5860_p2 = scmp.ne.s32.totalorder %s563_s20, %s5859_s23  ;;  %p5867_p5 = scmp.lt.s32.totalorder %s563_s20, %s563_s20 }
  0xcb   : > { %p5868_p0 = scmp.lt.s32.totalorder %s5866_s3, %s5859_s23 }
  0xcc   : > { %p5862_p1 = pnand %p5860_p2, %p7872_p3 }
  0xcd   : > { %p5869_p4 = por %p5868_p0, %p5867_p5 }
  0xce   : > { %p5863_p11 = pneg %p5862_p1 }
  0xd0   : > { %p5870_p6 = pnand %p5869_p4, %p5863_p11 }
  0xd2   : > { %5873 = shalt.err (!%p5870_p6)
}
  0xd3   : > { %5404 = dma.hbm_to_vmem [thread:$0]  (!%p7873_p10), %s7806_s15, 16, %s563_s20, [#allocation24]  }
  0xd4   : > { %s4849_s7 = sshll.u32 %s6255_s26, 6  ;;  %s5028_s19 = sshll.u32 %s6022_s24, 10 }
  0xd5   : > { %s7877_s21 = sld [smem:[#allocation58_spill]]  ;;  %s577_s23 = scalar_lea.vmem [#allocation2], %s4849_s7 }
  0xd6   : > { %s584_s0 = sshll.u32 %s577_s23, 4  ;;  %s574_s3 = scalar_lea.sflag [#allocation3], %s6255_s26  ;;  %s6354_s0 = int_to_ptr.vmem [resolvable:$true] %s584_s0 }
  0xd7   : > { %p7879_p7 = scmp.ne.s32.totalorder %s7871_s25, 0 }
  0xdb   : > { %s7878_s17 = smov %s7877_s21  ;;  %s6352_s1 = scalar_lea.hbm %s7877_s21, %s5028_s19 }
  0xdc   : > { %s5874_s13 = scalar_lea.hbm %s6352_s1, 1024  ;;  %s5879_s4 = scalar_lea.hbm %s7878_s17, 2048 }
  0xdd   : > { %p5875_p3 = scmp.ne.s32.totalorder %s6352_s1, %s5874_s13  ;;  %p5880_p8 = scmp.lt.s32.totalorder %s6352_s1, %s7878_s17 }
  0xde   : > { %p5881_p12 = scmp.lt.s32.totalorder %s5879_s4, %s5874_s13 }
  0xdf   : > { %p5877_p9 = pnand %p5875_p3, %p7879_p7 }
  0xe0   : > { %p5882_p13 = por %p5881_p12, %p5880_p8 }
  0xe1   : > { %p5878_p10 = pneg %p5877_p9 }
  0xe3   : > { %p5883_p2 = pnand %p5882_p13, %p5878_p10 }
  0xe5   : > { %5886 = shalt.err (!%p5883_p2)
}
  0xe6   : > { %s5887_s7 = scalar_lea.vmem %s6354_s0, 1024  ;;  %s6040_s30 = smov [#allocation2]  }
  0xe7   : > { %p5888_p1 = scmp.ne.s32.totalorder %s6354_s0, %s5887_s7  ;;  %s5892_s21 = sshll.u32 %s6040_s30, 4  ;;  %s5893_s21 = int_to_ptr.vmem [resolvable:$false] %s5892_s21 }
  0xe8   : > { %s5894_s23 = scalar_lea.vmem %s5893_s21, 2048  ;;  %p5895_p0 = scmp.lt.s32.totalorder %s6354_s0, %s5893_s21 }
  0xe9   : > { %p5890_p11 = pnand %p5888_p1, %p7879_p7  ;;  %p5896_p4 = scmp.lt.s32.totalorder %s5894_s23, %s5887_s7 }
  0xeb   : > { %p5891_p5 = pneg %p5890_p11  ;;  %p5897_p6 = por %p5896_p4, %p5895_p0 }
  0xed   : > { %p5898_p3 = pnand %p5897_p6, %p5891_p5 }
  0xef   : > { %5901 = shalt.err (!%p5898_p3)
}
  0xf0   : > { %p7880_p9 = scmp.ne.s32.totalorder %s7869_s18, 0  ;;  %s5030_s4 = sshll.u32 %s6022_s24, 11 }
  0xf1   : > { %s7881_s13 = sshll.u32 %s6255_s26, 7  ;;  %s6386_s7 = scalar_lea.hbm %s7793_s2, %s5030_s4 }
  0xf2   : > { %5408 = dma.hbm_to_vmem [thread:$0]  (!%p7880_p9), %s6352_s1, 1024, %s6354_s0, %s574_s3, %s7876_s16, %s7876_s16, %s7875_s9  }
  0xf3   : > { %s616_s20 = scalar_lea.vmem [#allocation7], %s7881_s13  ;;  %s5902_s30 = scalar_lea.hbm %s6386_s7, 2048 }
  0xf4   : > { %s624_s11 = sshll.u32 %s616_s20, 4  ;;  %p5903_p10 = scmp.ne.s32.totalorder %s6386_s7, %s5902_s30  ;;  %s6388_s11 = int_to_ptr.vmem [resolvable:$true] %s624_s11 }
  0xf5   : > { %s5907_s26 = scalar_lea.hbm %s7793_s2, 4096  ;;  %p5908_p13 = scmp.lt.s32.totalorder %s6386_s7, %s7793_s2 }
  0xf6   : > { %p5905_p8 = pnand %p5903_p10, %p7879_p7  ;;  %p5909_p2 = scmp.lt.s32.totalorder %s5907_s26, %s5902_s30 }
  0xf8   : > { %p5906_p12 = pneg %p5905_p8  ;;  %p5910_p1 = por %p5909_p2, %p5908_p13 }
  0xfa   : > { %p5911_p11 = pnand %p5910_p1, %p5906_p12 }
  0xfc   : > { %5914 = shalt.err (!%p5911_p11)
}
  0xfd   : > { %s5915_s3 = scalar_lea.vmem %s6388_s11, 2048  ;;  %s6041_s21 = smov [#allocation7]  }
  0xfe   : > { %p5916_p5 = scmp.ne.s32.totalorder %s6388_s11, %s5915_s3  ;;  %s5920_s23 = sshll.u32 %s6041_s21, 4  ;;  %s5921_s23 = int_to_ptr.vmem [resolvable:$false] %s5920_s23 }
  0xff   : > { %s5922_s4 = scalar_lea.vmem %s5921_s23, 4096  ;;  %p5923_p6 = scmp.lt.s32.totalorder %s6388_s11, %s5921_s23 }
 0x100   : > { %p5918_p0 = pnand %p5916_p5, %p7879_p7  ;;  %p5924_p3 = scmp.lt.s32.totalorder %s5922_s4, %s5915_s3 }
 0x102   : > { %p5919_p4 = pneg %p5918_p0  ;;  %p5925_p10 = por %p5924_p3, %p5923_p6 }
 0x104   : > { %p5926_p8 = pnand %p5925_p10, %p5919_p4 }
 0x106   : > { %5929 = shalt.err (!%p5926_p8)
}
 0x107   : > { %s6042_s13 = smov 256   ;;  %s6043_s20 = smov 16  }
 0x108   : > { %5414 = dma.hbm_to_vmem [thread:$0]  (!%p7880_p9), %s6386_s7, 2048, %s6388_s11, %s6274_s5, %s6042_s13, %s6042_s13, %s6043_s20  }
 0x109   : > { %s7882_s25 = sld [smem:[#allocation37_spill]] }
 0x10f   : > { %p7883_p7 = scmp.ne.s32.totalorder %s7882_s25, 0 }
 0x111   : > { %636 = sbr.rel (%p7883_p7) target bundleno = 2024 (0x7e8), region = 84 }
 0x116   : > { %s6414_s28 = sand.u32 1, %s6014_s22   ;;  %p7884_p12 = scmp.ne.s32.totalorder %s7865_s29, 0 }
 0x117   : > { %s4859_s19 = sshll.u32 %s6414_s28, 6  ;;  %s639_s30 = scalar_lea.sflag [#allocation3], %s6414_s28 }
 0x118   : > { %s6418_s1 = scalar_lea.vmem [#allocation2], %s4859_s19 }
 0x119   : > { %5973 = dma.done.wait (%p7884_p12), %s639_s30, 1024  }
 0x11a   : > { %5975 = vsyncadd (%p7884_p12), %s639_s30, 4294966272  ;;  %s647_s5 = sand.u32 1, %s6154_s27   ;;  %s4860_s18 = sshll.u32 %s6414_s28, 3 }
 0x11b   : > { %s648_s11 = scalar_lea.sflag [#allocation6], %s647_s5  ;;  %s6428_s7 = scalar_lea.vmem [#allocation5], %s4860_s18 }
 0x11c   : > { %5977 = dma.done.wait (%p7884_p12), %s648_s11, 2176  }
 0x11d   : > { %5979 = vsyncadd (%p7884_p12), %s648_s11, 4294965120  ;;  %s4861_s9 = sshll.u32 %s6414_s28, 7  ;;  %p7885_p9 = scmp.eq.s32.totalorder %s6154_s27, 0 }
 0x11e   : > { %s6435_s26 = scalar_lea.vmem [#allocation7], %s4861_s9 }
 0x11f   : > { %5981 = dma.done.wait (%p7885_p9), [#allocation9], 82992   ;;  %p7886_p13 = pmov %p7885_p9 }
 0x120   : > { %p7887_p2 = pmov %p7885_p9 }
 0x121   : > { %5983 = vsyncadd (%p7886_p13), [#allocation9], 4294884304 }
 0x122   : > { %5985 = dma.done.wait (%p7887_p2), [#allocation12], 528   ;;  %p7888_p1 = pmov %p7887_p2 }
 0x124   : > { %5987 = vsyncadd (%p7888_p1), [#allocation12], 4294966768  ;;  %p7889_p11 = pmov %p7888_p1 }
 0x125   : > { %p7890_p5 = pmov %p7888_p1 }
 0x126   : > { %5989 = dma.done.wait (%p7889_p11), [#allocation15], 528  }
 0x127   : > { %5991 = vsyncadd (%p7890_p5), [#allocation15], 4294966768  ;;  %p7891_p0 = pmov %p7888_p1 }
 0x129   : > { %5993 = dma.done.wait (%p7891_p0), [#allocation18], 528   ;;  %p7892_p4 = pmov %p7891_p0 }
 0x12a   : > { %p7893_p6 = pmov %p7891_p0 }
 0x12b   : > { %5995 = vsyncadd (%p7892_p4), [#allocation18], 4294966768 }
 0x12c   : > { %5997 = dma.done.wait (%p7893_p6), [#allocation21], 528   ;;  %p7894_p3 = pmov %p7891_p0 }
 0x12d   : > { %p7895_p10 = pmov %p7891_p0 }
 0x12e   : > { %5999 = vsyncadd (%p7894_p3), [#allocation21], 4294966768 }
 0x12f   : > { %6001 = dma.done.wait (%p7895_p10), [#allocation24], 16   ;;  %p7896_p8 = pmov %p7891_p0 }
 0x130   : > { %s7897_s0 = sld [smem:[#allocation63_spill]]  ;;  %v1341_v1 = vld [vmem:[#allocation8 + $0xcb0] sm:$0xff]  ;;  %v1340_v2 = vld [vmem:[#allocation8 + $0xca8] sm:$0xff]  ;;  %v1314_v4 = vld [vmem:[#allocation8 + $0xbd8] sm:$0xff]  ;;  %vm805_vm0 = vcmask 523264   ;;  %vm6045_vm1 = vmmov 0  }
 0x131   : > { %6003 = vsyncadd (%p7896_p8), [#allocation24], 4294967280  ;;  %1607 = vmatprep.subr.mxu1 %v1341_v1  ;;  %v1313_v5 = vld [vmem:[#allocation8 + $0xbd0] sm:$0xff]  ;;  %v1287_v7 = vld [vmem:[#allocation8 + $0xb00] sm:$0xff]  ;;  %s7908_s21 = sld [smem:[#allocation62_spill]]  ;;  %vm3723_vm2 = vcmask 261120  }
 0x132   : > { %1608 = vmatpush1.msra.mxu1 %v1340_v2  ;;  %v1286_v8 = vld [vmem:[#allocation8 + $0xaf8] sm:$0xff]  ;;  %v1260_v10 = vld [vmem:[#allocation8 + $0xa28] sm:$0xff]  ;;  %v1259_v11 = vld [vmem:[#allocation8 + $0xa20] sm:$0xff]  ;;  %vm4587_vm3 = vcmask 1041409   ;;  %vm4589_vm4 = vcmask 1042434   ;;  %vm4591_vm5 = vcmask 1043459  }
 0x133   : > { %1609 = vmatprep.subr.mxu1 %v1314_v4  ;;  %v1233_v13 = vld [vmem:[#allocation8 + $0x950] sm:$0xff]  ;;  %v1232_v14 = vld [vmem:[#allocation8 + $0x948] sm:$0xff]  ;;  %v1206_v16 = vld [vmem:[#allocation8 + $0x878] sm:$0xff]  ;;  %vm4593_vm6 = vcmask 1044484   ;;  %vm4595_vm7 = vcmask 1045509   ;;  %vm4597_vm8 = vcmask 1046534  }
 0x134   : > { %1610 = vmatpush1.msra.mxu1 %v1313_v5  ;;  %v1205_v17 = vld [vmem:[#allocation8 + $0x870] sm:$0xff]  ;;  %v1179_v19 = vld [vmem:[#allocation8 + $0x7a0] sm:$0xff]  ;;  %v1178_v20 = vld [vmem:[#allocation8 + $0x798] sm:$0xff]  ;;  %s762_s30 = scalar_lea.vmem [#allocation25], %s4860_s18  ;;  %vm4599_vm9 = vcmask 1047559   ;;  %s7945_s9 = sld [smem:[#allocation68_spill]] }
 0x135   : > { %1611 = vmatprep.subr.mxu1 %v1287_v7  ;;  %v1152_v22 = vld [vmem:[#allocation8 + $0x6c8] sm:$0xff]  ;;  %v765_v23 = vld [vmem:[%s6418_s1] sm:$0xff]  ;;  %v1151_v24 = vld [vmem:[#allocation8 + $0x6c0] sm:$0xff]  ;;  %s4604_s16 = scalar_lea.sflag [#allocation4], %s6414_s28  ;;  %p7946_p12 = scmp.ne.s32.totalorder %s7866_s6, 0 }
 0x136   : > { %v797_v0 = vld [vmem:[%s7897_s0 + $0x38] sm:$0xff]  ;;  %v796_v3 = vld [vmem:[%s7897_s0 + $0x30] sm:$0xff]  ;;  %v795_v6 = vld [vmem:[%s7897_s0 + $0x28] sm:$0xff]  ;;  %1612 = vmatpush1.msra.mxu1 %v1286_v8  ;;  %5184 = vmatprep.mubr.msk.f32.mxu0 %vm805_vm0, %v765_v23 }
 0x137   : > { %5168 = vmatprep.subr.mxu0 %v797_v0  ;;  %v794_v9 = vld [vmem:[%s7897_s0 + $0x20] sm:$0xff]  ;;  %v793_v12 = vld [vmem:[%s7897_s0 + $0x18] sm:$0xff]  ;;  %1613 = vmatprep.subr.mxu1 %v1260_v10  ;;  %v792_v15 = vld [vmem:[%s7897_s0 + $0x10] sm:$0xff]  ;;  %s7909_s4 = smov %s7908_s21 }
 0x138   : > { %5169 = vmatpush3.msra.mxu0 %v797_v0  ;;  %1614 = vmatpush1.msra.mxu1 %v1259_v11  ;;  %v791_v18 = vld [vmem:[%s7897_s0 + $0x8] sm:$0xff]  ;;  %v790_v21 = vld [vmem:[%s7897_s0] sm:$0xff]  ;;  %v1343_v27 = vld [vmem:[#allocation8 + $0xcc0] sm:$0xff] }
 0x139   : > { %5170 = vmatprep.subr.mxu0 %v796_v3  ;;  %1615 = vmatprep.subr.mxu1 %v1233_v13  ;;  %v766_v25 = vld [vmem:[%s6418_s1 + $0x8] sm:$0xff]  ;;  %v1125_v26 = vld [vmem:[#allocation8 + $0x5f0] sm:$0xff]  ;;  %v1124_v28 = vld [vmem:[#allocation8 + $0x5e8] sm:$0xff] }
 0x13a   : > { %5171 = vmatpush3.msra.mxu0 %v796_v3  ;;  %1616 = vmatpush1.msra.mxu1 %v1232_v14  ;;  %v1342_v29 = vld [vmem:[#allocation8 + $0xcb8] sm:$0xff]  ;;  %v1316_v31 = vld [vmem:[#allocation8 + $0xbe8] sm:$0xff]  ;;  %v1097_v32 = vld [vmem:[#allocation8 + $0x510] sm:$0xff] }
 0x13b   : > { %5172 = vmatprep.subr.mxu0 %v795_v6  ;;  %1617 = vmatprep.subr.mxu1 %v1206_v16  ;;  %v1098_v30 = vld [vmem:[#allocation8 + $0x518] sm:$0xff]  ;;  %v1315_v33 = vld [vmem:[#allocation8 + $0xbe0] sm:$0xff]  ;;  %v1289_v35 = vld [vmem:[#allocation8 + $0xb10] sm:$0xff] }
 0x13c   : > { %5173 = vmatpush3.msra.mxu0 %v795_v6  ;;  %1618 = vmatpush1.msra.mxu1 %v1205_v17  ;;  %v1071_v34 = vld [vmem:[#allocation8 + $0x440] sm:$0xff]  ;;  %v1070_v36 = vld [vmem:[#allocation8 + $0x438] sm:$0xff]  ;;  %v1288_v37 = vld [vmem:[#allocation8 + $0xb08] sm:$0xff] }
 0x13d   : > { %5174 = vmatprep.subr.mxu0 %v794_v9  ;;  %1619 = vmatprep.subr.mxu1 %v1179_v19  ;;  %v1044_v38 = vld [vmem:[#allocation8 + $0x368] sm:$0xff]  ;;  %v1262_v39 = vld [vmem:[#allocation8 + $0xa38] sm:$0xff]  ;;  %v1043_v40 = vld [vmem:[#allocation8 + $0x360] sm:$0xff] }
 0x13e   : > { %5175 = vmatpush3.msra.mxu0 %v794_v9  ;;  %1620 = vmatpush1.msra.mxu1 %v1178_v20  ;;  %v1261_v41 = vld [vmem:[#allocation8 + $0xa30] sm:$0xff]  ;;  %v1235_v43 = vld [vmem:[#allocation8 + $0x960] sm:$0xff]  ;;  %v1016_v44 = vld [vmem:[#allocation8 + $0x288] sm:$0xff] }
 0x13f   : > { %5176 = vmatprep.subr.mxu0 %v793_v12  ;;  %1621 = vmatprep.subr.mxu1 %v1152_v22  ;;  %v1017_v42 = vld [vmem:[#allocation8 + $0x290] sm:$0xff]  ;;  %v1234_v45 = vld [vmem:[#allocation8 + $0x958] sm:$0xff]  ;;  %v1208_v47 = vld [vmem:[#allocation8 + $0x888] sm:$0xff] }
 0x140   : > { %5177 = vmatpush3.msra.mxu0 %v793_v12  ;;  %1622 = vmatpush1.msra.mxu1 %v1151_v24  ;;  %v990_v46 = vld [vmem:[#allocation8 + $0x1b8] sm:$0xff]  ;;  %v989_v48 = vld [vmem:[#allocation8 + $0x1b0] sm:$0xff]  ;;  %v1207_v49 = vld [vmem:[#allocation8 + $0x880] sm:$0xff] }
 0x141   : > { %5178 = vmatprep.subr.mxu0 %v792_v15  ;;  %1623 = vmatprep.subr.mxu1 %v1125_v26  ;;  %v963_v50 = vld [vmem:[#allocation8 + $0xe0] sm:$0xff]  ;;  %v1181_v51 = vld [vmem:[#allocation8 + $0x7b0] sm:$0xff]  ;;  %v962_v52 = vld [vmem:[#allocation8 + $0xd8] sm:$0xff] }
 0x142   : > { %5179 = vmatpush3.msra.mxu0 %v792_v15  ;;  %1624 = vmatpush1.msra.mxu1 %v1124_v28  ;;  %v1180_v53 = vld [vmem:[#allocation8 + $0x7a8] sm:$0xff]  ;;  %v1154_v55 = vld [vmem:[#allocation8 + $0x6d8] sm:$0xff]  ;;  %v935_v56 = vld [vmem:[#allocation8] sm:$0xff] }
 0x143   : > { %5180 = vmatprep.subr.mxu0 %v791_v18  ;;  %1625 = vmatprep.subr.mxu1 %v1098_v30  ;;  %v936_v54 = vld [vmem:[#allocation8 + $0x8] sm:$0xff]  ;;  %v1153_v57 = vld [vmem:[#allocation8 + $0x6d0] sm:$0xff]  ;;  %v1127_v59 = vld [vmem:[#allocation8 + $0x600] sm:$0xff] }
 0x144   : > { %5181 = vmatpush3.msra.mxu0 %v791_v18  ;;  %1626 = vmatpush1.msra.mxu1 %v1097_v32  ;;  %v1557_v58 = vld [vmem:[#allocation8 + $0x1370] sm:$0xff]  ;;  %v1556_v60 = vld [vmem:[#allocation8 + $0x1368] sm:$0xff]  ;;  %v1126_v61 = vld [vmem:[#allocation8 + $0x5f8] sm:$0xff] }
 0x145   : > { %5182 = vmatprep.subr.mxu0 %v790_v21  ;;  %1627 = vmatprep.subr.mxu1 %v1071_v34  ;;  %v1530_v62 = vld [vmem:[#allocation8 + $0x1298] sm:$0xff]  ;;  %v1100_v63 = vld [vmem:[#allocation8 + $0x528] sm:$0xff]  ;;  %v1529_v0 = vld [vmem:[#allocation8 + $0x1290] sm:$0xff] }
 0x146   : > { %5183 = vmatpush3.msra.mxu0 %v790_v21  ;;  %1628 = vmatpush1.msra.mxu1 %v1070_v36  ;;  %v1099_v1 = vld [vmem:[#allocation8 + $0x520] sm:$0xff]  ;;  %v1073_v3 = vld [vmem:[#allocation8 + $0x450] sm:$0xff]  ;;  %v1502_v4 = vld [vmem:[#allocation8 + $0x11b8] sm:$0xff] }
 0x147   : > { %5185 = vmatmul.mubr.msk.f32.vlgmr.msra.gmra.mxu0 %vm805_vm0, %v766_v25  ;;  %1720 = vmatprep.subr.mxu0 %v1343_v27  ;;  %v1503_v2 = vld [vmem:[#allocation8 + $0x11c0] sm:$0xff]  ;;  %v1072_v5 = vld [vmem:[#allocation8 + $0x448] sm:$0xff]  ;;  %v1046_v7 = vld [vmem:[#allocation8 + $0x378] sm:$0xff] }
 0x148   : > { %1721 = vmatpush1.msra.mxu0 %v1342_v29  ;;  %1629 = vmatprep.subr.mxu1 %v1044_v38  ;;  %v1476_v6 = vld [vmem:[#allocation8 + $0x10e8] sm:$0xff]  ;;  %v1475_v8 = vld [vmem:[#allocation8 + $0x10e0] sm:$0xff]  ;;  %v1045_v9 = vld [vmem:[#allocation8 + $0x370] sm:$0xff] }
 0x149   : > { %1722 = vmatprep.subr.mxu0 %v1316_v31  ;;  %1630 = vmatpush1.msra.mxu1 %v1043_v40  ;;  %v1449_v10 = vld [vmem:[#allocation8 + $0x1010] sm:$0xff]  ;;  %v1019_v11 = vld [vmem:[#allocation8 + $0x2a0] sm:$0xff]  ;;  %v1448_v12 = vld [vmem:[#allocation8 + $0x1008] sm:$0xff] }
 0x14a   : > { %1723 = vmatpush1.msra.mxu0 %v1315_v33  ;;  %1631 = vmatprep.subr.mxu1 %v1017_v42  ;;  %v1018_v13 = vld [vmem:[#allocation8 + $0x298] sm:$0xff]  ;;  %v992_v15 = vld [vmem:[#allocation8 + $0x1c8] sm:$0xff]  ;;  %v1421_v16 = vld [vmem:[#allocation8 + $0xf30] sm:$0xff] }
 0x14b   : > { %1724 = vmatprep.subr.mxu0 %v1289_v35  ;;  %1632 = vmatpush1.msra.mxu1 %v1016_v44  ;;  %v1422_v14 = vld [vmem:[#allocation8 + $0xf38] sm:$0xff]  ;;  %v991_v17 = vld [vmem:[#allocation8 + $0x1c0] sm:$0xff]  ;;  %v965_v19 = vld [vmem:[#allocation8 + $0xf0] sm:$0xff] }
 0x14c   : > { %1725 = vmatpush1.msra.mxu0 %v1288_v37  ;;  %1633 = vmatprep.subr.mxu1 %v990_v46  ;;  %v1395_v18 = vld [vmem:[#allocation8 + $0xe60] sm:$0xff]  ;;  %v1394_v20 = vld [vmem:[#allocation8 + $0xe58] sm:$0xff]  ;;  %v964_v21 = vld [vmem:[#allocation8 + $0xe8] sm:$0xff] }
 0x14d   : > { %1726 = vmatprep.subr.mxu0 %v1262_v39  ;;  %1634 = vmatpush1.msra.mxu1 %v989_v48  ;;  %v1368_v22 = vld [vmem:[#allocation8 + $0xd88] sm:$0xff]  ;;  %v938_v23 = vld [vmem:[#allocation8 + $0x18] sm:$0xff]  ;;  %v1367_v24 = vld [vmem:[#allocation8 + $0xd80] sm:$0xff] }
 0x14e   : > { %1727 = vmatpush1.msra.mxu0 %v1261_v41  ;;  %1635 = vmatprep.subr.mxu1 %v963_v50  ;;  %v937_v25 = vld [vmem:[#allocation8 + $0x10] sm:$0xff]  ;;  %v6490_v26 = vld [vmem:[%s6435_s26 + $0x8] sm:$0xff]  ;;  %v1559_v27 = vld [vmem:[#allocation8 + $0x1380] sm:$0xff] }
 0x14f   : > { %1728 = vmatprep.subr.mxu0 %v1235_v43  ;;  %1636 = vmatpush1.msra.mxu1 %v962_v52  ;;  %v1345_v28 = vld [vmem:[#allocation8 + $0xcd0] sm:$0xff]  ;;  %v6493_v29 = vld [vmem:[%s6435_s26] sm:$0xff]  ;;  %v1558_v30 = vld [vmem:[#allocation8 + $0x1378] sm:$0xff] }
 0x150   : > { %1729 = vmatpush1.msra.mxu0 %v1234_v45  ;;  %1637 = vmatprep.subr.mxu1 %v936_v54  ;;  %v1344_v31 = vld [vmem:[#allocation8 + $0xcc8] sm:$0xff]  ;;  %v767_v32 = vld [vmem:[%s6418_s1 + $0x10] sm:$0xff]  ;;  %v1318_v34 = vld [vmem:[#allocation8 + $0xbf8] sm:$0xff] }
 0x151   : > { %1730 = vmatprep.subr.mxu0 %v1208_v47  ;;  %1638 = vmatpush1.msra.mxu1 %v935_v56  ;;  %v1532_v33 = vld [vmem:[#allocation8 + $0x12a8] sm:$0xff]  ;;  %v1531_v36 = vld [vmem:[#allocation8 + $0x12a0] sm:$0xff]  ;;  %v1317_v37 = vld [vmem:[#allocation8 + $0xbf0] sm:$0xff] }
 0x152   : > { %1731 = vmatpush1.msra.mxu0 %v1207_v49  ;;  %1655 = vmatprep.subr.mxu1 %v1557_v58  ;;  %v768_v35 = vld [vmem:[%s6418_s1 + $0x18] sm:$0xff]  ;;  %v1505_v38 = vld [vmem:[#allocation8 + $0x11d0] sm:$0xff]  ;;  %v1291_v39 = vld [vmem:[#allocation8 + $0xb20] sm:$0xff] }
 0x153   : > { %1732 = vmatprep.subr.mxu0 %v1181_v51  ;;  %1656 = vmatpush2.msra.mxu1 %v1556_v60  ;;  %v1504_v40 = vld [vmem:[#allocation8 + $0x11c8] sm:$0xff]  ;;  %v1290_v41 = vld [vmem:[#allocation8 + $0xb18] sm:$0xff]  ;;  %v769_v42 = vld [vmem:[%s6418_s1 + $0x20] sm:$0xff] }
 0x154   : > { %1733 = vmatpush1.msra.mxu0 %v1180_v53  ;;  %1657 = vmatprep.subr.mxu1 %v1530_v62  ;;  %v1478_v43 = vld [vmem:[#allocation8 + $0x10f8] sm:$0xff]  ;;  %v1264_v44 = vld [vmem:[#allocation8 + $0xa48] sm:$0xff]  ;;  %v1477_v46 = vld [vmem:[#allocation8 + $0x10f0] sm:$0xff] }
 0x155   : > { %1734 = vmatprep.subr.mxu0 %v1154_v55  ;;  %1658 = vmatpush2.msra.mxu1 %v1529_v0  ;;  %v770_v45 = vld [vmem:[%s6418_s1 + $0x28] sm:$0xff]  ;;  %v1263_v47 = vld [vmem:[#allocation8 + $0xa40] sm:$0xff]  ;;  %v1237_v49 = vld [vmem:[#allocation8 + $0x970] sm:$0xff] }
 0x156   : > { %1735 = vmatpush1.msra.mxu0 %v1153_v57  ;;  %1659 = vmatprep.subr.mxu1 %v1503_v2  ;;  %v1451_v48 = vld [vmem:[#allocation8 + $0x1020] sm:$0xff]  ;;  %v1450_v50 = vld [vmem:[#allocation8 + $0x1018] sm:$0xff]  ;;  %v1236_v51 = vld [vmem:[#allocation8 + $0x968] sm:$0xff] }
 0x157   : > { %1736 = vmatprep.subr.mxu0 %v1127_v59  ;;  %1660 = vmatpush2.msra.mxu1 %v1502_v4  ;;  %v771_v52 = vld [vmem:[%s6418_s1 + $0x30] sm:$0xff]  ;;  %v1424_v53 = vld [vmem:[#allocation8 + $0xf48] sm:$0xff]  ;;  %v1210_v54 = vld [vmem:[#allocation8 + $0x898] sm:$0xff] }
 0x158   : > { %1737 = vmatpush1.msra.mxu0 %v1126_v61  ;;  %1661 = vmatprep.subr.mxu1 %v1476_v6  ;;  %v772_v55 = vld [vmem:[%s6418_s1 + $0x38] sm:$0xff]  ;;  %v1423_v56 = vld [vmem:[#allocation8 + $0xf40] sm:$0xff]  ;;  %v1209_v57 = vld [vmem:[#allocation8 + $0x890] sm:$0xff] }
 0x159   : > { %1738 = vmatprep.subr.mxu0 %v1100_v63  ;;  %1662 = vmatpush2.msra.mxu1 %v1475_v8  ;;  %v1397_v58 = vld [vmem:[#allocation8 + $0xe70] sm:$0xff]  ;;  %v1183_v59 = vld [vmem:[#allocation8 + $0x7c0] sm:$0xff]  ;;  %v1396_v60 = vld [vmem:[#allocation8 + $0xe68] sm:$0xff] }
 0x15a   : > { %1739 = vmatpush1.msra.mxu0 %v1099_v1  ;;  %1663 = vmatprep.subr.mxu1 %v1449_v10  ;;  %v1182_v61 = vld [vmem:[#allocation8 + $0x7b8] sm:$0xff]  ;;  %v1156_v63 = vld [vmem:[#allocation8 + $0x6e8] sm:$0xff]  ;;  %v1369_v0 = vld [vmem:[#allocation8 + $0xd90] sm:$0xff] }
 0x15b   : > { %1740 = vmatprep.subr.mxu0 %v1073_v3  ;;  %1664 = vmatpush2.msra.mxu1 %v1448_v12  ;;  %v1370_v62 = vld [vmem:[#allocation8 + $0xd98] sm:$0xff]  ;;  %v1155_v1 = vld [vmem:[#allocation8 + $0x6e0] sm:$0xff]  ;;  %v1129_v2 = vld [vmem:[#allocation8 + $0x610] sm:$0xff] }
 0x15c   : > { %1741 = vmatpush1.msra.mxu0 %v1072_v5  ;;  %1665 = vmatprep.subr.mxu1 %v1422_v14  ;;  %v1347_v3 = vld [vmem:[#allocation8 + $0xce0] sm:$0xff]  ;;  %v1128_v4 = vld [vmem:[#allocation8 + $0x608] sm:$0xff]  ;;  %v1346_v5 = vld [vmem:[#allocation8 + $0xcd8] sm:$0xff] }
 0x15d   : > { %1742 = vmatprep.subr.mxu0 %v1046_v7  ;;  %1666 = vmatpush2.msra.mxu1 %v1421_v16  ;;  %v1102_v6 = vld [vmem:[#allocation8 + $0x538] sm:$0xff]  ;;  %v1320_v7 = vld [vmem:[#allocation8 + $0xc08] sm:$0xff]  ;;  %v1101_v8 = vld [vmem:[#allocation8 + $0x530] sm:$0xff] }
 0x15e   : > { %1743 = vmatpush1.msra.mxu0 %v1045_v9  ;;  %1667 = vmatprep.subr.mxu1 %v1395_v18  ;;  %v1319_v9 = vld [vmem:[#allocation8 + $0xc00] sm:$0xff]  ;;  %v6514_v10 = vld [vmem:[%s6435_s26 + $0x18] sm:$0xff]  ;;  %v1293_v12 = vld [vmem:[#allocation8 + $0xb30] sm:$0xff] }
 0x15f   : > { %1744 = vmatprep.subr.mxu0 %v1019_v11  ;;  %1668 = vmatpush2.msra.mxu1 %v1394_v20  ;;  %v1075_v11 = vld [vmem:[#allocation8 + $0x460] sm:$0xff]  ;;  %v1074_v14 = vld [vmem:[#allocation8 + $0x458] sm:$0xff]  ;;  %v1048_v16 = vld [vmem:[#allocation8 + $0x388] sm:$0xff] }
 0x160   : > { %1745 = vmatpush1.msra.mxu0 %v1018_v13  ;;  %1669 = vmatprep.subr.mxu1 %v1368_v22  ;;  %v6517_v13 = vld [vmem:[%s6435_s26 + $0x10] sm:$0xff]  ;;  %v1047_v18 = vld [vmem:[#allocation8 + $0x380] sm:$0xff]  ;;  %v6523_v20 = vld [vmem:[%s6435_s26 + $0x28] sm:$0xff] }
 0x161   : > { %1746 = vmatprep.subr.mxu0 %v992_v15  ;;  %1670 = vmatpush2.msra.mxu1 %v1367_v24  ;;  %v1292_v15 = vld [vmem:[#allocation8 + $0xb28] sm:$0xff]  ;;  %v1239_v22 = vld [vmem:[#allocation8 + $0x980] sm:$0xff] }
 0x162   : > { %1747 = vmatpush1.msra.mxu0 %v991_v17  ;;  %4883 = vmatprep.mubr.msk.f32.mxu1 %vm805_vm0, %v6490_v26  ;;  %v1266_v17 = vld [vmem:[#allocation8 + $0xa58] sm:$0xff]  ;;  %v1020_v24 = vld [vmem:[#allocation8 + $0x2a8] sm:$0xff] }
 0x163   : > { %1748 = vmatprep.subr.mxu0 %v965_v19  ;;  %1833 = vmatprep.subr.mxu1 %v1345_v28  ;;  %v1265_v19 = vld [vmem:[#allocation8 + $0xa50] sm:$0xff]  ;;  %v1212_v28 = vld [vmem:[#allocation8 + $0x8a8] sm:$0xff] }
 0x164   : > { %1749 = vmatpush1.msra.mxu0 %v964_v21  ;;  %1672 = vmatmul.mubr.f32.vlgmr.msra.gmra.mxu1 %v6493_v29  ;;  %v1021_v21 = vld [vmem:[#allocation8 + $0x2b0] sm:$0xff] }
 0x165   : > { %1750 = vmatprep.subr.mxu0 %v938_v23  ;;  %1834 = vmatpush1.msra.mxu1 %v1344_v31  ;;  %v6526_v23 = vld [vmem:[%s6435_s26 + $0x20] sm:$0xff] }
 0x166   : > { %1751 = vmatpush1.msra.mxu0 %v937_v25  ;;  %5187 = vmatprep.mubr.msk.f32.mxu0 %vm805_vm0, %v767_v32  ;;  %v1238_v25 = vld [vmem:[#allocation8 + $0x978] sm:$0xff]  ;;  %v1211_v31 = vld [vmem:[#allocation8 + $0x8a0] sm:$0xff] }
 0x167   : > { %1768 = vmatprep.subr.mxu0 %v1559_v27  ;;  %1835 = vmatprep.subr.mxu1 %v1318_v34  ;;  %v994_v27 = vld [vmem:[#allocation8 + $0x1d8] sm:$0xff]  ;;  %v1185_v34 = vld [vmem:[#allocation8 + $0x7d0] sm:$0xff] }
 0x168   : > { %1769 = vmatpush2.msra.mxu0 %v1558_v30  ;;  %1836 = vmatpush1.msra.mxu1 %v1317_v37  ;;  %v993_v30 = vld [vmem:[#allocation8 + $0x1d0] sm:$0xff]  ;;  %v6532_v32 = vld [vmem:[%s6435_s26 + $0x38] sm:$0xff]  ;;  %v1184_v37 = vld [vmem:[#allocation8 + $0x7c8] sm:$0xff] }
 0x169   : > { %1770 = vmatprep.subr.mxu0 %v1532_v33  ;;  %5188 = vmatmul.mubr.msk.f32.gmra.mxu0 %vm805_vm0, %v768_v35  ;;  %v967_v33 = vld [vmem:[#allocation8 + $0x100] sm:$0xff]  ;;  %v6535_v35 = vld [vmem:[%s6435_s26 + $0x30] sm:$0xff] }
 0x16a   : > { %1771 = vmatpush2.msra.mxu0 %v1531_v36  ;;  %1837 = vmatprep.subr.mxu1 %v1291_v39  ;;  %v966_v36 = vld [vmem:[#allocation8 + $0xf8] sm:$0xff] }
 0x16b   : > { %1772 = vmatprep.subr.mxu0 %v1505_v38  ;;  %1838 = vmatpush1.msra.mxu1 %v1290_v41  ;;  %v940_v38 = vld [vmem:[#allocation8 + $0x28] sm:$0xff]  ;;  %v1158_v39 = vld [vmem:[#allocation8 + $0x6f8] sm:$0xff]  ;;  %v1157_v41 = vld [vmem:[#allocation8 + $0x6f0] sm:$0xff] }
 0x16c   : > { %1773 = vmatpush2.msra.mxu0 %v1504_v40  ;;  %5190 = vmatprep.mubr.msk.f32.mxu0 %vm805_vm0, %v769_v42  ;;  %v939_v40 = vld [vmem:[#allocation8 + $0x20] sm:$0xff]  ;;  %v6541_v42 = vld [vmem:[%s6435_s26 + $0x48] sm:$0xff] }
 0x16d   : > { %1774 = vmatprep.subr.mxu0 %v1478_v43  ;;  %1839 = vmatprep.subr.mxu1 %v1264_v44  ;;  %v1561_v43 = vld [vmem:[#allocation8 + $0x1390] sm:$0xff]  ;;  %v1131_v44 = vld [vmem:[#allocation8 + $0x620] sm:$0xff] }
 0x16e   : > { %5191 = vmatmul.mubr.msk.f32.gmra.mxu0 %vm805_vm0, %v770_v45  ;;  %1840 = vmatpush1.msra.mxu1 %v1263_v47  ;;  %v6544_v45 = vld [vmem:[%s6435_s26 + $0x40] sm:$0xff]  ;;  %v1130_v47 = vld [vmem:[#allocation8 + $0x618] sm:$0xff] }
 0x16f   : > { %1775 = vmatpush2.msra.mxu0 %v1477_v46  ;;  %1841 = vmatprep.subr.mxu1 %v1237_v49  ;;  %v1560_v46 = vld [vmem:[#allocation8 + $0x1388] sm:$0xff] }
 0x170   : > { %1776 = vmatprep.subr.mxu0 %v1451_v48  ;;  %1842 = vmatpush1.msra.mxu1 %v1236_v51  ;;  %v1534_v48 = vld [vmem:[#allocation8 + $0x12b8] sm:$0xff]  ;;  %v1104_v49 = vld [vmem:[#allocation8 + $0x548] sm:$0xff]  ;;  %v1103_v51 = vld [vmem:[#allocation8 + $0x540] sm:$0xff] }
 0x171   : > { %1777 = vmatpush2.msra.mxu0 %v1450_v50  ;;  %5193 = vmatprep.mubr.msk.f32.mxu0 %vm805_vm0, %v771_v52  ;;  %v1533_v50 = vld [vmem:[#allocation8 + $0x12b0] sm:$0xff]  ;;  %v6553_v52 = vld [vmem:[%s6435_s26 + $0x58] sm:$0xff] }
 0x172   : > { %1778 = vmatprep.subr.mxu0 %v1424_v53  ;;  %1843 = vmatprep.subr.mxu1 %v1210_v54  ;;  %v1507_v53 = vld [vmem:[#allocation8 + $0x11e0] sm:$0xff]  ;;  %v1077_v54 = vld [vmem:[#allocation8 + $0x470] sm:$0xff] }
 0x173   : > { %5194 = vmatmul.mubr.msk.f32.gmra.mxu0 %vm805_vm0, %v772_v55  ;;  %1844 = vmatpush1.msra.mxu1 %v1209_v57  ;;  %v6556_v55 = vld [vmem:[%s6435_s26 + $0x50] sm:$0xff]  ;;  %v1076_v57 = vld [vmem:[#allocation8 + $0x468] sm:$0xff] }
 0x174   : > { %1779 = vmatpush2.msra.mxu0 %v1423_v56  ;;  %1845 = vmatprep.subr.mxu1 %v1183_v59  ;;  %v1506_v56 = vld [vmem:[#allocation8 + $0x11d8] sm:$0xff] }
 0x175   : > { %1780 = vmatprep.subr.mxu0 %v1397_v58  ;;  %1846 = vmatpush1.msra.mxu1 %v1182_v61  ;;  %v1480_v58 = vld [vmem:[#allocation8 + $0x1108] sm:$0xff]  ;;  %v1050_v59 = vld [vmem:[#allocation8 + $0x398] sm:$0xff]  ;;  %v1049_v61 = vld [vmem:[#allocation8 + $0x390] sm:$0xff] }
 0x176   : > { %1781 = vmatpush2.msra.mxu0 %v1396_v60  ;;  %1847 = vmatprep.subr.mxu1 %v1156_v63  ;;  %v1479_v60 = vld [vmem:[#allocation8 + $0x1100] sm:$0xff]  ;;  %v1453_v63 = vld [vmem:[#allocation8 + $0x1030] sm:$0xff] }
 0x177   : > { %1782 = vmatprep.subr.mxu0 %v1370_v62  ;;  %4891 = vmatprep.mubr.msk.f32.mxu0 %vm805_vm0, %v6490_v26  ;;  %v6565_v62 = vld [vmem:[%s6435_s26 + $0x68] sm:$0xff] }
 0x178   : > { %1783 = vmatpush2.msra.mxu0 %v1369_v0  ;;  %1848 = vmatpush1.msra.mxu1 %v1155_v1  ;;  %v1023_v0 = vld [vmem:[#allocation8 + $0x2c0] sm:$0xff] }
 0x179   : > { %1785 = vmatmul.mubr.f32.vlgmr.msra.gmra.mxu0 %v6493_v29  ;;  %1849 = vmatprep.subr.mxu1 %v1129_v2  ;;  %v6568_v1 = vld [vmem:[%s6435_s26 + $0x60] sm:$0xff]  ;;  %v1452_v2 = vld [vmem:[#allocation8 + $0x1028] sm:$0xff] }
 0x17a   : > { %1946 = vmatprep.subr.mxu0 %v1347_v3  ;;  %1850 = vmatpush1.msra.mxu1 %v1128_v4  ;;  %v1022_v3 = vld [vmem:[#allocation8 + $0x2b8] sm:$0xff] }
 0x17b   : > { %1947 = vmatpush1.msra.mxu0 %v1346_v5  ;;  %1851 = vmatprep.subr.mxu1 %v1102_v6  ;;  %v1426_v4 = vld [vmem:[#allocation8 + $0xf58] sm:$0xff]  ;;  %v996_v5 = vld [vmem:[#allocation8 + $0x1e8] sm:$0xff]  ;;  %v1425_v6 = vld [vmem:[#allocation8 + $0xf50] sm:$0xff] }
 0x17c   : > { %1948 = vmatprep.subr.mxu0 %v1320_v7  ;;  %1852 = vmatpush1.msra.mxu1 %v1101_v8  ;;  %v995_v7 = vld [vmem:[#allocation8 + $0x1e0] sm:$0xff]  ;;  %v6577_v8 = vld [vmem:[%s6435_s26 + $0x78] sm:$0xff] }
 0x17d   : > { %1949 = vmatpush1.msra.mxu0 %v1319_v9  ;;  %4884 = vmatprep.mubr.msk.f32.mxu1 %vm805_vm0, %v6514_v10  ;;  %v1399_v9 = vld [vmem:[#allocation8 + $0xe80] sm:$0xff] }
 0x17e   : > { %1853 = vmatprep.subr.mxu1 %v1075_v11  ;;  %1950 = vmatprep.subr.mxu0 %v1293_v12  ;;  %v969_v11 = vld [vmem:[#allocation8 + $0x110] sm:$0xff] }
 0x17f   : > { %1678 = vmatmul.mubr.f32.gmra.mxu1 %v6517_v13  ;;  %1951 = vmatpush1.msra.mxu0 %v1292_v15  ;;  %v6580_v12 = vld [vmem:[%s6435_s26 + $0x70] sm:$0xff]  ;;  %v968_v15 = vld [vmem:[#allocation8 + $0x108] sm:$0xff] }
 0x180   : > { %1854 = vmatpush1.msra.mxu1 %v1074_v14  ;;  %1952 = vmatprep.subr.mxu0 %v1266_v17  ;;  %v1398_v14 = vld [vmem:[#allocation8 + $0xe78] sm:$0xff] }
 0x181   : > { %1855 = vmatprep.subr.mxu1 %v1048_v16  ;;  %1953 = vmatpush1.msra.mxu0 %v1265_v19  ;;  %v1372_v16 = vld [vmem:[#allocation8 + $0xda8] sm:$0xff]  ;;  %v942_v17 = vld [vmem:[#allocation8 + $0x38] sm:$0xff]  ;;  %v941_v19 = vld [vmem:[#allocation8 + $0x30] sm:$0xff] }
 0x182   : > { %1856 = vmatpush1.msra.mxu1 %v1047_v18  ;;  %4885 = vmatprep.mubr.msk.f32.mxu1 %vm805_vm0, %v6523_v20  ;;  %v1371_v18 = vld [vmem:[#allocation8 + $0xda0] sm:$0xff] }
 0x183   : > { %1857 = vmatprep.subr.mxu1 %v1021_v21  ;;  %1954 = vmatprep.subr.mxu0 %v1239_v22  ;;  %v1563_v21 = vld [vmem:[#allocation8 + $0x13a0] sm:$0xff]  ;;  %v1349_v22 = vld [vmem:[#allocation8 + $0xcf0] sm:$0xff] }
 0x184   : > { %1684 = vmatmul.mubr.f32.gmra.mxu1 %v6526_v23  ;;  %1955 = vmatpush1.msra.mxu0 %v1238_v25  ;;  %v1348_v25 = vld [vmem:[#allocation8 + $0xce8] sm:$0xff] }
 0x185   : > { %1858 = vmatpush1.msra.mxu1 %v1020_v24  ;;  %1956 = vmatprep.subr.mxu0 %v1212_v28  ;;  %v1562_v24 = vld [vmem:[#allocation8 + $0x1398] sm:$0xff] }
 0x186   : > { %1859 = vmatprep.subr.mxu1 %v994_v27  ;;  %1957 = vmatpush1.msra.mxu0 %v1211_v31  ;;  %v1536_v27 = vld [vmem:[#allocation8 + $0x12c8] sm:$0xff]  ;;  %v1322_v28 = vld [vmem:[#allocation8 + $0xc18] sm:$0xff]  ;;  %v1321_v31 = vld [vmem:[#allocation8 + $0xc10] sm:$0xff] }
 0x187   : > { %1860 = vmatpush1.msra.mxu1 %v993_v30  ;;  %4886 = vmatprep.mubr.msk.f32.mxu1 %vm805_vm0, %v6532_v32  ;;  %v1535_v30 = vld [vmem:[#allocation8 + $0x12c0] sm:$0xff] }
 0x188   : > { %1861 = vmatprep.subr.mxu1 %v967_v33  ;;  %1958 = vmatprep.subr.mxu0 %v1185_v34  ;;  %v1509_v33 = vld [vmem:[#allocation8 + $0x11f0] sm:$0xff]  ;;  %v1295_v34 = vld [vmem:[#allocation8 + $0xb40] sm:$0xff] }
 0x189   : > { %1690 = vmatmul.mubr.f32.gmra.mxu1 %v6535_v35  ;;  %1959 = vmatpush1.msra.mxu0 %v1184_v37  ;;  %v1294_v37 = vld [vmem:[#allocation8 + $0xb38] sm:$0xff] }
 0x18a   : > { %1862 = vmatpush1.msra.mxu1 %v966_v36  ;;  %1960 = vmatprep.subr.mxu0 %v1158_v39  ;;  %v1508_v36 = vld [vmem:[#allocation8 + $0x11e8] sm:$0xff] }
 0x18b   : > { %1863 = vmatprep.subr.mxu1 %v940_v38  ;;  %1961 = vmatpush1.msra.mxu0 %v1157_v41  ;;  %v1482_v38 = vld [vmem:[#allocation8 + $0x1118] sm:$0xff]  ;;  %v1268_v39 = vld [vmem:[#allocation8 + $0xa68] sm:$0xff]  ;;  %v1267_v41 = vld [vmem:[#allocation8 + $0xa60] sm:$0xff] }
 0x18c   : > { %1864 = vmatpush1.msra.mxu1 %v939_v40  ;;  %4887 = vmatprep.mubr.msk.f32.mxu1 %vm805_vm0, %v6541_v42  ;;  %v1481_v40 = vld [vmem:[#allocation8 + $0x1110] sm:$0xff] }
 0x18d   : > { %4892 = vmatprep.mubr.msk.f32.mxu0 %vm805_vm0, %v6514_v10  ;;  %1881 = vmatprep.subr.mxu1 %v1561_v43  ;;  %v1455_v43 = vld [vmem:[#allocation8 + $0x1040] sm:$0xff] }
 0x18e   : > { %1962 = vmatprep.subr.mxu0 %v1131_v44  ;;  %1696 = vmatmul.mubr.f32.gmra.mxu1 %v6544_v45  ;;  %v1241_v44 = vld [vmem:[#allocation8 + $0x990] sm:$0xff] }
 0x18f   : > { %1791 = vmatmul.mubr.f32.gmra.mxu0 %v6517_v13  ;;  %1882 = vmatpush2.msra.mxu1 %v1560_v46  ;;  %v1454_v46 = vld [vmem:[#allocation8 + $0x1038] sm:$0xff] }
 0x190   : > { %1963 = vmatpush1.msra.mxu0 %v1130_v47  ;;  %1883 = vmatprep.subr.mxu1 %v1534_v48  ;;  %v1240_v47 = vld [vmem:[#allocation8 + $0x988] sm:$0xff] }
 0x191   : > { %1964 = vmatprep.subr.mxu0 %v1104_v49  ;;  %1884 = vmatpush2.msra.mxu1 %v1533_v50  ;;  %v1428_v48 = vld [vmem:[#allocation8 + $0xf68] sm:$0xff]  ;;  %v1214_v49 = vld [vmem:[#allocation8 + $0x8b8] sm:$0xff]  ;;  %v1427_v50 = vld [vmem:[#allocation8 + $0xf60] sm:$0xff] }
 0x192   : > { %1965 = vmatpush1.msra.mxu0 %v1103_v51  ;;  %4888 = vmatprep.mubr.msk.f32.mxu1 %vm805_vm0, %v6553_v52  ;;  %v1213_v51 = vld [vmem:[#allocation8 + $0x8b0] sm:$0xff] }
 0x193   : > { %4893 = vmatprep.mubr.msk.f32.mxu0 %vm805_vm0, %v6523_v20  ;;  %1885 = vmatprep.subr.mxu1 %v1507_v53  ;;  %v1401_v53 = vld [vmem:[#allocation8 + $0xe90] sm:$0xff] }
 0x194   : > { %1966 = vmatprep.subr.mxu0 %v1077_v54  ;;  %1702 = vmatmul.mubr.f32.gmra.mxu1 %v6556_v55  ;;  %v1187_v54 = vld [vmem:[#allocation8 + $0x7e0] sm:$0xff] }
 0x195   : > { %1797 = vmatmul.mubr.f32.gmra.mxu0 %v6526_v23  ;;  %1886 = vmatpush2.msra.mxu1 %v1506_v56  ;;  %v1400_v56 = vld [vmem:[#allocation8 + $0xe88] sm:$0xff] }
 0x196   : > { %1967 = vmatpush1.msra.mxu0 %v1076_v57  ;;  %1887 = vmatprep.subr.mxu1 %v1480_v58  ;;  %v1186_v57 = vld [vmem:[#allocation8 + $0x7d8] sm:$0xff] }
 0x197   : > { %1968 = vmatprep.subr.mxu0 %v1050_v59  ;;  %1888 = vmatpush2.msra.mxu1 %v1479_v60  ;;  %v1374_v58 = vld [vmem:[#allocation8 + $0xdb8] sm:$0xff]  ;;  %v1160_v59 = vld [vmem:[#allocation8 + $0x708] sm:$0xff]  ;;  %v1373_v60 = vld [vmem:[#allocation8 + $0xdb0] sm:$0xff] }
 0x198   : > { %1969 = vmatpush1.msra.mxu0 %v1049_v61  ;;  %4889 = vmatprep.mubr.msk.f32.mxu1 %vm805_vm0, %v6565_v62  ;;  %v1159_v61 = vld [vmem:[#allocation8 + $0x700] sm:$0xff] }
 0x199   : > { %4894 = vmatprep.mubr.msk.f32.mxu0 %vm805_vm0, %v6532_v32  ;;  %1889 = vmatprep.subr.mxu1 %v1453_v63  ;;  %v1133_v63 = vld [vmem:[#allocation8 + $0x630] sm:$0xff] }
 0x19a   : > { %1970 = vmatprep.subr.mxu0 %v1023_v0  ;;  %1708 = vmatmul.mubr.f32.gmra.mxu1 %v6568_v1  ;;  %v1351_v0 = vld [vmem:[#allocation8 + $0xd00] sm:$0xff] }
 0x19b   : > { %1803 = vmatmul.mubr.f32.gmra.mxu0 %v6535_v35  ;;  %1890 = vmatpush2.msra.mxu1 %v1452_v2  ;;  %v1132_v2 = vld [vmem:[#allocation8 + $0x628] sm:$0xff] }
 0x19c   : > { %1971 = vmatpush1.msra.mxu0 %v1022_v3  ;;  %1891 = vmatprep.subr.mxu1 %v1426_v4  ;;  %v1350_v3 = vld [vmem:[#allocation8 + $0xcf8] sm:$0xff] }
 0x19d   : > { %1972 = vmatprep.subr.mxu0 %v996_v5  ;;  %1892 = vmatpush2.msra.mxu1 %v1425_v6  ;;  %v1106_v4 = vld [vmem:[#allocation8 + $0x558] sm:$0xff]  ;;  %v1324_v5 = vld [vmem:[#allocation8 + $0xc28] sm:$0xff]  ;;  %v1105_v6 = vld [vmem:[#allocation8 + $0x550] sm:$0xff] }
 0x19e   : > { %1973 = vmatpush1.msra.mxu0 %v995_v7  ;;  %4890 = vmatprep.mubr.msk.f32.mxu1 %vm805_vm0, %v6577_v8  ;;  %v1323_v7 = vld [vmem:[#allocation8 + $0xc20] sm:$0xff] }
 0x19f   : > { %4895 = vmatprep.mubr.msk.f32.mxu0 %vm805_vm0, %v6541_v42  ;;  %1893 = vmatprep.subr.mxu1 %v1399_v9  ;;  %v1079_v9 = vld [vmem:[#allocation8 + $0x480] sm:$0xff] }
 0x1a0   : > { %1974 = vmatprep.subr.mxu0 %v969_v11  ;;  %1714 = vmatmul.mubr.f32.gmra.mxu1 %v6580_v12  ;;  %v1297_v11 = vld [vmem:[#allocation8 + $0xb50] sm:$0xff] }
 0x1a1   : > { %1809 = vmatmul.mubr.f32.gmra.mxu0 %v6544_v45  ;;  %1894 = vmatpush2.msra.mxu1 %v1398_v14  ;;  %v1078_v14 = vld [vmem:[#allocation8 + $0x478] sm:$0xff] }
 0x1a2   : > { %1975 = vmatpush1.msra.mxu0 %v968_v15  ;;  %1895 = vmatprep.subr.mxu1 %v1372_v16  ;;  %v1296_v15 = vld [vmem:[#allocation8 + $0xb48] sm:$0xff] }
 0x1a3   : > { %1976 = vmatprep.subr.mxu0 %v942_v17  ;;  %1896 = vmatpush2.msra.mxu1 %v1371_v18  ;;  %v1052_v16 = vld [vmem:[#allocation8 + $0x3a8] sm:$0xff]  ;;  %v1270_v17 = vld [vmem:[#allocation8 + $0xa78] sm:$0xff]  ;;  %v1051_v18 = vld [vmem:[#allocation8 + $0x3a0] sm:$0xff] }
 0x1a4   : > { %1977 = vmatpush1.msra.mxu0 %v941_v19  ;;  %4896 = vmatprep.mubr.msk.f32.mxu0 %vm805_vm0, %v6553_v52  ;;  %v1269_v19 = vld [vmem:[#allocation8 + $0xa70] sm:$0xff] }
 0x1a5   : > { %4899 = vmatprep.mubr.msk.f32.mxu1 %vm805_vm0, %v6490_v26  ;;  %1994 = vmatprep.subr.mxu0 %v1563_v21  ;;  %v1025_v21 = vld [vmem:[#allocation8 + $0x2d0] sm:$0xff] }
 0x1a6   : > { %2059 = vmatprep.subr.mxu1 %v1349_v22  ;;  %1815 = vmatmul.mubr.f32.gmra.mxu0 %v6556_v55  ;;  %v1243_v22 = vld [vmem:[#allocation8 + $0x9a0] sm:$0xff] }
 0x1a7   : > { %1898 = vmatmul.mubr.f32.vlgmr.msra.gmra.mxu1 %v6493_v29  ;;  %1995 = vmatpush2.msra.mxu0 %v1562_v24  ;;  %v1024_v24 = vld [vmem:[#allocation8 + $0x2c8] sm:$0xff] }
 0x1a8   : > { %2060 = vmatpush1.msra.mxu1 %v1348_v25  ;;  %1996 = vmatprep.subr.mxu0 %v1536_v27  ;;  %v1242_v25 = vld [vmem:[#allocation8 + $0x998] sm:$0xff] }
 0x1a9   : > { %2061 = vmatprep.subr.mxu1 %v1322_v28  ;;  %1997 = vmatpush2.msra.mxu0 %v1535_v30  ;;  %v998_v27 = vld [vmem:[#allocation8 + $0x1f8] sm:$0xff]  ;;  %v1216_v28 = vld [vmem:[#allocation8 + $0x8c8] sm:$0xff]  ;;  %v997_v30 = vld [vmem:[#allocation8 + $0x1f0] sm:$0xff] }
 0x1aa   : > { %2062 = vmatpush1.msra.mxu1 %v1321_v31  ;;  %4897 = vmatprep.mubr.msk.f32.mxu0 %vm805_vm0, %v6565_v62  ;;  %v1215_v31 = vld [vmem:[#allocation8 + $0x8c0] sm:$0xff] }
 0x1ab   : > { %1998 = vmatprep.subr.mxu0 %v1509_v33  ;;  %2063 = vmatprep.subr.mxu1 %v1295_v34  ;;  %v971_v33 = vld [vmem:[#allocation8 + $0x120] sm:$0xff]  ;;  %v1189_v34 = vld [vmem:[#allocation8 + $0x7f0] sm:$0xff] }
 0x1ac   : > { %1821 = vmatmul.mubr.f32.gmra.mxu0 %v6568_v1  ;;  %2064 = vmatpush1.msra.mxu1 %v1294_v37  ;;  %v1188_v37 = vld [vmem:[#allocation8 + $0x7e8] sm:$0xff] }
 0x1ad   : > { %1999 = vmatpush2.msra.mxu0 %v1508_v36  ;;  %2065 = vmatprep.subr.mxu1 %v1268_v39  ;;  %v970_v36 = vld [vmem:[#allocation8 + $0x118] sm:$0xff] }
 0x1ae   : > { %2000 = vmatprep.subr.mxu0 %v1482_v38  ;;  %2066 = vmatpush1.msra.mxu1 %v1267_v41  ;;  %v944_v38 = vld [vmem:[#allocation8 + $0x48] sm:$0xff]  ;;  %v1162_v39 = vld [vmem:[#allocation8 + $0x718] sm:$0xff]  ;;  %v1161_v41 = vld [vmem:[#allocation8 + $0x710] sm:$0xff] }
 0x1af   : > { %2001 = vmatpush2.msra.mxu0 %v1481_v40  ;;  %4898 = vmatprep.mubr.msk.f32.mxu0 %vm805_vm0, %v6577_v8  ;;  %v943_v40 = vld [vmem:[#allocation8 + $0x40] sm:$0xff] }
 0x1b0   : > { %2002 = vmatprep.subr.mxu0 %v1455_v43  ;;  %2067 = vmatprep.subr.mxu1 %v1241_v44  ;;  %v1565_v43 = vld [vmem:[#allocation8 + $0x13b0] sm:$0xff]  ;;  %v1135_v44 = vld [vmem:[#allocation8 + $0x640] sm:$0xff] }
 0x1b1   : > { %1827 = vmatmul.mubr.f32.gmra.mxu0 %v6580_v12  ;;  %2068 = vmatpush1.msra.mxu1 %v1240_v47  ;;  %v1134_v47 = vld [vmem:[#allocation8 + $0x638] sm:$0xff] }
 0x1b2   : > { %2003 = vmatpush2.msra.mxu0 %v1454_v46  ;;  %2069 = vmatprep.subr.mxu1 %v1214_v49  ;;  %v1564_v46 = vld [vmem:[#allocation8 + $0x13a8] sm:$0xff] }
 0x1b3   : > { %2004 = vmatprep.subr.mxu0 %v1428_v48  ;;  %2070 = vmatpush1.msra.mxu1 %v1213_v51  ;;  %v1538_v48 = vld [vmem:[#allocation8 + $0x12d8] sm:$0xff]  ;;  %v1108_v49 = vld [vmem:[#allocation8 + $0x568] sm:$0xff]  ;;  %v1107_v51 = vld [vmem:[#allocation8 + $0x560] sm:$0xff] }
 0x1b4   : > { %2005 = vmatpush2.msra.mxu0 %v1427_v50  ;;  %2071 = vmatprep.subr.mxu1 %v1187_v54  ;;  %v1537_v50 = vld [vmem:[#allocation8 + $0x12d0] sm:$0xff] }
 0x1b5   : > { %2006 = vmatprep.subr.mxu0 %v1401_v53  ;;  %2072 = vmatpush1.msra.mxu1 %v1186_v57  ;;  %v1511_v53 = vld [vmem:[#allocation8 + $0x1200] sm:$0xff]  ;;  %v1081_v54 = vld [vmem:[#allocation8 + $0x490] sm:$0xff]  ;;  %v1080_v57 = vld [vmem:[#allocation8 + $0x488] sm:$0xff] }
 0x1b6   : > { %2007 = vmatpush2.msra.mxu0 %v1400_v56  ;;  %2073 = vmatprep.subr.mxu1 %v1160_v59  ;;  %v1510_v56 = vld [vmem:[#allocation8 + $0x11f8] sm:$0xff] }
 0x1b7   : > { %2008 = vmatprep.subr.mxu0 %v1374_v58  ;;  %4907 = vmatprep.mubr.msk.f32.mxu0 %vm805_vm0, %v6490_v26  ;;  %v1484_v58 = vld [vmem:[#allocation8 + $0x1128] sm:$0xff]  ;;  %v1054_v59 = vld [vmem:[#allocation8 + $0x3b8] sm:$0xff] }
 0x1b8   : > { %2009 = vmatpush2.msra.mxu0 %v1373_v60  ;;  %2074 = vmatpush1.msra.mxu1 %v1159_v61  ;;  %v1483_v60 = vld [vmem:[#allocation8 + $0x1120] sm:$0xff]  ;;  %v1053_v61 = vld [vmem:[#allocation8 + $0x3b0] sm:$0xff] }
 0x1b9   : > { %2011 = vmatmul.mubr.f32.vlgmr.msra.gmra.mxu0 %v6493_v29  ;;  %2075 = vmatprep.subr.mxu1 %v1133_v63  ;;  %v1457_v63 = vld [vmem:[#allocation8 + $0x1050] sm:$0xff] }
 0x1ba   : > { %2172 = vmatprep.subr.mxu0 %v1351_v0  ;;  %2076 = vmatpush1.msra.mxu1 %v1132_v2  ;;  %v1027_v0 = vld [vmem:[#allocation8 + $0x2e0] sm:$0xff]  ;;  %v1456_v2 = vld [vmem:[#allocation8 + $0x1048] sm:$0xff] }
 0x1bb   : > { %2173 = vmatpush1.msra.mxu0 %v1350_v3  ;;  %2077 = vmatprep.subr.mxu1 %v1106_v4  ;;  %v1026_v3 = vld [vmem:[#allocation8 + $0x2d8] sm:$0xff] }
 0x1bc   : > { %2174 = vmatprep.subr.mxu0 %v1324_v5  ;;  %4900 = vmatprep.mubr.msk.f32.mxu1 %vm805_vm0, %v6514_v10  ;;  %v1430_v4 = vld [vmem:[#allocation8 + $0xf78] sm:$0xff]  ;;  %v1000_v5 = vld [vmem:[#allocation8 + $0x208] sm:$0xff] }
 0x1bd   : > { %4908 = vmatprep.mubr.msk.f32.mxu0 %vm805_vm0, %v6514_v10  ;;  %2078 = vmatpush1.msra.mxu1 %v1105_v6  ;;  %v1429_v6 = vld [vmem:[#allocation8 + $0xf70] sm:$0xff] }
 0x1be   : > { %2175 = vmatpush1.msra.mxu0 %v1323_v7  ;;  %1904 = vmatmul.mubr.f32.gmra.mxu1 %v6517_v13  ;;  %v999_v7 = vld [vmem:[#allocation8 + $0x200] sm:$0xff] }
 0x1bf   : > { %2017 = vmatmul.mubr.f32.gmra.mxu0 %v6517_v13  ;;  %2079 = vmatprep.subr.mxu1 %v1079_v9  ;;  %v1403_v9 = vld [vmem:[#allocation8 + $0xea0] sm:$0xff] }
 0x1c0   : > { %2176 = vmatprep.subr.mxu0 %v1297_v11  ;;  %2080 = vmatpush1.msra.mxu1 %v1078_v14  ;;  %v973_v11 = vld [vmem:[#allocation8 + $0x130] sm:$0xff]  ;;  %v1402_v14 = vld [vmem:[#allocation8 + $0xe98] sm:$0xff] }
 0x1c1   : > { %2177 = vmatpush1.msra.mxu0 %v1296_v15  ;;  %2081 = vmatprep.subr.mxu1 %v1052_v16  ;;  %v972_v15 = vld [vmem:[#allocation8 + $0x128] sm:$0xff] }
 0x1c2   : > { %2178 = vmatprep.subr.mxu0 %v1270_v17  ;;  %4901 = vmatprep.mubr.msk.f32.mxu1 %vm805_vm0, %v6523_v20  ;;  %v1376_v16 = vld [vmem:[#allocation8 + $0xdc8] sm:$0xff]  ;;  %v946_v17 = vld [vmem:[#allocation8 + $0x58] sm:$0xff] }
 0x1c3   : > { %4909 = vmatprep.mubr.msk.f32.mxu0 %vm805_vm0, %v6523_v20  ;;  %2082 = vmatpush1.msra.mxu1 %v1051_v18  ;;  %v1375_v18 = vld [vmem:[#allocation8 + $0xdc0] sm:$0xff] }
 0x1c4   : > { %2179 = vmatpush1.msra.mxu0 %v1269_v19  ;;  %1910 = vmatmul.mubr.f32.gmra.mxu1 %v6526_v23  ;;  %v945_v19 = vld [vmem:[#allocation8 + $0x50] sm:$0xff] }
 0x1c5   : > { %2023 = vmatmul.mubr.f32.gmra.mxu0 %v6526_v23  ;;  %2083 = vmatprep.subr.mxu1 %v1025_v21  ;;  %v1567_v21 = vld [vmem:[#allocation8 + $0x13c0] sm:$0xff] }
 0x1c6   : > { %2180 = vmatprep.subr.mxu0 %v1243_v22  ;;  %2084 = vmatpush1.msra.mxu1 %v1024_v24  ;;  %v1353_v22 = vld [vmem:[#allocation8 + $0xd10] sm:$0xff]  ;;  %v1566_v24 = vld [vmem:[#allocation8 + $0x13b8] sm:$0xff] }
 0x1c7   : > { %2181 = vmatpush1.msra.mxu0 %v1242_v25  ;;  %2085 = vmatprep.subr.mxu1 %v998_v27  ;;  %v1352_v25 = vld [vmem:[#allocation8 + $0xd08] sm:$0xff] }
 0x1c8   : > { %2182 = vmatprep.subr.mxu0 %v1216_v28  ;;  %4902 = vmatprep.mubr.msk.f32.mxu1 %vm805_vm0, %v6532_v32  ;;  %v1540_v27 = vld [vmem:[#allocation8 + $0x12e8] sm:$0xff]  ;;  %v1326_v28 = vld [vmem:[#allocation8 + $0xc38] sm:$0xff] }
 0x1c9   : > { %4910 = vmatprep.mubr.msk.f32.mxu0 %vm805_vm0, %v6532_v32  ;;  %2086 = vmatpush1.msra.mxu1 %v997_v30  ;;  %v1539_v30 = vld [vmem:[#allocation8 + $0x12e0] sm:$0xff] }
 0x1ca   : > { %2183 = vmatpush1.msra.mxu0 %v1215_v31  ;;  %1916 = vmatmul.mubr.f32.gmra.mxu1 %v6535_v35  ;;  %v1325_v31 = vld [vmem:[#allocation8 + $0xc30] sm:$0xff] }
 0x1cb   : > { %2029 = vmatmul.mubr.f32.gmra.mxu0 %v6535_v35  ;;  %2087 = vmatprep.subr.mxu1 %v971_v33  ;;  %v1513_v33 = vld [vmem:[#allocation8 + $0x1210] sm:$0xff] }
 0x1cc   : > { %2184 = vmatprep.subr.mxu0 %v1189_v34  ;;  %2088 = vmatpush1.msra.mxu1 %v970_v36  ;;  %v1299_v34 = vld [vmem:[#allocation8 + $0xb60] sm:$0xff]  ;;  %v1298_v36 = vld [vmem:[#allocation8 + $0xb58] sm:$0xff] }
 0x1cd   : > { %2185 = vmatpush1.msra.mxu0 %v1188_v37  ;;  %2089 = vmatprep.subr.mxu1 %v944_v38  ;;  %v1272_v37 = vld [vmem:[#allocation8 + $0xa88] sm:$0xff]  ;;  %v1485_v38 = vld [vmem:[#allocation8 + $0x1130] sm:$0xff] }
 0x1ce   : > { %2186 = vmatprep.subr.mxu0 %v1162_v39  ;;  %4903 = vmatprep.mubr.msk.f32.mxu1 %vm805_vm0, %v6541_v42  ;;  %v1271_v39 = vld [vmem:[#allocation8 + $0xa80] sm:$0xff] }
 0x1cf   : > { %4911 = vmatprep.mubr.msk.f32.mxu0 %vm805_vm0, %v6541_v42  ;;  %2090 = vmatpush1.msra.mxu1 %v943_v40  ;;  %v1459_v40 = vld [vmem:[#allocation8 + $0x1060] sm:$0xff] }
 0x1d0   : > { %2187 = vmatpush1.msra.mxu0 %v1161_v41  ;;  %1922 = vmatmul.mubr.f32.gmra.mxu1 %v6544_v45  ;;  %v1245_v41 = vld [vmem:[#allocation8 + $0x9b0] sm:$0xff] }
 0x1d1   : > { %2035 = vmatmul.mubr.f32.gmra.mxu0 %v6544_v45  ;;  %2107 = vmatprep.subr.mxu1 %v1565_v43  ;;  %v1244_v43 = vld [vmem:[#allocation8 + $0x9a8] sm:$0xff] }
 0x1d2   : > { %2188 = vmatprep.subr.mxu0 %v1135_v44  ;;  %2108 = vmatpush2.msra.mxu1 %v1564_v46  ;;  %v1432_v44 = vld [vmem:[#allocation8 + $0xf88] sm:$0xff]  ;;  %v1218_v46 = vld [vmem:[#allocation8 + $0x8d8] sm:$0xff] }
 0x1d3   : > { %2189 = vmatpush1.msra.mxu0 %v1134_v47  ;;  %2109 = vmatprep.subr.mxu1 %v1538_v48  ;;  %v1217_v47 = vld [vmem:[#allocation8 + $0x8d0] sm:$0xff] }
 0x1d4   : > { %2190 = vmatprep.subr.mxu0 %v1108_v49  ;;  %4904 = vmatprep.mubr.msk.f32.mxu1 %vm805_vm0, %v6553_v52  ;;  %v1405_v48 = vld [vmem:[#allocation8 + $0xeb0] sm:$0xff]  ;;  %v1191_v49 = vld [vmem:[#allocation8 + $0x800] sm:$0xff] }
 0x1d5   : > { %4912 = vmatprep.mubr.msk.f32.mxu0 %vm805_vm0, %v6553_v52  ;;  %2110 = vmatpush2.msra.mxu1 %v1537_v50  ;;  %v1190_v50 = vld [vmem:[#allocation8 + $0x7f8] sm:$0xff] }
 0x1d6   : > { %2191 = vmatpush1.msra.mxu0 %v1107_v51  ;;  %1928 = vmatmul.mubr.f32.gmra.mxu1 %v6556_v55  ;;  %v1378_v51 = vld [vmem:[#allocation8 + $0xdd8] sm:$0xff] }
 0x1d7   : > { %2041 = vmatmul.mubr.f32.gmra.mxu0 %v6556_v55  ;;  %2111 = vmatprep.subr.mxu1 %v1511_v53  ;;  %v1377_v53 = vld [vmem:[#allocation8 + $0xdd0] sm:$0xff] }
 0x1d8   : > { %2192 = vmatprep.subr.mxu0 %v1081_v54  ;;  %2112 = vmatpush2.msra.mxu1 %v1510_v56  ;;  %v1163_v54 = vld [vmem:[#allocation8 + $0x720] sm:$0xff] }
 0x1d9   : > { %2193 = vmatpush1.msra.mxu0 %v1080_v57  ;;  %2113 = vmatprep.subr.mxu1 %v1484_v58  ;;  %v1355_v56 = vld [vmem:[#allocation8 + $0xd20] sm:$0xff]  ;;  %v6660_v57 = vld [vmem:[%s6435_s26 + $0x8] sm:$0xff]  ;;  %v1354_v58 = vld [vmem:[#allocation8 + $0xd18] sm:$0xff] }
 0x1da   : > { %2194 = vmatprep.subr.mxu0 %v1054_v59  ;;  %4905 = vmatprep.mubr.msk.f32.mxu1 %vm805_vm0, %v6565_v62  ;;  %v6666_v59 = vld [vmem:[%s6435_s26] sm:$0xff] }
 0x1db   : > { %4913 = vmatprep.mubr.msk.f32.mxu0 %vm805_vm0, %v6565_v62  ;;  %2114 = vmatpush2.msra.mxu1 %v1483_v60  ;;  %v1110_v60 = vld [vmem:[#allocation8 + $0x578] sm:$0xff] }
 0x1dc   : > { %2195 = vmatpush1.msra.mxu0 %v1053_v61  ;;  %1934 = vmatmul.mubr.f32.gmra.mxu1 %v6568_v1  ;;  %v1328_v61 = vld [vmem:[#allocation8 + $0xc48] sm:$0xff] }
 0x1dd   : > { %2047 = vmatmul.mubr.f32.gmra.mxu0 %v6568_v1  ;;  %2115 = vmatprep.subr.mxu1 %v1457_v63  ;;  %v1327_v63 = vld [vmem:[#allocation8 + $0xc40] sm:$0xff] }
 0x1de   : > { %2196 = vmatprep.subr.mxu0 %v1027_v0  ;;  %2116 = vmatpush2.msra.mxu1 %v1456_v2  ;;  %v1083_v0 = vld [vmem:[#allocation8 + $0x4a0] sm:$0xff]  ;;  %v1301_v2 = vld [vmem:[#allocation8 + $0xb70] sm:$0xff] }
 0x1df   : > { %2197 = vmatpush1.msra.mxu0 %v1026_v3  ;;  %2117 = vmatprep.subr.mxu1 %v1430_v4  ;;  %v1300_v3 = vld [vmem:[#allocation8 + $0xb68] sm:$0xff] }
 0x1e0   : > { %2198 = vmatprep.subr.mxu0 %v1000_v5  ;;  %4906 = vmatprep.mubr.msk.f32.mxu1 %vm805_vm0, %v6577_v8  ;;  %v1056_v4 = vld [vmem:[#allocation8 + $0x3c8] sm:$0xff]  ;;  %v1274_v5 = vld [vmem:[#allocation8 + $0xa98] sm:$0xff] }
 0x1e1   : > { %4914 = vmatprep.mubr.msk.f32.mxu0 %vm805_vm0, %v6577_v8  ;;  %2118 = vmatpush2.msra.mxu1 %v1429_v6  ;;  %v1055_v6 = vld [vmem:[#allocation8 + $0x3c0] sm:$0xff] }
 0x1e2   : > { %2199 = vmatpush1.msra.mxu0 %v999_v7  ;;  %1940 = vmatmul.mubr.f32.gmra.mxu1 %v6580_v12  ;;  %v1273_v7 = vld [vmem:[#allocation8 + $0xa90] sm:$0xff] }
 0x1e3   : > { %2053 = vmatmul.mubr.f32.gmra.mxu0 %v6580_v12  ;;  %2119 = vmatprep.subr.mxu1 %v1403_v9  ;;  %v1029_v9 = vld [vmem:[#allocation8 + $0x2f0] sm:$0xff] }
 0x1e4   : > { %2200 = vmatprep.subr.mxu0 %v973_v11  ;;  %2120 = vmatpush2.msra.mxu1 %v1402_v14  ;;  %v1247_v11 = vld [vmem:[#allocation8 + $0x9c0] sm:$0xff]  ;;  %v1246_v14 = vld [vmem:[#allocation8 + $0x9b8] sm:$0xff] }
 0x1e5   : > { %2201 = vmatpush1.msra.mxu0 %v972_v15  ;;  %2121 = vmatprep.subr.mxu1 %v1376_v16  ;;  %v1220_v15 = vld [vmem:[#allocation8 + $0x8e8] sm:$0xff]  ;;  %v1001_v16 = vld [vmem:[#allocation8 + $0x210] sm:$0xff] }
 0x1e6   : > { %2202 = vmatprep.subr.mxu0 %v946_v17  ;;  %2122 = vmatpush2.msra.mxu1 %v1375_v18  ;;  %v1219_v17 = vld [vmem:[#allocation8 + $0x8e0] sm:$0xff] }
 0x1e7   : > { %4915 = vmatprep.mubr.msk.f32.mxu1 %vm805_vm0, %v6490_v26  ;;  %2203 = vmatpush1.msra.mxu0 %v945_v19  ;;  %v1512_v26 = vld [vmem:[#allocation8 + $0x1208] sm:$0xff]  ;;  %v975_v18 = vld [vmem:[#allocation8 + $0x140] sm:$0xff]  ;;  %v1193_v19 = vld [vmem:[#allocation8 + $0x810] sm:$0xff] }
 0x1e8   : > { %2124 = vmatmul.mubr.f32.vlgmr.msra.gmra.mxu1 %v6493_v29  ;;  %2220 = vmatprep.subr.mxu0 %v1567_v21  ;;  %v1486_v29 = vld [vmem:[#allocation8 + $0x1138] sm:$0xff]  ;;  %v1192_v21 = vld [vmem:[#allocation8 + $0x808] sm:$0xff] }
 0x1e9   : > { %2285 = vmatprep.subr.mxu1 %v1353_v22  ;;  %2221 = vmatpush2.msra.mxu0 %v1566_v24  ;;  %v1166_v22 = vld [vmem:[#allocation8 + $0x738] sm:$0xff]  ;;  %v947_v24 = vld [vmem:[#allocation8 + $0x60] sm:$0xff] }
 0x1ea   : > { %2286 = vmatpush1.msra.mxu1 %v1352_v25  ;;  %2222 = vmatprep.subr.mxu0 %v1540_v27  ;;  %v1165_v25 = vld [vmem:[#allocation8 + $0x730] sm:$0xff] }
 0x1eb   : > { %2287 = vmatprep.subr.mxu1 %v1326_v28  ;;  %4916 = vmatprep.mubr.msk.f32.mxu1 %vm805_vm0, %v6514_v10  ;;  %v1458_v10 = vld [vmem:[#allocation8 + $0x1058] sm:$0xff]  ;;  %v1569_v27 = vld [vmem:[#allocation8 + $0x13d0] sm:$0xff]  ;;  %v1139_v28 = vld [vmem:[#allocation8 + $0x660] sm:$0xff] }
 0x1ec   : > { %2223 = vmatpush2.msra.mxu0 %v1539_v30  ;;  %2288 = vmatpush1.msra.mxu1 %v1325_v31  ;;  %v1138_v30 = vld [vmem:[#allocation8 + $0x658] sm:$0xff] }
 0x1ed   : > { %2224 = vmatprep.subr.mxu0 %v1513_v33  ;;  %2130 = vmatmul.mubr.f32.gmra.mxu1 %v6517_v13  ;;  %v1431_v13 = vld [vmem:[#allocation8 + $0xf80] sm:$0xff]  ;;  %v1542_v31 = vld [vmem:[#allocation8 + $0x12f8] sm:$0xff]  ;;  %v1541_v33 = vld [vmem:[#allocation8 + $0x12f0] sm:$0xff] }
 0x1ee   : > { %2289 = vmatprep.subr.mxu1 %v1299_v34  ;;  %2225 = vmatpush2.msra.mxu0 %v1512_v26  ;;  %v1111_v34 = vld [vmem:[#allocation8 + $0x580] sm:$0xff]  ;;  %v6679_v26 = vld [vmem:[%s6435_s26 + $0x18] sm:$0xff] }
 0x1ef   : > { %2290 = vmatpush1.msra.mxu1 %v1298_v36  ;;  %2226 = vmatprep.subr.mxu0 %v1486_v29  ;;  %v1515_v36 = vld [vmem:[#allocation8 + $0x1220] sm:$0xff]  ;;  %v1085_v29 = vld [vmem:[#allocation8 + $0x4b0] sm:$0xff] }
 0x1f0   : > { %2291 = vmatprep.subr.mxu1 %v1272_v37  ;;  %4917 = vmatprep.mubr.msk.f32.mxu1 %vm805_vm0, %v6523_v20  ;;  %v1404_v20 = vld [vmem:[#allocation8 + $0xea8] sm:$0xff]  ;;  %v6684_v37 = vld [vmem:[%s6435_s26 + $0x10] sm:$0xff] }
 0x1f1   : > { %2227 = vmatpush2.msra.mxu0 %v1485_v38  ;;  %2292 = vmatpush1.msra.mxu1 %v1271_v39  ;;  %v1514_v38 = vld [vmem:[#allocation8 + $0x1218] sm:$0xff]  ;;  %v1084_v39 = vld [vmem:[#allocation8 + $0x4a8] sm:$0xff] }
 0x1f2   : > { %2228 = vmatprep.subr.mxu0 %v1459_v40  ;;  %2136 = vmatmul.mubr.f32.gmra.mxu1 %v6526_v23  ;;  %v1164_v23 = vld [vmem:[#allocation8 + $0x728] sm:$0xff] }
 0x1f3   : > { %2293 = vmatprep.subr.mxu1 %v1245_v41  ;;  %2229 = vmatpush2.msra.mxu0 %v1458_v10  ;;  %v1488_v40 = vld [vmem:[#allocation8 + $0x1148] sm:$0xff]  ;;  %v1058_v41 = vld [vmem:[#allocation8 + $0x3d8] sm:$0xff]  ;;  %v1487_v10 = vld [vmem:[#allocation8 + $0x1140] sm:$0xff] }
 0x1f4   : > { %2294 = vmatpush1.msra.mxu1 %v1244_v43  ;;  %2230 = vmatprep.subr.mxu0 %v1432_v44  ;;  %v1057_v43 = vld [vmem:[#allocation8 + $0x3d0] sm:$0xff]  ;;  %v6688_v44 = vld [vmem:[%s6435_s26 + $0x28] sm:$0xff] }
 0x1f5   : > { %2295 = vmatprep.subr.mxu1 %v1218_v46  ;;  %4918 = vmatprep.mubr.msk.f32.mxu1 %vm805_vm0, %v6532_v32  ;;  %v1137_v32 = vld [vmem:[#allocation8 + $0x650] sm:$0xff] }
 0x1f6   : > { %2231 = vmatpush2.msra.mxu0 %v1431_v13  ;;  %2296 = vmatpush1.msra.mxu1 %v1217_v47  ;;  %v1461_v46 = vld [vmem:[#allocation8 + $0x1070] sm:$0xff]  ;;  %v1031_v13 = vld [vmem:[#allocation8 + $0x300] sm:$0xff] }
 0x1f7   : > { %2232 = vmatprep.subr.mxu0 %v1405_v48  ;;  %2142 = vmatmul.mubr.f32.gmra.mxu1 %v6535_v35  ;;  %v1136_v35 = vld [vmem:[#allocation8 + $0x648] sm:$0xff]  ;;  %v6693_v47 = vld [vmem:[%s6435_s26 + $0x20] sm:$0xff] }
 0x1f8   : > { %2297 = vmatprep.subr.mxu1 %v1191_v49  ;;  %2233 = vmatpush2.msra.mxu0 %v1404_v20  ;;  %v1460_v48 = vld [vmem:[#allocation8 + $0x1068] sm:$0xff]  ;;  %v1030_v49 = vld [vmem:[#allocation8 + $0x2f8] sm:$0xff] }
 0x1f9   : > { %2298 = vmatpush1.msra.mxu1 %v1190_v50  ;;  %2234 = vmatprep.subr.mxu0 %v1378_v51  ;;  %v1434_v20 = vld [vmem:[#allocation8 + $0xf98] sm:$0xff]  ;;  %v1004_v50 = vld [vmem:[#allocation8 + $0x228] sm:$0xff]  ;;  %v1433_v51 = vld [vmem:[#allocation8 + $0xf90] sm:$0xff] }
 0x1fa   : > { %2299 = vmatprep.subr.mxu1 %v1164_v23  ;;  %4919 = vmatprep.mubr.msk.f32.mxu1 %vm805_vm0, %v6541_v42  ;;  %v1109_v42 = vld [vmem:[#allocation8 + $0x570] sm:$0xff]  ;;  %v1003_v23 = vld [vmem:[#allocation8 + $0x220] sm:$0xff] }
 0x1fb   : > { %2235 = vmatpush2.msra.mxu0 %v1377_v53  ;;  %4923 = vmatprep.mubr.msk.f32.mxu0 %vm805_vm0, %v6660_v57  ;;  %v6697_v53 = vld [vmem:[%s6435_s26 + $0x38] sm:$0xff] }
 0x1fc   : > { %2300 = vmatpush1.msra.mxu1 %v1163_v54  ;;  %2237 = vmatmul.mubr.f32.vlgmr.msra.gmra.mxu0 %v6666_v59  ;;  %v1407_v54 = vld [vmem:[#allocation8 + $0xec0] sm:$0xff] }
 0x1fd   : > { %2148 = vmatmul.mubr.f32.gmra.mxu1 %v6544_v45  ;;  %2301 = vmatprep.subr.mxu1 %v1137_v32  ;;  %v1082_v45 = vld [vmem:[#allocation8 + $0x498] sm:$0xff]  ;;  %v977_v32 = vld [vmem:[#allocation8 + $0x150] sm:$0xff] }
 0x1fe   : > { %2398 = vmatprep.subr.mxu0 %v1355_v56  ;;  %2302 = vmatpush1.msra.mxu1 %v1136_v35  ;;  %v6702_v56 = vld [vmem:[%s6435_s26 + $0x30] sm:$0xff]  ;;  %v1406_v35 = vld [vmem:[#allocation8 + $0xeb8] sm:$0xff] }
 0x1ff   : > { %2399 = vmatpush1.msra.mxu0 %v1354_v58  ;;  %2303 = vmatprep.subr.mxu1 %v1110_v60  ;;  %v976_v58 = vld [vmem:[#allocation8 + $0x148] sm:$0xff] }
 0x200   : > { %2400 = vmatprep.subr.mxu0 %v1328_v61  ;;  %4920 = vmatprep.mubr.msk.f32.mxu1 %vm805_vm0, %v6553_v52  ;;  %v1028_v52 = vld [vmem:[#allocation8 + $0x2e8] sm:$0xff]  ;;  %v950_v61 = vld [vmem:[#allocation8 + $0x78] sm:$0xff] }
 0x201   : > { %2304 = vmatpush1.msra.mxu1 %v1109_v42  ;;  %2401 = vmatpush1.msra.mxu0 %v1327_v63  ;;  %v1380_v60 = vld [vmem:[#allocation8 + $0xde8] sm:$0xff]  ;;  %v1379_v42 = vld [vmem:[#allocation8 + $0xde0] sm:$0xff] }
 0x202   : > { %2154 = vmatmul.mubr.f32.gmra.mxu1 %v6556_v55  ;;  %2305 = vmatprep.subr.mxu1 %v1083_v0  ;;  %v1002_v55 = vld [vmem:[#allocation8 + $0x218] sm:$0xff]  ;;  %v6706_v63 = vld [vmem:[%s6435_s26 + $0x48] sm:$0xff]  ;;  %v949_v0 = vld [vmem:[#allocation8 + $0x70] sm:$0xff] }
 0x203   : > { %2402 = vmatprep.subr.mxu0 %v1301_v2  ;;  %2306 = vmatpush1.msra.mxu1 %v1082_v45  ;;  %v6711_v2 = vld [vmem:[%s6435_s26 + $0x40] sm:$0xff] }
 0x204   : > { %2403 = vmatpush1.msra.mxu0 %v1300_v3  ;;  %2307 = vmatprep.subr.mxu1 %v1056_v4  ;;  %v1571_v45 = vld [vmem:[#allocation8 + $0x13e0] sm:$0xff]  ;;  %v1357_v3 = vld [vmem:[#allocation8 + $0xd30] sm:$0xff] }
 0x205   : > { %2404 = vmatprep.subr.mxu0 %v1274_v5  ;;  %4921 = vmatprep.mubr.msk.f32.mxu1 %vm805_vm0, %v6565_v62  ;;  %v974_v62 = vld [vmem:[#allocation8 + $0x138] sm:$0xff] }
 0x206   : > { %2308 = vmatpush1.msra.mxu1 %v1055_v6  ;;  %2405 = vmatpush1.msra.mxu0 %v1273_v7  ;;  %v1570_v5 = vld [vmem:[#allocation8 + $0x13d8] sm:$0xff]  ;;  %v1356_v6 = vld [vmem:[#allocation8 + $0xd28] sm:$0xff] }
 0x207   : > { %2160 = vmatmul.mubr.f32.gmra.mxu1 %v6568_v1  ;;  %2309 = vmatprep.subr.mxu1 %v1029_v9  ;;  %v948_v1 = vld [vmem:[#allocation8 + $0x68] sm:$0xff]  ;;  %v6714_v4 = vpop.f32.mrf.mxu0  ;;  %v1330_v9 = vld [vmem:[#allocation8 + $0xc58] sm:$0xff] }
 0x208   : > { %2406 = vmatprep.subr.mxu0 %v1247_v11  ;;  %2310 = vmatpush1.msra.mxu1 %v1028_v52  ;;  %7898 = vst [vmem:[#allocation41_spill] sm:$0xff] %v6714_v4  ;;  %v1544_v7 = vld [vmem:[#allocation8 + $0x1308] sm:$0xff]  ;;  %v1543_v11 = vld [vmem:[#allocation8 + $0x1300] sm:$0xff]  ;;  %v3479_v4 = vld [vmem:[%s7909_s4 + $0x148] sm:$0xff] }
 0x209   : > { %2407 = vmatpush1.msra.mxu0 %v1246_v14  ;;  %2311 = vmatprep.subr.mxu1 %v1002_v55  ;;  %v6719_v52 = vpop.f32.mrf.mxu0  ;;  %v6722_v14 = vld [vmem:[%s6435_s26 + $0x58] sm:$0xff]  ;;  %v1329_v55 = vld [vmem:[#allocation8 + $0xc50] sm:$0xff] }
 0x20a   : > { %2408 = vmatprep.subr.mxu0 %v1220_v15  ;;  %4922 = vmatprep.mubr.msk.f32.mxu1 %vm805_vm0, %v6577_v8  ;;  %v1568_v8 = vld [vmem:[#allocation8 + $0x13c8] sm:$0xff]  ;;  %7899 = vst [vmem:[#allocation42_spill] sm:$0xff] %v6719_v52  ;;  %v1517_v15 = vld [vmem:[#allocation8 + $0x1230] sm:$0xff] }
 0x20b   : > { %2312 = vmatpush1.msra.mxu1 %v1001_v16  ;;  %2409 = vmatpush1.msra.mxu0 %v1219_v17  ;;  %v6727_v16 = vld [vmem:[%s6435_s26 + $0x50] sm:$0xff]  ;;  %v1303_v17 = vld [vmem:[#allocation8 + $0xb80] sm:$0xff] }
 0x20c   : > { %2166 = vmatmul.mubr.f32.gmra.mxu1 %v6580_v12  ;;  %2313 = vmatprep.subr.mxu1 %v975_v18  ;;  %v1112_v12 = vld [vmem:[#allocation8 + $0x588] sm:$0xff] }
 0x20d   : > { %2410 = vmatprep.subr.mxu0 %v1193_v19  ;;  %2314 = vmatpush1.msra.mxu1 %v974_v62  ;;  %v1516_v19 = vld [vmem:[#allocation8 + $0x1228] sm:$0xff]  ;;  %v1302_v62 = vld [vmem:[#allocation8 + $0xb78] sm:$0xff] }
 0x20e   : > { %2411 = vmatpush1.msra.mxu0 %v1192_v21  ;;  %2315 = vmatprep.subr.mxu1 %v948_v1  ;;  %v1490_v21 = vld [vmem:[#allocation8 + $0x1158] sm:$0xff] }
 0x20f   : > { %2412 = vmatprep.subr.mxu0 %v1166_v22  ;;  %2316 = vmatpush1.msra.mxu1 %v947_v24  ;;  %v1276_v22 = vld [vmem:[#allocation8 + $0xaa8] sm:$0xff]  ;;  %v1489_v24 = vld [vmem:[#allocation8 + $0x1150] sm:$0xff] }
 0x210   : > { %2413 = vmatpush1.msra.mxu0 %v1165_v25  ;;  %2333 = vmatprep.subr.mxu1 %v1569_v27  ;;  %v6738_v25 = vld [vmem:[%s6435_s26 + $0x68] sm:$0xff]  ;;  %v1275_v27 = vld [vmem:[#allocation8 + $0xaa0] sm:$0xff] }
 0x211   : > { %2414 = vmatprep.subr.mxu0 %v1139_v28  ;;  %2334 = vmatpush2.msra.mxu1 %v1568_v8  ;;  %v1463_v28 = vld [vmem:[#allocation8 + $0x1080] sm:$0xff] }
 0x212   : > { %2415 = vmatpush1.msra.mxu0 %v1138_v30  ;;  %4924 = vmatprep.mubr.msk.f32.mxu0 %vm805_vm0, %v6679_v26  ;;  %v6745_v30 = vld [vmem:[%s6435_s26 + $0x60] sm:$0xff] }
 0x213   : > { %2335 = vmatprep.subr.mxu1 %v1542_v31  ;;  %2416 = vmatprep.subr.mxu0 %v1112_v12  ;;  %v1249_v31 = vld [vmem:[#allocation8 + $0x9d0] sm:$0xff]  ;;  %v1462_v12 = vld [vmem:[#allocation8 + $0x1078] sm:$0xff] }
 0x214   : > { %2243 = vmatmul.mubr.f32.gmra.mxu0 %v6684_v37  ;;  %2336 = vmatpush2.msra.mxu1 %v1541_v33  ;;  %v1248_v33 = vld [vmem:[#allocation8 + $0x9c8] sm:$0xff] }
 0x215   : > { %2417 = vmatpush1.msra.mxu0 %v1111_v34  ;;  %2337 = vmatprep.subr.mxu1 %v1515_v36  ;;  %v1436_v36 = vld [vmem:[#allocation8 + $0xfa8] sm:$0xff] }
 0x216   : > { %2418 = vmatprep.subr.mxu0 %v1085_v29  ;;  %2338 = vmatpush2.msra.mxu1 %v1514_v38  ;;  %v1222_v29 = vld [vmem:[#allocation8 + $0x8f8] sm:$0xff]  ;;  %v1435_v38 = vld [vmem:[#allocation8 + $0xfa0] sm:$0xff] }
 0x217   : > { %2419 = vmatpush1.msra.mxu0 %v1084_v39  ;;  %4925 = vmatprep.mubr.msk.f32.mxu0 %vm805_vm0, %v6688_v44 }
 0x218   : > { %2339 = vmatprep.subr.mxu1 %v1488_v40  ;;  %2420 = vmatprep.subr.mxu0 %v1058_v41  ;;  %v6756_v40 = vld [vmem:[%s6435_s26 + $0x78] sm:$0xff]  ;;  %v1221_v41 = vld [vmem:[#allocation8 + $0x8f0] sm:$0xff] }
 0x219   : > { %2249 = vmatmul.mubr.f32.gmra.mxu0 %v6693_v47  ;;  %2340 = vmatpush2.msra.mxu1 %v1487_v10  ;;  %v1409_v10 = vld [vmem:[#allocation8 + $0xed0] sm:$0xff] }
 0x21a   : > { %2421 = vmatpush1.msra.mxu0 %v1057_v43  ;;  %2341 = vmatprep.subr.mxu1 %v1461_v46  ;;  %v6761_v43 = vld [vmem:[%s6435_s26 + $0x70] sm:$0xff]  ;;  %v1195_v46 = vld [vmem:[#allocation8 + $0x820] sm:$0xff] }
 0x21b   : > { %2422 = vmatprep.subr.mxu0 %v1031_v13  ;;  %2342 = vmatpush2.msra.mxu1 %v1460_v48 }
 0x21c   : > { %2423 = vmatpush1.msra.mxu0 %v1030_v49  ;;  %4926 = vmatprep.mubr.msk.f32.mxu0 %vm805_vm0, %v6697_v53  ;;  %v1408_v49 = vld [vmem:[#allocation8 + $0xec8] sm:$0xff] }
 0x21d   : > { %2343 = vmatprep.subr.mxu1 %v1434_v20  ;;  %2424 = vmatprep.subr.mxu0 %v1004_v50  ;;  %v1194_v20 = vld [vmem:[#allocation8 + $0x818] sm:$0xff] }
 0x21e   : > { %2255 = vmatmul.mubr.f32.gmra.mxu0 %v6702_v56  ;;  %2344 = vmatpush2.msra.mxu1 %v1433_v51  ;;  %v1382_v50 = vld [vmem:[#allocation8 + $0xdf8] sm:$0xff]  ;;  %v1168_v51 = vld [vmem:[#allocation8 + $0x748] sm:$0xff] }
 0x21f   : > { %2425 = vmatpush1.msra.mxu0 %v1003_v23  ;;  %2345 = vmatprep.subr.mxu1 %v1407_v54  ;;  %v1381_v23 = vld [vmem:[#allocation8 + $0xdf0] sm:$0xff]  ;;  %v1167_v54 = vld [vmem:[#allocation8 + $0x740] sm:$0xff] }
 0x220   : > { %2426 = vmatprep.subr.mxu0 %v977_v32  ;;  %2346 = vmatpush2.msra.mxu1 %v1406_v35 }
 0x221   : > { %2427 = vmatpush1.msra.mxu0 %v976_v58  ;;  %4927 = vmatprep.mubr.msk.f32.mxu0 %vm805_vm0, %v6706_v63  ;;  %v1141_v58 = vld [vmem:[#allocation8 + $0x670] sm:$0xff] }
 0x222   : > { %2347 = vmatprep.subr.mxu1 %v1380_v60  ;;  %2428 = vmatprep.subr.mxu0 %v950_v61  ;;  %v1359_v60 = vld [vmem:[#allocation8 + $0xd40] sm:$0xff] }
 0x223   : > { %2261 = vmatmul.mubr.f32.gmra.mxu0 %v6711_v2  ;;  %2348 = vmatpush2.msra.mxu1 %v1379_v42  ;;  %v1140_v42 = vld [vmem:[#allocation8 + $0x668] sm:$0xff] }
 0x224   : > { %4931 = vmatprep.mubr.msk.f32.mxu1 %vm805_vm0, %v6660_v57  ;;  %2429 = vmatpush1.msra.mxu0 %v949_v0  ;;  %v1673_v48 = vpop.f32.mrf.mxu1  ;;  %v1358_v0 = vld [vmem:[#allocation8 + $0xd38] sm:$0xff] }
 0x225   : > { %2350 = vmatmul.mubr.f32.vlgmr.msra.gmra.mxu1 %v6666_v59  ;;  %2446 = vmatprep.subr.mxu0 %v1571_v45 }
 0x226   : > { %2511 = vmatprep.subr.mxu1 %v1357_v3  ;;  %2447 = vmatpush2.msra.mxu0 %v1570_v5  ;;  %v1675_v32 = vpop.f32.mrf.mxu1  ;;  %v1114_v5 = vld [vmem:[#allocation8 + $0x598] sm:$0xff] }
 0x227   : > { %2512 = vmatpush1.msra.mxu1 %v1356_v6  ;;  %4928 = vmatprep.mubr.msk.f32.mxu0 %vm805_vm0, %v6722_v14  ;;  %v3181_v45 = vmax.f32 %v1673_v48, %v1675_v32  ;;  %v1332_v6 = vld [vmem:[#allocation8 + $0xc68] sm:$0xff]  ;;  %v1223_v48 = vld [vmem:[#allocation8 + $0x900] sm:$0xff]  ;;  %v1170_v32 = vld [vmem:[#allocation8 + $0x758] sm:$0xff] }
 0x228   : > { %2448 = vmatprep.subr.mxu0 %v1544_v7  ;;  %2513 = vmatprep.subr.mxu1 %v1330_v9  ;;  %v1113_v7 = vld [vmem:[#allocation8 + $0x590] sm:$0xff] }
 0x229   : > { %2267 = vmatmul.mubr.f32.gmra.mxu0 %v6727_v16  ;;  %v6730_v18 = vpop.f32.mrf.mxu0  ;;  %4932 = vmatprep.mubr.msk.f32.mxu1 %vm805_vm0, %v6679_v26 }
 0x22a   : > { %7900 = vst [vmem:[#allocation43_spill] sm:$0xff] %v6730_v18  ;;  %2449 = vmatpush2.msra.mxu0 %v1543_v11  ;;  %2514 = vmatpush1.msra.mxu1 %v1329_v55  ;;  %v1331_v11 = vld [vmem:[#allocation8 + $0xc60] sm:$0xff] }
 0x22b   : > { %2450 = vmatprep.subr.mxu0 %v1517_v15  ;;  %v6734_v1 = vpop.f32.mrf.mxu0  ;;  %2356 = vmatmul.mubr.f32.gmra.mxu1 %v6684_v37  ;;  %v1087_v15 = vld [vmem:[#allocation8 + $0x4c0] sm:$0xff] }
 0x22c   : > { %7901 = vst [vmem:[#allocation44_spill] sm:$0xff] %v6734_v1  ;;  %2515 = vmatprep.subr.mxu1 %v1303_v17  ;;  %2451 = vmatpush2.msra.mxu0 %v1516_v19  ;;  %v1305_v17 = vld [vmem:[#allocation8 + $0xb90] sm:$0xff]  ;;  %v1086_v19 = vld [vmem:[#allocation8 + $0x4b8] sm:$0xff]  ;;  %v3375_v1 = vlaneseq }
 0x22d   : > { %2516 = vmatpush1.msra.mxu1 %v1302_v62  ;;  %4929 = vmatprep.mubr.msk.f32.mxu0 %vm805_vm0, %v6738_v25  ;;  %v1304_v62 = vld [vmem:[#allocation8 + $0xb88] sm:$0xff] }
 0x22e   : > { %2452 = vmatprep.subr.mxu0 %v1490_v21  ;;  %v6742_v8 = vpop.f32.mrf.mxu0  ;;  %2517 = vmatprep.subr.mxu1 %v1276_v22  ;;  %v1060_v22 = vld [vmem:[#allocation8 + $0x3e8] sm:$0xff] }
 0x22f   : > { %7902 = vst [vmem:[#allocation45_spill] sm:$0xff] %v6742_v8  ;;  %2273 = vmatmul.mubr.f32.gmra.mxu0 %v6745_v30  ;;  %4933 = vmatprep.mubr.msk.f32.mxu1 %vm805_vm0, %v6688_v44  ;;  %v3481_v8 = vld [vmem:[%s7909_s4 + $0x158] sm:$0xff] }
 0x230   : > { %2453 = vmatpush2.msra.mxu0 %v1489_v24  ;;  %v6750_v34 = vpop.f32.mrf.mxu0  ;;  %2518 = vmatpush1.msra.mxu1 %v1275_v27  ;;  %v1278_v24 = vld [vmem:[#allocation8 + $0xab8] sm:$0xff]  ;;  %v1059_v27 = vld [vmem:[#allocation8 + $0x3e0] sm:$0xff] }
 0x231   : > { %7903 = vst [vmem:[#allocation46_spill] sm:$0xff] %v6750_v34  ;;  %2454 = vmatprep.subr.mxu0 %v1463_v28  ;;  %2362 = vmatmul.mubr.f32.gmra.mxu1 %v6693_v47  ;;  %v1277_v28 = vld [vmem:[#allocation8 + $0xab0] sm:$0xff] }
 0x232   : > { %2519 = vmatprep.subr.mxu1 %v1249_v31  ;;  %2455 = vmatpush2.msra.mxu0 %v1462_v12  ;;  %v1033_v12 = vld [vmem:[#allocation8 + $0x310] sm:$0xff] }
 0x233   : > { %2520 = vmatpush1.msra.mxu1 %v1248_v33  ;;  %v6753_v39 = vpop.f32.mrf.mxu0  ;;  %4930 = vmatprep.mubr.msk.f32.mxu0 %vm805_vm0, %v6756_v40  ;;  %v1251_v33 = vld [vmem:[#allocation8 + $0x9e0] sm:$0xff]  ;;  %v3482_v34 = vld [vmem:[%s7909_s4 + $0x160] sm:$0xff] }
 0x234   : > { %7904 = vst [vmem:[#allocation47_spill] sm:$0xff] %v6753_v39  ;;  %2456 = vmatprep.subr.mxu0 %v1436_v36  ;;  %2521 = vmatprep.subr.mxu1 %v1222_v29  ;;  %v1032_v36 = vld [vmem:[#allocation8 + $0x308] sm:$0xff]  ;;  %v1250_v29 = vld [vmem:[#allocation8 + $0x9d8] sm:$0xff] }
 0x235   : > { %2279 = vmatmul.mubr.f32.gmra.mxu0 %v6761_v43  ;;  %v6764_v13 = vpop.f32.mrf.mxu0  ;;  %4934 = vmatprep.mubr.msk.f32.mxu1 %vm805_vm0, %v6697_v53 }
 0x236   : > { %7905 = vst [vmem:[#allocation48_spill] sm:$0xff] %v6764_v13  ;;  %2457 = vmatpush2.msra.mxu0 %v1435_v38  ;;  %2522 = vmatpush1.msra.mxu1 %v1221_v41  ;;  %v1006_v38 = vld [vmem:[#allocation8 + $0x238] sm:$0xff]  ;;  %v1224_v41 = vld [vmem:[#allocation8 + $0x908] sm:$0xff] }
 0x237   : > { %2458 = vmatprep.subr.mxu0 %v1409_v10  ;;  %2368 = vmatmul.mubr.f32.gmra.mxu1 %v6702_v56 }
 0x238   : > { %2523 = vmatprep.subr.mxu1 %v1195_v46  ;;  %2459 = vmatpush2.msra.mxu0 %v1408_v49  ;;  %v1005_v46 = vld [vmem:[#allocation8 + $0x230] sm:$0xff]  ;;  %v979_v49 = vld [vmem:[#allocation8 + $0x160] sm:$0xff] }
 0x239   : > { %2524 = vmatpush1.msra.mxu1 %v1194_v20  ;;  %v1786_v35 = vpop.f32.mrf.mxu0  ;;  %2460 = vmatprep.subr.mxu0 %v1382_v50  ;;  %v1197_v20 = vld [vmem:[#allocation8 + $0x830] sm:$0xff]  ;;  %v978_v50 = vld [vmem:[#allocation8 + $0x158] sm:$0xff] }
 0x23a   : > { %2525 = vmatprep.subr.mxu1 %v1168_v51  ;;  %4935 = vmatprep.mubr.msk.f32.mxu1 %vm805_vm0, %v6706_v63  ;;  %v1196_v51 = vld [vmem:[#allocation8 + $0x828] sm:$0xff] }
 0x23b   : > { %2461 = vmatpush2.msra.mxu0 %v1381_v23  ;;  %v1788_v61 = vpop.f32.mrf.mxu0  ;;  %4939 = vmatprep.mubr.msk.f32.mxu0 %vm805_vm0, %v6660_v57 }
 0x23c   : > { %2526 = vmatpush1.msra.mxu1 %v1167_v54  ;;  %v3189_v3 = vmax.f32 %v1786_v35, %v1788_v61  ;;  %2463 = vmatmul.mubr.f32.vlgmr.msra.gmra.mxu0 %v6666_v59  ;;  %v952_v54 = vld [vmem:[#allocation8 + $0x88] sm:$0xff]  ;;  %v951_v35 = vld [vmem:[#allocation8 + $0x80] sm:$0xff] }
 0x23d   : > { %2374 = vmatmul.mubr.f32.gmra.mxu1 %v6711_v2  ;;  %2527 = vmatprep.subr.mxu1 %v1141_v58  ;;  %v1169_v58 = vld [vmem:[#allocation8 + $0x750] sm:$0xff]  ;;  %v1143_v61 = vld [vmem:[#allocation8 + $0x680] sm:$0xff] }
 0x23e   : > { %2624 = vmatprep.subr.mxu0 %v1359_v60  ;;  %v6775_v9 = vmax.f32 %v3181_v45, %v3189_v3  ;;  %2528 = vmatpush1.msra.mxu1 %v1140_v42  ;;  %v1573_v60 = vld [vmem:[#allocation8 + $0x13f0] sm:$0xff]  ;;  %v1572_v42 = vld [vmem:[#allocation8 + $0x13e8] sm:$0xff] }
 0x23f   : > { %2625 = vmatpush1.msra.mxu0 %v1358_v0  ;;  %v6777_v55 = vpop.f32.mrf.mxu1  ;;  %2529 = vmatprep.subr.mxu1 %v1114_v5  ;;  %v1142_v0 = vld [vmem:[#allocation8 + $0x678] sm:$0xff] }
 0x240   : > { %2626 = vmatprep.subr.mxu0 %v1332_v6  ;;  %4936 = vmatprep.mubr.msk.f32.mxu1 %vm805_vm0, %v6722_v14  ;;  %v1546_v5 = vld [vmem:[#allocation8 + $0x1318] sm:$0xff] }
 0x241   : > { %2530 = vmatpush1.msra.mxu1 %v1113_v7  ;;  %v6781_v21 = vpop.f32.mrf.mxu1  ;;  %2627 = vmatpush1.msra.mxu0 %v1331_v11  ;;  %v1116_v7 = vld [vmem:[#allocation8 + $0x5a8] sm:$0xff] }
 0x242   : > { %2380 = vmatmul.mubr.f32.gmra.mxu1 %v6727_v16  ;;  %2531 = vmatprep.subr.mxu1 %v1087_v15  ;;  %v3182_v6 = vmax.f32 %v6777_v55, %v6781_v21  ;;  %v1545_v15 = vld [vmem:[#allocation8 + $0x1310] sm:$0xff]  ;;  %v1518_v55 = vld [vmem:[#allocation8 + $0x1238] sm:$0xff]  ;;  %v1088_v21 = vld [vmem:[#allocation8 + $0x4c8] sm:$0xff] }
 0x243   : > { %2628 = vmatprep.subr.mxu0 %v1305_v17  ;;  %2532 = vmatpush1.msra.mxu1 %v1086_v19  ;;  %v1115_v17 = vld [vmem:[#allocation8 + $0x5a0] sm:$0xff] }
 0x244   : > { %2629 = vmatpush1.msra.mxu0 %v1304_v62  ;;  %v6784_v31 = vpop.f32.mrf.mxu1  ;;  %2533 = vmatprep.subr.mxu1 %v1060_v22  ;;  %v1519_v62 = vld [vmem:[#allocation8 + $0x1240] sm:$0xff]  ;;  %v1089_v22 = vld [vmem:[#allocation8 + $0x4d0] sm:$0xff] }
 0x245   : > { %2630 = vmatprep.subr.mxu0 %v1278_v24  ;;  %4937 = vmatprep.mubr.msk.f32.mxu1 %vm805_vm0, %v6738_v25 }
 0x246   : > { %2534 = vmatpush1.msra.mxu1 %v1059_v27  ;;  %2631 = vmatpush1.msra.mxu0 %v1277_v28  ;;  %v6789_v10 = vpop.f32.mrf.mxu1  ;;  %v1492_v28 = vld [vmem:[#allocation8 + $0x1168] sm:$0xff] }
 0x247   : > { %2386 = vmatmul.mubr.f32.gmra.mxu1 %v6745_v30  ;;  %2535 = vmatprep.subr.mxu1 %v1033_v12 }
 0x248   : > { %2632 = vmatprep.subr.mxu0 %v1251_v33  ;;  %2536 = vmatpush1.msra.mxu1 %v1032_v36  ;;  %v1062_v33 = vld [vmem:[#allocation8 + $0x3f8] sm:$0xff]  ;;  %v3183_v36 = vmax.f32 %v6784_v31, %v6789_v10 }
 0x249   : > { %2633 = vmatpush1.msra.mxu0 %v1250_v29  ;;  %2537 = vmatprep.subr.mxu1 %v1006_v38  ;;  %v6793_v23 = vpop.f32.mrf.mxu1  ;;  %v1491_v29 = vld [vmem:[#allocation8 + $0x1160] sm:$0xff]  ;;  %v1061_v38 = vld [vmem:[#allocation8 + $0x3f0] sm:$0xff]  ;;  %v1438_v31 = vld [vmem:[#allocation8 + $0xfb8] sm:$0xff] }
 0x24a   : > { %2634 = vmatprep.subr.mxu0 %v1224_v41  ;;  %4938 = vmatprep.mubr.msk.f32.mxu1 %vm805_vm0, %v6756_v40 }
 0x24b   : > { %2538 = vmatpush1.msra.mxu1 %v1005_v46  ;;  %2635 = vmatpush1.msra.mxu0 %v1223_v48  ;;  %v6796_v3 = vpop.f32.mrf.mxu1  ;;  %v1465_v48 = vld [vmem:[#allocation8 + $0x1090] sm:$0xff] }
 0x24c   : > { %2392 = vmatmul.mubr.f32.gmra.mxu1 %v6761_v43  ;;  %2539 = vmatprep.subr.mxu1 %v979_v49  ;;  %v1035_v49 = vld [vmem:[#allocation8 + $0x320] sm:$0xff] }
 0x24d   : > { %2636 = vmatprep.subr.mxu0 %v1197_v20  ;;  %2540 = vmatpush1.msra.mxu1 %v978_v50  ;;  %v1464_v50 = vld [vmem:[#allocation8 + $0x1088] sm:$0xff] }
 0x24e   : > { %2637 = vmatpush1.msra.mxu0 %v1196_v51  ;;  %2541 = vmatprep.subr.mxu1 %v952_v54  ;;  %v6802_v24 = vpop.f32.mrf.mxu1  ;;  %v1034_v51 = vld [vmem:[#allocation8 + $0x318] sm:$0xff]  ;;  %v1008_v54 = vld [vmem:[#allocation8 + $0x248] sm:$0xff] }
 0x24f   : > { %2638 = vmatprep.subr.mxu0 %v1170_v32  ;;  %v1792_v45 = vpop.f32.mrf.mxu0  ;;  %2542 = vmatpush1.msra.mxu1 %v951_v35 }
 0x250   : > { %2639 = vmatpush1.msra.mxu0 %v1169_v58  ;;  %2559 = vmatprep.subr.mxu1 %v1573_v60  ;;  %v6809_v46 = vpop.f32.mrf.mxu1  ;;  %v1437_v58 = vld [vmem:[#allocation8 + $0xfb0] sm:$0xff]  ;;  %v1007_v60 = vld [vmem:[#allocation8 + $0x240] sm:$0xff] }
 0x251   : > { %2640 = vmatprep.subr.mxu0 %v1143_v61  ;;  %v1794_v11 = vpop.f32.mrf.mxu0  ;;  %2560 = vmatpush2.msra.mxu1 %v1572_v42  ;;  %v3184_v61 = vmax.f32 %v6793_v23, %v6796_v3  ;;  %v1411_v42 = vld [vmem:[#allocation8 + $0xee0] sm:$0xff]  ;;  %v954_v23 = vld [vmem:[#allocation8 + $0x98] sm:$0xff] }
 0x252   : > { %2641 = vmatpush1.msra.mxu0 %v1142_v0  ;;  %v3190_v19 = vmax.f32 %v1792_v45, %v1794_v11  ;;  %4940 = vmatprep.mubr.msk.f32.mxu0 %vm805_vm0, %v6679_v26  ;;  %v981_v0 = vld [vmem:[#allocation8 + $0x170] sm:$0xff]  ;;  %v1384_v11 = vld [vmem:[#allocation8 + $0xe08] sm:$0xff] }
 0x253   : > { %2561 = vmatprep.subr.mxu1 %v1546_v5  ;;  %2642 = vmatprep.subr.mxu0 %v1116_v7  ;;  %v1410_v5 = vld [vmem:[#allocation8 + $0xed8] sm:$0xff] }
 0x254   : > { %2469 = vmatmul.mubr.f32.gmra.mxu0 %v6684_v37  ;;  %v6805_v27 = vmax.f32 %v3182_v6, %v3190_v19  ;;  %2562 = vmatpush2.msra.mxu1 %v1545_v15  ;;  %v6816_v35 = vpop.f32.mrf.mxu1  ;;  %v980_v6 = vld [vmem:[#allocation8 + $0x168] sm:$0xff] }
 0x255   : > { %2643 = vmatpush1.msra.mxu0 %v1115_v17  ;;  %v1798_v12 = vpop.f32.mrf.mxu0  ;;  %2563 = vmatprep.subr.mxu1 %v1519_v62  ;;  %v1383_v17 = vld [vmem:[#allocation8 + $0xe00] sm:$0xff]  ;;  %v953_v62 = vld [vmem:[#allocation8 + $0x90] sm:$0xff] }
 0x256   : > { %2644 = vmatprep.subr.mxu0 %v1089_v22  ;;  %2564 = vmatpush2.msra.mxu1 %v1518_v55  ;;  %v1705_v15 = vpop.f32.mrf.mxu1  ;;  %v3185_v22 = vmax.f32 %v6802_v24, %v6809_v46  ;;  %v1575_v55 = vld [vmem:[#allocation8 + $0x1400] sm:$0xff]  ;;  %v1334_v24 = vld [vmem:[#allocation8 + $0xc78] sm:$0xff] }
 0x257   : > { %2645 = vmatpush1.msra.mxu0 %v1088_v21  ;;  %v1800_v41 = vpop.f32.mrf.mxu0  ;;  %4941 = vmatprep.mubr.msk.f32.mxu0 %vm805_vm0, %v6688_v44  ;;  %v1361_v21 = vld [vmem:[#allocation8 + $0xd50] sm:$0xff]  ;;  %v1547_v46 = vld [vmem:[#allocation8 + $0x1320] sm:$0xff] }
 0x258   : > { %2565 = vmatprep.subr.mxu1 %v1492_v28  ;;  %v3191_v20 = vmax.f32 %v1798_v12, %v1800_v41  ;;  %2646 = vmatprep.subr.mxu0 %v1062_v33  ;;  %v1574_v33 = vld [vmem:[#allocation8 + $0x13f8] sm:$0xff] }
 0x259   : > { %2475 = vmatmul.mubr.f32.gmra.mxu0 %v6693_v47  ;;  %2566 = vmatpush2.msra.mxu1 %v1491_v29 }
 0x25a   : > { %2647 = vmatpush1.msra.mxu0 %v1061_v38  ;;  %v6814_v10 = vmax.f32 %v3183_v36, %v3191_v20  ;;  %2567 = vmatprep.subr.mxu1 %v1465_v48  ;;  %v6830_v12 = vpop.f32.mrf.mxu1  ;;  %v1360_v36 = vld [vmem:[#allocation8 + $0xd48] sm:$0xff]  ;;  %v1521_v20 = vld [vmem:[#allocation8 + $0x1250] sm:$0xff] }
 0x25b   : > { %2648 = vmatprep.subr.mxu0 %v1035_v49  ;;  %v1804_v32 = vpop.f32.mrf.mxu0  ;;  %2568 = vmatpush2.msra.mxu1 %v1464_v50  ;;  %v1548_v38 = vld [vmem:[#allocation8 + $0x1328] sm:$0xff]  ;;  %v3186_v50 = vmax.f32 %v6816_v35, %v1705_v15 }
 0x25c   : > { %2649 = vmatpush1.msra.mxu0 %v1034_v51  ;;  %4942 = vmatprep.mubr.msk.f32.mxu0 %vm805_vm0, %v6697_v53  ;;  %v1711_v49 = vpop.f32.mrf.mxu1  ;;  %v1280_v35 = vld [vmem:[#allocation8 + $0xac8] sm:$0xff] }
 0x25d   : > { %2569 = vmatprep.subr.mxu1 %v1438_v31  ;;  %v1806_v45 = vpop.f32.mrf.mxu0  ;;  %2650 = vmatprep.subr.mxu0 %v1008_v54  ;;  %v1520_v31 = vld [vmem:[#allocation8 + $0x1248] sm:$0xff]  ;;  %v1306_v54 = vld [vmem:[#allocation8 + $0xb98] sm:$0xff] }
 0x25e   : > { %2481 = vmatmul.mubr.f32.gmra.mxu0 %v6702_v56  ;;  %v3192_v7 = vmax.f32 %v1804_v32, %v1806_v45  ;;  %2570 = vmatpush2.msra.mxu1 %v1437_v58  ;;  %v1494_v58 = vld [vmem:[#allocation8 + $0x1178] sm:$0xff]  ;;  %v3187_v45 = vmax.f32 %v6830_v12, %v1711_v49  ;;  %v1439_v12 = vld [vmem:[#allocation8 + $0xfc0] sm:$0xff] }
 0x25f   : > { %2651 = vmatpush1.msra.mxu0 %v1007_v60  ;;  %2571 = vmatprep.subr.mxu1 %v1411_v42  ;;  %v1198_v49 = vld [vmem:[#allocation8 + $0x838] sm:$0xff] }
 0x260   : > { %2652 = vmatprep.subr.mxu0 %v981_v0  ;;  %v6823_v3 = vmax.f32 %v3184_v61, %v3192_v7  ;;  %2572 = vmatpush2.msra.mxu1 %v1410_v5  ;;  %v1715_v60 = vpop.f32.mrf.mxu1  ;;  %v1493_v0 = vld [vmem:[#allocation8 + $0x1170] sm:$0xff]  ;;  %v1279_v5 = vld [vmem:[#allocation8 + $0xac0] sm:$0xff] }
 0x261   : > { %2653 = vmatpush1.msra.mxu0 %v980_v6  ;;  %v1810_v19 = vpop.f32.mrf.mxu0  ;;  %4943 = vmatprep.mubr.msk.f32.mxu0 %vm805_vm0, %v6706_v63  ;;  %v1467_v6 = vld [vmem:[#allocation8 + $0x10a0] sm:$0xff] }
 0x262   : > { %2573 = vmatprep.subr.mxu1 %v1384_v11  ;;  %2654 = vmatprep.subr.mxu0 %v954_v23  ;;  %v1253_v11 = vld [vmem:[#allocation8 + $0x9f0] sm:$0xff]  ;;  %v1717_v23 = vpop.f32.mrf.mxu1 }
 0x263   : > { %2487 = vmatmul.mubr.f32.gmra.mxu0 %v6711_v2  ;;  %v1812_v28 = vpop.f32.mrf.mxu0  ;;  %2574 = vmatpush2.msra.mxu1 %v1383_v17  ;;  %v1466_v17 = vld [vmem:[#allocation8 + $0x1098] sm:$0xff] }
 0x264   : > { %4947 = vmatprep.mubr.msk.f32.mxu1 %vm805_vm0, %v6660_v57  ;;  %v3193_v29 = vmax.f32 %v1810_v19, %v1812_v28  ;;  %2655 = vmatpush1.msra.mxu0 %v953_v62  ;;  %v1333_v57 = vld [vmem:[#allocation8 + $0xc70] sm:$0xff]  ;;  %v1252_v19 = vld [vmem:[#allocation8 + $0x9e8] sm:$0xff]  ;;  %v3188_v28 = vmax.f32 %v1715_v60, %v1717_v23 }
 0x265   : > { %2576 = vmatmul.mubr.f32.vlgmr.msra.gmra.mxu1 %v6666_v59  ;;  %2672 = vmatprep.subr.mxu0 %v1575_v55  ;;  %v1307_v59 = vld [vmem:[#allocation8 + $0xba0] sm:$0xff]  ;;  %v1440_v62 = vld [vmem:[#allocation8 + $0xfc8] sm:$0xff]  ;;  %v1117_v23 = vld [vmem:[#allocation8 + $0x5b0] sm:$0xff] }
 0x266   : > { %2737 = vmatprep.subr.mxu1 %v1361_v21  ;;  %v6835_v41 = vmax.f32 %v3185_v22, %v3193_v29  ;;  %2673 = vmatpush2.msra.mxu0 %v1574_v33  ;;  %v1816_v48 = vpop.f32.mrf.mxu0  ;;  %v1226_v21 = vld [vmem:[#allocation8 + $0x918] sm:$0xff]  ;;  %v1413_v29 = vld [vmem:[#allocation8 + $0xef0] sm:$0xff] }
 0x267   : > { %2738 = vmatpush1.msra.mxu1 %v1360_v36  ;;  %4944 = vmatprep.mubr.msk.f32.mxu0 %vm805_vm0, %v6722_v14  ;;  %v1225_v36 = vld [vmem:[#allocation8 + $0x910] sm:$0xff] }
 0x268   : > { %2674 = vmatprep.subr.mxu0 %v1548_v38  ;;  %2739 = vmatprep.subr.mxu1 %v1334_v24  ;;  %v1818_v51 = vpop.f32.mrf.mxu0  ;;  %v1199_v24 = vld [vmem:[#allocation8 + $0x840] sm:$0xff] }
 0x269   : > { %2493 = vmatmul.mubr.f32.gmra.mxu0 %v6727_v16  ;;  %4948 = vmatprep.mubr.msk.f32.mxu1 %vm805_vm0, %v6679_v26  ;;  %v3194_v32 = vmax.f32 %v1816_v48, %v1818_v51  ;;  %v1412_v48 = vld [vmem:[#allocation8 + $0xee8] sm:$0xff]  ;;  %v1171_v51 = vld [vmem:[#allocation8 + $0x760] sm:$0xff] }
 0x26a   : > { %2675 = vmatpush2.msra.mxu0 %v1547_v46  ;;  %2740 = vmatpush1.msra.mxu1 %v1333_v57  ;;  %v1899_v46 = vpop.f32.mrf.mxu1 }
 0x26b   : > { %2676 = vmatprep.subr.mxu0 %v1521_v20  ;;  %2582 = vmatmul.mubr.f32.gmra.mxu1 %v6684_v37  ;;  %v6844_v61 = vmax.f32 %v3186_v50, %v3194_v32  ;;  %v1386_v20 = vld [vmem:[#allocation8 + $0xe18] sm:$0xff]  ;;  %v1172_v50 = vld [vmem:[#allocation8 + $0x768] sm:$0xff]  ;;  %v1145_v32 = vld [vmem:[#allocation8 + $0x690] sm:$0xff] }
 0x26c   : > { %2741 = vmatprep.subr.mxu1 %v1307_v59  ;;  %v1822_v42 = vpop.f32.mrf.mxu0  ;;  %2677 = vmatpush2.msra.mxu0 %v1520_v31  ;;  %v1385_v59 = vld [vmem:[#allocation8 + $0xe10] sm:$0xff]  ;;  %v1901_v31 = vpop.f32.mrf.mxu1 }
 0x26d   : > { %2742 = vmatpush1.msra.mxu1 %v1306_v54  ;;  %4945 = vmatprep.mubr.msk.f32.mxu0 %vm805_vm0, %v6738_v25 }
 0x26e   : > { %2678 = vmatprep.subr.mxu0 %v1494_v58  ;;  %v1824_v7 = vpop.f32.mrf.mxu0  ;;  %2743 = vmatprep.subr.mxu1 %v1280_v35  ;;  %v1363_v58 = vld [vmem:[#allocation8 + $0xd60] sm:$0xff]  ;;  %v6866_v35 = vld [vmem:[%s6435_s26 + $0x8] sm:$0xff] }
 0x26f   : > { %2499 = vmatmul.mubr.f32.gmra.mxu0 %v6745_v30  ;;  %v3195_v15 = vmax.f32 %v1822_v42, %v1824_v7  ;;  %4949 = vmatprep.mubr.msk.f32.mxu1 %vm805_vm0, %v6688_v44  ;;  %v1144_v42 = vld [vmem:[#allocation8 + $0x688] sm:$0xff]  ;;  %v1118_v7 = vld [vmem:[#allocation8 + $0x5b8] sm:$0xff] }
 0x270   : > { %2679 = vmatpush2.msra.mxu0 %v1493_v0  ;;  %2744 = vmatpush1.msra.mxu1 %v1279_v5  ;;  %v1362_v0 = vld [vmem:[#allocation8 + $0xd58] sm:$0xff] }
 0x271   : > { %2680 = vmatprep.subr.mxu0 %v1467_v6  ;;  %v6852_v22 = vmax.f32 %v3187_v45, %v3195_v15  ;;  %v1828_v55 = vpop.f32.mrf.mxu0  ;;  %2588 = vmatmul.mubr.f32.gmra.mxu1 %v6693_v47  ;;  %v3197_v45 = vmax.f32 %v1899_v46, %v1901_v31  ;;  %v6872_v6 = vld [vmem:[%s6435_s26] sm:$0xff]  ;;  %v1064_v46 = vld [vmem:[#allocation8 + $0x408] sm:$0xff] }
 0x272   : > { %2745 = vmatprep.subr.mxu1 %v1253_v11  ;;  %2681 = vmatpush2.msra.mxu0 %v1466_v17  ;;  %v1336_v11 = vld [vmem:[#allocation8 + $0xc88] sm:$0xff]  ;;  %v1335_v17 = vld [vmem:[#allocation8 + $0xc80] sm:$0xff] }
 0x273   : > { %2746 = vmatpush1.msra.mxu1 %v1252_v19  ;;  %v1830_v33 = vpop.f32.mrf.mxu0  ;;  %4946 = vmatprep.mubr.msk.f32.mxu0 %vm805_vm0, %v6756_v40  ;;  %v1255_v31 = vld [vmem:[#allocation8 + $0xa00] sm:$0xff] }
 0x274   : > { %2682 = vmatprep.subr.mxu0 %v1440_v62  ;;  %v3196_v38 = vmax.f32 %v1828_v55, %v1830_v33  ;;  %2747 = vmatprep.subr.mxu1 %v1226_v21  ;;  %v1091_v21 = vld [vmem:[#allocation8 + $0x4e0] sm:$0xff] }
 0x275   : > { %2505 = vmatmul.mubr.f32.gmra.mxu0 %v6761_v43  ;;  %4950 = vmatprep.mubr.msk.f32.mxu1 %vm805_vm0, %v6697_v53 }
 0x276   : > { %2683 = vmatpush2.msra.mxu0 %v1439_v12  ;;  %v6860_v57 = vmax.f32 %v3188_v28, %v3196_v38  ;;  %2748 = vmatpush1.msra.mxu1 %v1225_v36  ;;  %v1309_v28 = vld [vmem:[#allocation8 + $0xbb0] sm:$0xff]  ;;  %v1090_v36 = vld [vmem:[#allocation8 + $0x4d8] sm:$0xff] }
 0x277   : > { %2684 = vmatprep.subr.mxu0 %v1413_v29  ;;  %2594 = vmatmul.mubr.f32.gmra.mxu1 %v6702_v56  ;;  %v1308_v29 = vld [vmem:[#allocation8 + $0xba8] sm:$0xff] }
 0x278   : > { %2749 = vmatprep.subr.mxu1 %v1199_v24  ;;  %2685 = vmatpush2.msra.mxu0 %v1412_v48  ;;  %v1282_v48 = vld [vmem:[#allocation8 + $0xad8] sm:$0xff] }
 0x279   : > { %2750 = vmatpush1.msra.mxu1 %v1198_v49  ;;  %v2012_v54 = vpop.f32.mrf.mxu0  ;;  %2686 = vmatprep.subr.mxu0 %v1386_v20  ;;  %v1281_v20 = vld [vmem:[#allocation8 + $0xad0] sm:$0xff] }
 0x27a   : > { %2751 = vmatprep.subr.mxu1 %v1172_v50  ;;  %4951 = vmatprep.mubr.msk.f32.mxu1 %vm805_vm0, %v6706_v63 }
 0x27b   : > { %2687 = vmatpush2.msra.mxu0 %v1385_v59  ;;  %v2014_v60 = vpop.f32.mrf.mxu0  ;;  %4955 = vmatprep.mubr.msk.f32.mxu0 %vm805_vm0, %v6866_v35 }
 0x27c   : > { %2752 = vmatpush1.msra.mxu1 %v1171_v51  ;;  %v3205_v5 = vmax.f32 %v2012_v54, %v2014_v60  ;;  %2689 = vmatmul.mubr.f32.vlgmr.msra.gmra.mxu0 %v6872_v6  ;;  %v1254_v60 = vld [vmem:[#allocation8 + $0x9f8] sm:$0xff] }
 0x27d   : > { %2600 = vmatmul.mubr.f32.gmra.mxu1 %v6711_v2  ;;  %2753 = vmatprep.subr.mxu1 %v1145_v32 }
 0x27e   : > { %2850 = vmatprep.subr.mxu0 %v1363_v58  ;;  %v6875_v15 = vmax.f32 %v3197_v45, %v3205_v5  ;;  %2754 = vmatpush1.msra.mxu1 %v1144_v42  ;;  %v1905_v19 = vpop.f32.mrf.mxu1  ;;  %v1036_v58 = vld [vmem:[#allocation8 + $0x328] sm:$0xff]  ;;  %v1010_v45 = vld [vmem:[#allocation8 + $0x258] sm:$0xff] }
 0x27f   : > { %2851 = vmatpush1.msra.mxu0 %v1362_v0  ;;  %v2018_v62 = vpop.f32.mrf.mxu0  ;;  %2755 = vmatprep.subr.mxu1 %v1118_v7  ;;  %v1228_v5 = vld [vmem:[#allocation8 + $0x928] sm:$0xff] }
 0x280   : > { %2852 = vmatprep.subr.mxu0 %v1336_v11  ;;  %v3237_v55 = vmax.f32 %v6775_v9, %v6875_v15  ;;  %4952 = vmatprep.mubr.msk.f32.mxu1 %vm805_vm0, %v6722_v14  ;;  %v1907_v12 = vpop.f32.mrf.mxu1  ;;  %v1227_v11 = vld [vmem:[#allocation8 + $0x920] sm:$0xff]  ;;  %v1470_v9 = vld [vmem:[#allocation8 + $0x10b8] sm:$0xff]  ;;  %v1256_v15 = vld [vmem:[#allocation8 + $0xa08] sm:$0xff] }
 0x281   : > { %4956 = vmatprep.mubr.msk.f32.mxu0 %vm805_vm0, %v6679_v26  ;;  %v2020_v33 = vpop.f32.mrf.mxu0  ;;  %2756 = vmatpush1.msra.mxu1 %v1117_v23  ;;  %v3198_v38 = vmax.f32 %v1905_v19, %v1907_v12  ;;  %v1063_v26 = vld [vmem:[#allocation8 + $0x400] sm:$0xff]  ;;  %v982_v12 = vld [vmem:[#allocation8 + $0x178] sm:$0xff] }
 0x282   : > { %2853 = vmatpush1.msra.mxu0 %v1335_v17  ;;  %v3206_v24 = vmax.f32 %v2018_v62, %v2020_v33  ;;  %2606 = vmatmul.mubr.f32.gmra.mxu1 %v6727_v16  ;;  %v1201_v62 = vld [vmem:[#allocation8 + $0x850] sm:$0xff]  ;;  %v1200_v33 = vld [vmem:[#allocation8 + $0x848] sm:$0xff] }
 0x283   : > { %2695 = vmatmul.mubr.f32.gmra.mxu0 %v6684_v37  ;;  %2757 = vmatprep.subr.mxu1 %v1091_v21  ;;  %v1037_v37 = vld [vmem:[#allocation8 + $0x330] sm:$0xff] }
 0x284   : > { %2854 = vmatprep.subr.mxu0 %v1309_v28  ;;  %v6885_v49 = vmax.f32 %v3198_v38, %v3206_v24  ;;  %2758 = vmatpush1.msra.mxu1 %v1090_v36  ;;  %v1911_v50 = vpop.f32.mrf.mxu1  ;;  %v956_v38 = vld [vmem:[#allocation8 + $0xa8] sm:$0xff]  ;;  %v1174_v24 = vld [vmem:[#allocation8 + $0x778] sm:$0xff] }
 0x285   : > { %2855 = vmatpush1.msra.mxu0 %v1308_v29  ;;  %v2024_v59 = vpop.f32.mrf.mxu0  ;;  %2759 = vmatprep.subr.mxu1 %v1064_v46  ;;  %v955_v46 = vld [vmem:[#allocation8 + $0xa0] sm:$0xff] }
 0x286   : > { %2856 = vmatprep.subr.mxu0 %v1282_v48  ;;  %v3238_v51 = vmax.f32 %v6805_v27, %v6885_v49  ;;  %4953 = vmatprep.mubr.msk.f32.mxu1 %vm805_vm0, %v6738_v25  ;;  %v1913_v54 = vpop.f32.mrf.mxu1  ;;  %v1173_v48 = vld [vmem:[#allocation8 + $0x770] sm:$0xff]  ;;  %v1202_v27 = vld [vmem:[#allocation8 + $0x858] sm:$0xff] }
 0x287   : > { %4957 = vmatprep.mubr.msk.f32.mxu0 %vm805_vm0, %v6688_v44  ;;  %v2026_v32 = vpop.f32.mrf.mxu0  ;;  %2760 = vmatpush1.msra.mxu1 %v1063_v26  ;;  %v3199_v42 = vmax.f32 %v1911_v50, %v1913_v54  ;;  %v1009_v44 = vld [vmem:[#allocation8 + $0x250] sm:$0xff] }
 0x288   : > { %2857 = vmatpush1.msra.mxu0 %v1281_v20  ;;  %v3207_v0 = vmax.f32 %v2024_v59, %v2026_v32  ;;  %2612 = vmatmul.mubr.f32.gmra.mxu1 %v6745_v30  ;;  %v1577_v26 = vld [vmem:[#allocation8 + $0x1410] sm:$0xff]  ;;  %v1147_v59 = vld [vmem:[#allocation8 + $0x6a0] sm:$0xff] }
 0x289   : > { %2701 = vmatmul.mubr.f32.gmra.mxu0 %v6693_v47  ;;  %2761 = vmatprep.subr.mxu1 %v1037_v37  ;;  %v983_v47 = vld [vmem:[#allocation8 + $0x180] sm:$0xff] }
 0x28a   : > { %2858 = vmatprep.subr.mxu0 %v1255_v31  ;;  %v6895_v7 = vmax.f32 %v3199_v42, %v3207_v0  ;;  %2762 = vmatpush1.msra.mxu1 %v1036_v58  ;;  %v1917_v23 = vpop.f32.mrf.mxu1  ;;  %v1146_v31 = vld [vmem:[#allocation8 + $0x698] sm:$0xff] }
 0x28b   : > { %2859 = vmatpush1.msra.mxu0 %v1254_v60  ;;  %v2030_v17 = vpop.f32.mrf.mxu0  ;;  %2763 = vmatprep.subr.mxu1 %v1010_v45  ;;  %v1550_v58 = vld [vmem:[#allocation8 + $0x1338] sm:$0xff]  ;;  %v1120_v60 = vld [vmem:[#allocation8 + $0x5c8] sm:$0xff]  ;;  %v1549_v45 = vld [vmem:[#allocation8 + $0x1330] sm:$0xff] }
 0x28c   : > { %2860 = vmatprep.subr.mxu0 %v1228_v5  ;;  %v3239_v19 = vmax.f32 %v6814_v10, %v6895_v7  ;;  %4954 = vmatprep.mubr.msk.f32.mxu1 %vm805_vm0, %v6756_v40  ;;  %v1919_v21 = vpop.f32.mrf.mxu1  ;;  %v1119_v5 = vld [vmem:[#allocation8 + $0x5c0] sm:$0xff]  ;;  %v1148_v10 = vld [vmem:[#allocation8 + $0x6a8] sm:$0xff]  ;;  %v1366_v7 = vld [vmem:[#allocation8 + $0xd78] sm:$0xff] }
 0x28d   : > { %4958 = vmatprep.mubr.msk.f32.mxu0 %vm805_vm0, %v6697_v53  ;;  %v2032_v28 = vpop.f32.mrf.mxu0  ;;  %2764 = vmatpush1.msra.mxu1 %v1009_v44  ;;  %v3200_v36 = vmax.f32 %v1917_v23, %v1919_v21  ;;  %v1523_v44 = vld [vmem:[#allocation8 + $0x1260] sm:$0xff]  ;;  %v1496_v21 = vld [vmem:[#allocation8 + $0x1188] sm:$0xff] }
 0x28e   : > { %2861 = vmatpush1.msra.mxu0 %v1227_v11  ;;  %v3208_v29 = vmax.f32 %v2030_v17, %v2032_v28  ;;  %2618 = vmatmul.mubr.f32.gmra.mxu1 %v6761_v43  ;;  %v1093_v11 = vld [vmem:[#allocation8 + $0x4f0] sm:$0xff]  ;;  %v1066_v28 = vld [vmem:[#allocation8 + $0x418] sm:$0xff] }
 0x28f   : > { %2707 = vmatmul.mubr.f32.gmra.mxu0 %v6702_v56  ;;  %2765 = vmatprep.subr.mxu1 %v983_v47  ;;  %v1576_v56 = vld [vmem:[#allocation8 + $0x1408] sm:$0xff]  ;;  %v1522_v47 = vld [vmem:[#allocation8 + $0x1258] sm:$0xff] }
 0x290   : > { %2862 = vmatprep.subr.mxu0 %v1201_v62  ;;  %v6905_v53 = vmax.f32 %v3200_v36, %v3208_v29  ;;  %2766 = vmatpush1.msra.mxu1 %v982_v12  ;;  %v1923_v20 = vpop.f32.mrf.mxu1  ;;  %v1092_v62 = vld [vmem:[#allocation8 + $0x4e8] sm:$0xff]  ;;  %v1495_v36 = vld [vmem:[#allocation8 + $0x1180] sm:$0xff] }
 0x291   : > { %2863 = vmatpush1.msra.mxu0 %v1200_v33  ;;  %v2036_v50 = vpop.f32.mrf.mxu0  ;;  %2767 = vmatprep.subr.mxu1 %v956_v38 }
 0x292   : > { %2864 = vmatprep.subr.mxu0 %v1174_v24  ;;  %v3240_v37 = vmax.f32 %v6823_v3, %v6905_v53  ;;  %4959 = vmatprep.mubr.msk.f32.mxu0 %vm805_vm0, %v6706_v63  ;;  %v1925_v54 = vpop.f32.mrf.mxu1  ;;  %v1469_v24 = vld [vmem:[#allocation8 + $0x10b0] sm:$0xff]  ;;  %v1095_v3 = vld [vmem:[#allocation8 + $0x500] sm:$0xff]  ;;  %v1094_v53 = vld [vmem:[#allocation8 + $0x4f8] sm:$0xff] }
 0x293   : > { %2768 = vmatpush1.msra.mxu1 %v955_v46  ;;  %v2038_v32 = vpop.f32.mrf.mxu0  ;;  %2865 = vmatpush1.msra.mxu0 %v1173_v48  ;;  %v3201_v42 = vmax.f32 %v1923_v20, %v1925_v54  ;;  %v1039_v46 = vld [vmem:[#allocation8 + $0x340] sm:$0xff]  ;;  %v1038_v20 = vld [vmem:[#allocation8 + $0x338] sm:$0xff]  ;;  %v1441_v54 = vld [vmem:[#allocation8 + $0xfd0] sm:$0xff] }
 0x294   : > { %2785 = vmatprep.subr.mxu1 %v1577_v26  ;;  %v3209_v0 = vmax.f32 %v2036_v50, %v2038_v32  ;;  %2713 = vmatmul.mubr.f32.gmra.mxu0 %v6711_v2  ;;  %v1468_v26 = vld [vmem:[#allocation8 + $0x10a8] sm:$0xff] }
 0x295   : > { %2866 = vmatprep.subr.mxu0 %v1147_v59  ;;  %2786 = vmatpush2.msra.mxu1 %v1576_v56  ;;  %v1442_v59 = vld [vmem:[#allocation8 + $0xfd8] sm:$0xff]  ;;  %v1012_v56 = vld [vmem:[#allocation8 + $0x268] sm:$0xff] }
 0x296   : > { %2867 = vmatpush1.msra.mxu0 %v1146_v31  ;;  %v6912_v63 = vmax.f32 %v3201_v42, %v3209_v0  ;;  %2787 = vmatprep.subr.mxu1 %v1550_v58  ;;  %v1929_v23 = vpop.f32.mrf.mxu1 }
 0x297   : > { %2868 = vmatprep.subr.mxu0 %v1120_v60  ;;  %v2042_v17 = vpop.f32.mrf.mxu0  ;;  %4960 = vmatprep.mubr.msk.f32.mxu0 %vm805_vm0, %v6722_v14  ;;  %v1065_v14 = vld [vmem:[#allocation8 + $0x410] sm:$0xff]  ;;  %v1415_v60 = vld [vmem:[#allocation8 + $0xf00] sm:$0xff] }
 0x298   : > { %2788 = vmatpush2.msra.mxu1 %v1549_v45  ;;  %v3241_v2 = vmax.f32 %v6835_v41, %v6912_v63  ;;  %2869 = vmatpush1.msra.mxu0 %v1119_v5  ;;  %v1931_v12 = vpop.f32.mrf.mxu1  ;;  %v985_v45 = vld [vmem:[#allocation8 + $0x190] sm:$0xff]  ;;  %v1414_v5 = vld [vmem:[#allocation8 + $0xef8] sm:$0xff] }
 0x299   : > { %2789 = vmatprep.subr.mxu1 %v1523_v44  ;;  %v2044_v33 = vpop.f32.mrf.mxu0  ;;  %2719 = vmatmul.mubr.f32.gmra.mxu0 %v6727_v16  ;;  %v3202_v29 = vmax.f32 %v1929_v23, %v1931_v12  ;;  %v984_v44 = vld [vmem:[#allocation8 + $0x188] sm:$0xff]  ;;  %v958_v23 = vld [vmem:[#allocation8 + $0xb8] sm:$0xff]  ;;  %v1285_v41 = vld [vmem:[#allocation8 + $0xaf0] sm:$0xff] }
 0x29a   : > { %2870 = vmatprep.subr.mxu0 %v1093_v11  ;;  %v3210_v38 = vmax.f32 %v2042_v17, %v2044_v33  ;;  %2790 = vmatpush2.msra.mxu1 %v1522_v47  ;;  %v1388_v11 = vld [vmem:[#allocation8 + $0xe28] sm:$0xff]  ;;  %v1579_v33 = vld [vmem:[#allocation8 + $0x1420] sm:$0xff] }
 0x29b   : > { %2871 = vmatpush1.msra.mxu0 %v1092_v62  ;;  %2791 = vmatprep.subr.mxu1 %v1496_v21  ;;  %v1387_v62 = vld [vmem:[#allocation8 + $0xe20] sm:$0xff] }
 0x29c   : > { %2872 = vmatprep.subr.mxu0 %v1066_v28  ;;  %v6919_v48 = vmax.f32 %v3202_v29, %v3210_v38  ;;  %4961 = vmatprep.mubr.msk.f32.mxu0 %vm805_vm0, %v6738_v25  ;;  %v1935_v16 = vpop.f32.mrf.mxu1  ;;  %v1011_v25 = vld [vmem:[#allocation8 + $0x260] sm:$0xff] }
 0x29d   : > { %2792 = vmatpush2.msra.mxu1 %v1495_v36  ;;  %v2048_v50 = vpop.f32.mrf.mxu0  ;;  %2873 = vmatpush1.msra.mxu0 %v1065_v14  ;;  %v1365_v36 = vld [vmem:[#allocation8 + $0xd70] sm:$0xff]  ;;  %v1364_v14 = vld [vmem:[#allocation8 + $0xd68] sm:$0xff] }
 0x29e   : > { %2793 = vmatprep.subr.mxu1 %v1469_v24  ;;  %v3242_v31 = vmax.f32 %v6844_v61, %v6919_v48  ;;  %2725 = vmatmul.mubr.f32.gmra.mxu0 %v6745_v30  ;;  %v1937_v32 = vpop.f32.mrf.mxu1  ;;  %v1552_v24 = vld [vmem:[#allocation8 + $0x1348] sm:$0xff]  ;;  %v1013_v48 = vld [vmem:[#allocation8 + $0x270] sm:$0xff] }
 0x29f   : > { %2874 = vmatprep.subr.mxu0 %v1039_v46  ;;  %v2050_v58 = vpop.f32.mrf.mxu0  ;;  %2794 = vmatpush2.msra.mxu1 %v1468_v26  ;;  %v3203_v42 = vmax.f32 %v1935_v16, %v1937_v32  ;;  %v1338_v46 = vld [vmem:[#allocation8 + $0xc98] sm:$0xff]  ;;  %v1551_v16 = vld [vmem:[#allocation8 + $0x1340] sm:$0xff] }
 0x2a0   : > { %2875 = vmatpush1.msra.mxu0 %v1038_v20  ;;  %v3211_v0 = vmax.f32 %v2048_v50, %v2050_v58  ;;  %2795 = vmatprep.subr.mxu1 %v1442_v59  ;;  %v1337_v50 = vld [vmem:[#allocation8 + $0xc90] sm:$0xff]  ;;  %v1311_v32 = vld [vmem:[#allocation8 + $0xbc0] sm:$0xff] }
 0x2a1   : > { %2876 = vmatprep.subr.mxu0 %v1012_v56  ;;  %4962 = vmatprep.mubr.msk.f32.mxu0 %vm805_vm0, %v6756_v40  ;;  %v957_v40 = vld [vmem:[#allocation8 + $0xb0] sm:$0xff] }
 0x2a2   : > { %2796 = vmatpush2.msra.mxu1 %v1441_v54  ;;  %v6928_v30 = vmax.f32 %v3203_v42, %v3211_v0  ;;  %2877 = vmatpush1.msra.mxu0 %v1011_v25  ;;  %v1941_v17 = vpop.f32.mrf.mxu1  ;;  %v1525_v59 = vld [vmem:[#allocation8 + $0x1270] sm:$0xff]  ;;  %v6941_v25 = vld [vmem:[%s6435_s26 + $0x18] sm:$0xff] }
 0x2a3   : > { %2797 = vmatprep.subr.mxu1 %v1415_v60  ;;  %v2054_v47 = vpop.f32.mrf.mxu0  ;;  %2731 = vmatmul.mubr.f32.gmra.mxu0 %v6761_v43  ;;  %v1578_v43 = vld [vmem:[#allocation8 + $0x1418] sm:$0xff]  ;;  %v1524_v60 = vld [vmem:[#allocation8 + $0x1268] sm:$0xff] }
 0x2a4   : > { %2878 = vmatprep.subr.mxu0 %v985_v45  ;;  %v3243_v21 = vmax.f32 %v6852_v22, %v6928_v30  ;;  %2798 = vmatpush2.msra.mxu1 %v1414_v5  ;;  %v1943_v28 = vpop.f32.mrf.mxu1  ;;  %v1310_v42 = vld [vmem:[#allocation8 + $0xbb8] sm:$0xff]  ;;  %v1284_v45 = vld [vmem:[#allocation8 + $0xae8] sm:$0xff]  ;;  %v7054_v22 = vld [vmem:[%s6435_s26 + $0x70] sm:$0xff] }
 0x2a5   : > { %2879 = vmatpush1.msra.mxu0 %v984_v44  ;;  %v2056_v12 = vpop.f32.mrf.mxu0  ;;  %2799 = vmatprep.subr.mxu1 %v1388_v11  ;;  %v3204_v29 = vmax.f32 %v1941_v17, %v1943_v28  ;;  %v1498_v0 = vld [vmem:[#allocation8 + $0x1198] sm:$0xff]  ;;  %v6951_v44 = vld [vmem:[%s6435_s26 + $0x10] sm:$0xff]  ;;  %v1283_v17 = vld [vmem:[#allocation8 + $0xae0] sm:$0xff] }
 0x2a6   : > { %2880 = vmatprep.subr.mxu0 %v958_v23  ;;  %v3212_v38 = vmax.f32 %v2054_v47, %v2056_v12  ;;  %2800 = vmatpush2.msra.mxu1 %v1387_v62  ;;  %v1497_v11 = vld [vmem:[#allocation8 + $0x1190] sm:$0xff]  ;;  %v1471_v47 = vld [vmem:[#allocation8 + $0x10c0] sm:$0xff]  ;;  %v6955_v28 = vld [vmem:[%s6435_s26 + $0x28] sm:$0xff] }
 0x2a7   : > { %4963 = vmatprep.mubr.msk.f32.mxu1 %vm805_vm0, %v6866_v35  ;;  %2881 = vmatpush1.msra.mxu0 %v957_v40  ;;  %v1257_v62 = vld [vmem:[#allocation8 + $0xa10] sm:$0xff]  ;;  %v1444_v12 = vld [vmem:[#allocation8 + $0xfe8] sm:$0xff] }
 0x2a8   : > { %2802 = vmatmul.mubr.f32.vlgmr.msra.gmra.mxu1 %v6872_v6  ;;  %v6936_v26 = vmax.f32 %v3204_v29, %v3212_v38  ;;  %v2125_v20 = vpop.f32.mrf.mxu1  ;;  %2898 = vmatprep.subr.mxu0 %v1579_v33  ;;  %v1230_v33 = vld [vmem:[#allocation8 + $0x938] sm:$0xff]  ;;  %v1443_v29 = vld [vmem:[#allocation8 + $0xfe0] sm:$0xff]  ;;  %v960_v30 = vld [vmem:[#allocation8 + $0xc8] sm:$0xff] }
 0x2a9   : > { %2963 = vmatprep.subr.mxu1 %v1365_v36  ;;  %2899 = vmatpush2.msra.mxu0 %v1578_v43  ;;  %v6960_v36 = vld [vmem:[%s6435_s26 + $0x20] sm:$0xff] }
 0x2aa   : > { %2964 = vmatpush1.msra.mxu1 %v1364_v14  ;;  %v2127_v56 = vpop.f32.mrf.mxu1  ;;  %v3244_v54 = vmax.f32 %v6860_v57, %v6936_v26  ;;  %2900 = vmatprep.subr.mxu0 %v1552_v24  ;;  %v1229_v14 = vld [vmem:[#allocation8 + $0x930] sm:$0xff]  ;;  %v1123_v26 = vld [vmem:[#allocation8 + $0x5e0] sm:$0xff] }
 0x2ab   : > { %2965 = vmatprep.subr.mxu1 %v1338_v46  ;;  %v3213_v58 = vmax.f32 %v2125_v20, %v2127_v56  ;;  %4964 = vmatprep.mubr.msk.f32.mxu1 %vm805_vm0, %v6941_v25  ;;  %v1417_v24 = vld [vmem:[#allocation8 + $0xf10] sm:$0xff]  ;;  %v1203_v46 = vld [vmem:[#allocation8 + $0x860] sm:$0xff] }
 0x2ac   : > { %2901 = vmatpush2.msra.mxu0 %v1551_v16  ;;  %2966 = vmatpush1.msra.mxu1 %v1337_v50  ;;  %v6969_v16 = vld [vmem:[%s6435_s26 + $0x38] sm:$0xff]  ;;  %v1416_v50 = vld [vmem:[#allocation8 + $0xf08] sm:$0xff]  ;;  %v6974_v56 = vld [vmem:[%s6435_s26 + $0x30] sm:$0xff] }
 0x2ad   : > { %2902 = vmatprep.subr.mxu0 %v1525_v59  ;;  %v6948_v5 = vmax.f32 %v3237_v55, %v3213_v58  ;;  %2808 = vmatmul.mubr.f32.gmra.mxu1 %v6951_v44  ;;  %v2131_v23 = vpop.f32.mrf.mxu1  ;;  %v1176_v59 = vld [vmem:[#allocation8 + $0x788] sm:$0xff]  ;;  %v1553_v57 = vld [vmem:[#allocation8 + $0x1350] sm:$0xff] }
 0x2ae   : > { %2967 = vmatprep.subr.mxu1 %v1311_v32  ;;  %2903 = vmatpush2.msra.mxu0 %v1524_v60  ;;  %v1389_v32 = vld [vmem:[#allocation8 + $0xe30] sm:$0xff] }
 0x2af   : > { %2968 = vmatpush1.msra.mxu1 %v1310_v42  ;;  %2904 = vmatprep.subr.mxu0 %v1498_v0  ;;  %v2133_v40 = vpop.f32.mrf.mxu1  ;;  %v1175_v42 = vld [vmem:[#allocation8 + $0x780] sm:$0xff] }
 0x2b0   : > { %2969 = vmatprep.subr.mxu1 %v1284_v45  ;;  %4965 = vmatprep.mubr.msk.f32.mxu1 %vm805_vm0, %v6955_v28  ;;  %v3214_v55 = vmax.f32 %v2131_v23, %v2133_v40  ;;  %v6983_v45 = vld [vmem:[%s6435_s26 + $0x48] sm:$0xff]  ;;  %v7834_v40 = vmov 0.0  }
 0x2b1   : > { %2905 = vmatpush2.msra.mxu0 %v1497_v11  ;;  %2970 = vmatpush1.msra.mxu1 %v1283_v17  ;;  %v1149_v11 = vld [vmem:[#allocation8 + $0x6b0] sm:$0xff]  ;;  %v1122_v17 = vld [vmem:[#allocation8 + $0x5d8] sm:$0xff] }
 0x2b2   : > { %2906 = vmatprep.subr.mxu0 %v1471_v47  ;;  %2814 = vmatmul.mubr.f32.gmra.mxu1 %v6960_v36  ;;  %v6966_v38 = vmax.f32 %v3238_v51, %v3214_v55  ;;  %v2137_v43 = vpop.f32.mrf.mxu1  ;;  %v1390_v51 = vld [vmem:[#allocation8 + $0xe38] sm:$0xff] }
 0x2b3   : > { %2971 = vmatprep.subr.mxu1 %v1257_v62  ;;  %2907 = vmatpush2.msra.mxu0 %v1470_v9  ;;  %v1121_v9 = vld [vmem:[#allocation8 + $0x5d0] sm:$0xff] }
 0x2b4   : > { %2972 = vmatpush1.msra.mxu1 %v1256_v15  ;;  %2908 = vmatprep.subr.mxu0 %v1444_v12  ;;  %v2139_v20 = vpop.f32.mrf.mxu1  ;;  %v1339_v15 = vld [vmem:[#allocation8 + $0xca0] sm:$0xff] }
 0x2b5   : > { %2973 = vmatprep.subr.mxu1 %v1230_v33  ;;  %4966 = vmatprep.mubr.msk.f32.mxu1 %vm805_vm0, %v6969_v16  ;;  %v3215_v49 = vmax.f32 %v2137_v43, %v2139_v20  ;;  %v7002_v33 = vld [vmem:[%s6435_s26 + $0x58] sm:$0xff]  ;;  %v1067_v20 = vld [vmem:[#allocation8 + $0x420] sm:$0xff] }
 0x2b6   : > { %2909 = vmatpush2.msra.mxu0 %v1443_v29  ;;  %2974 = vmatpush1.msra.mxu1 %v1229_v14  ;;  %v7014_v14 = vld [vmem:[%s6435_s26 + $0x50] sm:$0xff] }
 0x2b7   : > { %2910 = vmatprep.subr.mxu0 %v1417_v24  ;;  %2820 = vmatmul.mubr.f32.gmra.mxu1 %v6974_v56  ;;  %v6980_v58 = vmax.f32 %v3239_v19, %v3215_v49  ;;  %v2143_v60 = vpop.f32.mrf.mxu1  ;;  %v6990_v19 = vld [vmem:[%s6435_s26 + $0x40] sm:$0xff]  ;;  %v1068_v24 = vld [vmem:[#allocation8 + $0x428] sm:$0xff] }
 0x2b8   : > { %2975 = vmatprep.subr.mxu1 %v1203_v46  ;;  %2911 = vmatpush2.msra.mxu0 %v1416_v50  ;;  %v1041_v50 = vld [vmem:[#allocation8 + $0x350] sm:$0xff] }
 0x2b9   : > { %2976 = vmatpush1.msra.mxu1 %v1202_v27  ;;  %2912 = vmatprep.subr.mxu0 %v1390_v51  ;;  %v2145_v0 = vpop.f32.mrf.mxu1  ;;  %v1040_v51 = vld [vmem:[#allocation8 + $0x348] sm:$0xff] }
 0x2ba   : > { %2977 = vmatprep.subr.mxu1 %v1176_v59  ;;  %4967 = vmatprep.mubr.msk.f32.mxu1 %vm805_vm0, %v6983_v45  ;;  %v3216_v23 = vmax.f32 %v2143_v60, %v2145_v0  ;;  %v1258_v59 = vld [vmem:[#allocation8 + $0xa18] sm:$0xff] }
 0x2bb   : > { %2913 = vmatpush2.msra.mxu0 %v1389_v32  ;;  %4971 = vmatprep.mubr.msk.f32.mxu0 %vm805_vm0, %v6866_v35  ;;  %v7033_v32 = vld [vmem:[%s6435_s26 + $0x60] sm:$0xff]  ;;  %v1014_v60 = vld [vmem:[#allocation8 + $0x278] sm:$0xff] }
 0x2bc   : > { %2978 = vmatpush1.msra.mxu1 %v1175_v42  ;;  %2915 = vmatmul.mubr.f32.vlgmr.msra.gmra.mxu0 %v6872_v6  ;;  %v6997_v47 = vmax.f32 %v3240_v37, %v3216_v23  ;;  %v1312_v37 = vld [vmem:[#allocation8 + $0xbc8] sm:$0xff]  ;;  %v7045_v23 = vld [vmem:[%s6435_s26 + $0x78] sm:$0xff] }
 0x2bd   : > { %2826 = vmatmul.mubr.f32.gmra.mxu1 %v6990_v19  ;;  %v2149_v62 = vpop.f32.mrf.mxu1  ;;  %2979 = vmatprep.subr.mxu1 %v1149_v11 }
 0x2be   : > { %3076 = vmatprep.subr.mxu0 %v7834_v40  ;;  %2980 = vmatpush1.msra.mxu1 %v1148_v10  ;;  %v987_v10 = vld [vmem:[#allocation8 + $0x1a0] sm:$0xff] }
 0x2bf   : > { %3077 = vmatpush1.msra.mxu0 %v1366_v7  ;;  %v2151_v55 = vpop.f32.mrf.mxu1  ;;  %2981 = vmatprep.subr.mxu1 %v1122_v17  ;;  %v986_v7 = vld [vmem:[#allocation8 + $0x198] sm:$0xff]  ;;  %v1204_v17 = vld [vmem:[#allocation8 + $0x868] sm:$0xff] }
 0x2c0   : > { %3078 = vmatprep.subr.mxu0 %v7834_v40  ;;  %v3217_v12 = vmax.f32 %v2149_v62, %v2151_v55  ;;  %4968 = vmatprep.mubr.msk.f32.mxu1 %vm805_vm0, %v7002_v33  ;;  %v7051_v62 = vpop.f32.mrf.mxu0  ;;  %v1177_v55 = vld [vmem:[#allocation8 + $0x790] sm:$0xff] }
 0x2c1   : > { %4972 = vmatprep.mubr.msk.f32.mxu0 %vm805_vm0, %v6941_v25  ;;  %2982 = vmatpush1.msra.mxu1 %v1121_v9 }
 0x2c2   : > { %3079 = vmatpush1.msra.mxu0 %v1339_v15  ;;  %v7011_v29 = vmax.f32 %v3241_v2, %v3217_v12  ;;  %v2155_v43 = vpop.f32.mrf.mxu1  ;;  %2832 = vmatmul.mubr.f32.gmra.mxu1 %v7014_v14  ;;  %v7021_v2 = vld [vmem:[%s6435_s26 + $0x68] sm:$0xff]  ;;  %v959_v15 = vld [vmem:[#allocation8 + $0xc0] sm:$0xff]  ;;  %v1581_v12 = vld [vmem:[#allocation8 + $0x1430] sm:$0xff] }
 0x2c3   : > { %2921 = vmatmul.mubr.f32.gmra.mxu0 %v6951_v44  ;;  %2983 = vmatprep.subr.mxu1 %v1095_v3 }
 0x2c4   : > { %3080 = vmatprep.subr.mxu0 %v7834_v40  ;;  %v2157_v46 = vpop.f32.mrf.mxu1  ;;  %2984 = vmatpush1.msra.mxu1 %v1094_v53  ;;  %v7065_v53 = vpop.f32.mrf.mxu0 }
 0x2c5   : > { %3081 = vmatpush1.msra.mxu0 %v1312_v37  ;;  %v3218_v63 = vmax.f32 %v2155_v43, %v2157_v46  ;;  %2985 = vmatprep.subr.mxu1 %v1068_v24  ;;  %v1580_v37 = vld [vmem:[#allocation8 + $0x1428] sm:$0xff]  ;;  %v1150_v43 = vld [vmem:[#allocation8 + $0x6b8] sm:$0xff] }
 0x2c6   : > { %3082 = vmatprep.subr.mxu0 %v7834_v40  ;;  %4969 = vmatprep.mubr.msk.f32.mxu1 %vm805_vm0, %v7021_v2  ;;  %v1554_v24 = vld [vmem:[#allocation8 + $0x1358] sm:$0xff] }
 0x2c7   : > { %4973 = vmatprep.mubr.msk.f32.mxu0 %vm805_vm0, %v6955_v28  ;;  %v7030_v27 = vmax.f32 %v3242_v31, %v3218_v63  ;;  %v2161_v49 = vpop.f32.mrf.mxu1  ;;  %2986 = vmatpush1.msra.mxu1 %v1067_v20  ;;  %v1231_v31 = vld [vmem:[#allocation8 + $0x940] sm:$0xff]  ;;  %v1096_v63 = vld [vmem:[#allocation8 + $0x508] sm:$0xff] }
 0x2c8   : > { %3083 = vmatpush1.msra.mxu0 %v1285_v41  ;;  %2838 = vmatmul.mubr.f32.gmra.mxu1 %v7033_v32  ;;  %v1526_v41 = vld [vmem:[#allocation8 + $0x1278] sm:$0xff] }
 0x2c9   : > { %2927 = vmatmul.mubr.f32.gmra.mxu0 %v6960_v36  ;;  %v2163_v42 = vpop.f32.mrf.mxu1  ;;  %2987 = vmatprep.subr.mxu1 %v1041_v50  ;;  %v1500_v50 = vld [vmem:[#allocation8 + $0x11a8] sm:$0xff] }
 0x2ca   : > { %3084 = vmatprep.subr.mxu0 %v7834_v40  ;;  %v3219_v61 = vmax.f32 %v2161_v49, %v2163_v42  ;;  %2988 = vmatpush1.msra.mxu1 %v1040_v51  ;;  %v1499_v51 = vld [vmem:[#allocation8 + $0x11a0] sm:$0xff] }
 0x2cb   : > { %3085 = vmatpush1.msra.mxu0 %v1258_v59  ;;  %2989 = vmatprep.subr.mxu1 %v1014_v60  ;;  %v1069_v59 = vld [vmem:[#allocation8 + $0x430] sm:$0xff] }
 0x2cc   : > { %3086 = vmatprep.subr.mxu0 %v7834_v40  ;;  %v7042_v0 = vmax.f32 %v3243_v21, %v3219_v61  ;;  %v2167_v11 = vpop.f32.mrf.mxu1  ;;  %4970 = vmatprep.mubr.msk.f32.mxu1 %vm805_vm0, %v7045_v23  ;;  %v1473_v60 = vld [vmem:[#allocation8 + $0x10d0] sm:$0xff]  ;;  %v1472_v61 = vld [vmem:[#allocation8 + $0x10c8] sm:$0xff] }
 0x2cd   : > { %4974 = vmatprep.mubr.msk.f32.mxu0 %vm805_vm0, %v6969_v16  ;;  %2990 = vmatpush1.msra.mxu1 %v1013_v48  ;;  %v1042_v48 = vld [vmem:[#allocation8 + $0x358] sm:$0xff] }
 0x2ce   : > { %7906 = vst [vmem:[#allocation49_spill] sm:$0xff] %v7042_v0  ;;  %3087 = vmatpush1.msra.mxu0 %v1231_v31  ;;  %v2169_v9 = vpop.f32.mrf.mxu1  ;;  %2844 = vmatmul.mubr.f32.gmra.mxu1 %v7054_v22  ;;  %v1446_v31 = vld [vmem:[#allocation8 + $0xff8] sm:$0xff] }
 0x2cf   : > { %2933 = vmatmul.mubr.f32.gmra.mxu0 %v6974_v56  ;;  %v3220_v21 = vmax.f32 %v2167_v11, %v2169_v9  ;;  %2991 = vmatprep.subr.mxu1 %v987_v10  ;;  %v1445_v10 = vld [vmem:[#allocation8 + $0xff0] sm:$0xff] }
 0x2d0   : > { %3088 = vmatprep.subr.mxu0 %v7834_v40  ;;  %2992 = vmatpush1.msra.mxu1 %v986_v7  ;;  %v1015_v7 = vld [vmem:[#allocation8 + $0x280] sm:$0xff] }
 0x2d1   : > { %3089 = vmatpush1.msra.mxu0 %v1204_v17  ;;  %v7062_v3 = vmax.f32 %v3244_v54, %v3220_v21  ;;  %2993 = vmatprep.subr.mxu1 %v960_v30  ;;  %v1527_v54 = vld [vmem:[#allocation8 + $0x1280] sm:$0xff]  ;;  %v1418_v30 = vld [vmem:[#allocation8 + $0xf18] sm:$0xff]  ;;  %v988_v21 = vld [vmem:[#allocation8 + $0x1a8] sm:$0xff] }
 0x2d2   : > { %3090 = vmatprep.subr.mxu0 %v7834_v40  ;;  %4975 = vmatprep.mubr.msk.f32.mxu0 %vm805_vm0, %v6983_v45  ;;  %v1419_v17 = vld [vmem:[#allocation8 + $0xf20] sm:$0xff] }
 0x2d3   : > { %7907 = vst [vmem:[#allocation50_spill] sm:$0xff] %v7062_v3  ;;  %2994 = vmatpush1.msra.mxu1 %v959_v15  ;;  %3091 = vmatpush1.msra.mxu0 %v1177_v55  ;;  %v1392_v15 = vld [vmem:[#allocation8 + $0xe48] sm:$0xff]  ;;  %v7359_v3 = vshrl.u32 %v3375_v1, 7 }
 0x2d4   : > { %3011 = vmatprep.subr.mxu1 %v1581_v12  ;;  %v7069_v46 = vpop.f32.mrf.mxu0  ;;  %2939 = vmatmul.mubr.f32.gmra.mxu0 %v6990_v19  ;;  %v1391_v12 = vld [vmem:[#allocation8 + $0xe40] sm:$0xff]  ;;  %v3477_v1 = vld [vmem:[%s7909_s4 + $0x138] sm:$0xff] }
 0x2d5   : > { %3092 = vmatprep.subr.mxu0 %v7834_v40  ;;  %3012 = vmatpush2.msra.mxu1 %v1580_v37  ;;  %v961_v37 = vld [vmem:[#allocation8 + $0xd0] sm:$0xff]  ;;  %7914 = vst [vmem:[#allocation55_spill] sm:$0xff] %v7359_v3 }
 0x2d6   : > { %3093 = vmatpush1.msra.mxu0 %v1150_v43  ;;  %v7073_v20 = vpop.f32.mrf.mxu0  ;;  %3013 = vmatprep.subr.mxu1 %v1554_v24  ;;  %v3483_v24 = vld [vmem:[%s7909_s4 + $0x168] sm:$0xff] }
 0x2d7   : > { %3094 = vmatprep.subr.mxu0 %v7834_v40  ;;  %4976 = vmatprep.mubr.msk.f32.mxu0 %vm805_vm0, %v7002_v33 }
 0x2d8   : > { %3014 = vmatpush2.msra.mxu1 %v1553_v57  ;;  %3095 = vmatpush1.msra.mxu0 %v1123_v26  ;;  %v1582_v57 = vld [vmem:[#allocation8 + $0x1438] sm:$0xff] }
 0x2d9   : > { %3015 = vmatprep.subr.mxu1 %v1527_v54  ;;  %v7078_v49 = vpop.f32.mrf.mxu0  ;;  %2945 = vmatmul.mubr.f32.gmra.mxu0 %v7014_v14  ;;  %v3469_v54 = vld [vmem:[%s7908_s21 + $0xf8] sm:$0xff] }
 0x2da   : > { %3096 = vmatprep.subr.mxu0 %v7834_v40  ;;  %3016 = vmatpush2.msra.mxu1 %v1526_v41  ;;  %v1555_v41 = vld [vmem:[#allocation8 + $0x1360] sm:$0xff] }
 0x2db   : > { %3097 = vmatpush1.msra.mxu0 %v1096_v63  ;;  %v7082_v42 = vpop.f32.mrf.mxu0  ;;  %3017 = vmatprep.subr.mxu1 %v1500_v50  ;;  %v1528_v50 = vld [vmem:[#allocation8 + $0x1288] sm:$0xff] }
 0x2dc   : > { %3098 = vmatprep.subr.mxu0 %v7834_v40  ;;  %4977 = vmatprep.mubr.msk.f32.mxu0 %vm805_vm0, %v7021_v2 }
 0x2dd   : > { %3018 = vmatpush2.msra.mxu1 %v1499_v51  ;;  %3099 = vmatpush1.msra.mxu0 %v1069_v59  ;;  %v3453_v59 = vld [vmem:[%s7909_s4 + $0x78] sm:$0xff] }
 0x2de   : > { %3019 = vmatprep.subr.mxu1 %v1473_v60  ;;  %v7087_v11 = vpop.f32.mrf.mxu0  ;;  %2951 = vmatmul.mubr.f32.gmra.mxu0 %v7033_v32  ;;  %v3484_v60 = vld [vmem:[%s7909_s4 + $0x170] sm:$0xff] }
 0x2df   : > { %3100 = vmatprep.subr.mxu0 %v7834_v40  ;;  %3020 = vmatpush2.msra.mxu1 %v1472_v61  ;;  %v1501_v61 = vld [vmem:[#allocation8 + $0x11b0] sm:$0xff] }
 0x2e0   : > { %3101 = vmatpush1.msra.mxu0 %v1042_v48  ;;  %v7091_v9 = vpop.f32.mrf.mxu0  ;;  %3021 = vmatprep.subr.mxu1 %v1446_v31  ;;  %v1474_v48 = vld [vmem:[#allocation8 + $0x10d8] sm:$0xff] }
 0x2e1   : > { %3102 = vmatprep.subr.mxu0 %v7834_v40  ;;  %4978 = vmatprep.mubr.msk.f32.mxu0 %vm805_vm0, %v7045_v23 }
 0x2e2   : > { %3022 = vmatpush2.msra.mxu1 %v1445_v10  ;;  %3103 = vmatpush1.msra.mxu0 %v1015_v7  ;;  %v3452_v7 = vld [vmem:[%s7909_s4 + $0x70] sm:$0xff] }
 0x2e3   : > { %3023 = vmatprep.subr.mxu1 %v1419_v17  ;;  %v7096_v55 = vpop.f32.mrf.mxu0  ;;  %2957 = vmatmul.mubr.f32.gmra.mxu0 %v7054_v22  ;;  %v3467_v17 = vld [vmem:[%s7909_s4 + $0xe8] sm:$0xff] }
 0x2e4   : > { %3104 = vmatprep.subr.mxu0 %v7834_v40  ;;  %3024 = vmatpush2.msra.mxu1 %v1418_v30  ;;  %v1447_v30 = vld [vmem:[#allocation8 + $0x1000] sm:$0xff] }
 0x2e5   : > { %3105 = vmatpush1.msra.mxu0 %v988_v21  ;;  %v7100_v43 = vpop.f32.mrf.mxu0  ;;  %3025 = vmatprep.subr.mxu1 %v1392_v15  ;;  %v7107_v26 = vpop.f32.mrf.mxu1 }
 0x2e6   : > { %3106 = vmatprep.subr.mxu0 %v7834_v40  ;;  %3026 = vmatpush2.msra.mxu1 %v1391_v12  ;;  %v1420_v12 = vld [vmem:[#allocation8 + $0xf28] sm:$0xff] }
 0x2e7   : > { %4979 = vmatprep.mubr.msk.f32.mxu1 %vm805_vm0, %v6866_v35  ;;  %3107 = vmatpush1.msra.mxu0 %v961_v37 }
 0x2e8   : > { %3028 = vmatmul.mubr.f32.vlgmr.msra.gmra.mxu1 %v6872_v6  ;;  %3124 = vmatprep.subr.mxu0 %v7834_v40  ;;  %v7121_v6 = vpop.f32.mrf.mxu1 }
 0x2e9   : > { %4980 = vmatprep.mubr.msk.f32.mxu1 %vm805_vm0, %v6941_v25  ;;  %v7116_v63 = vpop.f32.mrf.mxu0  ;;  %3125 = vmatpush2.msra.mxu0 %v1582_v57  ;;  %v3451_v57 = vld [vmem:[%s7909_s4 + $0x68] sm:$0xff]  ;;  %v3261_v0 = vmax.f32 %v7107_v26, %v7121_v6  ;;  %v3381_v26 = vsub.s32 1, %v7359_v3 }
 0x2ea   : > { %4987 = vmatprep.mubr.msk.f32.mxu0 %vm805_vm0, %v6866_v35  ;;  %3126 = vmatprep.subr.mxu0 %v7834_v40  ;;  %v3468_v35 = vld [vmem:[%s7909_s4 + $0xf0] sm:$0xff] }
 0x2eb   : > { %v7123_v51 = vpop.f32.mrf.mxu0  ;;  %5047 = vmatprep.subr.mxu1 %v3469_v54  ;;  %3127 = vmatpush2.msra.mxu0 %v1555_v41  ;;  %v7138_v31 = vpop.f32.mrf.mxu1  ;;  %v3466_v54 = vld [vmem:[%s7909_s4 + $0xe0] sm:$0xff] }
 0x2ec   : > { %3034 = vmatmul.mubr.f32.gmra.mxu1 %v6951_v44  ;;  %3128 = vmatprep.subr.mxu0 %v7834_v40  ;;  %v1393_v41 = vld [vmem:[#allocation8 + $0xe50] sm:$0xff] }
 0x2ed   : > { %4981 = vmatprep.mubr.msk.f32.mxu1 %vm805_vm0, %v6955_v28  ;;  %3129 = vmatpush2.msra.mxu0 %v1528_v50  ;;  %v7157_v37 = vpop.f32.mrf.mxu1 }
 0x2ee   : > { %5048 = vmatpush3.msra.mxu1 %v3453_v59  ;;  %3130 = vmatprep.subr.mxu0 %v7834_v40 }
 0x2ef   : > { %v7140_v10 = vpop.f32.mrf.mxu0  ;;  %5049 = vmatprep.subr.mxu1 %v3468_v35  ;;  %3131 = vmatpush2.msra.mxu0 %v1501_v61  ;;  %v3450_v61 = vld [vmem:[%s7909_s4 + $0x60] sm:$0xff] }
 0x2f0   : > { %3040 = vmatmul.mubr.f32.gmra.mxu1 %v6960_v36  ;;  %3132 = vmatprep.subr.mxu0 %v7834_v40 }
 0x2f1   : > { %4982 = vmatprep.mubr.msk.f32.mxu1 %vm805_vm0, %v6969_v16  ;;  %v7152_v21 = vpop.f32.mrf.mxu0  ;;  %3133 = vmatpush2.msra.mxu0 %v1474_v48  ;;  %v7172_v59 = vpop.f32.mrf.mxu1 }
 0x2f2   : > { %5050 = vmatpush3.msra.mxu1 %v3452_v7  ;;  %3134 = vmatprep.subr.mxu0 %v7834_v40  ;;  %v3465_v7 = vld [vmem:[%s7909_s4 + $0xd8] sm:$0xff] }
 0x2f3   : > { %5051 = vmatprep.subr.mxu1 %v3467_v17  ;;  %3135 = vmatpush2.msra.mxu0 %v1447_v30  ;;  %v5559_v17 = vld [vmem:[%s6435_s26] sm:$0xff]  ;;  %v7190_v30 = vpop.f32.mrf.mxu1  ;;  %s4617_s26 = sshll.u32 %s762_s30, 4  ;;  %s4618_s26 = int_to_ptr.vmem [resolvable:$true] %s4617_s26 }
 0x2f4   : > { %3046 = vmatmul.mubr.f32.gmra.mxu1 %v6974_v56  ;;  %3136 = vmatprep.subr.mxu0 %v7834_v40  ;;  %s5930_s1 = scalar_lea.vmem %s4618_s26, 128 }
 0x2f5   : > { %4983 = vmatprep.mubr.msk.f32.mxu1 %vm805_vm0, %v6983_v45  ;;  %v7169_v50 = vpop.f32.mrf.mxu0  ;;  %3137 = vmatpush2.msra.mxu0 %v1420_v12  ;;  %v3449_v12 = vld [vmem:[%s7909_s4 + $0x58] sm:$0xff]  ;;  %p5931_p7 = scmp.ne.s32.totalorder %s4618_s26, %s5930_s1 }
 0x2f6   : > { %7910 = vst [vmem:[#allocation51_spill] sm:$0xff] %v7169_v50  ;;  %5052 = vmatpush3.msra.mxu1 %v3451_v57  ;;  %3138 = vmatprep.subr.mxu0 %v7834_v40  ;;  %v3464_v57 = vld [vmem:[%s7909_s4 + $0xd0] sm:$0xff] }
 0x2f7   : > { %v7174_v35 = vpop.f32.mrf.mxu0  ;;  %5053 = vmatprep.subr.mxu1 %v3466_v54  ;;  %3139 = vmatpush2.msra.mxu0 %v1393_v41  ;;  %v3448_v54 = vld [vmem:[%s7909_s4 + $0x50] sm:$0xff]  ;;  %p5932_p9 = pnand %p5931_p7, %p7946_p12 }
 0x2f8   : > { %7911 = vst [vmem:[#allocation52_spill] sm:$0xff] %v7174_v35  ;;  %3052 = vmatmul.mubr.f32.gmra.mxu1 %v6990_v19  ;;  %3141 = vmatmul.mubr.f32.vlgmr.msra.gmra.mxu0 %v5559_v17 }
 0x2f9   : > { %4984 = vmatprep.mubr.msk.f32.mxu1 %vm805_vm0, %v7002_v33  ;;  %4988 = vmatprep.mubr.msk.f32.mxu0 %vm805_vm0, %v6941_v25  ;;  %v7204_v25 = vpop.f32.mrf.mxu1  ;;  %p5933_p13 = pneg %p5932_p9 }
 0x2fa   : > { %5054 = vmatpush3.msra.mxu1 %v3450_v61  ;;  %v3462_v61 = vld [vmem:[%s7909_s4 + $0xc0] sm:$0xff] }
 0x2fb   : > { %5055 = vmatprep.subr.mxu1 %v3465_v7  ;;  %v7221_v41 = vpop.f32.mrf.mxu1  ;;  %v3445_v7 = vld [vmem:[%s7909_s4 + $0x38] sm:$0xff] }
 0x2fc   : > { %3058 = vmatmul.mubr.f32.gmra.mxu1 %v7014_v14  ;;  %3146 = vmatmul.mubr.f32.gmra.mxu0 %v6951_v44  ;;  %v3463_v44 = vld [vmem:[%s7909_s4 + $0xc8] sm:$0xff] }
 0x2fd   : > { %4985 = vmatprep.mubr.msk.f32.mxu1 %vm805_vm0, %v7021_v2  ;;  %4989 = vmatprep.mubr.msk.f32.mxu0 %vm805_vm0, %v6955_v28  ;;  %v3447_v28 = vld [vmem:[%s7909_s4 + $0x48] sm:$0xff]  ;;  %v7239_v17 = vpop.f32.mrf.mxu1 }
 0x2fe   : > { %5056 = vmatpush3.msra.mxu1 %v3449_v12  ;;  %v3444_v12 = vld [vmem:[%s7909_s4 + $0x30] sm:$0xff] }
 0x2ff   : > { %5057 = vmatprep.subr.mxu1 %v3464_v57  ;;  %v3443_v57 = vld [vmem:[%s7909_s4 + $0x28] sm:$0xff] }
 0x300   : > { %3064 = vmatmul.mubr.f32.gmra.mxu1 %v7033_v32  ;;  %3151 = vmatmul.mubr.f32.gmra.mxu0 %v6960_v36  ;;  %v3446_v36 = vld [vmem:[%s7909_s4 + $0x40] sm:$0xff] }
 0x301   : > { %4986 = vmatprep.mubr.msk.f32.mxu1 %vm805_vm0, %v7045_v23  ;;  %4990 = vmatprep.mubr.msk.f32.mxu0 %vm805_vm0, %v6969_v16  ;;  %v3461_v16 = vld [vmem:[%s7909_s4 + $0xb8] sm:$0xff] }
 0x302   : > { %5058 = vmatpush3.msra.mxu1 %v3448_v54  ;;  %v7256_v54 = vpop.f32.mrf.mxu1 }
 0x303   : > { %5059 = vmatprep.subr.mxu1 %v3463_v44  ;;  %v3442_v44 = vld [vmem:[%s7909_s4 + $0x20] sm:$0xff] }
 0x304   : > { %3070 = vmatmul.mubr.f32.gmra.mxu1 %v7054_v22  ;;  %3156 = vmatmul.mubr.f32.gmra.mxu0 %v6974_v56  ;;  %v3460_v56 = vld [vmem:[%s7909_s4 + $0xb0] sm:$0xff] }
 0x305   : > { %5060 = vmatpush3.msra.mxu1 %v3447_v28  ;;  %4991 = vmatprep.mubr.msk.f32.mxu0 %vm805_vm0, %v6983_v45  ;;  %v3459_v45 = vld [vmem:[%s7909_s4 + $0xa8] sm:$0xff]  ;;  %v7270_v28 = vpop.f32.mrf.mxu0 }
 0x306   : > { %5061 = vmatprep.subr.mxu1 %v3462_v61  ;;  %v3441_v61 = vld [vmem:[%s7909_s4 + $0x18] sm:$0xff] }
 0x307   : > { %5062 = vmatpush3.msra.mxu1 %v3446_v36  ;;  %v7275_v36 = vpop.f32.mrf.mxu1 }
 0x308   : > { %5063 = vmatprep.subr.mxu1 %v3461_v16  ;;  %3161 = vmatmul.mubr.f32.gmra.mxu0 %v6990_v19  ;;  %v3458_v19 = vld [vmem:[%s7909_s4 + $0xa0] sm:$0xff]  ;;  %v3440_v16 = vld [vmem:[%s7909_s4 + $0x10] sm:$0xff] }
 0x309   : > { %5064 = vmatpush3.msra.mxu1 %v3445_v7  ;;  %4992 = vmatprep.mubr.msk.f32.mxu0 %vm805_vm0, %v7002_v33  ;;  %v3457_v33 = vld [vmem:[%s7909_s4 + $0x98] sm:$0xff]  ;;  %v7289_v7 = vpop.f32.mrf.mxu0 }
 0x30a   : > { %5065 = vmatprep.subr.mxu1 %v3460_v56  ;;  %v3439_v56 = vld [vmem:[%s7909_s4 + $0x8] sm:$0xff] }
 0x30b   : > { %5066 = vmatpush3.msra.mxu1 %v3444_v12  ;;  %v7294_v12 = vpop.f32.mrf.mxu1 }
 0x30c   : > { %5067 = vmatprep.subr.mxu1 %v3459_v45  ;;  %3166 = vmatmul.mubr.f32.gmra.mxu0 %v7014_v14  ;;  %v3456_v14 = vld [vmem:[%s7909_s4 + $0x90] sm:$0xff] }
 0x30d   : > { %5068 = vmatpush3.msra.mxu1 %v3443_v57  ;;  %4993 = vmatprep.mubr.msk.f32.mxu0 %vm805_vm0, %v7021_v2  ;;  %v3455_v2 = vld [vmem:[%s7909_s4 + $0x88] sm:$0xff] }
 0x30e   : > { %5069 = vmatprep.subr.mxu1 %v3458_v19  ;;  %v7307_v19 = vpop.f32.mrf.mxu1 }
 0x30f   : > { %5070 = vmatpush3.msra.mxu1 %v3442_v44 }
 0x310   : > { %5071 = vmatprep.subr.mxu1 %v3457_v33  ;;  %3171 = vmatmul.mubr.f32.gmra.mxu0 %v7033_v32  ;;  %v3454_v32 = vld [vmem:[%s7909_s4 + $0x80] sm:$0xff]  ;;  %v7312_v33 = vpop.f32.mrf.mxu1 }
 0x311   : > { %5072 = vmatpush3.msra.mxu1 %v3441_v61  ;;  %4994 = vmatprep.mubr.msk.f32.mxu0 %vm805_vm0, %v7045_v23  ;;  %v3438_v23 = vld [vmem:[%s7909_s4] sm:$0xff] }
 0x312   : > { %5073 = vmatprep.subr.mxu1 %v3456_v14 }
 0x313   : > { %5074 = vmatpush3.msra.mxu1 %v3440_v16  ;;  %v7318_v16 = vpop.f32.mrf.mxu1 }
 0x314   : > { %v7299_v45 = vpop.f32.mrf.mxu0  ;;  %5075 = vmatprep.subr.mxu1 %v3455_v2  ;;  %3176 = vmatmul.mubr.f32.gmra.mxu0 %v7054_v22  ;;  %7912 = vst [vmem:[#allocation53_spill] sm:$0xff] %v7318_v16  ;;  %v3269_v16 = vmax.f32 %v7270_v28, %v7289_v7  ;;  %v3476_v28 = vld [vmem:[%s7909_s4 + $0x130] sm:$0xff] }
 0x315   : > { %5076 = vmatpush3.msra.mxu1 %v3439_v56  ;;  %v7322_v2 = vpop.f32.mrf.mxu1 }
 0x316   : > { %v7305_v57 = vpop.f32.mrf.mxu0  ;;  %5077 = vmatprep.subr.mxu1 %v3454_v32  ;;  %7913 = vst [vmem:[#allocation54_spill] sm:$0xff] %v7322_v2 }
 0x317   : > { %5078 = vmatpush3.msra.mxu1 %v3438_v23 }
 0x318   : > { %5260 = vmatprep.subr.mxu1 %v7834_v40  ;;  %v3485_v40 = vld [vmem:[%s7909_s4 + $0x178] sm:$0xff] }
 0x319   : > { %v7310_v44 = vpop.f32.mrf.mxu0  ;;  %5196 = vmatprep.subr.mxu0 %v3485_v40 }
 0x31a   : > { %5197 = vmatpush3.msra.mxu0 %v3485_v40 }
 0x31b   : > { %v7314_v61 = vpop.f32.mrf.mxu0  ;;  %5198 = vmatprep.subr.mxu0 %v3484_v60 }
 0x31c   : > { %5199 = vmatpush3.msra.mxu0 %v3484_v60 }
 0x31d   : > { %5200 = vmatprep.subr.mxu0 %v3483_v24 }
 0x31e   : > { %v7316_v14 = vpop.f32.mrf.mxu0  ;;  %5201 = vmatpush3.msra.mxu0 %v3483_v24  ;;  %v3480_v24 = vld [vmem:[%s7909_s4 + $0x150] sm:$0xff] }
 0x31f   : > { %5202 = vmatprep.subr.mxu0 %v3482_v34 }
 0x320   : > { %v7320_v22 = vpop.f32.mrf.mxu0  ;;  %5203 = vmatpush3.msra.mxu0 %v3482_v34 }
 0x321   : > { %5204 = vmatprep.subr.mxu0 %v3481_v8 }
 0x322   : > { %5205 = vmatpush3.msra.mxu0 %v3481_v8  ;;  %v3478_v8 = vld [vmem:[%s7909_s4 + $0x140] sm:$0xff] }
 0x323   : > { %v7324_v56 = vpop.f32.mrf.mxu0  ;;  %5206 = vmatprep.subr.mxu0 %v3480_v24 }
 0x324   : > { %5207 = vmatpush3.msra.mxu0 %v3480_v24 }
 0x325   : > { %v2577_v32 = vpop.f32.mrf.mxu1  ;;  %v7326_v23 = vpop.f32.mrf.mxu0  ;;  %5208 = vmatprep.subr.mxu0 %v3479_v4 }
 0x326   : > { %5209 = vmatpush3.msra.mxu0 %v3479_v4  ;;  %v7376_v4 = vld [vmem:[#allocation10] sm:$0x7] }
 0x327   : > { %v2579_v48 = vpop.f32.mrf.mxu1  ;;  %5210 = vmatprep.subr.mxu0 %v3478_v8 }
 0x328   : > { %v3277_v35 = vmax.f32 %v2577_v32, %v2579_v48  ;;  %v7374_v48 = vsub.s32 0, %v7359_v3  ;;  %5211 = vmatpush3.msra.mxu0 %v3478_v8  ;;  %v3253_v32 = vmax.f32 %v7051_v62, %v7065_v53  ;;  %v3475_v53 = vld [vmem:[%s7909_s4 + $0x128] sm:$0xff] }
 0x329   : > { %v7331_v15 = vpop.f32.mrf.mxu0  ;;  %5212 = vmatprep.subr.mxu0 %v3477_v1 }
 0x32a   : > { %7916 = vst [vmem:[#allocation57_spill] sm:$0xff] %v7374_v48  ;;  %v3293_v24 = vmax.f32 %v3269_v16, %v3277_v35  ;;  %5213 = vmatpush3.msra.mxu0 %v3477_v1  ;;  %v3285_v7 = vmax.f32 %v3253_v32, %v3261_v0  ;;  %v7392_v62 = vrot.slane %v7376_v4, %v7374_v48  ;;  %v3474_v32 = vld [vmem:[%s7909_s4 + $0x120] sm:$0xff] }
 0x32b   : > { %v7339_v13 = vpop.f32.mrf.mxu0  ;;  %v2583_v39 = vpop.f32.mrf.mxu1  ;;  %5214 = vmatprep.subr.mxu0 %v3476_v28  ;;  %v3262_v35 = vmax.f32 %v7138_v31, %v7157_v37  ;;  %v3270_v16 = vmax.f32 %v7299_v45, %v7305_v57 }
 0x32c   : > { %5215 = vmatpush3.msra.mxu0 %v3476_v28  ;;  %v3301_v0 = vmax.f32 %v3285_v7, %v3293_v24  ;;  %v3254_v28 = vmax.f32 %v7069_v46, %v7073_v20  ;;  %v3390_v45 = vadd.f32 %v7392_v62, %v6948_v5  ;;  %v3473_v24 = vld [vmem:[%s7909_s4 + $0x118] sm:$0xff]  ;;  %v3472_v46 = vld [vmem:[%s7909_s4 + $0x110] sm:$0xff]  ;;  %v3263_v5 = vmax.f32 %v7172_v59, %v7190_v30 }
 0x32d   : > { %v2585_v40 = vpop.f32.mrf.mxu1  ;;  %5216 = vmatprep.subr.mxu0 %v3475_v53  ;;  %v3271_v20 = vmax.f32 %v7310_v44, %v7314_v61  ;;  %v3393_v59 = vadd.f32 %v7392_v62, %v6966_v38  ;;  %v3470_v44 = vld [vmem:[%s7909_s4 + $0x100] sm:$0xff]  ;;  %v3272_v38 = vmax.f32 %v7316_v14, %v7320_v22 }
 0x32e   : > { %v3278_v8 = vmax.f32 %v2583_v39, %v2585_v40  ;;  %v7402_v39 = vrot.slane %v7376_v4, %v3381_v26  ;;  %5217 = vmatpush3.msra.mxu0 %v3475_v53  ;;  %v3286_v26 = vmax.f32 %v3254_v28, %v3262_v35  ;;  %v3414_v35 = vmax.f32 %v3390_v45, 0.0 }
 0x32f   : > { %v7347_v18 = vpop.f32.mrf.mxu0  ;;  %5218 = vmatprep.subr.mxu0 %v3474_v32 }
 0x330   : > { %v3294_v31 = vmax.f32 %v3270_v16, %v3278_v8  ;;  %5219 = vmatpush3.msra.mxu0 %v3474_v32 }
 0x331   : > { %v7349_v52 = vpop.f32.mrf.mxu0  ;;  %v7354_v60 = vpop.f32.mrf.mxu1  ;;  %5220 = vmatprep.subr.mxu0 %v3473_v24 }
 0x332   : > { %5221 = vmatpush3.msra.mxu0 %v3473_v24  ;;  %v3302_v16 = vmax.f32 %v3286_v26, %v3294_v31  ;;  %v3264_v31 = vmax.f32 %v7204_v25, %v7221_v41  ;;  %v3417_v26 = vmax.f32 %v3393_v59, 0.0 }
 0x333   : > { %v2591_v34 = vpop.f32.mrf.mxu1  ;;  %5222 = vmatprep.subr.mxu0 %v3472_v46 }
 0x334   : > { %v3279_v7 = vmax.f32 %v7354_v60, %v2591_v34  ;;  %5223 = vmatpush3.msra.mxu0 %v3472_v46  ;;  %v3471_v34 = vld [vmem:[%s7909_s4 + $0x108] sm:$0xff] }
 0x335   : > { %v7361_v50 = vpop.f32.mrf.mxu0  ;;  %5224 = vmatprep.subr.mxu0 %v3471_v34 }
 0x336   : > { %7915 = vst [vmem:[#allocation56_spill] sm:$0xff] %v7361_v50  ;;  %5225 = vmatpush3.msra.mxu0 %v3471_v34 }
 0x337   : > { %v7380_v50 = vpop.f32.mrf.mxu1  ;;  %v7383_v6 = vpop.f32.mrf.mxu0  ;;  %5226 = vmatprep.subr.mxu0 %v3470_v44 }
 0x338   : > { %5227 = vmatpush3.msra.mxu0 %v3470_v44 }
 0x339   : > { %v7388_v2 = vpop.f32.mrf.mxu1 }
 0x33c   : > { %v2690_v1 = vpop.f32.mrf.mxu0 }
 0x33d   : > { %v7404_v40 = vpop.f32.mrf.mxu1  ;;  %v3309_v37 = vmax.f32 %v3301_v0, %v2690_v1  ;;  %v3255_v0 = vmax.f32 %v7078_v49, %v7082_v42  ;;  %v3295_v1 = vmax.f32 %v3271_v20, %v3279_v7  ;;  %v3280_v49 = vmax.f32 %v7380_v50, %v7388_v2 }
 0x33e   : > { %v7413_v57 = vpop.f32.mrf.mxu0  ;;  %v3396_v2 = vadd.f32 %v7392_v62, %v6980_v58  ;;  %v3265_v20 = vmax.f32 %v7239_v17, %v7256_v54  ;;  %v7917_v17 = vmax.f32 %v7096_v55, %v7100_v43  ;;  %v3402_v55 = vadd.f32 %v7392_v62, %v7011_v29 }
 0x33f   : > { %v3391_v53 = vadd.f32 %v7402_v39, %v3309_v37  ;;  %v2603_v48 = vpop.f32.mrf.mxu1  ;;  %v3287_v61 = vmax.f32 %v3255_v0, %v3263_v5  ;;  %v3296_v46 = vmax.f32 %v3272_v38, %v3280_v49  ;;  %v7918_v43 = vmax.f32 %v7116_v63, %v7123_v51 }
 0x340   : > { %v3281_v41 = vmax.f32 %v7404_v40, %v2603_v48  ;;  %v3399_v48 = vadd.f32 %v7392_v62, %v6997_v47  ;;  %v3289_v54 = vmax.f32 %v7917_v17, %v3265_v20  ;;  %v3405_v51 = vadd.f32 %v7392_v62, %v7030_v27 }
 0x341   : > { %v3415_v8 = vmax.f32 %v3391_v53, 0.0  ;;  %v3303_v24 = vmax.f32 %v3287_v61, %v3295_v1  ;;  %v3256_v53 = vmax.f32 %v7087_v11, %v7091_v9  ;;  %v3273_v11 = vmax.f32 %v7324_v56, %v7326_v23 }
 0x342   : > { %v2607_v32 = vpop.f32.mrf.mxu1  ;;  %v3266_v23 = vmax.f32 %v7275_v36, %v7294_v12  ;;  %v3274_v1 = vmax.f32 %v7331_v15, %v7339_v13  ;;  %v3423_v47 = vmax.f32 %v3399_v48, 0.0  ;;  %v3267_v13 = vmax.f32 %v7307_v19, %v7312_v33 }
 0x343   : > { %v2696_v60 = vpop.f32.mrf.mxu0  ;;  %3550 = vmatprep.mubr.f32.mxu1 %v3415_v8  ;;  %v3288_v25 = vmax.f32 %v3256_v53, %v3264_v31  ;;  %v3297_v58 = vmax.f32 %v3273_v11, %v3281_v41  ;;  %v3275_v15 = vmax.f32 %v7347_v18, %v7349_v52  ;;  %v7919_v53 = vmax.f32 %v7140_v10, %v7152_v21  ;;  %v7920_v52 = vld [vmem:[#allocation54_spill] sm:$0xff]  ;;  %v7921_v18 = vld [vmem:[#allocation53_spill] sm:$0xff] }
 0x344   : > { %v3310_v28 = vmax.f32 %v3302_v16, %v2696_v60  ;;  %3551 = vmatmul.mubr.f32.vlgmr.msra.gmra.mxu1 %v3414_v35  ;;  %v2609_v45 = vpop.f32.mrf.mxu1  ;;  %v3420_v16 = vmax.f32 %v3396_v2, 0.0  ;;  %v3290_v31 = vmax.f32 %v7918_v43, %v3266_v23  ;;  %v3429_v20 = vmax.f32 %v3405_v51, 0.0  ;;  %v7923_v10 = vld [vmem:[#allocation49_spill] sm:$0xff] }
 0x345   : > { %v7434_v30 = vpop.f32.mrf.mxu0  ;;  %v3304_v8 = vmax.f32 %v3288_v25, %v3296_v46  ;;  %v3282_v40 = vmax.f32 %v2607_v32, %v2609_v45  ;;  %v3305_v44 = vmax.f32 %v3289_v54, %v3297_v58  ;;  %v3291_v19 = vmax.f32 %v7919_v53, %v3267_v13  ;;  %v7927_v54 = vld [vmem:[#allocation50_spill] sm:$0xff] }
 0x346   : > { %v3394_v42 = vadd.f32 %v7402_v39, %v3310_v28  ;;  %v3268_v46 = vmax.f32 %v7921_v18, %v7920_v52  ;;  %v3408_v21 = vadd.f32 %v7392_v62, %v7923_v10 }
 0x347   : > { %v3298_v32 = vmax.f32 %v3274_v1, %v3282_v40 }
 0x348   : > { %v3418_v37 = vmax.f32 %v3394_v42, 0.0  ;;  %v2613_v14 = vpop.f32.mrf.mxu1  ;;  %v3432_v40 = vmax.f32 %v3408_v21, 0.0 }
 0x349   : > { %v2702_v7 = vpop.f32.mrf.mxu0 }
 0x34a   : > { %v3311_v50 = vmax.f32 %v3303_v24, %v2702_v7  ;;  %3555 = vmatprep.mubr.f32.mxu1 %v3418_v37  ;;  %v2615_v60 = vpop.f32.mrf.mxu1  ;;  %v3306_v37 = vmax.f32 %v3290_v31, %v3298_v32 }
 0x34b   : > { %v7450_v5 = vpop.f32.mrf.mxu0  ;;  %3556 = vmatmul.mubr.f32.gmra.mxu1 %v3417_v26  ;;  %v3283_v49 = vmax.f32 %v2613_v14, %v2615_v60  ;;  %v3426_v26 = vmax.f32 %v3402_v55, 0.0 }
 0x34c   : > { %v3397_v22 = vadd.f32 %v7402_v39, %v3311_v50  ;;  %v7922_v50 = vld [vmem:[#allocation56_spill] sm:$0xff] }
 0x34d   : > { %v3299_v45 = vmax.f32 %v3275_v15, %v3283_v49  ;;  %v3276_v2 = vmax.f32 %v7922_v50, %v7383_v6 }
 0x34e   : > { %v3421_v9 = vmax.f32 %v3397_v22, 0.0  ;;  %v2619_v28 = vpop.f32.mrf.mxu1 }
 0x34f   : > { %v2708_v35 = vpop.f32.mrf.mxu0  ;;  %v3307_v41 = vmax.f32 %v3291_v19, %v3299_v45 }
 0x350   : > { %v3312_v34 = vmax.f32 %v3304_v8, %v2708_v35  ;;  %3560 = vmatprep.mubr.f32.mxu1 %v3421_v9  ;;  %v2621_v12 = vpop.f32.mrf.mxu1  ;;  %v7924_v9 = vld [vmem:[#allocation51_spill] sm:$0xff]  ;;  %v7925_v8 = vld [vmem:[#allocation52_spill] sm:$0xff] }
 0x351   : > { %v7460_v0 = vpop.f32.mrf.mxu0  ;;  %3561 = vmatmul.mubr.f32.gmra.mxu1 %v3420_v16  ;;  %v3284_v7 = vmax.f32 %v2619_v28, %v2621_v12  ;;  %v7926_v16 = vmax.f32 %v7924_v9, %v7925_v8 }
 0x352   : > { %v3400_v56 = vadd.f32 %v7402_v39, %v3312_v34 }
 0x353   : > { %v3300_v14 = vmax.f32 %v3276_v2, %v3284_v7  ;;  %v3292_v35 = vmax.f32 %v7926_v16, %v3268_v46  ;;  %v3385_v16 = vsub.s32 2, %v7359_v3 }
 0x354   : > { %v3424_v59 = vmax.f32 %v3400_v56, 0.0  ;;  %v2714_v61 = vpop.f32.mrf.mxu0  ;;  %v3411_v56 = vadd.f32 %v7392_v62, %v7927_v54 }
 0x355   : > { %v3313_v42 = vmax.f32 %v3305_v44, %v2714_v61  ;;  %v3308_v60 = vmax.f32 %v3292_v35, %v3300_v14 }
 0x356   : > { %3565 = vmatprep.mubr.f32.mxu1 %v3424_v59  ;;  %v7475_v36 = vpop.f32.mrf.mxu0  ;;  %v3435_v28 = vmax.f32 %v3411_v56, 0.0 }
 0x357   : > { %3566 = vmatmul.mubr.f32.gmra.mxu1 %v3423_v47  ;;  %v3403_v38 = vadd.f32 %v7402_v39, %v3313_v42 }
 0x359   : > { %v3427_v24 = vmax.f32 %v3403_v38, 0.0  ;;  %v2720_v29 = vpop.f32.mrf.mxu0 }
 0x35a   : > { %v3314_v63 = vmax.f32 %v3306_v37, %v2720_v29 }
 0x35b   : > { %v7487_v33 = vpop.f32.mrf.mxu0  ;;  %3570 = vmatprep.mubr.f32.mxu1 %v3427_v24 }
 0x35c   : > { %v3406_v25 = vadd.f32 %v7402_v39, %v3314_v63  ;;  %3571 = vmatmul.mubr.f32.gmra.mxu1 %v3426_v26 }
 0x35e   : > { %v3430_v22 = vmax.f32 %v3406_v25, 0.0  ;;  %v2726_v27 = vpop.f32.mrf.mxu0 }
 0x35f   : > { %v3315_v11 = vmax.f32 %v3307_v41, %v2726_v27 }
 0x360   : > { %v7499_v58 = vpop.f32.mrf.mxu0  ;;  %3575 = vmatprep.mubr.f32.mxu1 %v3430_v22 }
 0x361   : > { %v3409_v6 = vadd.f32 %v7402_v39, %v3315_v11  ;;  %3576 = vmatmul.mubr.f32.gmra.mxu1 %v3429_v20 }
 0x363   : > { %v3433_v34 = vmax.f32 %v3409_v6, 0.0  ;;  %v2732_v48 = vpop.f32.mrf.mxu0 }
 0x364   : > { %v3316_v17 = vmax.f32 %v3308_v60, %v2732_v48 }
 0x365   : > { %3580 = vmatprep.mubr.f32.mxu1 %v3433_v34  ;;  %v7505_v61 = vpop.f32.mrf.mxu0 }
 0x366   : > { %v3412_v23 = vadd.f32 %v7402_v39, %v3316_v17  ;;  %3581 = vmatmul.mubr.f32.gmra.mxu1 %v3432_v40  ;;  %7928 = vst [vmem:[#allocation54_spill] sm:$0xff] %v7505_v61 }
 0x368   : > { %v3436_v1 = vmax.f32 %v3412_v23, 0.0  ;;  %v2803_v59 = vpop.f32.mrf.mxu1  ;;  %v7554_v23 = vrot.slane %v7376_v4, %v3385_v16 }
 0x369   : > { %v3317_v6 = vmax.f32 %v7413_v57, %v2803_v59 }
 0x36a   : > { %3585 = vmatprep.mubr.f32.mxu1 %v3436_v1  ;;  %v2805_v44 = vpop.f32.mrf.mxu1 }
 0x36b   : > { %3586 = vmatmul.mubr.f32.gmra.mxu1 %v3435_v28 }
 0x36d   : > { %v2809_v47 = vpop.f32.mrf.mxu1 }
 0x36e   : > { %v3318_v28 = vmax.f32 %v7434_v30, %v2809_v47 }
 0x36f   : > { %v2811_v32 = vpop.f32.mrf.mxu1 }
 0x372   : > { %v7507_v49 = vpop.f32.mrf.mxu1 }
 0x374   : > { %v7509_v55 = vpop.f32.mrf.mxu1 }
 0x377   : > { %v7511_v43 = vpop.f32.mrf.mxu1 }
 0x379   : > { %v7513_v31 = vpop.f32.mrf.mxu1 }
 0x37c   : > { %v2916_v42 = vpop.f32.mrf.mxu0 }
 0x37d   : > { %v7515_v15 = vpop.f32.mrf.mxu1  ;;  %v3325_v8 = vmax.f32 %v2805_v44, %v2916_v42 }
 0x37e   : > { %v2918_v62 = vpop.f32.mrf.mxu0 }
 0x37f   : > { %v7517_v38 = vpop.f32.mrf.mxu1  ;;  %v3349_v17 = vmax.f32 %v3317_v6, %v3325_v8 }
 0x382   : > { %v7519_v45 = vpop.f32.mrf.mxu1 }
 0x383   : > { %v2922_v39 = vpop.f32.mrf.mxu0 }
 0x384   : > { %v7523_v29 = vpop.f32.mrf.mxu1  ;;  %v3326_v54 = vmax.f32 %v2811_v32, %v2922_v39  ;;  %v3319_v32 = vmax.f32 %v7450_v5, %v7507_v49 }
 0x385   : > { %v2924_v13 = vpop.f32.mrf.mxu0 }
 0x388   : > { %v7527_v7 = vpop.f32.mrf.mxu1 }
 0x389   : > { %v2928_v12 = vpop.f32.mrf.mxu0 }
 0x38a   : > { %v7531_v51 = vpop.f32.mrf.mxu1  ;;  %v3327_v57 = vmax.f32 %v7509_v55, %v2928_v12  ;;  %v3320_v12 = vmax.f32 %v7460_v0, %v7511_v43 }
 0x38b   : > { %v2930_v37 = vpop.f32.mrf.mxu0 }
 0x38e   : > { %v7535_v19 = vpop.f32.mrf.mxu1 }
 0x38f   : > { %v7521_v24 = vpop.f32.mrf.mxu0  ;;  %7929 = vst [vmem:[#allocation53_spill] sm:$0xff] %v7535_v19  ;;  %v3350_v19 = vmax.f32 %v3318_v28, %v3326_v54 }
 0x390   : > { %v7539_v18 = vpop.f32.mrf.mxu1 }
 0x391   : > { %v7525_v26 = vpop.f32.mrf.mxu0 }
 0x394   : > { %v7529_v63 = vpop.f32.mrf.mxu0 }
 0x395   : > { %v3329_v16 = vmax.f32 %v7517_v38, %v7529_v63 }
 0x396   : > { %v7533_v53 = vpop.f32.mrf.mxu0 }
 0x399   : > { %v7537_v52 = vpop.f32.mrf.mxu0 }
 0x39b   : > { %v7541_v50 = vpop.f32.mrf.mxu0 }
 0x39e   : > { %v7543_v41 = vpop.f32.mrf.mxu0 }
 0x39f   : > { %v3331_v28 = vmax.f32 %v7531_v51, %v7543_v41 }
 0x3a0   : > { %v7545_v27 = vpop.f32.mrf.mxu0 }
 0x3a3   : > { %v7547_v10 = vpop.f32.mrf.mxu0 }
 0x3a5   : > { %v7549_v21 = vpop.f32.mrf.mxu0 }
 0x3a6   : > { %7930 = vst [vmem:[#allocation56_spill] sm:$0xff] %v7549_v21 }
 0x3a8   : > { %v3029_v46 = vpop.f32.mrf.mxu1 }
 0x3a9   : > { %v3333_v60 = vmax.f32 %v2918_v62, %v3029_v46 }
 0x3aa   : > { %v3031_v2 = vpop.f32.mrf.mxu1 }
 0x3ac   : > { %v3035_v25 = vpop.f32.mrf.mxu1 }
 0x3ad   : > { %v3334_v21 = vmax.f32 %v2924_v13, %v3035_v25  ;;  %v3351_v13 = vmax.f32 %v3319_v32, %v3327_v57 }
 0x3ae   : > { %v3037_v14 = vpop.f32.mrf.mxu1 }
 0x3b0   : > { %v3041_v22 = vpop.f32.mrf.mxu1 }
 0x3b1   : > { %v3335_v4 = vmax.f32 %v2930_v37, %v3041_v22 }
 0x3b2   : > { %v3043_v20 = vpop.f32.mrf.mxu1 }
 0x3b4   : > { %v3047_v11 = vpop.f32.mrf.mxu1 }
 0x3b5   : > { %v3336_v5 = vmax.f32 %v7525_v26, %v3047_v11 }
 0x3b6   : > { %v3049_v9 = vpop.f32.mrf.mxu1 }
 0x3b8   : > { %v3142_v35 = vpop.f32.mrf.mxu0  ;;  %v3053_v48 = vpop.f32.mrf.mxu1 }
 0x3b9   : > { %v3341_v34 = vmax.f32 %v3031_v2, %v3142_v35  ;;  %v3321_v35 = vmax.f32 %v7475_v36, %v7515_v15  ;;  %v3337_v43 = vmax.f32 %v7533_v53, %v3053_v48 }
 0x3ba   : > { %v3144_v40 = vpop.f32.mrf.mxu0  ;;  %v3055_v3 = vpop.f32.mrf.mxu1 }
 0x3bb   : > { %v3357_v56 = vmax.f32 %v3333_v60, %v3341_v34  ;;  %v3353_v34 = vmax.f32 %v3321_v35, %v3329_v16  ;;  %v3330_v40 = vmax.f32 %v7523_v29, %v7537_v52  ;;  %v3862_v16 = vld [vmem:[#allocation17 + $0x8] sm:$0xff] }
 0x3bc   : > { %v3147_v1 = vpop.f32.mrf.mxu0  ;;  %v3059_v30 = vpop.f32.mrf.mxu1 }
 0x3bd   : > { %v3365_v44 = vmax.f32 %v3349_v17, %v3357_v56  ;;  %v3342_v42 = vmax.f32 %v3037_v14, %v3147_v1  ;;  %v3322_v17 = vmax.f32 %v7487_v33, %v7519_v45  ;;  %v3338_v15 = vmax.f32 %v7541_v50, %v3059_v30 }
 0x3be   : > { %v3149_v61 = vpop.f32.mrf.mxu0  ;;  %v3061_v22 = vpop.f32.mrf.mxu1 }
 0x3bf   : > { %v3358_v59 = vmax.f32 %v3334_v21, %v3342_v42  ;;  %v3392_v62 = vadd.f32 %v7554_v23, %v3365_v44  ;;  %v3328_v61 = vmax.f32 %v7513_v31, %v7521_v24  ;;  %v3354_v1 = vmax.f32 %v3322_v17, %v3330_v40  ;;  %v4874_v40 = vld [vmem:[#allocation11] ss:$0 sm:$0xff] }
 0x3c0   : > { %v3152_v39 = vpop.f32.mrf.mxu0  ;;  %v3323_v44 = vmax.f32 %v7499_v58, %v7527_v7 }
 0x3c1   : > { %v3366_v46 = vmax.f32 %v3350_v19, %v3358_v59  ;;  %v3343_v2 = vmax.f32 %v3043_v20, %v3152_v39  ;;  %v3416_v8 = vmax.f32 %v3392_v62, 0.0  ;;  %v3352_v21 = vmax.f32 %v3320_v12, %v3328_v61 }
 0x3c2   : > { %v3154_v47 = vpop.f32.mrf.mxu0  ;;  %v3355_v32 = vmax.f32 %v3323_v44, %v3331_v28  ;;  %v3332_v39 = vmax.f32 %v7539_v18, %v7547_v10 }
 0x3c3   : > { %v3395_v25 = vadd.f32 %v7554_v23, %v3366_v46  ;;  %v3359_v55 = vmax.f32 %v3335_v4, %v3343_v2  ;;  %5228 = vmatprep.mubr.f32.mxu0 %v3416_v8  ;;  %v7931_v4 = vld [vmem:[#allocation53_spill] sm:$0xff]  ;;  %v7932_v46 = vld [vmem:[#allocation54_spill] sm:$0xff]  ;;  %v7933_v8 = vld [vmem:[#allocation56_spill] sm:$0xff] }
 0x3c4   : > { %v3157_v14 = vpop.f32.mrf.mxu0  ;;  %v3324_v2 = vmax.f32 %v7932_v46, %v7931_v4 }
 0x3c5   : > { %v3419_v49 = vmax.f32 %v3395_v25, 0.0  ;;  %v3367_v37 = vmax.f32 %v3351_v13, %v3359_v55  ;;  %v3344_v19 = vmax.f32 %v3049_v9, %v3157_v14  ;;  %v3065_v9 = vpop.f32.mrf.mxu1 }
 0x3c6   : > { %v3159_v20 = vpop.f32.mrf.mxu0  ;;  %v3339_v45 = vmax.f32 %v7545_v27, %v3065_v9  ;;  %v3356_v25 = vmax.f32 %v3324_v2, %v3332_v39 }
 0x3c7   : > { %v3360_v31 = vmax.f32 %v3336_v5, %v3344_v19  ;;  %5229 = vmatmul.mubr.f32.vlgmr.msra.gmra.mxu0 %v3419_v49  ;;  %v3398_v24 = vadd.f32 %v7554_v23, %v3367_v37  ;;  %v3067_v54 = vpop.f32.mrf.mxu1  ;;  %v3715_v49 = vld [vmem:[#allocation13 + $0x18] sm:$0xff]  ;;  %v3714_v37 = vld [vmem:[#allocation13 + $0x10] sm:$0xff]  ;;  %v3713_v19 = vld [vmem:[#allocation13 + $0x8] sm:$0xff] }
 0x3c8   : > { %v3162_v0 = vpop.f32.mrf.mxu0  ;;  %5240 = vmatprep.subr.mxu0 %v3715_v49  ;;  %v3864_v20 = vld [vmem:[#allocation17 + $0x18] sm:$0xff] }
 0x3c9   : > { %v3368_v26 = vmax.f32 %v3352_v21, %v3360_v31  ;;  %v3345_v11 = vmax.f32 %v3055_v3, %v3162_v0  ;;  %v3422_v6 = vmax.f32 %v3398_v24, 0.0  ;;  %v3071_v59 = vpop.f32.mrf.mxu1  ;;  %5241 = vmatpush3.msra.mxu0 %v3715_v49  ;;  %v3863_v21 = vld [vmem:[#allocation17 + $0x10] sm:$0xff]  ;;  %5261 = vmatpush3.msra.mxu1 %v3864_v20  ;;  %v3861_v31 = vld [vmem:[#allocation17] sm:$0xff] }
 0x3ca   : > { %v3164_v60 = vpop.f32.mrf.mxu0  ;;  %v3340_v27 = vmax.f32 %v7933_v8, %v3071_v59  ;;  %5242 = vmatprep.subr.mxu0 %v3714_v37 }
 0x3cb   : > { %v3401_v38 = vadd.f32 %v7554_v23, %v3368_v26  ;;  %v3361_v63 = vmax.f32 %v3337_v43, %v3345_v11  ;;  %5231 = vmatprep.mubr.f32.mxu0 %v3422_v6  ;;  %v3073_v58 = vpop.f32.mrf.mxu1  ;;  %5243 = vmatpush3.msra.mxu0 %v3714_v37 }
 0x3cc   : > { %v3167_v36 = vpop.f32.mrf.mxu0  ;;  %5244 = vmatprep.subr.mxu0 %v3713_v19 }
 0x3cd   : > { %v3425_v53 = vmax.f32 %v3401_v38, 0.0  ;;  %v3369_v48 = vmax.f32 %v3353_v34, %v3361_v63  ;;  %v3346_v3 = vmax.f32 %v3061_v22, %v3167_v36  ;;  %5245 = vmatpush3.msra.mxu0 %v3713_v19  ;;  %v3712_v22 = vld [vmem:[#allocation13] sm:$0xff] }
 0x3ce   : > { %v3169_v56 = vpop.f32.mrf.mxu0  ;;  %5246 = vmatprep.subr.mxu0 %v3712_v22 }
 0x3cf   : > { %v3362_v29 = vmax.f32 %v3338_v15, %v3346_v3  ;;  %5232 = vmatmul.mubr.f32.gmra.mxu0 %v3425_v53  ;;  %v3404_v52 = vadd.f32 %v7554_v23, %v3369_v48  ;;  %v7935_v53 = vld [vmem:[#allocation41_spill] sm:$0xff] }
 0x3d0   : > { %v3172_v33 = vpop.f32.mrf.mxu0  ;;  %5247 = vmatpush3.msra.mxu0 %v3712_v22  ;;  %v902_v48 = vadd.f32 %v7935_v53, %v4874_v40 }
 0x3d1   : > { %v3370_v50 = vmax.f32 %v3354_v1, %v3362_v29  ;;  %v3347_v42 = vmax.f32 %v3067_v54, %v3172_v33  ;;  %v3428_v57 = vmax.f32 %v3404_v52, 0.0  ;;  %v7936_v54 = vld [vmem:[#allocation42_spill] sm:$0xff] }
 0x3d2   : > { %v3174_v62 = vpop.f32.mrf.mxu0  ;;  %v897_v56 = vadd.f32 %v4874_v40, %v7936_v54 }
 0x3d3   : > { %v3407_v51 = vadd.f32 %v7554_v23, %v3370_v50  ;;  %v3363_v41 = vmax.f32 %v3339_v45, %v3347_v42  ;;  %5234 = vmatprep.mubr.f32.mxu0 %v3428_v57  ;;  %v7937_v62 = vld [vmem:[#allocation43_spill] sm:$0xff] }
 0x3d4   : > { %v3177_v7 = vpop.f32.mrf.mxu0 }
 0x3d5   : > { %v3431_v30 = vmax.f32 %v3407_v51, 0.0  ;;  %v3371_v47 = vmax.f32 %v3355_v32, %v3363_v41  ;;  %v3348_v13 = vmax.f32 %v3073_v58, %v3177_v7  ;;  %v912_v32 = vadd.f32 %v7937_v62, %v4874_v40  ;;  %v7938_v51 = vld [vmem:[#allocation44_spill] sm:$0xff] }
 0x3d6   : > { %v3179_v61 = vpop.f32.mrf.mxu0  ;;  %v907_v41 = vadd.f32 %v4874_v40, %v7938_v51 }
 0x3d7   : > { %v3364_v55 = vmax.f32 %v3340_v27, %v3348_v13  ;;  %5235 = vmatmul.mubr.f32.gmra.mxu0 %v3431_v30  ;;  %v3410_v18 = vadd.f32 %v7554_v23, %v3371_v47 }
 0x3d9   : > { %v3372_v10 = vmax.f32 %v3356_v25, %v3364_v55  ;;  %v3434_v12 = vmax.f32 %v3410_v18, 0.0  ;;  %v7939_v25 = vld [vmem:[#allocation45_spill] sm:$0xff] }
 0x3da   : > { %v922_v55 = vadd.f32 %v7939_v25, %v4874_v40  ;;  %v7943_v25 = vld [vmem:[#allocation55_spill] sm:$0xff] }
 0x3db   : > { %v3413_v14 = vadd.f32 %v7554_v23, %v3372_v10  ;;  %5237 = vmatprep.mubr.f32.mxu0 %v3434_v12  ;;  %v7934_v23 = vmov 0.0   ;;  %v7940_v10 = vld [vmem:[#allocation46_spill] sm:$0xff] }
 0x3dc   : > { %5268 = vmatprep.mubr.msk.f32.mxu1 %vm6045_vm1, %v7934_v23  ;;  %5262 = vmatprep.subr.mxu1 %v7934_v23  ;;  %v917_v12 = vadd.f32 %v4874_v40, %v7940_v10 }
 0x3dd   : > { %v3437_v5 = vmax.f32 %v3413_v14, 0.0  ;;  %5263 = vmatpush3.msra.mxu1 %v3863_v21 }
 0x3de   : > { %5264 = vmatprep.subr.mxu1 %v7934_v23 }
 0x3df   : > { %5238 = vmatmul.mubr.f32.gmra.mxu0 %v3437_v5  ;;  %5265 = vmatpush3.msra.mxu1 %v3862_v16 }
 0x3e0   : > { %5266 = vmatprep.subr.mxu1 %v7934_v23 }
 0x3e1   : > { %5267 = vmatpush3.msra.mxu1 %v3861_v31  ;;  %v7941_v31 = vld [vmem:[#allocation47_spill] sm:$0xff] }
 0x404   : > { %v5079_v24 = vpop.f32.mrf.mxu1 }
 0x406   : > { %v5080_v35 = vpop.f32.mrf.mxu1 }
 0x407   : > { %v5081_v36 = vadd.f32 %v5080_v35, %v5079_v24  ;;  %v932_v24 = vadd.f32 %v7941_v31, %v4874_v40 }
 0x40b   : > { %v5082_v0 = vpop.f32.mrf.mxu1 }
 0x40d   : > { %v5083_v43 = vpop.f32.mrf.mxu1 }
 0x40e   : > { %v5084_v38 = vadd.f32 %v5083_v43, %v5082_v0  ;;  %v7942_v0 = vld [vmem:[#allocation48_spill] sm:$0xff] }
 0x40f   : > { %v927_v43 = vadd.f32 %v4874_v40, %v7942_v0  ;;  %v3938_v40 = vld [vmem:[#allocation16] sm:$0xff] }
 0x411   : > { %v5085_v26 = vpop.f32.mrf.mxu1 }
 0x413   : > { %v5086_v11 = vpop.f32.mrf.mxu1 }
 0x414   : > { %v5087_v57 = vadd.f32 %v5086_v11, %v5085_v26 }
 0x417   : > { %v5088_v6 = vpop.f32.mrf.mxu1 }
 0x419   : > { %v5089_v9 = vpop.f32.mrf.mxu1 }
 0x41a   : > { %v5090_v44 = vadd.f32 %v5089_v9, %v5088_v6 }
 0x41c   : > { %v5091_v60 = vpop.f32.mrf.mxu1 }
 0x41e   : > { %v5092_v34 = vpop.f32.mrf.mxu1 }
 0x41f   : > { %v5093_v13 = vadd.f32 %v5092_v34, %v5091_v60  ;;  %v773_v34 = vld [vmem:[%s6428_s7] sm:$0xff]  ;;  %s5025_s7 = sshll.u32 %s6154_s27, 7  ;;  %s6047_s27 = smov [#allocation25]  }
 0x420   : > { %5269 = vmatmul.mubr.msk.f32.vlgmr.msra.gmra.mxu1 %vm3723_vm2, %v773_v34  ;;  %s7753_s29 = scalar_lea.hbm %s7945_s9, %s5025_s7  ;;  %s5934_s18 = sshll.u32 %s6047_s27, 4  ;;  %s5935_s18 = int_to_ptr.vmem [resolvable:$false] %s5934_s18 }
 0x421   : > { %v5094_v63 = vpop.f32.mrf.mxu1  ;;  %s5936_s3 = scalar_lea.vmem %s5935_s18, 256  ;;  %p5937_p2 = scmp.lt.s32.totalorder %s4618_s26, %s5935_s18 }
 0x422   : > { %p5938_p1 = scmp.lt.s32.totalorder %s5936_s3, %s5930_s1 }
 0x423   : > { %v5095_v28 = vpop.f32.mrf.mxu1 }
 0x424   : > { %v5096_v7 = vadd.f32 %v5095_v28, %v5094_v63  ;;  %v3940_v63 = vld [vmem:[#allocation16 + $0x10] sm:$0xff]  ;;  %p5939_p11 = por %p5938_p1, %p5937_p2 }
 0x426   : > { %v5097_v45 = vpop.f32.mrf.mxu1  ;;  %p5940_p5 = pnand %p5939_p11, %p5933_p13 }
 0x428   : > { %v5098_v46 = vpop.f32.mrf.mxu1 }
 0x429   : > { %v5099_v23 = vadd.f32 %v5098_v46, %v5097_v45 }
 0x42b   : > { %v5100_v27 = vpop.f32.mrf.mxu1 }
 0x42d   : > { %v5101_v5 = vpop.f32.mrf.mxu1 }
 0x42e   : > { %v5102_v19 = vadd.f32 %v5101_v5, %v5100_v27  ;;  %v4193_v27 = vld [vmem:[#allocation20 + $0x8] sm:$0xff]  ;;  %v7944_v5 = vld [vmem:[#allocation57_spill] sm:$0xff] }
 0x487   : > { %v5230_v17 = vpop.f32.mrf.mxu0 }
 0x488   : > { %v3663_v15 = vadd.f32 %v5230_v17, %v5084_v38  ;;  %v3941_v38 = vld [vmem:[#allocation16 + $0x18] sm:$0xff]  ;;  %v3939_v17 = vld [vmem:[#allocation16 + $0x8] sm:$0xff] }
 0x489   : > { %v3657_v3 = vpop.f32.mrf.mxu0  ;;  %5271 = vmatprep.subr.mxu1 %v3941_v38 }
 0x48a   : > { %v3658_v1 = vadd.f32 %v5081_v36, %v3657_v3  ;;  %v3697_v29 = vadd.f32 %v3663_v15, %v902_v48  ;;  %5272 = vmatpush3.msra.mxu1 %v3941_v38  ;;  %v4995_v36 = vld [vmem:[#allocation14] ss:$0 sm:$0xff] }
 0x48b   : > { %5273 = vmatprep.subr.mxu1 %v3940_v63 }
 0x48c   : > { %v3696_v52 = vadd.f32 %v3658_v1, %v897_v56  ;;  %v3705_v50 = vmax.f32 %v3697_v29, 0.0  ;;  %5274 = vmatpush3.msra.mxu1 %v3940_v63 }
 0x48d   : > { %5275 = vmatprep.subr.mxu1 %v3939_v17 }
 0x48e   : > { %v3704_v33 = vmax.f32 %v3696_v52, 0.0  ;;  %5276 = vmatpush3.msra.mxu1 %v3939_v17 }
 0x48f   : > { %v5233_v42 = vpop.f32.mrf.mxu0  ;;  %5277 = vmatprep.subr.mxu1 %v3938_v40 }
 0x490   : > { %v3673_v59 = vadd.f32 %v5233_v42, %v5090_v44  ;;  %5248 = vmatprep.mubr.msk.f32.mxu0 %vm3723_vm2, %v3704_v33  ;;  %5278 = vmatpush3.msra.mxu1 %v3938_v40 }
 0x491   : > { %v3667_v39 = vpop.f32.mrf.mxu0  ;;  %5249 = vmatmul.mubr.msk.f32.vlgmr.msra.gmra.mxu0 %vm3723_vm2, %v3705_v50 }
 0x492   : > { %v3668_v4 = vadd.f32 %v5087_v57, %v3667_v39  ;;  %v3699_v2 = vadd.f32 %v3673_v59, %v912_v32 }
 0x494   : > { %v3698_v58 = vadd.f32 %v3668_v4, %v907_v41  ;;  %v3707_v30 = vmax.f32 %v3699_v2, 0.0 }
 0x496   : > { %v3706_v8 = vmax.f32 %v3698_v58, 0.0 }
 0x497   : > { %v5236_v47 = vpop.f32.mrf.mxu0 }
 0x498   : > { %v3683_v61 = vadd.f32 %v5236_v47, %v5096_v7  ;;  %5251 = vmatprep.mubr.msk.f32.mxu0 %vm3723_vm2, %v3706_v8  ;;  %v4195_v7 = vld [vmem:[#allocation20 + $0x18] sm:$0xff]  ;;  %v4194_v8 = vld [vmem:[#allocation20 + $0x10] sm:$0xff]  ;;  %v6046_v47 = vmov 1966171168  }
 0x499   : > { %v3677_v18 = vpop.f32.mrf.mxu0  ;;  %5252 = vmatmul.mubr.msk.f32.gmra.mxu0 %vm3723_vm2, %v3707_v30  ;;  %5291 = vmatprep.subr.mxu0 %v4195_v7  ;;  %v4192_v30 = vld [vmem:[#allocation20] sm:$0xff] }
 0x49a   : > { %v3678_v14 = vadd.f32 %v5093_v13, %v3677_v18  ;;  %v3701_v49 = vadd.f32 %v3683_v61, %v922_v55  ;;  %5311 = vmatprep.subr.mxu1 %v4195_v7  ;;  %5292 = vmatpush3.msra.mxu0 %v4195_v7  ;;  %v4074_v13 = vunpack.c.l.s4 %v6046_v47 }
 0x49b   : > { %5293 = vmatprep.subr.mxu0 %v4194_v8 }
 0x49c   : > { %v3700_v37 = vadd.f32 %v3678_v14, %v917_v12  ;;  %v3709_v20 = vmax.f32 %v3701_v49, 0.0  ;;  %5294 = vmatpush3.msra.mxu0 %v4194_v8  ;;  %v4075_v61 = vunpack.c.0.s8 %v4074_v13 }
 0x49d   : > { %5295 = vmatprep.subr.mxu0 %v4193_v27 }
 0x49e   : > { %v3708_v22 = vmax.f32 %v3700_v37, 0.0  ;;  %5296 = vmatpush3.msra.mxu0 %v4193_v27  ;;  %v4078_v55 = vsub.s32 %v4075_v61, %v7943_v25 }
 0x49f   : > { %v5239_v21 = vpop.f32.mrf.mxu0  ;;  %5297 = vmatprep.subr.mxu0 %v4192_v30 }
 0x4a0   : > { %v3693_v16 = vadd.f32 %v5239_v21, %v5102_v19  ;;  %5254 = vmatprep.mubr.msk.f32.mxu0 %vm3723_vm2, %v3708_v22  ;;  %5298 = vmatpush3.msra.mxu0 %v4192_v30  ;;  %v5013_v21 = vld [vmem:[#allocation19] ss:$0 sm:$0xff] }
 0x4a1   : > { %v3687_v35 = vpop.f32.mrf.mxu0  ;;  %5255 = vmatmul.mubr.msk.f32.gmra.mxu0 %vm3723_vm2, %v3709_v20 }
 0x4a2   : > { %v3688_v26 = vadd.f32 %v5099_v23, %v3687_v35  ;;  %v3703_v11 = vadd.f32 %v3693_v16, %v932_v24 }
 0x4a4   : > { %v3702_v6 = vadd.f32 %v3688_v26, %v927_v43  ;;  %v3711_v60 = vmax.f32 %v3703_v11, 0.0 }
 0x4a6   : > { %v3710_v9 = vmax.f32 %v3702_v6, 0.0 }
 0x4a8   : > { %5257 = vmatprep.mubr.msk.f32.mxu0 %vm3723_vm2, %v3710_v9 }
 0x4a9   : > { %5258 = vmatmul.mubr.msk.f32.gmra.mxu0 %vm3723_vm2, %v3711_v60 }
 0x4e0   : > { %v3934_v2 = vpop.f32.mrf.mxu1 }
 0x4e1   : > { %v4079_v18 = vrot.slane %v3934_v2, %v4078_v55  ;;  %v4072_v37 = vcombine.high %v3934_v2, %v3934_v2 }
 0x4e2   : > { %v5270_v58 = vpop.f32.mrf.mxu1 }
 0x4e3   : > { %v4087_v10 = vcombine.high %v4079_v18, %v4079_v18  ;;  %v4095_v14 = vrot.slane %v4079_v18, %v4078_v55  ;;  %v4086_v31 = vrot.slane %v4072_v37, %v4078_v55 }
 0x4e5   : > { %v4109_v12 = vrot.slane %v4087_v10, %v4078_v55  ;;  %v4124_v19 = vrot.slane %v4095_v14, %v7944_v5  ;;  %v4117_v35 = vcombine.high %v4095_v14, %v4095_v14  ;;  %v4088_v11 = vcombine.high %v4086_v31, %v4086_v31 }
 0x4e7   : > { %v4128_v49 = vrot.slane %v4109_v12, %v7944_v5  ;;  %v4119_v23 = vcombine.high %v4109_v12, %v4109_v12  ;;  %v4132_v9 = vrot.slane %v4117_v35, %v7944_v5  ;;  %v4116_v40 = vrot.slane %v4088_v11, %v4078_v55 }
 0x4e9   : > { %v4136_v26 = vrot.slane %v4119_v23, %v7944_v5 }
 0x551   : > { %v5250_v15 = vpop.f32.mrf.mxu0 }
 0x552   : > { %v7615_v53 = vadd.f32 %v5250_v15, %v4995_v36 }
 0x553   : > { %v3814_v48 = vpop.f32.mrf.mxu0 }
 0x554   : > { %v7617_v3 = vadd.f32 %v4995_v36, %v3814_v48  ;;  %v3854_v56 = vmax.f32 %v7615_v53, 0.0  ;;  %v4102_v48 = vrot.slane %v4086_v31, %v4078_v55  ;;  %v5023_v31 = vld [vmem:[#allocation23] ss:$0 sm:$0xff] }
 0x556   : > { %v3853_v54 = vmax.f32 %v7617_v3, 0.0 }
 0x558   : > { %5279 = vmatprep.mubr.msk.f32.mxu1 %vm3723_vm2, %v3853_v54 }
 0x559   : > { %v5253_v1 = vpop.f32.mrf.mxu0  ;;  %5280 = vmatmul.mubr.msk.f32.vlgmr.msra.gmra.mxu1 %vm3723_vm2, %v3854_v56 }
 0x55a   : > { %v7627_v28 = vadd.f32 %v5253_v1, %v4995_v36  ;;  %5315 = vmatpush3.msra.mxu1 %v4195_v7  ;;  %v4120_v7 = vcombine.high %v4116_v40, %v4116_v40 }
 0x55b   : > { %v3824_v29 = vpop.f32.mrf.mxu0  ;;  %5312 = vmatprep.subr.mxu1 %v4194_v8 }
 0x55c   : > { %v7629_v52 = vadd.f32 %v4995_v36, %v3824_v29  ;;  %v3856_v33 = vmax.f32 %v7627_v28, 0.0  ;;  %5316 = vmatpush3.msra.mxu1 %v4194_v8  ;;  %v4144_v29 = vrot.slane %v4116_v40, %v7944_v5  ;;  %v4152_v13 = vrot.slane %v4120_v7, %v7944_v5 }
 0x55d   : > { %5313 = vmatprep.subr.mxu1 %v4193_v27 }
 0x55e   : > { %v3855_v44 = vmax.f32 %v7629_v52, 0.0  ;;  %5317 = vmatpush3.msra.mxu1 %v4193_v27 }
 0x55f   : > { %5314 = vmatprep.subr.mxu1 %v4192_v30 }
 0x560   : > { %5282 = vmatprep.mubr.msk.f32.mxu1 %vm3723_vm2, %v3855_v44  ;;  %5318 = vmatpush3.msra.mxu1 %v4192_v30  ;;  %v4118_v30 = vcombine.high %v4102_v48, %v4102_v48 }
 0x561   : > { %v5256_v45 = vpop.f32.mrf.mxu0  ;;  %5283 = vmatmul.mubr.msk.f32.gmra.mxu1 %vm3723_vm2, %v3856_v33 }
 0x562   : > { %v7639_v50 = vadd.f32 %v5256_v45, %v4995_v36  ;;  %v4148_v18 = vrot.slane %v4118_v30, %v7944_v5 }
 0x563   : > { %v3834_v42 = vpop.f32.mrf.mxu0 }
 0x564   : > { %v7641_v57 = vadd.f32 %v4995_v36, %v3834_v42  ;;  %v3858_v62 = vmax.f32 %v7639_v50, 0.0 }
 0x566   : > { %v3857_v59 = vmax.f32 %v7641_v57, 0.0 }
 0x568   : > { %5285 = vmatprep.mubr.msk.f32.mxu1 %vm3723_vm2, %v3857_v59 }
 0x569   : > { %v5259_v32 = vpop.f32.mrf.mxu0  ;;  %5286 = vmatmul.mubr.msk.f32.gmra.mxu1 %vm3723_vm2, %v3858_v62 }
 0x56a   : > { %v7651_v39 = vadd.f32 %v5259_v32, %v4995_v36 }
 0x56b   : > { %v3844_v51 = vpop.f32.mrf.mxu0 }
 0x56c   : > { %v7653_v41 = vadd.f32 %v4995_v36, %v3844_v51  ;;  %v3860_v46 = vmax.f32 %v7651_v39, 0.0  ;;  %v4140_v51 = vrot.slane %v4102_v48, %v7944_v5 }
 0x56e   : > { %v3859_v4 = vmax.f32 %v7653_v41, 0.0 }
 0x570   : > { %5288 = vmatprep.mubr.msk.f32.mxu1 %vm3723_vm2, %v3859_v4 }
 0x571   : > { %5289 = vmatmul.mubr.msk.f32.gmra.mxu1 %vm3723_vm2, %v3860_v46 }
 0x619   : > { %v5281_v22 = vpop.f32.mrf.mxu1 }
 0x61a   : > { %v4162_v20 = vadd.f32 %v5281_v22, %v4128_v49  ;;  %v5014_v22 = vld [vmem:[#allocation22] ss:$0 sm:$0xff] }
 0x61b   : > { %v4032_v16 = vpop.f32.mrf.mxu1 }
 0x61c   : > { %v4161_v24 = vadd.f32 %v4124_v19, %v4032_v16  ;;  %v4177_v0 = vadd.f32 %v5013_v21, %v4162_v20 }
 0x61e   : > { %v4176_v43 = vadd.f32 %v5013_v21, %v4161_v24  ;;  %v4185_v60 = vmax.f32 %v4177_v0, 0.0 }
 0x620   : > { %v4184_v6 = vmax.f32 %v4176_v43, 0.0 }
 0x621   : > { %v5284_v34 = vpop.f32.mrf.mxu1 }
 0x622   : > { %v4164_v38 = vadd.f32 %v5284_v34, %v4136_v26  ;;  %5299 = vmatprep.mubr.msk.f32.mxu0 %vm3723_vm2, %v4184_v6 }
 0x623   : > { %v4042_v63 = vpop.f32.mrf.mxu1  ;;  %5300 = vmatmul.mubr.msk.f32.vlgmr.msra.gmra.mxu0 %vm3723_vm2, %v4185_v60 }
 0x624   : > { %v4163_v17 = vadd.f32 %v4132_v9, %v4042_v63  ;;  %v4179_v36 = vadd.f32 %v5013_v21, %v4164_v38 }
 0x626   : > { %v4178_v15 = vadd.f32 %v5013_v21, %v4163_v17  ;;  %v4187_v45 = vmax.f32 %v4179_v36, 0.0 }
 0x628   : > { %v4186_v1 = vmax.f32 %v4178_v15, 0.0 }
 0x629   : > { %v5287_v42 = vpop.f32.mrf.mxu1 }
 0x62a   : > { %v4166_v32 = vadd.f32 %v5287_v42, %v4144_v29  ;;  %5302 = vmatprep.mubr.msk.f32.mxu0 %vm3723_vm2, %v4186_v1 }
 0x62b   : > { %v4052_v2 = vpop.f32.mrf.mxu1  ;;  %5303 = vmatmul.mubr.msk.f32.gmra.mxu0 %vm3723_vm2, %v4187_v45 }
 0x62c   : > { %v4165_v58 = vadd.f32 %v4140_v51, %v4052_v2  ;;  %v4181_v8 = vadd.f32 %v5013_v21, %v4166_v32 }
 0x62e   : > { %v4180_v27 = vadd.f32 %v5013_v21, %v4165_v58  ;;  %v4189_v61 = vmax.f32 %v4181_v8, 0.0 }
 0x630   : > { %v4188_v47 = vmax.f32 %v4180_v27, 0.0 }
 0x631   : > { %v5290_v25 = vpop.f32.mrf.mxu1 }
 0x632   : > { %v4168_v55 = vadd.f32 %v5290_v25, %v4152_v13  ;;  %5305 = vmatprep.mubr.msk.f32.mxu0 %vm3723_vm2, %v4188_v47 }
 0x633   : > { %v4062_v10 = vpop.f32.mrf.mxu1  ;;  %5306 = vmatmul.mubr.msk.f32.gmra.mxu0 %vm3723_vm2, %v4189_v61 }
 0x634   : > { %v4167_v12 = vadd.f32 %v4148_v18, %v4062_v10  ;;  %v4183_v14 = vadd.f32 %v5013_v21, %v4168_v55 }
 0x636   : > { %v4182_v49 = vadd.f32 %v5013_v21, %v4167_v12  ;;  %v4191_v19 = vmax.f32 %v4183_v14, 0.0 }
 0x638   : > { %v4190_v37 = vmax.f32 %v4182_v49, 0.0 }
 0x63a   : > { %5308 = vmatprep.mubr.msk.f32.mxu1 %vm3723_vm2, %v4190_v37 }
 0x63b   : > { %5309 = vmatmul.mubr.msk.f32.vlgmr.msra.gmra.mxu1 %vm3723_vm2, %v4191_v19 }
 0x6e3   : > { %v5301_v20 = vpop.f32.mrf.mxu0 }
 0x6e4   : > { %v4299_v23 = vadd.f32 %v5301_v20, %v5014_v22 }
 0x6e5   : > { %v4293_v16 = vpop.f32.mrf.mxu0 }
 0x6e6   : > { %v4333_v24 = vmax.f32 %v4299_v23, 0.0  ;;  %v4294_v35 = vadd.f32 %v5014_v22, %v4293_v16 }
 0x6e8   : > { %v4332_v5 = vmax.f32 %v4294_v35, 0.0  ;;  %v4348_v0 = vmul.f32 %v5023_v31, %v4333_v24 }
 0x6ea   : > { %v4358_v43 = vsel %vm3723_vm2, %v4348_v0, 0.0  ;;  %v4347_v26 = vmul.f32 %v5023_v31, %v4332_v5 }
 0x6eb   : > { %4359 = vadd.xlane.f32.xlu0 %v4358_v43  ;;  %v5304_v21 = vpop.f32.mrf.mxu0 }
 0x6ec   : > { %v4309_v11 = vadd.f32 %v5304_v21, %v5014_v22  ;;  %v4355_v34 = vsel %vm3723_vm2, %v4347_v26, 0.0 }
 0x6ed   : > { %v4303_v6 = vpop.f32.mrf.mxu0 }
 0x6ee   : > { %v4335_v9 = vmax.f32 %v4309_v11, 0.0  ;;  %v4304_v60 = vadd.f32 %v5014_v22, %v4303_v6 }
 0x6ef   : > { %4356 = vadd.xlane.f32.xlu0 %v4355_v34 }
 0x6f0   : > { %v4334_v38 = vmax.f32 %v4304_v60, 0.0  ;;  %v4350_v63 = vmul.f32 %v5023_v31, %v4335_v9 }
 0x6f2   : > { %v4364_v17 = vsel %vm3723_vm2, %v4350_v63, 0.0  ;;  %v4349_v40 = vmul.f32 %v5023_v31, %v4334_v38 }
 0x6f3   : > { %4365 = vadd.xlane.f32.xlu1 %v4364_v17  ;;  %v5307_v36 = vpop.f32.mrf.mxu0 }
 0x6f4   : > { %v4319_v15 = vadd.f32 %v5307_v36, %v5014_v22  ;;  %v4361_v45 = vsel %vm3723_vm2, %v4349_v40, 0.0 }
 0x6f5   : > { %v4313_v48 = vpop.f32.mrf.mxu0 }
 0x6f6   : > { %v4337_v1 = vmax.f32 %v4319_v15, 0.0  ;;  %v4314_v29 = vadd.f32 %v5014_v22, %v4313_v48 }
 0x6f7   : > { %4362 = vadd.xlane.f32.xlu1 %v4361_v45 }
 0x6f8   : > { %v4336_v42 = vmax.f32 %v4314_v29, 0.0  ;;  %v4352_v32 = vmul.f32 %v5023_v31, %v4337_v1 }
 0x6fa   : > { %v4370_v51 = vsel %vm3723_vm2, %v4352_v32, 0.0  ;;  %v4351_v2 = vmul.f32 %v5023_v31, %v4336_v42 }
 0x6fb   : > { %4371 = vadd.xlane.f32.xlu1 %v4370_v51  ;;  %v5310_v58 = vpop.f32.mrf.mxu1 }
 0x6fc   : > { %v4329_v7 = vadd.f32 %v5310_v58, %v5014_v22  ;;  %v4367_v8 = vsel %vm3723_vm2, %v4351_v2, 0.0 }
 0x6fd   : > { %4368 = vadd.xlane.f32.xlu0 %v4367_v8  ;;  %v4323_v27 = vpop.f32.mrf.mxu1 }
 0x6fe   : > { %v4339_v30 = vmax.f32 %v4329_v7, 0.0  ;;  %v4324_v47 = vadd.f32 %v5014_v22, %v4323_v27 }
 0x700   : > { %v4338_v13 = vmax.f32 %v4324_v47, 0.0  ;;  %v4354_v61 = vmul.f32 %v5023_v31, %v4339_v30 }
 0x702   : > { %v4376_v25 = vsel %vm3723_vm2, %v4354_v61, 0.0  ;;  %v4353_v55 = vmul.f32 %v5023_v31, %v4338_v13 }
 0x703   : > { %4377 = vadd.xlane.f32.xlu1 %v4376_v25 }
 0x704   : > { %v4373_v18 = vsel %vm3723_vm2, %v4353_v55, 0.0 }
 0x705   : > { %4374 = vadd.xlane.f32.xlu0 %v4373_v18 }
 0x774   : > { %v4360_v10 = vpop.xlane.xlu0 %4359 }
 0x775   : > { %v4385_v12 = vrot.slane %v4360_v10, 4 }
 0x777   : > { %v4386_v14 = vmax.f32 %v4360_v10, %v4385_v12 }
 0x778   : > { %v4357_v49 = vpop.xlane.xlu0 %4356 }
 0x779   : > { %v4387_v37 = vrot.slane %v4386_v14, 2  ;;  %v4379_v19 = vrot.slane %v4357_v49, 4 }
 0x77b   : > { %v4388_v20 = vmax.f32 %v4386_v14, %v4387_v37  ;;  %v4380_v23 = vmax.f32 %v4357_v49, %v4379_v19 }
 0x77c   : > { %v4366_v16 = vpop.xlane.xlu1 %4365 }
 0x77d   : > { %v4389_v24 = vrot.slane %v4388_v20, 1  ;;  %v4381_v22 = vrot.slane %v4380_v23, 2  ;;  %v4397_v35 = vrot.slane %v4366_v16, 4 }
 0x77f   : > { %v4390_v5 = vmax.f32 %v4388_v20, %v4389_v24  ;;  %v4382_v0 = vmax.f32 %v4380_v23, %v4381_v22  ;;  %v4398_v43 = vmax.f32 %v4366_v16, %v4397_v35 }
 0x780   : > { %v4363_v31 = vpop.xlane.xlu1 %4362 }
 0x781   : > { %v4428_v26 = vsub.f32 %v4360_v10, %v4390_v5  ;;  %v4383_v21 = vrot.slane %v4382_v0, 1  ;;  %v4399_v11 = vrot.slane %v4398_v43, 2  ;;  %v4391_v6 = vrot.slane %v4363_v31, 4 }
 0x783   : > { %v4437_v9 = vmul.f32 1.442695, %v4428_v26  ;;  %v4384_v60 = vmax.f32 %v4382_v0, %v4383_v21  ;;  %v4400_v34 = vmax.f32 %v4398_v43, %v4399_v11  ;;  %v4392_v38 = vmax.f32 %v4363_v31, %v4391_v6 }
 0x784   : > { %v4372_v63 = vpop.xlane.xlu1 %4371 }
 0x785   : > { %5495 = vpow2.f32 %v4437_v9  ;;  %v4427_v17 = vsub.f32 %v4357_v49, %v4384_v60  ;;  %v4401_v40 = vrot.slane %v4400_v34, 1  ;;  %v4393_v36 = vrot.slane %v4392_v38, 2 }
 0x786   : > { %v4409_v15 = vrot.slane %v4372_v63, 4  ;;  %v4369_v48 = vpop.xlane.xlu0 %4368 }
 0x787   : > { %v4435_v1 = vmul.f32 1.442695, %v4427_v17  ;;  %v4402_v29 = vmax.f32 %v4400_v34, %v4401_v40  ;;  %v4394_v45 = vmax.f32 %v4392_v38, %v4393_v36  ;;  %v4403_v42 = vrot.slane %v4369_v48, 4 }
 0x788   : > { %v4410_v32 = vmax.f32 %v4372_v63, %v4409_v15 }
 0x789   : > { %5497 = vpow2.f32 %v4435_v1  ;;  %v4430_v51 = vsub.f32 %v4366_v16, %v4402_v29  ;;  %v4395_v2 = vrot.slane %v4394_v45, 1  ;;  %v4404_v58 = vmax.f32 %v4369_v48, %v4403_v42 }
 0x78a   : > { %v4411_v7 = vrot.slane %v4410_v32, 2 }
 0x78b   : > { %v4441_v8 = vmul.f32 1.442695, %v4430_v51  ;;  %v4396_v27 = vmax.f32 %v4394_v45, %v4395_v2  ;;  %v4405_v30 = vrot.slane %v4404_v58, 2 }
 0x78c   : > { %v4412_v47 = vmax.f32 %v4410_v32, %v4411_v7  ;;  %v4378_v13 = vpop.xlane.xlu1 %4377 }
 0x78d   : > { %5499 = vpow2.f32 %v4441_v8  ;;  %v4429_v61 = vsub.f32 %v4363_v31, %v4396_v27  ;;  %v4406_v25 = vmax.f32 %v4404_v58, %v4405_v30  ;;  %v4421_v55 = vrot.slane %v4378_v13, 4 }
 0x78e   : > { %v4413_v18 = vrot.slane %v4412_v47, 1  ;;  %v4375_v10 = vpop.xlane.xlu0 %4374 }
 0x78f   : > { %v4439_v12 = vmul.f32 1.442695, %v4429_v61  ;;  %v4407_v14 = vrot.slane %v4406_v25, 1  ;;  %v4422_v49 = vmax.f32 %v4378_v13, %v4421_v55  ;;  %v4415_v37 = vrot.slane %v4375_v10, 4 }
 0x790   : > { %v4414_v19 = vmax.f32 %v4412_v47, %v4413_v18 }
 0x791   : > { %5501 = vpow2.f32 %v4439_v12  ;;  %v4408_v20 = vmax.f32 %v4406_v25, %v4407_v14  ;;  %v4423_v23 = vrot.slane %v4422_v49, 2  ;;  %v4416_v16 = vmax.f32 %v4375_v10, %v4415_v37 }
 0x792   : > { %v7688_v24 = vpop.eup %5495  ;;  %v4432_v22 = vsub.f32 %v4372_v63, %v4414_v19 }
 0x793   : > { %v4457_v35 = vrot.slane %v7688_v24, 4  ;;  %v4431_v5 = vsub.f32 %v4369_v48, %v4408_v20  ;;  %v4424_v0 = vmax.f32 %v4422_v49, %v4423_v23  ;;  %v4417_v43 = vrot.slane %v4416_v16, 2 }
 0x794   : > { %v4445_v31 = vmul.f32 1.442695, %v4432_v22 }
 0x795   : > { %v4458_v26 = vadd.f32 %v7688_v24, %v4457_v35  ;;  %v4443_v21 = vmul.f32 1.442695, %v4431_v5  ;;  %v4425_v11 = vrot.slane %v4424_v0, 1  ;;  %v4418_v6 = vmax.f32 %v4416_v16, %v4417_v43 }
 0x796   : > { %v7692_v9 = vpop.eup %5497  ;;  %5503 = vpow2.f32 %v4445_v31 }
 0x797   : > { %v4459_v60 = vrot.slane %v4458_v26, 2  ;;  %v4451_v34 = vrot.slane %v7692_v9, 4  ;;  %5505 = vpow2.f32 %v4443_v21  ;;  %v4426_v38 = vmax.f32 %v4424_v0, %v4425_v11 }
 0x798   : > { %v4419_v63 = vrot.slane %v4418_v6, 1 }
 0x799   : > { %v4460_v17 = vadd.f32 %v4459_v60, %v4458_v26  ;;  %v4452_v40 = vadd.f32 %v7692_v9, %v4451_v34  ;;  %v4434_v36 = vsub.f32 %v4378_v13, %v4426_v38 }
 0x79a   : > { %v7696_v15 = vpop.eup %5499  ;;  %v4420_v48 = vmax.f32 %v4418_v6, %v4419_v63 }
 0x79b   : > { %v4461_v1 = vrot.slane %v4460_v17, 1  ;;  %v4453_v29 = vrot.slane %v4452_v40, 2  ;;  %v4469_v45 = vrot.slane %v7696_v15, 4  ;;  %v4449_v42 = vmul.f32 1.442695, %v4434_v36 }
 0x79c   : > { %v4433_v32 = vsub.f32 %v4375_v10, %v4420_v48 }
 0x79d   : > { %v4462_v51 = vadd.f32 %v4461_v1, %v4460_v17  ;;  %v4454_v2 = vadd.f32 %v4453_v29, %v4452_v40  ;;  %v4470_v58 = vadd.f32 %v7696_v15, %v4469_v45  ;;  %5507 = vpow2.f32 %v4449_v42 }
 0x79e   : > { %v7700_v7 = vpop.eup %5501  ;;  %v4447_v8 = vmul.f32 1.442695, %v4433_v32 }
 0x79f   : > { %5509 = vrcp.f32 %v4462_v51  ;;  %v4455_v27 = vrot.slane %v4454_v2, 1  ;;  %v4471_v30 = vrot.slane %v4470_v58, 2  ;;  %v4463_v47 = vrot.slane %v7700_v7, 4 }
 0x7a0   : > { %5511 = vpow2.f32 %v4447_v8 }
 0x7a1   : > { %v4456_v13 = vadd.f32 %v4455_v27, %v4454_v2  ;;  %v4472_v61 = vadd.f32 %v4471_v30, %v4470_v58  ;;  %v4464_v25 = vadd.f32 %v7700_v7, %v4463_v47 }
 0x7a3   : > { %v7704_v55 = vpop.eup %5503  ;;  %5513 = vrcp.f32 %v4456_v13  ;;  %v4473_v18 = vrot.slane %v4472_v61, 1  ;;  %v4465_v10 = vrot.slane %v4464_v25, 2 }
 0x7a4   : > { %v5506_v12 = vpop.eup %5505  ;;  %v4481_v14 = vrot.slane %v7704_v55, 4 }
 0x7a5   : > { %v4474_v49 = vadd.f32 %v4473_v18, %v4472_v61  ;;  %v4466_v37 = vadd.f32 %v4465_v10, %v4464_v25  ;;  %v4475_v19 = vrot.slane %v5506_v12, 4 }
 0x7a6   : > { %v4482_v20 = vadd.f32 %v7704_v55, %v4481_v14 }
 0x7a7   : > { %5515 = vrcp.f32 %v4474_v49  ;;  %v4467_v23 = vrot.slane %v4466_v37, 1  ;;  %v4476_v16 = vadd.f32 %v5506_v12, %v4475_v19 }
 0x7a8   : > { %v4483_v22 = vrot.slane %v4482_v20, 2 }
 0x7a9   : > { %v4468_v35 = vadd.f32 %v4467_v23, %v4466_v37  ;;  %v4477_v5 = vrot.slane %v4476_v16, 2 }
 0x7aa   : > { %v7708_v0 = vpop.eup %5507  ;;  %v4484_v43 = vadd.f32 %v4483_v22, %v4482_v20 }
 0x7ab   : > { %5517 = vrcp.f32 %v4468_v35  ;;  %v4478_v31 = vadd.f32 %v4477_v5, %v4476_v16  ;;  %v4493_v26 = vrot.slane %v7708_v0, 4 }
 0x7ac   : > { %v5510_v21 = vpop.eup %5509  ;;  %v4485_v11 = vrot.slane %v4484_v43, 1 }
 0x7ad   : > { %v7711_v6 = vpop.eup %5511  ;;  %v4479_v60 = vrot.slane %v4478_v31, 1  ;;  %v4494_v34 = vadd.f32 %v7708_v0, %v4493_v26  ;;  %v4502_v38 = vmul.f32 %v5510_v21, %v7688_v24 }
 0x7ae   : > { %v4486_v63 = vadd.f32 %v4485_v11, %v4484_v43  ;;  %v4487_v17 = vrot.slane %v7711_v6, 4 }
 0x7af   : > { %v4480_v40 = vadd.f32 %v4479_v60, %v4478_v31  ;;  %v4495_v36 = vrot.slane %v4494_v34, 2  ;;  %v4516_v32 = vmul.f32 %v4502_v38, %v3854_v56 }
 0x7b0   : > { %v5514_v48 = vpop.eup %5513  ;;  %5519 = vrcp.f32 %v4486_v63  ;;  %v4488_v1 = vadd.f32 %v7711_v6, %v4487_v17 }
 0x7b1   : > { %v4500_v29 = vmul.f32 %v5514_v48, %v7692_v9  ;;  %5521 = vrcp.f32 %v4480_v40  ;;  %v4496_v45 = vadd.f32 %v4495_v36, %v4494_v34  ;;  %v4530_v9 = vsel %vm3723_vm2, %v4516_v32, 0.0 }
 0x7b2   : > { %v4489_v42 = vrot.slane %v4488_v1, 2 }
 0x7b3   : > { %v4497_v51 = vrot.slane %v4496_v45, 1  ;;  %v4515_v24 = vmul.f32 %v4500_v29, %v3853_v54  ;;  %v4531_v54 = vrot.slane %v4530_v9, 4 }
 0x7b4   : > { %v5516_v2 = vpop.eup %5515  ;;  %v4490_v58 = vadd.f32 %v4489_v42, %v4488_v1 }
 0x7b5   : > { %v4498_v8 = vadd.f32 %v4497_v51, %v4496_v45  ;;  %v4506_v27 = vmul.f32 %v5516_v2, %v7696_v15  ;;  %v4523_v30 = vsel %vm3723_vm2, %v4515_v24, 0.0  ;;  %v4532_v14 = vadd.f32 %v4531_v54, %v4530_v9 }
 0x7b6   : > { %v4491_v47 = vrot.slane %v4490_v58, 1  ;;  %v4524_v61 = vrot.slane %v4523_v30, 4 }
 0x7b7   : > { %5523 = vrcp.f32 %v4498_v8  ;;  %v4518_v13 = vmul.f32 %v4506_v27, %v3856_v33 }
 0x7b8   : > { %v5518_v53 = vpop.eup %5517  ;;  %v4492_v56 = vadd.f32 %v4491_v47, %v4490_v58  ;;  %v4525_v18 = vadd.f32 %v4524_v61, %v4523_v30 }
 0x7b9   : > { %v4504_v3 = vmul.f32 %v5518_v53, %v7700_v7  ;;  %v4544_v25 = vsel %vm3723_vm2, %v4518_v13, 0.0 }
 0x7ba   : > { %5525 = vrcp.f32 %v4492_v56  ;;  %v4545_v37 = vrot.slane %v4544_v25, 4  ;;  %v4526_v23 = vrot.slane %v4525_v18, 2 }
 0x7bb   : > { %v4517_v15 = vmul.f32 %v4504_v3, %v3855_v44  ;;  %v4533_v44 = vrot.slane %v4532_v14, 2 }
 0x7bc   : > { %v4546_v22 = vadd.f32 %v4545_v37, %v4544_v25 }
 0x7bd   : > { %v5520_v10 = vpop.eup %5519  ;;  %v4537_v49 = vsel %vm3723_vm2, %v4517_v15, 0.0  ;;  %v4534_v50 = vadd.f32 %v4533_v44, %v4532_v14 }
 0x7be   : > { %v5522_v28 = vpop.eup %5521  ;;  %v4510_v33 = vmul.f32 %v5520_v10, %v7704_v55  ;;  %v4538_v19 = vrot.slane %v4537_v49, 4  ;;  %v4527_v55 = vadd.f32 %v4526_v23, %v4525_v18  ;;  %v4547_v11 = vrot.slane %v4546_v22, 2 }
 0x7bf   : > { %v4508_v20 = vmul.f32 %v5522_v28, %v5506_v12  ;;  %v4535_v40 = vrot.slane %v4534_v50, 1 }
 0x7c0   : > { %v4520_v7 = vmul.f32 %v4510_v33, %v3858_v62  ;;  %v4539_v16 = vadd.f32 %v4538_v19, %v4537_v49  ;;  %v4528_v63 = vrot.slane %v4527_v55, 1  ;;  %v4548_v48 = vadd.f32 %v4547_v11, %v4546_v22 }
 0x7c1   : > { %v4519_v52 = vmul.f32 %v4508_v20, %v3857_v59  ;;  %v4536_v2 = vadd.f32 %v4535_v40, %v4534_v50 }
 0x7c2   : > { %v4540_v35 = vrot.slane %v4539_v16, 2  ;;  %v4558_v5 = vsel %vm3723_vm2, %v4520_v7, 0.0  ;;  %v4529_v32 = vadd.f32 %v4528_v63, %v4527_v55  ;;  %v4549_v58 = vrot.slane %v4548_v48, 1 }
 0x7c3   : > { %v4551_v43 = vsel %vm3723_vm2, %v4519_v52, 0.0  ;;  %v4559_v31 = vrot.slane %v4558_v5, 4 }
 0x7c4   : > { %v5524_v26 = vpop.eup %5523  ;;  %v4552_v21 = vrot.slane %v4551_v43, 4  ;;  %v4541_v62 = vadd.f32 %v4540_v35, %v4539_v16  ;;  %v4588_v41 = vsel %vm4587_vm3, %v4536_v2, %v4529_v32  ;;  %v4550_v53 = vadd.f32 %v4549_v58, %v4548_v48 }
 0x7c5   : > { %v4514_v12 = vmul.f32 %v5524_v26, %v7708_v0  ;;  %v4560_v34 = vadd.f32 %v4559_v31, %v4558_v5 }
 0x7c6   : > { %v4553_v60 = vadd.f32 %v4552_v21, %v4551_v43  ;;  %v4542_v36 = vrot.slane %v4541_v62, 1 }
 0x7c7   : > { %v5526_v57 = vpop.eup %5525  ;;  %v4522_v59 = vmul.f32 %v4514_v12, %v3860_v46  ;;  %v4561_v45 = vrot.slane %v4560_v34, 2 }
 0x7c8   : > { %v4512_v38 = vmul.f32 %v5526_v57, %v7711_v6  ;;  %v4554_v17 = vrot.slane %v4553_v60, 2  ;;  %v4543_v46 = vadd.f32 %v4542_v36, %v4541_v62 }
 0x7c9   : > { %v4572_v1 = vsel %vm3723_vm2, %v4522_v59, 0.0  ;;  %v4562_v8 = vadd.f32 %v4561_v45, %v4560_v34 }
 0x7ca   : > { %v4521_v0 = vmul.f32 %v4512_v38, %v3859_v4  ;;  %v4555_v29 = vadd.f32 %v4554_v17, %v4553_v60  ;;  %v4573_v42 = vrot.slane %v4572_v1, 4  ;;  %v4590_v13 = vsel %vm4589_vm4, %v4543_v46, %v4588_v41 }
 0x7cb   : > { %v4563_v56 = vrot.slane %v4562_v8, 1  ;;  %v4592_v54 = vsel %vm4591_vm5, %v4550_v53, %v4590_v13 }
 0x7cc   : > { %v4565_v51 = vsel %vm3723_vm2, %v4521_v0, 0.0  ;;  %v4574_v39 = vadd.f32 %v4573_v42, %v4572_v1  ;;  %v4556_v6 = vrot.slane %v4555_v29, 1 }
 0x7cd   : > { %v4566_v24 = vrot.slane %v4565_v51, 4  ;;  %v4564_v18 = vadd.f32 %v4563_v56, %v4562_v8 }
 0x7ce   : > { %v4575_v27 = vrot.slane %v4574_v39, 2  ;;  %v4557_v4 = vadd.f32 %v4556_v6, %v4555_v29 }
 0x7cf   : > { %v4567_v30 = vadd.f32 %v4566_v24, %v4565_v51 }
 0x7d0   : > { %v4576_v47 = vadd.f32 %v4575_v27, %v4574_v39  ;;  %v4594_v15 = vsel %vm4593_vm6, %v4557_v4, %v4592_v54 }
 0x7d1   : > { %v4568_v9 = vrot.slane %v4567_v30, 2  ;;  %v4596_v49 = vsel %vm4595_vm7, %v4564_v18, %v4594_v15 }
 0x7d2   : > { %v4577_v3 = vrot.slane %v4576_v47, 1 }
 0x7d3   : > { %v4569_v61 = vadd.f32 %v4568_v9, %v4567_v30 }
 0x7d4   : > { %v4578_v14 = vadd.f32 %v4577_v3, %v4576_v47 }
 0x7d5   : > { %v4570_v25 = vrot.slane %v4569_v61, 1 }
 0x7d7   : > { %v4571_v10 = vadd.f32 %v4570_v25, %v4569_v61 }
 0x7d9   : > { %v4598_v37 = vsel %vm4597_vm8, %v4571_v10, %v4596_v49 }
 0x7da   : > { %v4600_v28 = vsel %vm4599_vm9, %v4578_v14, %v4598_v37 }
 0x7db   : > { %4602 = vst.msk [vmem:[%s762_s30] sm:$0xff] %vm3723_vm2, %v4600_v28 }
 0x7dc   : > { %5943 = shalt.err (!%p5940_p5)
}
 0x7dd   : > { %s5944_s21 = scalar_lea.hbm %s7753_s29, 128  ;;  %s5948_s13 = scalar_lea.hbm %s7945_s9, 256 }
 0x7de   : > { %p5945_p0 = scmp.ne.s32.totalorder %s7753_s29, %s5944_s21  ;;  %p5949_p3 = scmp.lt.s32.totalorder %s7753_s29, %s7945_s9 }
 0x7df   : > { %p5950_p10 = scmp.lt.s32.totalorder %s5948_s13, %s5944_s21 }
 0x7e0   : > { %p5946_p4 = pnand %p5945_p0, %p7946_p12 }
 0x7e1   : > { %p5951_p8 = por %p5950_p10, %p5949_p3 }
 0x7e2   : > { %p5947_p6 = pneg %p5946_p4 }
 0x7e4   : > { %p5952_p7 = pnand %p5951_p8, %p5947_p6 }
 0x7e6   : > { %5955 = shalt.err (!%p5952_p7)
}
 0x7e7   : > { %5369 = dma.vmem_to_hbm [thread:$0]  (%p7946_p12), %s4618_s26, 128, %s7753_s29, %s4604_s16  }
 0x7e8 PF: > { %s7947_s19 = sld [smem:[#allocation35_spill]]  ;;  %p7950_p13 = scmp.ge.s32.totalorder %s6022_s24, 2 }
 0x7e9   : > { %s7948_s7 = sld [smem:[#allocation40_spill]] }
 0x7ee   : > { %s4629_s30 = sand.u32 1, %s7947_s19  }
 0x7ef   : > { %p7949_p9 = scmp.ne.s32.totalorder %s7948_s7, 0  ;;  %s4630_s5 = scalar_lea.sflag [#allocation4], %s4629_s30 }
 0x7f1   : > { %p5416_p2 = pnand %p7950_p13, %p7949_p9 }
 0x7f3   : > { %p5417_p1 = pneg %p5416_p2 }
 0x7f5   : > { %6005 = dma.done.wait (%p5417_p1), %s4630_s5, 128  }
 0x7f6   : > { %6007 = vsyncadd (%p5417_p1), %s4630_s5, 4294967168  ;;  %s7951_s24 = sld [smem:[#allocation38_spill]]  ;;  %s7954_s21 = smov %s6014_s22 }
 0x7f7   : > { %s7952_s11 = sld [smem:[#allocation36_spill]] }
 0x7f8   : > { %s7953_s23 = sld [smem:[#allocation39_spill]] }
 0x7fc   : > { %p38_p11 = scmp.ge.s32.totalorder %s7951_s24, 4  }
 0x7fd   : > { %s7955_s22 = smov %s7952_s11 }
 0x7fe   :  { %40 = sbr.rel (!%p38_p11) target bundleno = 25 (0x19), region = 197 }
 0x803   :  { %4635 = vsyncpa [#allocation3], 1 }
 0x804   :  { %4637 = vsyncpa [#allocation3 + $0x1], 1 }
 0x805   :  { %4638 = vsyncpa [#allocation6], 1 }
 0x806   :  { %4640 = vsyncpa [#allocation6 + $0x1], 1 }
 0x807   :  { %4641 = vsyncpa [#allocation9], 1 }
 0x808   :  { %4642 = vsyncpa [#allocation12], 1 }
 0x809   :  { %4643 = vsyncpa [#allocation15], 1 }
 0x80a   :  { %4644 = vsyncpa [#allocation18], 1 }
 0x80b   :  { %4645 = vsyncpa [#allocation21], 1 }
 0x80c   :  { %4646 = vsyncpa [#allocation24], 1 }
 0x80d   :  { %4647 = vsyncpa [#allocation4], 1 }
 0x80e   :  { %4649 = vsyncpa [#allocation4 + $0x1], 1 }

</bundles_post_ra>
